<compile_context>
chip_gen: v7x
topology: tpu7x:2x2x1
jax: 0.10.0
libtpu: 0.0.40
codegen_flags: <defaults>
</compile_context>

<pallas_src>
import jax
import jax.numpy as jnp
from jax import lax
from jax.experimental import pallas as pl
from jax.experimental.pallas import tpu as pltpu

CPAD = 128  # lane-dense channel padding used throughout the network


# ----------------------------------------------------------------------------
# Fused conv3x3(+bias) + ReLU + maxpool2 kernel (one pallas_call per layer)
# ----------------------------------------------------------------------------
def _conv_relu_pool_pallas(x, w_pad, b_pad):
    """x: (N, H, W, CPAD) f32;  w_pad: (3, 3, CPAD, CPAD) bf16;  b_pad: (1, CPAD) f32.
    Returns maxpool2x2(relu(conv3x3_same(x) + b)): (N, H//2, W//2, CPAD) f32."""
    n, h, w, _ = x.shape
    hp, wp = h // 2, w // 2
    xp = jnp.pad(x, ((0, 0), (1, 1), (1, 1), (0, 0)))  # 'same' spatial padding

    def kernel(x_ref, w_ref, b_ref, o_ref):
        bias = b_ref[...]  # (1, CPAD) f32
        # 0/1 selection matrices: stride-2 column max-pool as two exact matmuls.
        row = lax.broadcasted_iota(jnp.int32, (wp, w), 0)
        col = lax.broadcasted_iota(jnp.int32, (wp, w), 1)
        sel_even = (col == 2 * row).astype(jnp.float32)
        sel_odd = (col == 2 * row + 1).astype(jnp.float32)

        def conv_row(r):
            # relu(bias + sum_{ki,kj} x[r+ki, kj:kj+W, :] @ w[ki, kj])   -> (W, CPAD)
            acc = jnp.zeros((w, CPAD), jnp.float32)
            for ki in range(3):
                for kj in range(3):
                    lhs = x_ref[0, r + ki, kj:kj + w, :].astype(jnp.bfloat16)
                    acc = acc + jnp.dot(lhs, w_ref[ki, kj],
                                        preferred_element_type=jnp.float32)
            return jnp.maximum(acc + bias, 0.0)

        def body(ph, carry):
            r0 = conv_row(2 * ph)
            r1 = conv_row(2 * ph + 1)
            m = jnp.maximum(r0, r1)  # pool over H
            pooled = jnp.maximum(    # pool over W (stride 2) via selection matmuls
                jnp.dot(sel_even, m, preferred_element_type=jnp.float32),
                jnp.dot(sel_odd, m, preferred_element_type=jnp.float32))
            o_ref[0, ph, :, :] = pooled
            return carry

        lax.fori_loop(0, hp, body, 0)

    return pl.pallas_call(
        kernel,
        out_shape=jax.ShapeDtypeStruct((n, hp, wp, CPAD), jnp.float32),
        grid=(n,),
        in_specs=[
            pl.BlockSpec((1, h + 2, w + 2, CPAD), lambda i: (i, 0, 0, 0)),
            pl.BlockSpec((3, 3, CPAD, CPAD), lambda i: (0, 0, 0, 0)),  # resident
            pl.BlockSpec((1, CPAD), lambda i: (0, 0)),                 # resident
        ],
        out_specs=pl.BlockSpec((1, hp, wp, CPAD), lambda i: (i, 0, 0, 0)),
        compiler_params=pltpu.CompilerParams(
            dimension_semantics=("parallel",),
            vmem_limit_bytes=32 * 1024 * 1024,
        ),
    )(xp, w_pad, b_pad)


# ----------------------------------------------------------------------------
# Fused classifier kernel: Linear -> ReLU -> (Dropout) -> Linear -> ReLU ->
# (Dropout) -> Linear, all padded to 128 lanes.
# ----------------------------------------------------------------------------
def _mlp_kernel(x_ref, w1_ref, b1_ref, w2_ref, b2_ref, w3_ref, b3_ref, o_ref):
    h = x_ref[...].astype(jnp.bfloat16)
    h = jnp.maximum(jnp.dot(h, w1_ref[...], preferred_element_type=jnp.float32)
                    + b1_ref[...], 0.0)
    # TODO(synk): nn.Dropout(0.5) is training-only; treated as identity (inference).
    h = jnp.maximum(jnp.dot(h.astype(jnp.bfloat16), w2_ref[...],
                            preferred_element_type=jnp.float32) + b2_ref[...], 0.0)
    o_ref[...] = (jnp.dot(h.astype(jnp.bfloat16), w3_ref[...],
                          preferred_element_type=jnp.float32) + b3_ref[...])


def _mlp_pallas(x, fc):
    n = x.shape[0]
    vmem = pl.BlockSpec(memory_space=pltpu.MemorySpace.VMEM)
    return pl.pallas_call(
        _mlp_kernel,
        out_shape=jax.ShapeDtypeStruct((n, CPAD), jnp.float32),
        in_specs=[vmem] * 7,
        out_specs=vmem,
    )(x, fc["w1"], fc["b1"], fc["w2"], fc["b2"], fc["w3"], fc["b3"])


# ----------------------------------------------------------------------------
# Parameter preparation (torch layout -> padded / transposed / bf16 kernels)
# ----------------------------------------------------------------------------
def _prepare_conv(w_oihw, b):
    cout, cin, kh, kw = w_oihw.shape
    wt = jnp.transpose(w_oihw, (2, 3, 1, 0))  # (3, 3, Cin, Cout)
    wt = jnp.pad(wt, ((0, 0), (0, 0), (0, CPAD - cin), (0, CPAD - cout)))
    bp = jnp.pad(b, (0, CPAD - cout)).reshape(1, CPAD).astype(jnp.float32)
    return wt.astype(jnp.bfloat16), bp


def _prepare_fc(w_oi, b):
    cout, cin = w_oi.shape
    wt = jnp.pad(jnp.transpose(w_oi), ((0, CPAD - cin), (0, CPAD - cout)))
    bp = jnp.pad(b, (0, CPAD - cout)).reshape(1, CPAD).astype(jnp.float32)
    return wt.astype(jnp.bfloat16), bp


def prepare_params(raw):
    convs = [_prepare_conv(w, b) for (w, b) in raw["convs"]]
    (w1, b1), (w2, b2), (w3, b3) = raw["fc"]
    fc = {}
    fc["w1"], fc["b1"] = _prepare_fc(w1, b1)
    fc["w2"], fc["b2"] = _prepare_fc(w2, b2)
    fc["w3"], fc["b3"] = _prepare_fc(w3, b3)
    return {"convs": convs, "fc": fc}


# ----------------------------------------------------------------------------
# VGG_s forward (Pallas) and pure-JAX reference
# ----------------------------------------------------------------------------
def vgg_s_forward(x_nchw, kparams):
    x = jnp.transpose(x_nchw, (0, 2, 3, 1))               # NCHW -> NHWC
    n, _, _, c = x.shape
    x = jnp.pad(x, ((0, 0), (0, 0), (0, 0), (0, CPAD - c)))  # lane-dense channels
    for (w_pad, b_pad) in kparams["convs"]:
        x = _conv_relu_pool_pallas(x, w_pad, b_pad)
    feats = x.reshape(n, CPAD)                             # spatial is 1x1 here
    logits = _mlp_pallas(feats, kparams["fc"])
    return logits[:, :10]


def vgg_s_reference(x_nchw, raw):
    x = x_nchw
    for (w, b) in raw["convs"]:
        y = lax.conv_general_dilated(
            x.astype(jnp.bfloat16), w.astype(jnp.bfloat16),
            window_strides=(1, 1), padding=[(1, 1), (1, 1)],
            dimension_numbers=("NCHW", "OIHW", "NCHW"),
            preferred_element_type=jnp.float32)
        y = jax.nn.relu(y + b[None, :, None, None])
        x = jnp.maximum(jnp.maximum(y[:, :, 0::2, 0::2], y[:, :, 0::2, 1::2]),
                        jnp.maximum(y[:, :, 1::2, 0::2], y[:, :, 1::2, 1::2]))
    h = x.reshape(x.shape[0], -1)
    (w1, b1), (w2, b2), (w3, b3) = raw["fc"]
    h = jax.nn.relu(jnp.dot(h.astype(jnp.bfloat16), w1.T.astype(jnp.bfloat16),
                            preferred_element_type=jnp.float32) + b1)
    h = jax.nn.relu(jnp.dot(h.astype(jnp.bfloat16), w2.T.astype(jnp.bfloat16),
                            preferred_element_type=jnp.float32) + b2)
    return jnp.dot(h.astype(jnp.bfloat16), w3.T.astype(jnp.bfloat16),
                   preferred_element_type=jnp.float32) + b3


# ----------------------------------------------------------------------------
# Main
# ----------------------------------------------------------------------------
if __name__ == "__main__":
    N = 2
    key = jax.random.PRNGKey(0)
    x = jax.random.normal(jax.random.fold_in(key, 123), (N, 3, 32, 32), jnp.float32)

    conv_defs = [(3, 8), (8, 16), (16, 32), (32, 64), (64, 64)]
    fc_defs = [(64, 64), (64, 64), (64, 10)]

    raw_convs = []
    k = key
    for (cin, cout) in conv_defs:
        k, kw, kb = jax.random.split(k, 3)
        std = (2.0 / (cin * 9)) ** 0.5
        raw_convs.append((std * jax.random.normal(kw, (cout, cin, 3, 3), jnp.float32),
                          0.05 * jax.random.normal(kb, (cout,), jnp.float32)))
    raw_fc = []
    for (cin, cout) in fc_defs:
        k, kw, kb = jax.random.split(k, 3)
        std = (2.0 / cin) ** 0.5
        raw_fc.append((std * jax.random.normal(kw, (cout, cin), jnp.float32),
                       0.05 * jax.random.normal(kb, (cout,), jnp.float32)))

    raw = {"convs": raw_convs, "fc": raw_fc}
    kparams = prepare_params(raw)

    fwd = jax.jit(vgg_s_forward)
    y = jax.block_until_ready(fwd(x, kparams))

    y_ref = jax.block_until_ready(vgg_s_reference(x, raw))
    assert y.shape == (N, 10), y.shape
    err = float(jnp.max(jnp.abs(y - y_ref)))
    scale = max(1.0, float(jnp.max(jnp.abs(y_ref))))
    assert err <= 2e-2 * scale, (err, scale)

    print("KERNEL_OK")
</pallas_src>

<mosaic_0001>
module attributes {stable_mosaic.version = 11 : i64} {
  func.func @kernel(%arg0: i32, %arg1: memref<1x34x34x128xf32, #tpu.memory_space<vmem>>, %arg2: memref<3x3x128x128xbf16, #tpu.memory_space<vmem>>, %arg3: memref<1x128xf32, #tpu.memory_space<vmem>>, %arg4: memref<1x16x16x128xf32, #tpu.memory_space<vmem>>) attributes {dimension_semantics = [#tpu.dimension_semantics<parallel>], iteration_bounds = array<i64: 2>, scalar_prefetch = 0 : i64, scratch_operands = 0 : i64, tpu.core_type = #tpu.core_type<tc>, window_params = [{transform_indices = @transform_0, window_bounds = array<i64: 1, 34, 34, 128>}, {pipeline_mode = #tpu.pipeline_mode<synchronous>, transform_indices = @transform_1, window_bounds = array<i64: 3, 3, 128, 128>}, {pipeline_mode = #tpu.pipeline_mode<synchronous>, transform_indices = @transform_2, window_bounds = array<i64: 1, 128>}, {transform_indices = @transform_3, window_bounds = array<i64: 1, 16, 16, 128>}]} {
    %c0 = arith.constant 0 : index
    %c0_0 = arith.constant 0 : index
    %0 = vector.load %arg3[%c0, %c0_0] : memref<1x128xf32, #tpu.memory_space<vmem>>, vector<1x128xf32>
    %1 = tpu.iota {dimensions = array<i32: 0>} : vector<16x32xi32>
    %2 = tpu.iota {dimensions = array<i32: 1>} : vector<16x32xi32>
    %c2_i32 = arith.constant 2 : i32
    %3 = vector.broadcast %c2_i32 : i32 to vector<16x32xi32>
    %4 = arith.muli %3, %1 : vector<16x32xi32>
    %5 = arith.cmpi eq, %2, %4 : vector<16x32xi32>
    %6 = arith.extui %5 : vector<16x32xi1> to vector<16x32xi32>
    %7 = arith.sitofp %6 : vector<16x32xi32> to vector<16x32xf32>
    %c2_i32_1 = arith.constant 2 : i32
    %8 = vector.broadcast %c2_i32_1 : i32 to vector<16x32xi32>
    %9 = arith.muli %8, %1 : vector<16x32xi32>
    %c1_i32 = arith.constant 1 : i32
    %10 = vector.broadcast %c1_i32 : i32 to vector<16x32xi32>
    %11 = arith.addi %9, %10 : vector<16x32xi32>
    %12 = arith.cmpi eq, %2, %11 : vector<16x32xi32>
    %13 = arith.extui %12 : vector<16x32xi1> to vector<16x32xi32>
    %14 = arith.sitofp %13 : vector<16x32xi32> to vector<16x32xf32>
    %c0_i32 = arith.constant 0 : i32
    %c16_i32 = arith.constant 16 : i32
    %15 = arith.addi %c0_i32, %c16_i32 : i32
    %c1_i32_2 = arith.constant 1 : i32
    scf.for %arg5 = %c0_i32 to %15 step %c1_i32_2  : i32 {
      %c2_i32_4 = arith.constant 2 : i32
      %16 = arith.muli %c2_i32_4, %arg5 : i32
      %cst = arith.constant 0.000000e+00 : f32
      %17 = vector.broadcast %cst : f32 to vector<32x128xf32>
      %c0_i32_5 = arith.constant 0 : i32
      %18 = arith.addi %16, %c0_i32_5 : i32
      %c0_6 = arith.constant 0 : index
      %19 = arith.index_cast %18 : i32 to index
      %c0_7 = arith.constant 0 : index
      %c0_8 = arith.constant 0 : index
      %20 = vector.load %arg1[%c0_6, %19, %c0_7, %c0_8] : memref<1x34x34x128xf32, #tpu.memory_space<vmem>>, vector<1x1x32x128xf32>
      %21 = vector.shape_cast %20 : vector<1x1x32x128xf32> to vector<32x128xf32>
      %22 = arith.truncf %21 : vector<32x128xf32> to vector<32x128xbf16>
      %c0_9 = arith.constant 0 : index
      %c0_10 = arith.constant 0 : index
      %c0_11 = arith.constant 0 : index
      %c0_12 = arith.constant 0 : index
      %23 = vector.load %arg2[%c0_9, %c0_10, %c0_11, %c0_12] : memref<3x3x128x128xbf16, #tpu.memory_space<vmem>>, vector<1x1x128x128xbf16>
      %24 = vector.shape_cast %23 : vector<1x1x128x128xbf16> to vector<128x128xbf16>
      %cst_13 = arith.constant dense<0.000000e+00> : vector<32x128xf32>
      %25 = tpu.matmul %22, %24, %cst_13 {dimension_numbers = #tpu.dot_dimension_numbers<[1], [0], [0], [1], [0, 0, 1, 1], [], []>} : vector<32x128xbf16>, vector<128x128xbf16>, vector<32x128xf32> -> vector<32x128xf32>
      %26 = arith.addf %17, %25 : vector<32x128xf32>
      %c0_i32_14 = arith.constant 0 : i32
      %27 = arith.addi %16, %c0_i32_14 : i32
      %c0_15 = arith.constant 0 : index
      %28 = arith.index_cast %27 : i32 to index
      %c1 = arith.constant 1 : index
      %c0_16 = arith.constant 0 : index
      %29 = vector.load %arg1[%c0_15, %28, %c1, %c0_16] : memref<1x34x34x128xf32, #tpu.memory_space<vmem>>, vector<1x1x32x128xf32>
      %30 = vector.shape_cast %29 : vector<1x1x32x128xf32> to vector<32x128xf32>
      %31 = arith.truncf %30 : vector<32x128xf32> to vector<32x128xbf16>
      %c0_17 = arith.constant 0 : index
      %c1_18 = arith.constant 1 : index
      %c0_19 = arith.constant 0 : index
      %c0_20 = arith.constant 0 : index
      %32 = vector.load %arg2[%c0_17, %c1_18, %c0_19, %c0_20] : memref<3x3x128x128xbf16, #tpu.memory_space<vmem>>, vector<1x1x128x128xbf16>
      %33 = vector.shape_cast %32 : vector<1x1x128x128xbf16> to vector<128x128xbf16>
      %cst_21 = arith.constant dense<0.000000e+00> : vector<32x128xf32>
      %34 = tpu.matmul %31, %33, %cst_21 {dimension_numbers = #tpu.dot_dimension_numbers<[1], [0], [0], [1], [0, 0, 1, 1], [], []>} : vector<32x128xbf16>, vector<128x128xbf16>, vector<32x128xf32> -> vector<32x128xf32>
      %35 = arith.addf %26, %34 : vector<32x128xf32>
      %c0_i32_22 = arith.constant 0 : i32
      %36 = arith.addi %16, %c0_i32_22 : i32
      %c0_23 = arith.constant 0 : index
      %37 = arith.index_cast %36 : i32 to index
      %c2 = arith.constant 2 : index
      %c0_24 = arith.constant 0 : index
      %38 = vector.load %arg1[%c0_23, %37, %c2, %c0_24] : memref<1x34x34x128xf32, #tpu.memory_space<vmem>>, vector<1x1x32x128xf32>
      %39 = vector.shape_cast %38 : vector<1x1x32x128xf32> to vector<32x128xf32>
      %40 = arith.truncf %39 : vector<32x128xf32> to vector<32x128xbf16>
      %c0_25 = arith.constant 0 : index
      %c2_26 = arith.constant 2 : index
      %c0_27 = arith.constant 0 : index
      %c0_28 = arith.constant 0 : index
      %41 = vector.load %arg2[%c0_25, %c2_26, %c0_27, %c0_28] : memref<3x3x128x128xbf16, #tpu.memory_space<vmem>>, vector<1x1x128x128xbf16>
      %42 = vector.shape_cast %41 : vector<1x1x128x128xbf16> to vector<128x128xbf16>
      %cst_29 = arith.constant dense<0.000000e+00> : vector<32x128xf32>
      %43 = tpu.matmul %40, %42, %cst_29 {dimension_numbers = #tpu.dot_dimension_numbers<[1], [0], [0], [1], [0, 0, 1, 1], [], []>} : vector<32x128xbf16>, vector<128x128xbf16>, vector<32x128xf32> -> vector<32x128xf32>
      %44 = arith.addf %35, %43 : vector<32x128xf32>
      %c1_i32_30 = arith.constant 1 : i32
      %45 = arith.addi %16, %c1_i32_30 : i32
      %c0_31 = arith.constant 0 : index
      %46 = arith.index_cast %45 : i32 to index
      %c0_32 = arith.constant 0 : index
      %c0_33 = arith.constant 0 : index
      %47 = vector.load %arg1[%c0_31, %46, %c0_32, %c0_33] : memref<1x34x34x128xf32, #tpu.memory_space<vmem>>, vector<1x1x32x128xf32>
      %48 = vector.shape_cast %47 : vector<1x1x32x128xf32> to vector<32x128xf32>
      %49 = arith.truncf %48 : vector<32x128xf32> to vector<32x128xbf16>
      %c1_34 = arith.constant 1 : index
      %c0_35 = arith.constant 0 : index
      %c0_36 = arith.constant 0 : index
      %c0_37 = arith.constant 0 : index
      %50 = vector.load %arg2[%c1_34, %c0_35, %c0_36, %c0_37] : memref<3x3x128x128xbf16, #tpu.memory_space<vmem>>, vector<1x1x128x128xbf16>
      %51 = vector.shape_cast %50 : vector<1x1x128x128xbf16> to vector<128x128xbf16>
      %cst_38 = arith.constant dense<0.000000e+00> : vector<32x128xf32>
      %52 = tpu.matmul %49, %51, %cst_38 {dimension_numbers = #tpu.dot_dimension_numbers<[1], [0], [0], [1], [0, 0, 1, 1], [], []>} : vector<32x128xbf16>, vector<128x128xbf16>, vector<32x128xf32> -> vector<32x128xf32>
      %53 = arith.addf %44, %52 : vector<32x128xf32>
      %c1_i32_39 = arith.constant 1 : i32
      %54 = arith.addi %16, %c1_i32_39 : i32
      %c0_40 = arith.constant 0 : index
      %55 = arith.index_cast %54 : i32 to index
      %c1_41 = arith.constant 1 : index
      %c0_42 = arith.constant 0 : index
      %56 = vector.load %arg1[%c0_40, %55, %c1_41, %c0_42] : memref<1x34x34x128xf32, #tpu.memory_space<vmem>>, vector<1x1x32x128xf32>
      %57 = vector.shape_cast %56 : vector<1x1x32x128xf32> to vector<32x128xf32>
      %58 = arith.truncf %57 : vector<32x128xf32> to vector<32x128xbf16>
      %c1_43 = arith.constant 1 : index
      %c1_44 = arith.constant 1 : index
      %c0_45 = arith.constant 0 : index
      %c0_46 = arith.constant 0 : index
      %59 = vector.load %arg2[%c1_43, %c1_44, %c0_45, %c0_46] : memref<3x3x128x128xbf16, #tpu.memory_space<vmem>>, vector<1x1x128x128xbf16>
      %60 = vector.shape_cast %59 : vector<1x1x128x128xbf16> to vector<128x128xbf16>
      %cst_47 = arith.constant dense<0.000000e+00> : vector<32x128xf32>
      %61 = tpu.matmul %58, %60, %cst_47 {dimension_numbers = #tpu.dot_dimension_numbers<[1], [0], [0], [1], [0, 0, 1, 1], [], []>} : vector<32x128xbf16>, vector<128x128xbf16>, vector<32x128xf32> -> vector<32x128xf32>
      %62 = arith.addf %53, %61 : vector<32x128xf32>
      %c1_i32_48 = arith.constant 1 : i32
      %63 = arith.addi %16, %c1_i32_48 : i32
      %c0_49 = arith.constant 0 : index
      %64 = arith.index_cast %63 : i32 to index
      %c2_50 = arith.constant 2 : index
      %c0_51 = arith.constant 0 : index
      %65 = vector.load %arg1[%c0_49, %64, %c2_50, %c0_51] : memref<1x34x34x128xf32, #tpu.memory_space<vmem>>, vector<1x1x32x128xf32>
      %66 = vector.shape_cast %65 : vector<1x1x32x128xf32> to vector<32x128xf32>
      %67 = arith.truncf %66 : vector<32x128xf32> to vector<32x128xbf16>
      %c1_52 = arith.constant 1 : index
      %c2_53 = arith.constant 2 : index
      %c0_54 = arith.constant 0 : index
      %c0_55 = arith.constant 0 : index
      %68 = vector.load %arg2[%c1_52, %c2_53, %c0_54, %c0_55] : memref<3x3x128x128xbf16, #tpu.memory_space<vmem>>, vector<1x1x128x128xbf16>
      %69 = vector.shape_cast %68 : vector<1x1x128x128xbf16> to vector<128x128xbf16>
      %cst_56 = arith.constant dense<0.000000e+00> : vector<32x128xf32>
      %70 = tpu.matmul %67, %69, %cst_56 {dimension_numbers = #tpu.dot_dimension_numbers<[1], [0], [0], [1], [0, 0, 1, 1], [], []>} : vector<32x128xbf16>, vector<128x128xbf16>, vector<32x128xf32> -> vector<32x128xf32>
      %71 = arith.addf %62, %70 : vector<32x128xf32>
      %c2_i32_57 = arith.constant 2 : i32
      %72 = arith.addi %16, %c2_i32_57 : i32
      %c0_58 = arith.constant 0 : index
      %73 = arith.index_cast %72 : i32 to index
      %c0_59 = arith.constant 0 : index
      %c0_60 = arith.constant 0 : index
      %74 = vector.load %arg1[%c0_58, %73, %c0_59, %c0_60] : memref<1x34x34x128xf32, #tpu.memory_space<vmem>>, vector<1x1x32x128xf32>
      %75 = vector.shape_cast %74 : vector<1x1x32x128xf32> to vector<32x128xf32>
      %76 = arith.truncf %75 : vector<32x128xf32> to vector<32x128xbf16>
      %c2_61 = arith.constant 2 : index
      %c0_62 = arith.constant 0 : index
      %c0_63 = arith.constant 0 : index
      %c0_64 = arith.constant 0 : index
      %77 = vector.load %arg2[%c2_61, %c0_62, %c0_63, %c0_64] : memref<3x3x128x128xbf16, #tpu.memory_space<vmem>>, vector<1x1x128x128xbf16>
      %78 = vector.shape_cast %77 : vector<1x1x128x128xbf16> to vector<128x128xbf16>
      %cst_65 = arith.constant dense<0.000000e+00> : vector<32x128xf32>
      %79 = tpu.matmul %76, %78, %cst_65 {dimension_numbers = #tpu.dot_dimension_numbers<[1], [0], [0], [1], [0, 0, 1, 1], [], []>} : vector<32x128xbf16>, vector<128x128xbf16>, vector<32x128xf32> -> vector<32x128xf32>
      %80 = arith.addf %71, %79 : vector<32x128xf32>
      %c2_i32_66 = arith.constant 2 : i32
      %81 = arith.addi %16, %c2_i32_66 : i32
      %c0_67 = arith.constant 0 : index
      %82 = arith.index_cast %81 : i32 to index
      %c1_68 = arith.constant 1 : index
      %c0_69 = arith.constant 0 : index
      %83 = vector.load %arg1[%c0_67, %82, %c1_68, %c0_69] : memref<1x34x34x128xf32, #tpu.memory_space<vmem>>, vector<1x1x32x128xf32>
      %84 = vector.shape_cast %83 : vector<1x1x32x128xf32> to vector<32x128xf32>
      %85 = arith.truncf %84 : vector<32x128xf32> to vector<32x128xbf16>
      %c2_70 = arith.constant 2 : index
      %c1_71 = arith.constant 1 : index
      %c0_72 = arith.constant 0 : index
      %c0_73 = arith.constant 0 : index
      %86 = vector.load %arg2[%c2_70, %c1_71, %c0_72, %c0_73] : memref<3x3x128x128xbf16, #tpu.memory_space<vmem>>, vector<1x1x128x128xbf16>
      %87 = vector.shape_cast %86 : vector<1x1x128x128xbf16> to vector<128x128xbf16>
      %cst_74 = arith.constant dense<0.000000e+00> : vector<32x128xf32>
      %88 = tpu.matmul %85, %87, %cst_74 {dimension_numbers = #tpu.dot_dimension_numbers<[1], [0], [0], [1], [0, 0, 1, 1], [], []>} : vector<32x128xbf16>, vector<128x128xbf16>, vector<32x128xf32> -> vector<32x128xf32>
      %89 = arith.addf %80, %88 : vector<32x128xf32>
      %c2_i32_75 = arith.constant 2 : i32
      %90 = arith.addi %16, %c2_i32_75 : i32
      %c0_76 = arith.constant 0 : index
      %91 = arith.index_cast %90 : i32 to index
      %c2_77 = arith.constant 2 : index
      %c0_78 = arith.constant 0 : index
      %92 = vector.load %arg1[%c0_76, %91, %c2_77, %c0_78] : memref<1x34x34x128xf32, #tpu.memory_space<vmem>>, vector<1x1x32x128xf32>
      %93 = vector.shape_cast %92 : vector<1x1x32x128xf32> to vector<32x128xf32>
      %94 = arith.truncf %93 : vector<32x128xf32> to vector<32x128xbf16>
      %c2_79 = arith.constant 2 : index
      %c2_80 = arith.constant 2 : index
      %c0_81 = arith.constant 0 : index
      %c0_82 = arith.constant 0 : index
      %95 = vector.load %arg2[%c2_79, %c2_80, %c0_81, %c0_82] : memref<3x3x128x128xbf16, #tpu.memory_space<vmem>>, vector<1x1x128x128xbf16>
      %96 = vector.shape_cast %95 : vector<1x1x128x128xbf16> to vector<128x128xbf16>
      %cst_83 = arith.constant dense<0.000000e+00> : vector<32x128xf32>
      %97 = tpu.matmul %94, %96, %cst_83 {dimension_numbers = #tpu.dot_dimension_numbers<[1], [0], [0], [1], [0, 0, 1, 1], [], []>} : vector<32x128xbf16>, vector<128x128xbf16>, vector<32x128xf32> -> vector<32x128xf32>
      %98 = arith.addf %89, %97 : vector<32x128xf32>
      %99 = vector.broadcast %0 : vector<1x128xf32> to vector<32x128xf32>
      %100 = arith.addf %98, %99 : vector<32x128xf32>
      %cst_84 = arith.constant 0.000000e+00 : f32
      %101 = vector.broadcast %cst_84 : f32 to vector<32x128xf32>
      %102 = arith.maximumf %100, %101 : vector<32x128xf32>
      %c2_i32_85 = arith.constant 2 : i32
      %103 = arith.muli %c2_i32_85, %arg5 : i32
      %c1_i32_86 = arith.constant 1 : i32
      %104 = arith.addi %103, %c1_i32_86 : i32
      %cst_87 = arith.constant 0.000000e+00 : f32
      %105 = vector.broadcast %cst_87 : f32 to vector<32x128xf32>
      %c0_i32_88 = arith.constant 0 : i32
      %106 = arith.addi %104, %c0_i32_88 : i32
      %c0_89 = arith.constant 0 : index
      %107 = arith.index_cast %106 : i32 to index
      %c0_90 = arith.constant 0 : index
      %c0_91 = arith.constant 0 : index
      %108 = vector.load %arg1[%c0_89, %107, %c0_90, %c0_91] : memref<1x34x34x128xf32, #tpu.memory_space<vmem>>, vector<1x1x32x128xf32>
      %109 = vector.shape_cast %108 : vector<1x1x32x128xf32> to vector<32x128xf32>
      %110 = arith.truncf %109 : vector<32x128xf32> to vector<32x128xbf16>
      %c0_92 = arith.constant 0 : index
      %c0_93 = arith.constant 0 : index
      %c0_94 = arith.constant 0 : index
      %c0_95 = arith.constant 0 : index
      %111 = vector.load %arg2[%c0_92, %c0_93, %c0_94, %c0_95] : memref<3x3x128x128xbf16, #tpu.memory_space<vmem>>, vector<1x1x128x128xbf16>
      %112 = vector.shape_cast %111 : vector<1x1x128x128xbf16> to vector<128x128xbf16>
      %cst_96 = arith.constant dense<0.000000e+00> : vector<32x128xf32>
      %113 = tpu.matmul %110, %112, %cst_96 {dimension_numbers = #tpu.dot_dimension_numbers<[1], [0], [0], [1], [0, 0, 1, 1], [], []>} : vector<32x128xbf16>, vector<128x128xbf16>, vector<32x128xf32> -> vector<32x128xf32>
      %114 = arith.addf %105, %113 : vector<32x128xf32>
      %c0_i32_97 = arith.constant 0 : i32
      %115 = arith.addi %104, %c0_i32_97 : i32
      %c0_98 = arith.constant 0 : index
      %116 = arith.index_cast %115 : i32 to index
      %c1_99 = arith.constant 1 : index
      %c0_100 = arith.constant 0 : index
      %117 = vector.load %arg1[%c0_98, %116, %c1_99, %c0_100] : memref<1x34x34x128xf32, #tpu.memory_space<vmem>>, vector<1x1x32x128xf32>
      %118 = vector.shape_cast %117 : vector<1x1x32x128xf32> to vector<32x128xf32>
      %119 = arith.truncf %118 : vector<32x128xf32> to vector<32x128xbf16>
      %c0_101 = arith.constant 0 : index
      %c1_102 = arith.constant 1 : index
      %c0_103 = arith.constant 0 : index
      %c0_104 = arith.constant 0 : index
      %120 = vector.load %arg2[%c0_101, %c1_102, %c0_103, %c0_104] : memref<3x3x128x128xbf16, #tpu.memory_space<vmem>>, vector<1x1x128x128xbf16>
      %121 = vector.shape_cast %120 : vector<1x1x128x128xbf16> to vector<128x128xbf16>
      %cst_105 = arith.constant dense<0.000000e+00> : vector<32x128xf32>
      %122 = tpu.matmul %119, %121, %cst_105 {dimension_numbers = #tpu.dot_dimension_numbers<[1], [0], [0], [1], [0, 0, 1, 1], [], []>} : vector<32x128xbf16>, vector<128x128xbf16>, vector<32x128xf32> -> vector<32x128xf32>
      %123 = arith.addf %114, %122 : vector<32x128xf32>
      %c0_i32_106 = arith.constant 0 : i32
      %124 = arith.addi %104, %c0_i32_106 : i32
      %c0_107 = arith.constant 0 : index
      %125 = arith.index_cast %124 : i32 to index
      %c2_108 = arith.constant 2 : index
      %c0_109 = arith.constant 0 : index
      %126 = vector.load %arg1[%c0_107, %125, %c2_108, %c0_109] : memref<1x34x34x128xf32, #tpu.memory_space<vmem>>, vector<1x1x32x128xf32>
      %127 = vector.shape_cast %126 : vector<1x1x32x128xf32> to vector<32x128xf32>
      %128 = arith.truncf %127 : vector<32x128xf32> to vector<32x128xbf16>
      %c0_110 = arith.constant 0 : index
      %c2_111 = arith.constant 2 : index
      %c0_112 = arith.constant 0 : index
      %c0_113 = arith.constant 0 : index
      %129 = vector.load %arg2[%c0_110, %c2_111, %c0_112, %c0_113] : memref<3x3x128x128xbf16, #tpu.memory_space<vmem>>, vector<1x1x128x128xbf16>
      %130 = vector.shape_cast %129 : vector<1x1x128x128xbf16> to vector<128x128xbf16>
      %cst_114 = arith.constant dense<0.000000e+00> : vector<32x128xf32>
      %131 = tpu.matmul %128, %130, %cst_114 {dimension_numbers = #tpu.dot_dimension_numbers<[1], [0], [0], [1], [0, 0, 1, 1], [], []>} : vector<32x128xbf16>, vector<128x128xbf16>, vector<32x128xf32> -> vector<32x128xf32>
      %132 = arith.addf %123, %131 : vector<32x128xf32>
      %c1_i32_115 = arith.constant 1 : i32
      %133 = arith.addi %104, %c1_i32_115 : i32
      %c0_116 = arith.constant 0 : index
      %134 = arith.index_cast %133 : i32 to index
      %c0_117 = arith.constant 0 : index
      %c0_118 = arith.constant 0 : index
      %135 = vector.load %arg1[%c0_116, %134, %c0_117, %c0_118] : memref<1x34x34x128xf32, #tpu.memory_space<vmem>>, vector<1x1x32x128xf32>
      %136 = vector.shape_cast %135 : vector<1x1x32x128xf32> to vector<32x128xf32>
      %137 = arith.truncf %136 : vector<32x128xf32> to vector<32x128xbf16>
      %c1_119 = arith.constant 1 : index
      %c0_120 = arith.constant 0 : index
      %c0_121 = arith.constant 0 : index
      %c0_122 = arith.constant 0 : index
      %138 = vector.load %arg2[%c1_119, %c0_120, %c0_121, %c0_122] : memref<3x3x128x128xbf16, #tpu.memory_space<vmem>>, vector<1x1x128x128xbf16>
      %139 = vector.shape_cast %138 : vector<1x1x128x128xbf16> to vector<128x128xbf16>
      %cst_123 = arith.constant dense<0.000000e+00> : vector<32x128xf32>
      %140 = tpu.matmul %137, %139, %cst_123 {dimension_numbers = #tpu.dot_dimension_numbers<[1], [0], [0], [1], [0, 0, 1, 1], [], []>} : vector<32x128xbf16>, vector<128x128xbf16>, vector<32x128xf32> -> vector<32x128xf32>
      %141 = arith.addf %132, %140 : vector<32x128xf32>
      %c1_i32_124 = arith.constant 1 : i32
      %142 = arith.addi %104, %c1_i32_124 : i32
      %c0_125 = arith.constant 0 : index
      %143 = arith.index_cast %142 : i32 to index
      %c1_126 = arith.constant 1 : index
      %c0_127 = arith.constant 0 : index
      %144 = vector.load %arg1[%c0_125, %143, %c1_126, %c0_127] : memref<1x34x34x128xf32, #tpu.memory_space<vmem>>, vector<1x1x32x128xf32>
      %145 = vector.shape_cast %144 : vector<1x1x32x128xf32> to vector<32x128xf32>
      %146 = arith.truncf %145 : vector<32x128xf32> to vector<32x128xbf16>
      %c1_128 = arith.constant 1 : index
      %c1_129 = arith.constant 1 : index
      %c0_130 = arith.constant 0 : index
      %c0_131 = arith.constant 0 : index
      %147 = vector.load %arg2[%c1_128, %c1_129, %c0_130, %c0_131] : memref<3x3x128x128xbf16, #tpu.memory_space<vmem>>, vector<1x1x128x128xbf16>
      %148 = vector.shape_cast %147 : vector<1x1x128x128xbf16> to vector<128x128xbf16>
      %cst_132 = arith.constant dense<0.000000e+00> : vector<32x128xf32>
      %149 = tpu.matmul %146, %148, %cst_132 {dimension_numbers = #tpu.dot_dimension_numbers<[1], [0], [0], [1], [0, 0, 1, 1], [], []>} : vector<32x128xbf16>, vector<128x128xbf16>, vector<32x128xf32> -> vector<32x128xf32>
      %150 = arith.addf %141, %149 : vector<32x128xf32>
      %c1_i32_133 = arith.constant 1 : i32
      %151 = arith.addi %104, %c1_i32_133 : i32
      %c0_134 = arith.constant 0 : index
      %152 = arith.index_cast %151 : i32 to index
      %c2_135 = arith.constant 2 : index
      %c0_136 = arith.constant 0 : index
      %153 = vector.load %arg1[%c0_134, %152, %c2_135, %c0_136] : memref<1x34x34x128xf32, #tpu.memory_space<vmem>>, vector<1x1x32x128xf32>
      %154 = vector.shape_cast %153 : vector<1x1x32x128xf32> to vector<32x128xf32>
      %155 = arith.truncf %154 : vector<32x128xf32> to vector<32x128xbf16>
      %c1_137 = arith.constant 1 : index
      %c2_138 = arith.constant 2 : index
      %c0_139 = arith.constant 0 : index
      %c0_140 = arith.constant 0 : index
      %156 = vector.load %arg2[%c1_137, %c2_138, %c0_139, %c0_140] : memref<3x3x128x128xbf16, #tpu.memory_space<vmem>>, vector<1x1x128x128xbf16>
      %157 = vector.shape_cast %156 : vector<1x1x128x128xbf16> to vector<128x128xbf16>
      %cst_141 = arith.constant dense<0.000000e+00> : vector<32x128xf32>
      %158 = tpu.matmul %155, %157, %cst_141 {dimension_numbers = #tpu.dot_dimension_numbers<[1], [0], [0], [1], [0, 0, 1, 1], [], []>} : vector<32x128xbf16>, vector<128x128xbf16>, vector<32x128xf32> -> vector<32x128xf32>
      %159 = arith.addf %150, %158 : vector<32x128xf32>
      %c2_i32_142 = arith.constant 2 : i32
      %160 = arith.addi %104, %c2_i32_142 : i32
      %c0_143 = arith.constant 0 : index
      %161 = arith.index_cast %160 : i32 to index
      %c0_144 = arith.constant 0 : index
      %c0_145 = arith.constant 0 : index
      %162 = vector.load %arg1[%c0_143, %161, %c0_144, %c0_145] : memref<1x34x34x128xf32, #tpu.memory_space<vmem>>, vector<1x1x32x128xf32>
      %163 = vector.shape_cast %162 : vector<1x1x32x128xf32> to vector<32x128xf32>
      %164 = arith.truncf %163 : vector<32x128xf32> to vector<32x128xbf16>
      %c2_146 = arith.constant 2 : index
      %c0_147 = arith.constant 0 : index
      %c0_148 = arith.constant 0 : index
      %c0_149 = arith.constant 0 : index
      %165 = vector.load %arg2[%c2_146, %c0_147, %c0_148, %c0_149] : memref<3x3x128x128xbf16, #tpu.memory_space<vmem>>, vector<1x1x128x128xbf16>
      %166 = vector.shape_cast %165 : vector<1x1x128x128xbf16> to vector<128x128xbf16>
      %cst_150 = arith.constant dense<0.000000e+00> : vector<32x128xf32>
      %167 = tpu.matmul %164, %166, %cst_150 {dimension_numbers = #tpu.dot_dimension_numbers<[1], [0], [0], [1], [0, 0, 1, 1], [], []>} : vector<32x128xbf16>, vector<128x128xbf16>, vector<32x128xf32> -> vector<32x128xf32>
      %168 = arith.addf %159, %167 : vector<32x128xf32>
      %c2_i32_151 = arith.constant 2 : i32
      %169 = arith.addi %104, %c2_i32_151 : i32
      %c0_152 = arith.constant 0 : index
      %170 = arith.index_cast %169 : i32 to index
      %c1_153 = arith.constant 1 : index
      %c0_154 = arith.constant 0 : index
      %171 = vector.load %arg1[%c0_152, %170, %c1_153, %c0_154] : memref<1x34x34x128xf32, #tpu.memory_space<vmem>>, vector<1x1x32x128xf32>
      %172 = vector.shape_cast %171 : vector<1x1x32x128xf32> to vector<32x128xf32>
      %173 = arith.truncf %172 : vector<32x128xf32> to vector<32x128xbf16>
      %c2_155 = arith.constant 2 : index
      %c1_156 = arith.constant 1 : index
      %c0_157 = arith.constant 0 : index
      %c0_158 = arith.constant 0 : index
      %174 = vector.load %arg2[%c2_155, %c1_156, %c0_157, %c0_158] : memref<3x3x128x128xbf16, #tpu.memory_space<vmem>>, vector<1x1x128x128xbf16>
      %175 = vector.shape_cast %174 : vector<1x1x128x128xbf16> to vector<128x128xbf16>
      %cst_159 = arith.constant dense<0.000000e+00> : vector<32x128xf32>
      %176 = tpu.matmul %173, %175, %cst_159 {dimension_numbers = #tpu.dot_dimension_numbers<[1], [0], [0], [1], [0, 0, 1, 1], [], []>} : vector<32x128xbf16>, vector<128x128xbf16>, vector<32x128xf32> -> vector<32x128xf32>
      %177 = arith.addf %168, %176 : vector<32x128xf32>
      %c2_i32_160 = arith.constant 2 : i32
      %178 = arith.addi %104, %c2_i32_160 : i32
      %c0_161 = arith.constant 0 : index
      %179 = arith.index_cast %178 : i32 to index
      %c2_162 = arith.constant 2 : index
      %c0_163 = arith.constant 0 : index
      %180 = vector.load %arg1[%c0_161, %179, %c2_162, %c0_163] : memref<1x34x34x128xf32, #tpu.memory_space<vmem>>, vector<1x1x32x128xf32>
      %181 = vector.shape_cast %180 : vector<1x1x32x128xf32> to vector<32x128xf32>
      %182 = arith.truncf %181 : vector<32x128xf32> to vector<32x128xbf16>
      %c2_164 = arith.constant 2 : index
      %c2_165 = arith.constant 2 : index
      %c0_166 = arith.constant 0 : index
      %c0_167 = arith.constant 0 : index
      %183 = vector.load %arg2[%c2_164, %c2_165, %c0_166, %c0_167] : memref<3x3x128x128xbf16, #tpu.memory_space<vmem>>, vector<1x1x128x128xbf16>
      %184 = vector.shape_cast %183 : vector<1x1x128x128xbf16> to vector<128x128xbf16>
      %cst_168 = arith.constant dense<0.000000e+00> : vector<32x128xf32>
      %185 = tpu.matmul %182, %184, %cst_168 {dimension_numbers = #tpu.dot_dimension_numbers<[1], [0], [0], [1], [0, 0, 1, 1], [], []>} : vector<32x128xbf16>, vector<128x128xbf16>, vector<32x128xf32> -> vector<32x128xf32>
      %186 = arith.addf %177, %185 : vector<32x128xf32>
      %187 = vector.broadcast %0 : vector<1x128xf32> to vector<32x128xf32>
      %188 = arith.addf %186, %187 : vector<32x128xf32>
      %cst_169 = arith.constant 0.000000e+00 : f32
      %189 = vector.broadcast %cst_169 : f32 to vector<32x128xf32>
      %190 = arith.maximumf %188, %189 : vector<32x128xf32>
      %191 = arith.maximumf %102, %190 : vector<32x128xf32>
      %cst_170 = arith.constant dense<0.000000e+00> : vector<16x128xf32>
      %192 = tpu.matmul %7, %191, %cst_170 {dimension_numbers = #tpu.dot_dimension_numbers<[1], [0], [0], [1], [0, 0, 1, 1], [], []>} : vector<16x32xf32>, vector<32x128xf32>, vector<16x128xf32> -> vector<16x128xf32>
      %cst_171 = arith.constant dense<0.000000e+00> : vector<16x128xf32>
      %193 = tpu.matmul %14, %191, %cst_171 {dimension_numbers = #tpu.dot_dimension_numbers<[1], [0], [0], [1], [0, 0, 1, 1], [], []>} : vector<16x32xf32>, vector<32x128xf32>, vector<16x128xf32> -> vector<16x128xf32>
      %194 = arith.maximumf %192, %193 : vector<16x128xf32>
      %c0_172 = arith.constant 0 : index
      %195 = arith.index_cast %arg5 : i32 to index
      %c0_173 = arith.constant 0 : index
      %c0_174 = arith.constant 0 : index
      %196 = vector.load %arg4[%c0_172, %195, %c0_173, %c0_174] : memref<1x16x16x128xf32, #tpu.memory_space<vmem>>, vector<1x1x16x128xf32>
      %197 = vector.shape_cast %196 : vector<1x1x16x128xf32> to vector<16x128xf32>
      %198 = vector.shape_cast %194 : vector<16x128xf32> to vector<1x1x16x128xf32>
      tpu.vector_store %arg4[%c0_172, %195, %c0_173, %c0_174], %198 {strides = array<i32>} : memref<1x16x16x128xf32, #tpu.memory_space<vmem>>, vector<1x1x16x128xf32>,
    }
    %c16_i32_3 = arith.constant 16 : i32
    return
  }
  func.func @transform_0(%arg0: i32) -> (i32, i32, i32, i32) {
    %c0_i32 = arith.constant 0 : i32
    %c0_i32_0 = arith.constant 0 : i32
    %c0_i32_1 = arith.constant 0 : i32
    %c0_i32_2 = arith.constant 0 : i32
    return %arg0, %c0_i32, %c0_i32_0, %c0_i32_1 : i32, i32, i32, i32
  }
  func.func @transform_1(%arg0: i32) -> (i32, i32, i32, i32) {
    %c0_i32 = arith.constant 0 : i32
    %c0_i32_0 = arith.constant 0 : i32
    %c0_i32_1 = arith.constant 0 : i32
    %c0_i32_2 = arith.constant 0 : i32
    %c0_i32_3 = arith.constant 0 : i32
    return %c0_i32, %c0_i32_0, %c0_i32_1, %c0_i32_2 : i32, i32, i32, i32
  }
  func.func @transform_2(%arg0: i32) -> (i32, i32) {
    %c0_i32 = arith.constant 0 : i32
    %c0_i32_0 = arith.constant 0 : i32
    %c0_i32_1 = arith.constant 0 : i32
    return %c0_i32, %c0_i32_0 : i32, i32
  }
  func.func @transform_3(%arg0: i32) -> (i32, i32, i32, i32) {
    %c0_i32 = arith.constant 0 : i32
    %c0_i32_0 = arith.constant 0 : i32
    %c0_i32_1 = arith.constant 0 : i32
    %c0_i32_2 = arith.constant 0 : i32
    return %arg0, %c0_i32, %c0_i32_0, %c0_i32_1 : i32, i32, i32, i32
  }
}

module attributes {stable_mosaic.version = 11 : i64} {
  func.func @kernel(%arg0: i32, %arg1: memref<1x18x18x128xf32, #tpu.memory_space<vmem>>, %arg2: memref<3x3x128x128xbf16, #tpu.memory_space<vmem>>, %arg3: memref<1x128xf32, #tpu.memory_space<vmem>>, %arg4: memref<1x8x8x128xf32, #tpu.memory_space<vmem>>) attributes {dimension_semantics = [#tpu.dimension_semantics<parallel>], iteration_bounds = array<i64: 2>, scalar_prefetch = 0 : i64, scratch_operands = 0 : i64, tpu.core_type = #tpu.core_type<tc>, window_params = [{transform_indices = @transform_0, window_bounds = array<i64: 1, 18, 18, 128>}, {pipeline_mode = #tpu.pipeline_mode<synchronous>, transform_indices = @transform_1, window_bounds = array<i64: 3, 3, 128, 128>}, {pipeline_mode = #tpu.pipeline_mode<synchronous>, transform_indices = @transform_2, window_bounds = array<i64: 1, 128>}, {transform_indices = @transform_3, window_bounds = array<i64: 1, 8, 8, 128>}]} {
    %c0 = arith.constant 0 : index
    %c0_0 = arith.constant 0 : index
    %0 = vector.load %arg3[%c0, %c0_0] : memref<1x128xf32, #tpu.memory_space<vmem>>, vector<1x128xf32>
    %1 = tpu.iota {dimensions = array<i32: 0>} : vector<8x16xi32>
    %2 = tpu.iota {dimensions = array<i32: 1>} : vector<8x16xi32>
    %c2_i32 = arith.constant 2 : i32
    %3 = vector.broadcast %c2_i32 : i32 to vector<8x16xi32>
    %4 = arith.muli %3, %1 : vector<8x16xi32>
    %5 = arith.cmpi eq, %2, %4 : vector<8x16xi32>
    %6 = arith.extui %5 : vector<8x16xi1> to vector<8x16xi32>
    %7 = arith.sitofp %6 : vector<8x16xi32> to vector<8x16xf32>
    %c2_i32_1 = arith.constant 2 : i32
    %8 = vector.broadcast %c2_i32_1 : i32 to vector<8x16xi32>
    %9 = arith.muli %8, %1 : vector<8x16xi32>
    %c1_i32 = arith.constant 1 : i32
    %10 = vector.broadcast %c1_i32 : i32 to vector<8x16xi32>
    %11 = arith.addi %9, %10 : vector<8x16xi32>
    %12 = arith.cmpi eq, %2, %11 : vector<8x16xi32>
    %13 = arith.extui %12 : vector<8x16xi1> to vector<8x16xi32>
    %14 = arith.sitofp %13 : vector<8x16xi32> to vector<8x16xf32>
    %c0_i32 = arith.constant 0 : i32
    %c8_i32 = arith.constant 8 : i32
    %15 = arith.addi %c0_i32, %c8_i32 : i32
    %c1_i32_2 = arith.constant 1 : i32
    scf.for %arg5 = %c0_i32 to %15 step %c1_i32_2  : i32 {
      %c2_i32_4 = arith.constant 2 : i32
      %16 = arith.muli %c2_i32_4, %arg5 : i32
      %cst = arith.constant 0.000000e+00 : f32
      %17 = vector.broadcast %cst : f32 to vector<16x128xf32>
      %c0_i32_5 = arith.constant 0 : i32
      %18 = arith.addi %16, %c0_i32_5 : i32
      %c0_6 = arith.constant 0 : index
      %19 = arith.index_cast %18 : i32 to index
      %c0_7 = arith.constant 0 : index
      %c0_8 = arith.constant 0 : index
      %20 = vector.load %arg1[%c0_6, %19, %c0_7, %c0_8] : memref<1x18x18x128xf32, #tpu.memory_space<vmem>>, vector<1x1x16x128xf32>
      %21 = vector.shape_cast %20 : vector<1x1x16x128xf32> to vector<16x128xf32>
      %22 = arith.truncf %21 : vector<16x128xf32> to vector<16x128xbf16>
      %c0_9 = arith.constant 0 : index
      %c0_10 = arith.constant 0 : index
      %c0_11 = arith.constant 0 : index
      %c0_12 = arith.constant 0 : index
      %23 = vector.load %arg2[%c0_9, %c0_10, %c0_11, %c0_12] : memref<3x3x128x128xbf16, #tpu.memory_space<vmem>>, vector<1x1x128x128xbf16>
      %24 = vector.shape_cast %23 : vector<1x1x128x128xbf16> to vector<128x128xbf16>
      %cst_13 = arith.constant dense<0.000000e+00> : vector<16x128xf32>
      %25 = tpu.matmul %22, %24, %cst_13 {dimension_numbers = #tpu.dot_dimension_numbers<[1], [0], [0], [1], [0, 0, 1, 1], [], []>} : vector<16x128xbf16>, vector<128x128xbf16>, vector<16x128xf32> -> vector<16x128xf32>
      %26 = arith.addf %17, %25 : vector<16x128xf32>
      %c0_i32_14 = arith.constant 0 : i32
      %27 = arith.addi %16, %c0_i32_14 : i32
      %c0_15 = arith.constant 0 : index
      %28 = arith.index_cast %27 : i32 to index
      %c1 = arith.constant 1 : index
      %c0_16 = arith.constant 0 : index
      %29 = vector.load %arg1[%c0_15, %28, %c1, %c0_16] : memref<1x18x18x128xf32, #tpu.memory_space<vmem>>, vector<1x1x16x128xf32>
      %30 = vector.shape_cast %29 : vector<1x1x16x128xf32> to vector<16x128xf32>
      %31 = arith.truncf %30 : vector<16x128xf32> to vector<16x128xbf16>
      %c0_17 = arith.constant 0 : index
      %c1_18 = arith.constant 1 : index
      %c0_19 = arith.constant 0 : index
      %c0_20 = arith.constant 0 : index
      %32 = vector.load %arg2[%c0_17, %c1_18, %c0_19, %c0_20] : memref<3x3x128x128xbf16, #tpu.memory_space<vmem>>, vector<1x1x128x128xbf16>
      %33 = vector.shape_cast %32 : vector<1x1x128x128xbf16> to vector<128x128xbf16>
      %cst_21 = arith.constant dense<0.000000e+00> : vector<16x128xf32>
      %34 = tpu.matmul %31, %33, %cst_21 {dimension_numbers = #tpu.dot_dimension_numbers<[1], [0], [0], [1], [0, 0, 1, 1], [], []>} : vector<16x128xbf16>, vector<128x128xbf16>, vector<16x128xf32> -> vector<16x128xf32>
      %35 = arith.addf %26, %34 : vector<16x128xf32>
      %c0_i32_22 = arith.constant 0 : i32
      %36 = arith.addi %16, %c0_i32_22 : i32
      %c0_23 = arith.constant 0 : index
      %37 = arith.index_cast %36 : i32 to index
      %c2 = arith.constant 2 : index
      %c0_24 = arith.constant 0 : index
      %38 = vector.load %arg1[%c0_23, %37, %c2, %c0_24] : memref<1x18x18x128xf32, #tpu.memory_space<vmem>>, vector<1x1x16x128xf32>
      %39 = vector.shape_cast %38 : vector<1x1x16x128xf32> to vector<16x128xf32>
      %40 = arith.truncf %39 : vector<16x128xf32> to vector<16x128xbf16>
      %c0_25 = arith.constant 0 : index
      %c2_26 = arith.constant 2 : index
      %c0_27 = arith.constant 0 : index
      %c0_28 = arith.constant 0 : index
      %41 = vector.load %arg2[%c0_25, %c2_26, %c0_27, %c0_28] : memref<3x3x128x128xbf16, #tpu.memory_space<vmem>>, vector<1x1x128x128xbf16>
      %42 = vector.shape_cast %41 : vector<1x1x128x128xbf16> to vector<128x128xbf16>
      %cst_29 = arith.constant dense<0.000000e+00> : vector<16x128xf32>
      %43 = tpu.matmul %40, %42, %cst_29 {dimension_numbers = #tpu.dot_dimension_numbers<[1], [0], [0], [1], [0, 0, 1, 1], [], []>} : vector<16x128xbf16>, vector<128x128xbf16>, vector<16x128xf32> -> vector<16x128xf32>
      %44 = arith.addf %35, %43 : vector<16x128xf32>
      %c1_i32_30 = arith.constant 1 : i32
      %45 = arith.addi %16, %c1_i32_30 : i32
      %c0_31 = arith.constant 0 : index
      %46 = arith.index_cast %45 : i32 to index
      %c0_32 = arith.constant 0 : index
      %c0_33 = arith.constant 0 : index
      %47 = vector.load %arg1[%c0_31, %46, %c0_32, %c0_33] : memref<1x18x18x128xf32, #tpu.memory_space<vmem>>, vector<1x1x16x128xf32>
      %48 = vector.shape_cast %47 : vector<1x1x16x128xf32> to vector<16x128xf32>
      %49 = arith.truncf %48 : vector<16x128xf32> to vector<16x128xbf16>
      %c1_34 = arith.constant 1 : index
      %c0_35 = arith.constant 0 : index
      %c0_36 = arith.constant 0 : index
      %c0_37 = arith.constant 0 : index
      %50 = vector.load %arg2[%c1_34, %c0_35, %c0_36, %c0_37] : memref<3x3x128x128xbf16, #tpu.memory_space<vmem>>, vector<1x1x128x128xbf16>
      %51 = vector.shape_cast %50 : vector<1x1x128x128xbf16> to vector<128x128xbf16>
      %cst_38 = arith.constant dense<0.000000e+00> : vector<16x128xf32>
      %52 = tpu.matmul %49, %51, %cst_38 {dimension_numbers = #tpu.dot_dimension_numbers<[1], [0], [0], [1], [0, 0, 1, 1], [], []>} : vector<16x128xbf16>, vector<128x128xbf16>, vector<16x128xf32> -> vector<16x128xf32>
      %53 = arith.addf %44, %52 : vector<16x128xf32>
      %c1_i32_39 = arith.constant 1 : i32
      %54 = arith.addi %16, %c1_i32_39 : i32
      %c0_40 = arith.constant 0 : index
      %55 = arith.index_cast %54 : i32 to index
      %c1_41 = arith.constant 1 : index
      %c0_42 = arith.constant 0 : index
      %56 = vector.load %arg1[%c0_40, %55, %c1_41, %c0_42] : memref<1x18x18x128xf32, #tpu.memory_space<vmem>>, vector<1x1x16x128xf32>
      %57 = vector.shape_cast %56 : vector<1x1x16x128xf32> to vector<16x128xf32>
      %58 = arith.truncf %57 : vector<16x128xf32> to vector<16x128xbf16>
      %c1_43 = arith.constant 1 : index
      %c1_44 = arith.constant 1 : index
      %c0_45 = arith.constant 0 : index
      %c0_46 = arith.constant 0 : index
      %59 = vector.load %arg2[%c1_43, %c1_44, %c0_45, %c0_46] : memref<3x3x128x128xbf16, #tpu.memory_space<vmem>>, vector<1x1x128x128xbf16>
      %60 = vector.shape_cast %59 : vector<1x1x128x128xbf16> to vector<128x128xbf16>
      %cst_47 = arith.constant dense<0.000000e+00> : vector<16x128xf32>
      %61 = tpu.matmul %58, %60, %cst_47 {dimension_numbers = #tpu.dot_dimension_numbers<[1], [0], [0], [1], [0, 0, 1, 1], [], []>} : vector<16x128xbf16>, vector<128x128xbf16>, vector<16x128xf32> -> vector<16x128xf32>
      %62 = arith.addf %53, %61 : vector<16x128xf32>
      %c1_i32_48 = arith.constant 1 : i32
      %63 = arith.addi %16, %c1_i32_48 : i32
      %c0_49 = arith.constant 0 : index
      %64 = arith.index_cast %63 : i32 to index
      %c2_50 = arith.constant 2 : index
      %c0_51 = arith.constant 0 : index
      %65 = vector.load %arg1[%c0_49, %64, %c2_50, %c0_51] : memref<1x18x18x128xf32, #tpu.memory_space<vmem>>, vector<1x1x16x128xf32>
      %66 = vector.shape_cast %65 : vector<1x1x16x128xf32> to vector<16x128xf32>
      %67 = arith.truncf %66 : vector<16x128xf32> to vector<16x128xbf16>
      %c1_52 = arith.constant 1 : index
      %c2_53 = arith.constant 2 : index
      %c0_54 = arith.constant 0 : index
      %c0_55 = arith.constant 0 : index
      %68 = vector.load %arg2[%c1_52, %c2_53, %c0_54, %c0_55] : memref<3x3x128x128xbf16, #tpu.memory_space<vmem>>, vector<1x1x128x128xbf16>
      %69 = vector.shape_cast %68 : vector<1x1x128x128xbf16> to vector<128x128xbf16>
      %cst_56 = arith.constant dense<0.000000e+00> : vector<16x128xf32>
      %70 = tpu.matmul %67, %69, %cst_56 {dimension_numbers = #tpu.dot_dimension_numbers<[1], [0], [0], [1], [0, 0, 1, 1], [], []>} : vector<16x128xbf16>, vector<128x128xbf16>, vector<16x128xf32> -> vector<16x128xf32>
      %71 = arith.addf %62, %70 : vector<16x128xf32>
      %c2_i32_57 = arith.constant 2 : i32
      %72 = arith.addi %16, %c2_i32_57 : i32
      %c0_58 = arith.constant 0 : index
      %73 = arith.index_cast %72 : i32 to index
      %c0_59 = arith.constant 0 : index
      %c0_60 = arith.constant 0 : index
      %74 = vector.load %arg1[%c0_58, %73, %c0_59, %c0_60] : memref<1x18x18x128xf32, #tpu.memory_space<vmem>>, vector<1x1x16x128xf32>
      %75 = vector.shape_cast %74 : vector<1x1x16x128xf32> to vector<16x128xf32>
      %76 = arith.truncf %75 : vector<16x128xf32> to vector<16x128xbf16>
      %c2_61 = arith.constant 2 : index
      %c0_62 = arith.constant 0 : index
      %c0_63 = arith.constant 0 : index
      %c0_64 = arith.constant 0 : index
      %77 = vector.load %arg2[%c2_61, %c0_62, %c0_63, %c0_64] : memref<3x3x128x128xbf16, #tpu.memory_space<vmem>>, vector<1x1x128x128xbf16>
      %78 = vector.shape_cast %77 : vector<1x1x128x128xbf16> to vector<128x128xbf16>
      %cst_65 = arith.constant dense<0.000000e+00> : vector<16x128xf32>
      %79 = tpu.matmul %76, %78, %cst_65 {dimension_numbers = #tpu.dot_dimension_numbers<[1], [0], [0], [1], [0, 0, 1, 1], [], []>} : vector<16x128xbf16>, vector<128x128xbf16>, vector<16x128xf32> -> vector<16x128xf32>
      %80 = arith.addf %71, %79 : vector<16x128xf32>
      %c2_i32_66 = arith.constant 2 : i32
      %81 = arith.addi %16, %c2_i32_66 : i32
      %c0_67 = arith.constant 0 : index
      %82 = arith.index_cast %81 : i32 to index
      %c1_68 = arith.constant 1 : index
      %c0_69 = arith.constant 0 : index
      %83 = vector.load %arg1[%c0_67, %82, %c1_68, %c0_69] : memref<1x18x18x128xf32, #tpu.memory_space<vmem>>, vector<1x1x16x128xf32>
      %84 = vector.shape_cast %83 : vector<1x1x16x128xf32> to vector<16x128xf32>
      %85 = arith.truncf %84 : vector<16x128xf32> to vector<16x128xbf16>
      %c2_70 = arith.constant 2 : index
      %c1_71 = arith.constant 1 : index
      %c0_72 = arith.constant 0 : index
      %c0_73 = arith.constant 0 : index
      %86 = vector.load %arg2[%c2_70, %c1_71, %c0_72, %c0_73] : memref<3x3x128x128xbf16, #tpu.memory_space<vmem>>, vector<1x1x128x128xbf16>
      %87 = vector.shape_cast %86 : vector<1x1x128x128xbf16> to vector<128x128xbf16>
      %cst_74 = arith.constant dense<0.000000e+00> : vector<16x128xf32>
      %88 = tpu.matmul %85, %87, %cst_74 {dimension_numbers = #tpu.dot_dimension_numbers<[1], [0], [0], [1], [0, 0, 1, 1], [], []>} : vector<16x128xbf16>, vector<128x128xbf16>, vector<16x128xf32> -> vector<16x128xf32>
      %89 = arith.addf %80, %88 : vector<16x128xf32>
      %c2_i32_75 = arith.constant 2 : i32
      %90 = arith.addi %16, %c2_i32_75 : i32
      %c0_76 = arith.constant 0 : index
      %91 = arith.index_cast %90 : i32 to index
      %c2_77 = arith.constant 2 : index
      %c0_78 = arith.constant 0 : index
      %92 = vector.load %arg1[%c0_76, %91, %c2_77, %c0_78] : memref<1x18x18x128xf32, #tpu.memory_space<vmem>>, vector<1x1x16x128xf32>
      %93 = vector.shape_cast %92 : vector<1x1x16x128xf32> to vector<16x128xf32>
      %94 = arith.truncf %93 : vector<16x128xf32> to vector<16x128xbf16>
      %c2_79 = arith.constant 2 : index
      %c2_80 = arith.constant 2 : index
      %c0_81 = arith.constant 0 : index
      %c0_82 = arith.constant 0 : index
      %95 = vector.load %arg2[%c2_79, %c2_80, %c0_81, %c0_82] : memref<3x3x128x128xbf16, #tpu.memory_space<vmem>>, vector<1x1x128x128xbf16>
      %96 = vector.shape_cast %95 : vector<1x1x128x128xbf16> to vector<128x128xbf16>
      %cst_83 = arith.constant dense<0.000000e+00> : vector<16x128xf32>
      %97 = tpu.matmul %94, %96, %cst_83 {dimension_numbers = #tpu.dot_dimension_numbers<[1], [0], [0], [1], [0, 0, 1, 1], [], []>} : vector<16x128xbf16>, vector<128x128xbf16>, vector<16x128xf32> -> vector<16x128xf32>
      %98 = arith.addf %89, %97 : vector<16x128xf32>
      %99 = vector.broadcast %0 : vector<1x128xf32> to vector<16x128xf32>
      %100 = arith.addf %98, %99 : vector<16x128xf32>
      %cst_84 = arith.constant 0.000000e+00 : f32
      %101 = vector.broadcast %cst_84 : f32 to vector<16x128xf32>
      %102 = arith.maximumf %100, %101 : vector<16x128xf32>
      %c2_i32_85 = arith.constant 2 : i32
      %103 = arith.muli %c2_i32_85, %arg5 : i32
      %c1_i32_86 = arith.constant 1 : i32
      %104 = arith.addi %103, %c1_i32_86 : i32
      %cst_87 = arith.constant 0.000000e+00 : f32
      %105 = vector.broadcast %cst_87 : f32 to vector<16x128xf32>
      %c0_i32_88 = arith.constant 0 : i32
      %106 = arith.addi %104, %c0_i32_88 : i32
      %c0_89 = arith.constant 0 : index
      %107 = arith.index_cast %106 : i32 to index
      %c0_90 = arith.constant 0 : index
      %c0_91 = arith.constant 0 : index
      %108 = vector.load %arg1[%c0_89, %107, %c0_90, %c0_91] : memref<1x18x18x128xf32, #tpu.memory_space<vmem>>, vector<1x1x16x128xf32>
      %109 = vector.shape_cast %108 : vector<1x1x16x128xf32> to vector<16x128xf32>
      %110 = arith.truncf %109 : vector<16x128xf32> to vector<16x128xbf16>
      %c0_92 = arith.constant 0 : index
      %c0_93 = arith.constant 0 : index
      %c0_94 = arith.constant 0 : index
      %c0_95 = arith.constant 0 : index
      %111 = vector.load %arg2[%c0_92, %c0_93, %c0_94, %c0_95] : memref<3x3x128x128xbf16, #tpu.memory_space<vmem>>, vector<1x1x128x128xbf16>
      %112 = vector.shape_cast %111 : vector<1x1x128x128xbf16> to vector<128x128xbf16>
      %cst_96 = arith.constant dense<0.000000e+00> : vector<16x128xf32>
      %113 = tpu.matmul %110, %112, %cst_96 {dimension_numbers = #tpu.dot_dimension_numbers<[1], [0], [0], [1], [0, 0, 1, 1], [], []>} : vector<16x128xbf16>, vector<128x128xbf16>, vector<16x128xf32> -> vector<16x128xf32>
      %114 = arith.addf %105, %113 : vector<16x128xf32>
      %c0_i32_97 = arith.constant 0 : i32
      %115 = arith.addi %104, %c0_i32_97 : i32
      %c0_98 = arith.constant 0 : index
      %116 = arith.index_cast %115 : i32 to index
      %c1_99 = arith.constant 1 : index
      %c0_100 = arith.constant 0 : index
      %117 = vector.load %arg1[%c0_98, %116, %c1_99, %c0_100] : memref<1x18x18x128xf32, #tpu.memory_space<vmem>>, vector<1x1x16x128xf32>
      %118 = vector.shape_cast %117 : vector<1x1x16x128xf32> to vector<16x128xf32>
      %119 = arith.truncf %118 : vector<16x128xf32> to vector<16x128xbf16>
      %c0_101 = arith.constant 0 : index
      %c1_102 = arith.constant 1 : index
      %c0_103 = arith.constant 0 : index
      %c0_104 = arith.constant 0 : index
      %120 = vector.load %arg2[%c0_101, %c1_102, %c0_103, %c0_104] : memref<3x3x128x128xbf16, #tpu.memory_space<vmem>>, vector<1x1x128x128xbf16>
      %121 = vector.shape_cast %120 : vector<1x1x128x128xbf16> to vector<128x128xbf16>
      %cst_105 = arith.constant dense<0.000000e+00> : vector<16x128xf32>
      %122 = tpu.matmul %119, %121, %cst_105 {dimension_numbers = #tpu.dot_dimension_numbers<[1], [0], [0], [1], [0, 0, 1, 1], [], []>} : vector<16x128xbf16>, vector<128x128xbf16>, vector<16x128xf32> -> vector<16x128xf32>
      %123 = arith.addf %114, %122 : vector<16x128xf32>
      %c0_i32_106 = arith.constant 0 : i32
      %124 = arith.addi %104, %c0_i32_106 : i32
      %c0_107 = arith.constant 0 : index
      %125 = arith.index_cast %124 : i32 to index
      %c2_108 = arith.constant 2 : index
      %c0_109 = arith.constant 0 : index
      %126 = vector.load %arg1[%c0_107, %125, %c2_108, %c0_109] : memref<1x18x18x128xf32, #tpu.memory_space<vmem>>, vector<1x1x16x128xf32>
      %127 = vector.shape_cast %126 : vector<1x1x16x128xf32> to vector<16x128xf32>
      %128 = arith.truncf %127 : vector<16x128xf32> to vector<16x128xbf16>
      %c0_110 = arith.constant 0 : index
      %c2_111 = arith.constant 2 : index
      %c0_112 = arith.constant 0 : index
      %c0_113 = arith.constant 0 : index
      %129 = vector.load %arg2[%c0_110, %c2_111, %c0_112, %c0_113] : memref<3x3x128x128xbf16, #tpu.memory_space<vmem>>, vector<1x1x128x128xbf16>
      %130 = vector.shape_cast %129 : vector<1x1x128x128xbf16> to vector<128x128xbf16>
      %cst_114 = arith.constant dense<0.000000e+00> : vector<16x128xf32>
      %131 = tpu.matmul %128, %130, %cst_114 {dimension_numbers = #tpu.dot_dimension_numbers<[1], [0], [0], [1], [0, 0, 1, 1], [], []>} : vector<16x128xbf16>, vector<128x128xbf16>, vector<16x128xf32> -> vector<16x128xf32>
      %132 = arith.addf %123, %131 : vector<16x128xf32>
      %c1_i32_115 = arith.constant 1 : i32
      %133 = arith.addi %104, %c1_i32_115 : i32
      %c0_116 = arith.constant 0 : index
      %134 = arith.index_cast %133 : i32 to index
      %c0_117 = arith.constant 0 : index
      %c0_118 = arith.constant 0 : index
      %135 = vector.load %arg1[%c0_116, %134, %c0_117, %c0_118] : memref<1x18x18x128xf32, #tpu.memory_space<vmem>>, vector<1x1x16x128xf32>
      %136 = vector.shape_cast %135 : vector<1x1x16x128xf32> to vector<16x128xf32>
      %137 = arith.truncf %136 : vector<16x128xf32> to vector<16x128xbf16>
      %c1_119 = arith.constant 1 : index
      %c0_120 = arith.constant 0 : index
      %c0_121 = arith.constant 0 : index
      %c0_122 = arith.constant 0 : index
      %138 = vector.load %arg2[%c1_119, %c0_120, %c0_121, %c0_122] : memref<3x3x128x128xbf16, #tpu.memory_space<vmem>>, vector<1x1x128x128xbf16>
      %139 = vector.shape_cast %138 : vector<1x1x128x128xbf16> to vector<128x128xbf16>
      %cst_123 = arith.constant dense<0.000000e+00> : vector<16x128xf32>
      %140 = tpu.matmul %137, %139, %cst_123 {dimension_numbers = #tpu.dot_dimension_numbers<[1], [0], [0], [1], [0, 0, 1, 1], [], []>} : vector<16x128xbf16>, vector<128x128xbf16>, vector<16x128xf32> -> vector<16x128xf32>
      %141 = arith.addf %132, %140 : vector<16x128xf32>
      %c1_i32_124 = arith.constant 1 : i32
      %142 = arith.addi %104, %c1_i32_124 : i32
      %c0_125 = arith.constant 0 : index
      %143 = arith.index_cast %142 : i32 to index
      %c1_126 = arith.constant 1 : index
      %c0_127 = arith.constant 0 : index
      %144 = vector.load %arg1[%c0_125, %143, %c1_126, %c0_127] : memref<1x18x18x128xf32, #tpu.memory_space<vmem>>, vector<1x1x16x128xf32>
      %145 = vector.shape_cast %144 : vector<1x1x16x128xf32> to vector<16x128xf32>
      %146 = arith.truncf %145 : vector<16x128xf32> to vector<16x128xbf16>
      %c1_128 = arith.constant 1 : index
      %c1_129 = arith.constant 1 : index
      %c0_130 = arith.constant 0 : index
      %c0_131 = arith.constant 0 : index
      %147 = vector.load %arg2[%c1_128, %c1_129, %c0_130, %c0_131] : memref<3x3x128x128xbf16, #tpu.memory_space<vmem>>, vector<1x1x128x128xbf16>
      %148 = vector.shape_cast %147 : vector<1x1x128x128xbf16> to vector<128x128xbf16>
      %cst_132 = arith.constant dense<0.000000e+00> : vector<16x128xf32>
      %149 = tpu.matmul %146, %148, %cst_132 {dimension_numbers = #tpu.dot_dimension_numbers<[1], [0], [0], [1], [0, 0, 1, 1], [], []>} : vector<16x128xbf16>, vector<128x128xbf16>, vector<16x128xf32> -> vector<16x128xf32>
      %150 = arith.addf %141, %149 : vector<16x128xf32>
      %c1_i32_133 = arith.constant 1 : i32
      %151 = arith.addi %104, %c1_i32_133 : i32
      %c0_134 = arith.constant 0 : index
      %152 = arith.index_cast %151 : i32 to index
      %c2_135 = arith.constant 2 : index
      %c0_136 = arith.constant 0 : index
      %153 = vector.load %arg1[%c0_134, %152, %c2_135, %c0_136] : memref<1x18x18x128xf32, #tpu.memory_space<vmem>>, vector<1x1x16x128xf32>
      %154 = vector.shape_cast %153 : vector<1x1x16x128xf32> to vector<16x128xf32>
      %155 = arith.truncf %154 : vector<16x128xf32> to vector<16x128xbf16>
      %c1_137 = arith.constant 1 : index
      %c2_138 = arith.constant 2 : index
      %c0_139 = arith.constant 0 : index
      %c0_140 = arith.constant 0 : index
      %156 = vector.load %arg2[%c1_137, %c2_138, %c0_139, %c0_140] : memref<3x3x128x128xbf16, #tpu.memory_space<vmem>>, vector<1x1x128x128xbf16>
      %157 = vector.shape_cast %156 : vector<1x1x128x128xbf16> to vector<128x128xbf16>
      %cst_141 = arith.constant dense<0.000000e+00> : vector<16x128xf32>
      %158 = tpu.matmul %155, %157, %cst_141 {dimension_numbers = #tpu.dot_dimension_numbers<[1], [0], [0], [1], [0, 0, 1, 1], [], []>} : vector<16x128xbf16>, vector<128x128xbf16>, vector<16x128xf32> -> vector<16x128xf32>
      %159 = arith.addf %150, %158 : vector<16x128xf32>
      %c2_i32_142 = arith.constant 2 : i32
      %160 = arith.addi %104, %c2_i32_142 : i32
      %c0_143 = arith.constant 0 : index
      %161 = arith.index_cast %160 : i32 to index
      %c0_144 = arith.constant 0 : index
      %c0_145 = arith.constant 0 : index
      %162 = vector.load %arg1[%c0_143, %161, %c0_144, %c0_145] : memref<1x18x18x128xf32, #tpu.memory_space<vmem>>, vector<1x1x16x128xf32>
      %163 = vector.shape_cast %162 : vector<1x1x16x128xf32> to vector<16x128xf32>
      %164 = arith.truncf %163 : vector<16x128xf32> to vector<16x128xbf16>
      %c2_146 = arith.constant 2 : index
      %c0_147 = arith.constant 0 : index
      %c0_148 = arith.constant 0 : index
      %c0_149 = arith.constant 0 : index
      %165 = vector.load %arg2[%c2_146, %c0_147, %c0_148, %c0_149] : memref<3x3x128x128xbf16, #tpu.memory_space<vmem>>, vector<1x1x128x128xbf16>
      %166 = vector.shape_cast %165 : vector<1x1x128x128xbf16> to vector<128x128xbf16>
      %cst_150 = arith.constant dense<0.000000e+00> : vector<16x128xf32>
      %167 = tpu.matmul %164, %166, %cst_150 {dimension_numbers = #tpu.dot_dimension_numbers<[1], [0], [0], [1], [0, 0, 1, 1], [], []>} : vector<16x128xbf16>, vector<128x128xbf16>, vector<16x128xf32> -> vector<16x128xf32>
      %168 = arith.addf %159, %167 : vector<16x128xf32>
      %c2_i32_151 = arith.constant 2 : i32
      %169 = arith.addi %104, %c2_i32_151 : i32
      %c0_152 = arith.constant 0 : index
      %170 = arith.index_cast %169 : i32 to index
      %c1_153 = arith.constant 1 : index
      %c0_154 = arith.constant 0 : index
      %171 = vector.load %arg1[%c0_152, %170, %c1_153, %c0_154] : memref<1x18x18x128xf32, #tpu.memory_space<vmem>>, vector<1x1x16x128xf32>
      %172 = vector.shape_cast %171 : vector<1x1x16x128xf32> to vector<16x128xf32>
      %173 = arith.truncf %172 : vector<16x128xf32> to vector<16x128xbf16>
      %c2_155 = arith.constant 2 : index
      %c1_156 = arith.constant 1 : index
      %c0_157 = arith.constant 0 : index
      %c0_158 = arith.constant 0 : index
      %174 = vector.load %arg2[%c2_155, %c1_156, %c0_157, %c0_158] : memref<3x3x128x128xbf16, #tpu.memory_space<vmem>>, vector<1x1x128x128xbf16>
      %175 = vector.shape_cast %174 : vector<1x1x128x128xbf16> to vector<128x128xbf16>
      %cst_159 = arith.constant dense<0.000000e+00> : vector<16x128xf32>
      %176 = tpu.matmul %173, %175, %cst_159 {dimension_numbers = #tpu.dot_dimension_numbers<[1], [0], [0], [1], [0, 0, 1, 1], [], []>} : vector<16x128xbf16>, vector<128x128xbf16>, vector<16x128xf32> -> vector<16x128xf32>
      %177 = arith.addf %168, %176 : vector<16x128xf32>
      %c2_i32_160 = arith.constant 2 : i32
      %178 = arith.addi %104, %c2_i32_160 : i32
      %c0_161 = arith.constant 0 : index
      %179 = arith.index_cast %178 : i32 to index
      %c2_162 = arith.constant 2 : index
      %c0_163 = arith.constant 0 : index
      %180 = vector.load %arg1[%c0_161, %179, %c2_162, %c0_163] : memref<1x18x18x128xf32, #tpu.memory_space<vmem>>, vector<1x1x16x128xf32>
      %181 = vector.shape_cast %180 : vector<1x1x16x128xf32> to vector<16x128xf32>
      %182 = arith.truncf %181 : vector<16x128xf32> to vector<16x128xbf16>
      %c2_164 = arith.constant 2 : index
      %c2_165 = arith.constant 2 : index
      %c0_166 = arith.constant 0 : index
      %c0_167 = arith.constant 0 : index
      %183 = vector.load %arg2[%c2_164, %c2_165, %c0_166, %c0_167] : memref<3x3x128x128xbf16, #tpu.memory_space<vmem>>, vector<1x1x128x128xbf16>
      %184 = vector.shape_cast %183 : vector<1x1x128x128xbf16> to vector<128x128xbf16>
      %cst_168 = arith.constant dense<0.000000e+00> : vector<16x128xf32>
      %185 = tpu.matmul %182, %184, %cst_168 {dimension_numbers = #tpu.dot_dimension_numbers<[1], [0], [0], [1], [0, 0, 1, 1], [], []>} : vector<16x128xbf16>, vector<128x128xbf16>, vector<16x128xf32> -> vector<16x128xf32>
      %186 = arith.addf %177, %185 : vector<16x128xf32>
      %187 = vector.broadcast %0 : vector<1x128xf32> to vector<16x128xf32>
      %188 = arith.addf %186, %187 : vector<16x128xf32>
      %cst_169 = arith.constant 0.000000e+00 : f32
      %189 = vector.broadcast %cst_169 : f32 to vector<16x128xf32>
      %190 = arith.maximumf %188, %189 : vector<16x128xf32>
      %191 = arith.maximumf %102, %190 : vector<16x128xf32>
      %cst_170 = arith.constant dense<0.000000e+00> : vector<8x128xf32>
      %192 = tpu.matmul %7, %191, %cst_170 {dimension_numbers = #tpu.dot_dimension_numbers<[1], [0], [0], [1], [0, 0, 1, 1], [], []>} : vector<8x16xf32>, vector<16x128xf32>, vector<8x128xf32> -> vector<8x128xf32>
      %cst_171 = arith.constant dense<0.000000e+00> : vector<8x128xf32>
      %193 = tpu.matmul %14, %191, %cst_171 {dimension_numbers = #tpu.dot_dimension_numbers<[1], [0], [0], [1], [0, 0, 1, 1], [], []>} : vector<8x16xf32>, vector<16x128xf32>, vector<8x128xf32> -> vector<8x128xf32>
      %194 = arith.maximumf %192, %193 : vector<8x128xf32>
      %c0_172 = arith.constant 0 : index
      %195 = arith.index_cast %arg5 : i32 to index
      %c0_173 = arith.constant 0 : index
      %c0_174 = arith.constant 0 : index
      %196 = vector.load %arg4[%c0_172, %195, %c0_173, %c0_174] : memref<1x8x8x128xf32, #tpu.memory_space<vmem>>, vector<1x1x8x128xf32>
      %197 = vector.shape_cast %196 : vector<1x1x8x128xf32> to vector<8x128xf32>
      %198 = vector.shape_cast %194 : vector<8x128xf32> to vector<1x1x8x128xf32>
      tpu.vector_store %arg4[%c0_172, %195, %c0_173, %c0_174], %198 {strides = array<i32>} : memref<1x8x8x128xf32, #tpu.memory_space<vmem>>, vector<1x1x8x128xf32>,
    }
    %c8_i32_3 = arith.constant 8 : i32
    return
  }
  func.func @transform_0(%arg0: i32) -> (i32, i32, i32, i32) {
    %c0_i32 = arith.constant 0 : i32
    %c0_i32_0 = arith.constant 0 : i32
    %c0_i32_1 = arith.constant 0 : i32
    %c0_i32_2 = arith.constant 0 : i32
    return %arg0, %c0_i32, %c0_i32_0, %c0_i32_1 : i32, i32, i32, i32
  }
  func.func @transform_1(%arg0: i32) -> (i32, i32, i32, i32) {
    %c0_i32 = arith.constant 0 : i32
    %c0_i32_0 = arith.constant 0 : i32
    %c0_i32_1 = arith.constant 0 : i32
    %c0_i32_2 = arith.constant 0 : i32
    %c0_i32_3 = arith.constant 0 : i32
    return %c0_i32, %c0_i32_0, %c0_i32_1, %c0_i32_2 : i32, i32, i32, i32
  }
  func.func @transform_2(%arg0: i32) -> (i32, i32) {
    %c0_i32 = arith.constant 0 : i32
    %c0_i32_0 = arith.constant 0 : i32
    %c0_i32_1 = arith.constant 0 : i32
    return %c0_i32, %c0_i32_0 : i32, i32
  }
  func.func @transform_3(%arg0: i32) -> (i32, i32, i32, i32) {
    %c0_i32 = arith.constant 0 : i32
    %c0_i32_0 = arith.constant 0 : i32
    %c0_i32_1 = arith.constant 0 : i32
    %c0_i32_2 = arith.constant 0 : i32
    return %arg0, %c0_i32, %c0_i32_0, %c0_i32_1 : i32, i32, i32, i32
  }
}

module attributes {stable_mosaic.version = 11 : i64} {
  func.func @kernel(%arg0: i32, %arg1: memref<1x10x10x128xf32, #tpu.memory_space<vmem>>, %arg2: memref<3x3x128x128xbf16, #tpu.memory_space<vmem>>, %arg3: memref<1x128xf32, #tpu.memory_space<vmem>>, %arg4: memref<1x4x4x128xf32, #tpu.memory_space<vmem>>) attributes {dimension_semantics = [#tpu.dimension_semantics<parallel>], iteration_bounds = array<i64: 2>, scalar_prefetch = 0 : i64, scratch_operands = 0 : i64, tpu.core_type = #tpu.core_type<tc>, window_params = [{transform_indices = @transform_0, window_bounds = array<i64: 1, 10, 10, 128>}, {pipeline_mode = #tpu.pipeline_mode<synchronous>, transform_indices = @transform_1, window_bounds = array<i64: 3, 3, 128, 128>}, {pipeline_mode = #tpu.pipeline_mode<synchronous>, transform_indices = @transform_2, window_bounds = array<i64: 1, 128>}, {transform_indices = @transform_3, window_bounds = array<i64: 1, 4, 4, 128>}]} {
    %c0 = arith.constant 0 : index
    %c0_0 = arith.constant 0 : index
    %0 = vector.load %arg3[%c0, %c0_0] : memref<1x128xf32, #tpu.memory_space<vmem>>, vector<1x128xf32>
    %1 = tpu.iota {dimensions = array<i32: 0>} : vector<4x8xi32>
    %2 = tpu.iota {dimensions = array<i32: 1>} : vector<4x8xi32>
    %c2_i32 = arith.constant 2 : i32
    %3 = vector.broadcast %c2_i32 : i32 to vector<4x8xi32>
    %4 = arith.muli %3, %1 : vector<4x8xi32>
    %5 = arith.cmpi eq, %2, %4 : vector<4x8xi32>
    %6 = arith.extui %5 : vector<4x8xi1> to vector<4x8xi32>
    %7 = arith.sitofp %6 : vector<4x8xi32> to vector<4x8xf32>
    %c2_i32_1 = arith.constant 2 : i32
    %8 = vector.broadcast %c2_i32_1 : i32 to vector<4x8xi32>
    %9 = arith.muli %8, %1 : vector<4x8xi32>
    %c1_i32 = arith.constant 1 : i32
    %10 = vector.broadcast %c1_i32 : i32 to vector<4x8xi32>
    %11 = arith.addi %9, %10 : vector<4x8xi32>
    %12 = arith.cmpi eq, %2, %11 : vector<4x8xi32>
    %13 = arith.extui %12 : vector<4x8xi1> to vector<4x8xi32>
    %14 = arith.sitofp %13 : vector<4x8xi32> to vector<4x8xf32>
    %c0_i32 = arith.constant 0 : i32
    %c4_i32 = arith.constant 4 : i32
    %15 = arith.addi %c0_i32, %c4_i32 : i32
    %c1_i32_2 = arith.constant 1 : i32
    scf.for %arg5 = %c0_i32 to %15 step %c1_i32_2  : i32 {
      %c2_i32_4 = arith.constant 2 : i32
      %16 = arith.muli %c2_i32_4, %arg5 : i32
      %cst = arith.constant 0.000000e+00 : f32
      %17 = vector.broadcast %cst : f32 to vector<8x128xf32>
      %c0_i32_5 = arith.constant 0 : i32
      %18 = arith.addi %16, %c0_i32_5 : i32
      %c0_6 = arith.constant 0 : index
      %19 = arith.index_cast %18 : i32 to index
      %c0_7 = arith.constant 0 : index
      %c0_8 = arith.constant 0 : index
      %20 = vector.load %arg1[%c0_6, %19, %c0_7, %c0_8] : memref<1x10x10x128xf32, #tpu.memory_space<vmem>>, vector<1x1x8x128xf32>
      %21 = vector.shape_cast %20 : vector<1x1x8x128xf32> to vector<8x128xf32>
      %22 = arith.truncf %21 : vector<8x128xf32> to vector<8x128xbf16>
      %c0_9 = arith.constant 0 : index
      %c0_10 = arith.constant 0 : index
      %c0_11 = arith.constant 0 : index
      %c0_12 = arith.constant 0 : index
      %23 = vector.load %arg2[%c0_9, %c0_10, %c0_11, %c0_12] : memref<3x3x128x128xbf16, #tpu.memory_space<vmem>>, vector<1x1x128x128xbf16>
      %24 = vector.shape_cast %23 : vector<1x1x128x128xbf16> to vector<128x128xbf16>
      %cst_13 = arith.constant dense<0.000000e+00> : vector<8x128xf32>
      %25 = tpu.matmul %22, %24, %cst_13 {dimension_numbers = #tpu.dot_dimension_numbers<[1], [0], [0], [1], [0, 0, 1, 1], [], []>} : vector<8x128xbf16>, vector<128x128xbf16>, vector<8x128xf32> -> vector<8x128xf32>
      %26 = arith.addf %17, %25 : vector<8x128xf32>
      %c0_i32_14 = arith.constant 0 : i32
      %27 = arith.addi %16, %c0_i32_14 : i32
      %c0_15 = arith.constant 0 : index
      %28 = arith.index_cast %27 : i32 to index
      %c1 = arith.constant 1 : index
      %c0_16 = arith.constant 0 : index
      %29 = vector.load %arg1[%c0_15, %28, %c1, %c0_16] : memref<1x10x10x128xf32, #tpu.memory_space<vmem>>, vector<1x1x8x128xf32>
      %30 = vector.shape_cast %29 : vector<1x1x8x128xf32> to vector<8x128xf32>
      %31 = arith.truncf %30 : vector<8x128xf32> to vector<8x128xbf16>
      %c0_17 = arith.constant 0 : index
      %c1_18 = arith.constant 1 : index
      %c0_19 = arith.constant 0 : index
      %c0_20 = arith.constant 0 : index
      %32 = vector.load %arg2[%c0_17, %c1_18, %c0_19, %c0_20] : memref<3x3x128x128xbf16, #tpu.memory_space<vmem>>, vector<1x1x128x128xbf16>
      %33 = vector.shape_cast %32 : vector<1x1x128x128xbf16> to vector<128x128xbf16>
      %cst_21 = arith.constant dense<0.000000e+00> : vector<8x128xf32>
      %34 = tpu.matmul %31, %33, %cst_21 {dimension_numbers = #tpu.dot_dimension_numbers<[1], [0], [0], [1], [0, 0, 1, 1], [], []>} : vector<8x128xbf16>, vector<128x128xbf16>, vector<8x128xf32> -> vector<8x128xf32>
      %35 = arith.addf %26, %34 : vector<8x128xf32>
      %c0_i32_22 = arith.constant 0 : i32
      %36 = arith.addi %16, %c0_i32_22 : i32
      %c0_23 = arith.constant 0 : index
      %37 = arith.index_cast %36 : i32 to index
      %c2 = arith.constant 2 : index
      %c0_24 = arith.constant 0 : index
      %38 = vector.load %arg1[%c0_23, %37, %c2, %c0_24] : memref<1x10x10x128xf32, #tpu.memory_space<vmem>>, vector<1x1x8x128xf32>
      %39 = vector.shape_cast %38 : vector<1x1x8x128xf32> to vector<8x128xf32>
      %40 = arith.truncf %39 : vector<8x128xf32> to vector<8x128xbf16>
      %c0_25 = arith.constant 0 : index
      %c2_26 = arith.constant 2 : index
      %c0_27 = arith.constant 0 : index
      %c0_28 = arith.constant 0 : index
      %41 = vector.load %arg2[%c0_25, %c2_26, %c0_27, %c0_28] : memref<3x3x128x128xbf16, #tpu.memory_space<vmem>>, vector<1x1x128x128xbf16>
      %42 = vector.shape_cast %41 : vector<1x1x128x128xbf16> to vector<128x128xbf16>
      %cst_29 = arith.constant dense<0.000000e+00> : vector<8x128xf32>
      %43 = tpu.matmul %40, %42, %cst_29 {dimension_numbers = #tpu.dot_dimension_numbers<[1], [0], [0], [1], [0, 0, 1, 1], [], []>} : vector<8x128xbf16>, vector<128x128xbf16>, vector<8x128xf32> -> vector<8x128xf32>
      %44 = arith.addf %35, %43 : vector<8x128xf32>
      %c1_i32_30 = arith.constant 1 : i32
      %45 = arith.addi %16, %c1_i32_30 : i32
      %c0_31 = arith.constant 0 : index
      %46 = arith.index_cast %45 : i32 to index
      %c0_32 = arith.constant 0 : index
      %c0_33 = arith.constant 0 : index
      %47 = vector.load %arg1[%c0_31, %46, %c0_32, %c0_33] : memref<1x10x10x128xf32, #tpu.memory_space<vmem>>, vector<1x1x8x128xf32>
      %48 = vector.shape_cast %47 : vector<1x1x8x128xf32> to vector<8x128xf32>
      %49 = arith.truncf %48 : vector<8x128xf32> to vector<8x128xbf16>
      %c1_34 = arith.constant 1 : index
      %c0_35 = arith.constant 0 : index
      %c0_36 = arith.constant 0 : index
      %c0_37 = arith.constant 0 : index
      %50 = vector.load %arg2[%c1_34, %c0_35, %c0_36, %c0_37] : memref<3x3x128x128xbf16, #tpu.memory_space<vmem>>, vector<1x1x128x128xbf16>
      %51 = vector.shape_cast %50 : vector<1x1x128x128xbf16> to vector<128x128xbf16>
      %cst_38 = arith.constant dense<0.000000e+00> : vector<8x128xf32>
      %52 = tpu.matmul %49, %51, %cst_38 {dimension_numbers = #tpu.dot_dimension_numbers<[1], [0], [0], [1], [0, 0, 1, 1], [], []>} : vector<8x128xbf16>, vector<128x128xbf16>, vector<8x128xf32> -> vector<8x128xf32>
      %53 = arith.addf %44, %52 : vector<8x128xf32>
      %c1_i32_39 = arith.constant 1 : i32
      %54 = arith.addi %16, %c1_i32_39 : i32
      %c0_40 = arith.constant 0 : index
      %55 = arith.index_cast %54 : i32 to index
      %c1_41 = arith.constant 1 : index
      %c0_42 = arith.constant 0 : index
      %56 = vector.load %arg1[%c0_40, %55, %c1_41, %c0_42] : memref<1x10x10x128xf32, #tpu.memory_space<vmem>>, vector<1x1x8x128xf32>
      %57 = vector.shape_cast %56 : vector<1x1x8x128xf32> to vector<8x128xf32>
      %58 = arith.truncf %57 : vector<8x128xf32> to vector<8x128xbf16>
      %c1_43 = arith.constant 1 : index
      %c1_44 = arith.constant 1 : index
      %c0_45 = arith.constant 0 : index
      %c0_46 = arith.constant 0 : index
      %59 = vector.load %arg2[%c1_43, %c1_44, %c0_45, %c0_46] : memref<3x3x128x128xbf16, #tpu.memory_space<vmem>>, vector<1x1x128x128xbf16>
      %60 = vector.shape_cast %59 : vector<1x1x128x128xbf16> to vector<128x128xbf16>
      %cst_47 = arith.constant dense<0.000000e+00> : vector<8x128xf32>
      %61 = tpu.matmul %58, %60, %cst_47 {dimension_numbers = #tpu.dot_dimension_numbers<[1], [0], [0], [1], [0, 0, 1, 1], [], []>} : vector<8x128xbf16>, vector<128x128xbf16>, vector<8x128xf32> -> vector<8x128xf32>
      %62 = arith.addf %53, %61 : vector<8x128xf32>
      %c1_i32_48 = arith.constant 1 : i32
      %63 = arith.addi %16, %c1_i32_48 : i32
      %c0_49 = arith.constant 0 : index
      %64 = arith.index_cast %63 : i32 to index
      %c2_50 = arith.constant 2 : index
      %c0_51 = arith.constant 0 : index
      %65 = vector.load %arg1[%c0_49, %64, %c2_50, %c0_51] : memref<1x10x10x128xf32, #tpu.memory_space<vmem>>, vector<1x1x8x128xf32>
      %66 = vector.shape_cast %65 : vector<1x1x8x128xf32> to vector<8x128xf32>
      %67 = arith.truncf %66 : vector<8x128xf32> to vector<8x128xbf16>
      %c1_52 = arith.constant 1 : index
      %c2_53 = arith.constant 2 : index
      %c0_54 = arith.constant 0 : index
      %c0_55 = arith.constant 0 : index
      %68 = vector.load %arg2[%c1_52, %c2_53, %c0_54, %c0_55] : memref<3x3x128x128xbf16, #tpu.memory_space<vmem>>, vector<1x1x128x128xbf16>
      %69 = vector.shape_cast %68 : vector<1x1x128x128xbf16> to vector<128x128xbf16>
      %cst_56 = arith.constant dense<0.000000e+00> : vector<8x128xf32>
      %70 = tpu.matmul %67, %69, %cst_56 {dimension_numbers = #tpu.dot_dimension_numbers<[1], [0], [0], [1], [0, 0, 1, 1], [], []>} : vector<8x128xbf16>, vector<128x128xbf16>, vector<8x128xf32> -> vector<8x128xf32>
      %71 = arith.addf %62, %70 : vector<8x128xf32>
      %c2_i32_57 = arith.constant 2 : i32
      %72 = arith.addi %16, %c2_i32_57 : i32
      %c0_58 = arith.constant 0 : index
      %73 = arith.index_cast %72 : i32 to index
      %c0_59 = arith.constant 0 : index
      %c0_60 = arith.constant 0 : index
      %74 = vector.load %arg1[%c0_58, %73, %c0_59, %c0_60] : memref<1x10x10x128xf32, #tpu.memory_space<vmem>>, vector<1x1x8x128xf32>
      %75 = vector.shape_cast %74 : vector<1x1x8x128xf32> to vector<8x128xf32>
      %76 = arith.truncf %75 : vector<8x128xf32> to vector<8x128xbf16>
      %c2_61 = arith.constant 2 : index
      %c0_62 = arith.constant 0 : index
      %c0_63 = arith.constant 0 : index
      %c0_64 = arith.constant 0 : index
      %77 = vector.load %arg2[%c2_61, %c0_62, %c0_63, %c0_64] : memref<3x3x128x128xbf16, #tpu.memory_space<vmem>>, vector<1x1x128x128xbf16>
      %78 = vector.shape_cast %77 : vector<1x1x128x128xbf16> to vector<128x128xbf16>
      %cst_65 = arith.constant dense<0.000000e+00> : vector<8x128xf32>
      %79 = tpu.matmul %76, %78, %cst_65 {dimension_numbers = #tpu.dot_dimension_numbers<[1], [0], [0], [1], [0, 0, 1, 1], [], []>} : vector<8x128xbf16>, vector<128x128xbf16>, vector<8x128xf32> -> vector<8x128xf32>
      %80 = arith.addf %71, %79 : vector<8x128xf32>
      %c2_i32_66 = arith.constant 2 : i32
      %81 = arith.addi %16, %c2_i32_66 : i32
      %c0_67 = arith.constant 0 : index
      %82 = arith.index_cast %81 : i32 to index
      %c1_68 = arith.constant 1 : index
      %c0_69 = arith.constant 0 : index
      %83 = vector.load %arg1[%c0_67, %82, %c1_68, %c0_69] : memref<1x10x10x128xf32, #tpu.memory_space<vmem>>, vector<1x1x8x128xf32>
      %84 = vector.shape_cast %83 : vector<1x1x8x128xf32> to vector<8x128xf32>
      %85 = arith.truncf %84 : vector<8x128xf32> to vector<8x128xbf16>
      %c2_70 = arith.constant 2 : index
      %c1_71 = arith.constant 1 : index
      %c0_72 = arith.constant 0 : index
      %c0_73 = arith.constant 0 : index
      %86 = vector.load %arg2[%c2_70, %c1_71, %c0_72, %c0_73] : memref<3x3x128x128xbf16, #tpu.memory_space<vmem>>, vector<1x1x128x128xbf16>
      %87 = vector.shape_cast %86 : vector<1x1x128x128xbf16> to vector<128x128xbf16>
      %cst_74 = arith.constant dense<0.000000e+00> : vector<8x128xf32>
      %88 = tpu.matmul %85, %87, %cst_74 {dimension_numbers = #tpu.dot_dimension_numbers<[1], [0], [0], [1], [0, 0, 1, 1], [], []>} : vector<8x128xbf16>, vector<128x128xbf16>, vector<8x128xf32> -> vector<8x128xf32>
      %89 = arith.addf %80, %88 : vector<8x128xf32>
      %c2_i32_75 = arith.constant 2 : i32
      %90 = arith.addi %16, %c2_i32_75 : i32
      %c0_76 = arith.constant 0 : index
      %91 = arith.index_cast %90 : i32 to index
      %c2_77 = arith.constant 2 : index
      %c0_78 = arith.constant 0 : index
      %92 = vector.load %arg1[%c0_76, %91, %c2_77, %c0_78] : memref<1x10x10x128xf32, #tpu.memory_space<vmem>>, vector<1x1x8x128xf32>
      %93 = vector.shape_cast %92 : vector<1x1x8x128xf32> to vector<8x128xf32>
      %94 = arith.truncf %93 : vector<8x128xf32> to vector<8x128xbf16>
      %c2_79 = arith.constant 2 : index
      %c2_80 = arith.constant 2 : index
      %c0_81 = arith.constant 0 : index
      %c0_82 = arith.constant 0 : index
      %95 = vector.load %arg2[%c2_79, %c2_80, %c0_81, %c0_82] : memref<3x3x128x128xbf16, #tpu.memory_space<vmem>>, vector<1x1x128x128xbf16>
      %96 = vector.shape_cast %95 : vector<1x1x128x128xbf16> to vector<128x128xbf16>
      %cst_83 = arith.constant dense<0.000000e+00> : vector<8x128xf32>
      %97 = tpu.matmul %94, %96, %cst_83 {dimension_numbers = #tpu.dot_dimension_numbers<[1], [0], [0], [1], [0, 0, 1, 1], [], []>} : vector<8x128xbf16>, vector<128x128xbf16>, vector<8x128xf32> -> vector<8x128xf32>
      %98 = arith.addf %89, %97 : vector<8x128xf32>
      %99 = vector.broadcast %0 : vector<1x128xf32> to vector<8x128xf32>
      %100 = arith.addf %98, %99 : vector<8x128xf32>
      %cst_84 = arith.constant 0.000000e+00 : f32
      %101 = vector.broadcast %cst_84 : f32 to vector<8x128xf32>
      %102 = arith.maximumf %100, %101 : vector<8x128xf32>
      %c2_i32_85 = arith.constant 2 : i32
      %103 = arith.muli %c2_i32_85, %arg5 : i32
      %c1_i32_86 = arith.constant 1 : i32
      %104 = arith.addi %103, %c1_i32_86 : i32
      %cst_87 = arith.constant 0.000000e+00 : f32
      %105 = vector.broadcast %cst_87 : f32 to vector<8x128xf32>
      %c0_i32_88 = arith.constant 0 : i32
      %106 = arith.addi %104, %c0_i32_88 : i32
      %c0_89 = arith.constant 0 : index
      %107 = arith.index_cast %106 : i32 to index
      %c0_90 = arith.constant 0 : index
      %c0_91 = arith.constant 0 : index
      %108 = vector.load %arg1[%c0_89, %107, %c0_90, %c0_91] : memref<1x10x10x128xf32, #tpu.memory_space<vmem>>, vector<1x1x8x128xf32>
      %109 = vector.shape_cast %108 : vector<1x1x8x128xf32> to vector<8x128xf32>
      %110 = arith.truncf %109 : vector<8x128xf32> to vector<8x128xbf16>
      %c0_92 = arith.constant 0 : index
      %c0_93 = arith.constant 0 : index
      %c0_94 = arith.constant 0 : index
      %c0_95 = arith.constant 0 : index
      %111 = vector.load %arg2[%c0_92, %c0_93, %c0_94, %c0_95] : memref<3x3x128x128xbf16, #tpu.memory_space<vmem>>, vector<1x1x128x128xbf16>
      %112 = vector.shape_cast %111 : vector<1x1x128x128xbf16> to vector<128x128xbf16>
      %cst_96 = arith.constant dense<0.000000e+00> : vector<8x128xf32>
      %113 = tpu.matmul %110, %112, %cst_96 {dimension_numbers = #tpu.dot_dimension_numbers<[1], [0], [0], [1], [0, 0, 1, 1], [], []>} : vector<8x128xbf16>, vector<128x128xbf16>, vector<8x128xf32> -> vector<8x128xf32>
      %114 = arith.addf %105, %113 : vector<8x128xf32>
      %c0_i32_97 = arith.constant 0 : i32
      %115 = arith.addi %104, %c0_i32_97 : i32
      %c0_98 = arith.constant 0 : index
      %116 = arith.index_cast %115 : i32 to index
      %c1_99 = arith.constant 1 : index
      %c0_100 = arith.constant 0 : index
      %117 = vector.load %arg1[%c0_98, %116, %c1_99, %c0_100] : memref<1x10x10x128xf32, #tpu.memory_space<vmem>>, vector<1x1x8x128xf32>
      %118 = vector.shape_cast %117 : vector<1x1x8x128xf32> to vector<8x128xf32>
      %119 = arith.truncf %118 : vector<8x128xf32> to vector<8x128xbf16>
      %c0_101 = arith.constant 0 : index
      %c1_102 = arith.constant 1 : index
      %c0_103 = arith.constant 0 : index
      %c0_104 = arith.constant 0 : index
      %120 = vector.load %arg2[%c0_101, %c1_102, %c0_103, %c0_104] : memref<3x3x128x128xbf16, #tpu.memory_space<vmem>>, vector<1x1x128x128xbf16>
      %121 = vector.shape_cast %120 : vector<1x1x128x128xbf16> to vector<128x128xbf16>
      %cst_105 = arith.constant dense<0.000000e+00> : vector<8x128xf32>
      %122 = tpu.matmul %119, %121, %cst_105 {dimension_numbers = #tpu.dot_dimension_numbers<[1], [0], [0], [1], [0, 0, 1, 1], [], []>} : vector<8x128xbf16>, vector<128x128xbf16>, vector<8x128xf32> -> vector<8x128xf32>
      %123 = arith.addf %114, %122 : vector<8x128xf32>
      %c0_i32_106 = arith.constant 0 : i32
      %124 = arith.addi %104, %c0_i32_106 : i32
      %c0_107 = arith.constant 0 : index
      %125 = arith.index_cast %124 : i32 to index
      %c2_108 = arith.constant 2 : index
      %c0_109 = arith.constant 0 : index
      %126 = vector.load %arg1[%c0_107, %125, %c2_108, %c0_109] : memref<1x10x10x128xf32, #tpu.memory_space<vmem>>, vector<1x1x8x128xf32>
      %127 = vector.shape_cast %126 : vector<1x1x8x128xf32> to vector<8x128xf32>
      %128 = arith.truncf %127 : vector<8x128xf32> to vector<8x128xbf16>
      %c0_110 = arith.constant 0 : index
      %c2_111 = arith.constant 2 : index
      %c0_112 = arith.constant 0 : index
      %c0_113 = arith.constant 0 : index
      %129 = vector.load %arg2[%c0_110, %c2_111, %c0_112, %c0_113] : memref<3x3x128x128xbf16, #tpu.memory_space<vmem>>, vector<1x1x128x128xbf16>
      %130 = vector.shape_cast %129 : vector<1x1x128x128xbf16> to vector<128x128xbf16>
      %cst_114 = arith.constant dense<0.000000e+00> : vector<8x128xf32>
      %131 = tpu.matmul %128, %130, %cst_114 {dimension_numbers = #tpu.dot_dimension_numbers<[1], [0], [0], [1], [0, 0, 1, 1], [], []>} : vector<8x128xbf16>, vector<128x128xbf16>, vector<8x128xf32> -> vector<8x128xf32>
      %132 = arith.addf %123, %131 : vector<8x128xf32>
      %c1_i32_115 = arith.constant 1 : i32
      %133 = arith.addi %104, %c1_i32_115 : i32
      %c0_116 = arith.constant 0 : index
      %134 = arith.index_cast %133 : i32 to index
      %c0_117 = arith.constant 0 : index
      %c0_118 = arith.constant 0 : index
      %135 = vector.load %arg1[%c0_116, %134, %c0_117, %c0_118] : memref<1x10x10x128xf32, #tpu.memory_space<vmem>>, vector<1x1x8x128xf32>
      %136 = vector.shape_cast %135 : vector<1x1x8x128xf32> to vector<8x128xf32>
      %137 = arith.truncf %136 : vector<8x128xf32> to vector<8x128xbf16>
      %c1_119 = arith.constant 1 : index
      %c0_120 = arith.constant 0 : index
      %c0_121 = arith.constant 0 : index
      %c0_122 = arith.constant 0 : index
      %138 = vector.load %arg2[%c1_119, %c0_120, %c0_121, %c0_122] : memref<3x3x128x128xbf16, #tpu.memory_space<vmem>>, vector<1x1x128x128xbf16>
      %139 = vector.shape_cast %138 : vector<1x1x128x128xbf16> to vector<128x128xbf16>
      %cst_123 = arith.constant dense<0.000000e+00> : vector<8x128xf32>
      %140 = tpu.matmul %137, %139, %cst_123 {dimension_numbers = #tpu.dot_dimension_numbers<[1], [0], [0], [1], [0, 0, 1, 1], [], []>} : vector<8x128xbf16>, vector<128x128xbf16>, vector<8x128xf32> -> vector<8x128xf32>
      %141 = arith.addf %132, %140 : vector<8x128xf32>
      %c1_i32_124 = arith.constant 1 : i32
      %142 = arith.addi %104, %c1_i32_124 : i32
      %c0_125 = arith.constant 0 : index
      %143 = arith.index_cast %142 : i32 to index
      %c1_126 = arith.constant 1 : index
      %c0_127 = arith.constant 0 : index
      %144 = vector.load %arg1[%c0_125, %143, %c1_126, %c0_127] : memref<1x10x10x128xf32, #tpu.memory_space<vmem>>, vector<1x1x8x128xf32>
      %145 = vector.shape_cast %144 : vector<1x1x8x128xf32> to vector<8x128xf32>
      %146 = arith.truncf %145 : vector<8x128xf32> to vector<8x128xbf16>
      %c1_128 = arith.constant 1 : index
      %c1_129 = arith.constant 1 : index
      %c0_130 = arith.constant 0 : index
      %c0_131 = arith.constant 0 : index
      %147 = vector.load %arg2[%c1_128, %c1_129, %c0_130, %c0_131] : memref<3x3x128x128xbf16, #tpu.memory_space<vmem>>, vector<1x1x128x128xbf16>
      %148 = vector.shape_cast %147 : vector<1x1x128x128xbf16> to vector<128x128xbf16>
      %cst_132 = arith.constant dense<0.000000e+00> : vector<8x128xf32>
      %149 = tpu.matmul %146, %148, %cst_132 {dimension_numbers = #tpu.dot_dimension_numbers<[1], [0], [0], [1], [0, 0, 1, 1], [], []>} : vector<8x128xbf16>, vector<128x128xbf16>, vector<8x128xf32> -> vector<8x128xf32>
      %150 = arith.addf %141, %149 : vector<8x128xf32>
      %c1_i32_133 = arith.constant 1 : i32
      %151 = arith.addi %104, %c1_i32_133 : i32
      %c0_134 = arith.constant 0 : index
      %152 = arith.index_cast %151 : i32 to index
      %c2_135 = arith.constant 2 : index
      %c0_136 = arith.constant 0 : index
      %153 = vector.load %arg1[%c0_134, %152, %c2_135, %c0_136] : memref<1x10x10x128xf32, #tpu.memory_space<vmem>>, vector<1x1x8x128xf32>
      %154 = vector.shape_cast %153 : vector<1x1x8x128xf32> to vector<8x128xf32>
      %155 = arith.truncf %154 : vector<8x128xf32> to vector<8x128xbf16>
      %c1_137 = arith.constant 1 : index
      %c2_138 = arith.constant 2 : index
      %c0_139 = arith.constant 0 : index
      %c0_140 = arith.constant 0 : index
      %156 = vector.load %arg2[%c1_137, %c2_138, %c0_139, %c0_140] : memref<3x3x128x128xbf16, #tpu.memory_space<vmem>>, vector<1x1x128x128xbf16>
      %157 = vector.shape_cast %156 : vector<1x1x128x128xbf16> to vector<128x128xbf16>
      %cst_141 = arith.constant dense<0.000000e+00> : vector<8x128xf32>
      %158 = tpu.matmul %155, %157, %cst_141 {dimension_numbers = #tpu.dot_dimension_numbers<[1], [0], [0], [1], [0, 0, 1, 1], [], []>} : vector<8x128xbf16>, vector<128x128xbf16>, vector<8x128xf32> -> vector<8x128xf32>
      %159 = arith.addf %150, %158 : vector<8x128xf32>
      %c2_i32_142 = arith.constant 2 : i32
      %160 = arith.addi %104, %c2_i32_142 : i32
      %c0_143 = arith.constant 0 : index
      %161 = arith.index_cast %160 : i32 to index
      %c0_144 = arith.constant 0 : index
      %c0_145 = arith.constant 0 : index
      %162 = vector.load %arg1[%c0_143, %161, %c0_144, %c0_145] : memref<1x10x10x128xf32, #tpu.memory_space<vmem>>, vector<1x1x8x128xf32>
      %163 = vector.shape_cast %162 : vector<1x1x8x128xf32> to vector<8x128xf32>
      %164 = arith.truncf %163 : vector<8x128xf32> to vector<8x128xbf16>
      %c2_146 = arith.constant 2 : index
      %c0_147 = arith.constant 0 : index
      %c0_148 = arith.constant 0 : index
      %c0_149 = arith.constant 0 : index
      %165 = vector.load %arg2[%c2_146, %c0_147, %c0_148, %c0_149] : memref<3x3x128x128xbf16, #tpu.memory_space<vmem>>, vector<1x1x128x128xbf16>
      %166 = vector.shape_cast %165 : vector<1x1x128x128xbf16> to vector<128x128xbf16>
      %cst_150 = arith.constant dense<0.000000e+00> : vector<8x128xf32>
      %167 = tpu.matmul %164, %166, %cst_150 {dimension_numbers = #tpu.dot_dimension_numbers<[1], [0], [0], [1], [0, 0, 1, 1], [], []>} : vector<8x128xbf16>, vector<128x128xbf16>, vector<8x128xf32> -> vector<8x128xf32>
      %168 = arith.addf %159, %167 : vector<8x128xf32>
      %c2_i32_151 = arith.constant 2 : i32
      %169 = arith.addi %104, %c2_i32_151 : i32
      %c0_152 = arith.constant 0 : index
      %170 = arith.index_cast %169 : i32 to index
      %c1_153 = arith.constant 1 : index
      %c0_154 = arith.constant 0 : index
      %171 = vector.load %arg1[%c0_152, %170, %c1_153, %c0_154] : memref<1x10x10x128xf32, #tpu.memory_space<vmem>>, vector<1x1x8x128xf32>
      %172 = vector.shape_cast %171 : vector<1x1x8x128xf32> to vector<8x128xf32>
      %173 = arith.truncf %172 : vector<8x128xf32> to vector<8x128xbf16>
      %c2_155 = arith.constant 2 : index
      %c1_156 = arith.constant 1 : index
      %c0_157 = arith.constant 0 : index
      %c0_158 = arith.constant 0 : index
      %174 = vector.load %arg2[%c2_155, %c1_156, %c0_157, %c0_158] : memref<3x3x128x128xbf16, #tpu.memory_space<vmem>>, vector<1x1x128x128xbf16>
      %175 = vector.shape_cast %174 : vector<1x1x128x128xbf16> to vector<128x128xbf16>
      %cst_159 = arith.constant dense<0.000000e+00> : vector<8x128xf32>
      %176 = tpu.matmul %173, %175, %cst_159 {dimension_numbers = #tpu.dot_dimension_numbers<[1], [0], [0], [1], [0, 0, 1, 1], [], []>} : vector<8x128xbf16>, vector<128x128xbf16>, vector<8x128xf32> -> vector<8x128xf32>
      %177 = arith.addf %168, %176 : vector<8x128xf32>
      %c2_i32_160 = arith.constant 2 : i32
      %178 = arith.addi %104, %c2_i32_160 : i32
      %c0_161 = arith.constant 0 : index
      %179 = arith.index_cast %178 : i32 to index
      %c2_162 = arith.constant 2 : index
      %c0_163 = arith.constant 0 : index
      %180 = vector.load %arg1[%c0_161, %179, %c2_162, %c0_163] : memref<1x10x10x128xf32, #tpu.memory_space<vmem>>, vector<1x1x8x128xf32>
      %181 = vector.shape_cast %180 : vector<1x1x8x128xf32> to vector<8x128xf32>
      %182 = arith.truncf %181 : vector<8x128xf32> to vector<8x128xbf16>
      %c2_164 = arith.constant 2 : index
      %c2_165 = arith.constant 2 : index
      %c0_166 = arith.constant 0 : index
      %c0_167 = arith.constant 0 : index
      %183 = vector.load %arg2[%c2_164, %c2_165, %c0_166, %c0_167] : memref<3x3x128x128xbf16, #tpu.memory_space<vmem>>, vector<1x1x128x128xbf16>
      %184 = vector.shape_cast %183 : vector<1x1x128x128xbf16> to vector<128x128xbf16>
      %cst_168 = arith.constant dense<0.000000e+00> : vector<8x128xf32>
      %185 = tpu.matmul %182, %184, %cst_168 {dimension_numbers = #tpu.dot_dimension_numbers<[1], [0], [0], [1], [0, 0, 1, 1], [], []>} : vector<8x128xbf16>, vector<128x128xbf16>, vector<8x128xf32> -> vector<8x128xf32>
      %186 = arith.addf %177, %185 : vector<8x128xf32>
      %187 = vector.broadcast %0 : vector<1x128xf32> to vector<8x128xf32>
      %188 = arith.addf %186, %187 : vector<8x128xf32>
      %cst_169 = arith.constant 0.000000e+00 : f32
      %189 = vector.broadcast %cst_169 : f32 to vector<8x128xf32>
      %190 = arith.maximumf %188, %189 : vector<8x128xf32>
      %191 = arith.maximumf %102, %190 : vector<8x128xf32>
      %cst_170 = arith.constant dense<0.000000e+00> : vector<4x128xf32>
      %192 = tpu.matmul %7, %191, %cst_170 {dimension_numbers = #tpu.dot_dimension_numbers<[1], [0], [0], [1], [0, 0, 1, 1], [], []>} : vector<4x8xf32>, vector<8x128xf32>, vector<4x128xf32> -> vector<4x128xf32>
      %cst_171 = arith.constant dense<0.000000e+00> : vector<4x128xf32>
      %193 = tpu.matmul %14, %191, %cst_171 {dimension_numbers = #tpu.dot_dimension_numbers<[1], [0], [0], [1], [0, 0, 1, 1], [], []>} : vector<4x8xf32>, vector<8x128xf32>, vector<4x128xf32> -> vector<4x128xf32>
      %194 = arith.maximumf %192, %193 : vector<4x128xf32>
      %c0_172 = arith.constant 0 : index
      %195 = arith.index_cast %arg5 : i32 to index
      %c0_173 = arith.constant 0 : index
      %c0_174 = arith.constant 0 : index
      %196 = vector.load %arg4[%c0_172, %195, %c0_173, %c0_174] : memref<1x4x4x128xf32, #tpu.memory_space<vmem>>, vector<1x1x4x128xf32>
      %197 = vector.shape_cast %196 : vector<1x1x4x128xf32> to vector<4x128xf32>
      %198 = vector.shape_cast %194 : vector<4x128xf32> to vector<1x1x4x128xf32>
      tpu.vector_store %arg4[%c0_172, %195, %c0_173, %c0_174], %198 {strides = array<i32>} : memref<1x4x4x128xf32, #tpu.memory_space<vmem>>, vector<1x1x4x128xf32>,
    }
    %c4_i32_3 = arith.constant 4 : i32
    return
  }
  func.func @transform_0(%arg0: i32) -> (i32, i32, i32, i32) {
    %c0_i32 = arith.constant 0 : i32
    %c0_i32_0 = arith.constant 0 : i32
    %c0_i32_1 = arith.constant 0 : i32
    %c0_i32_2 = arith.constant 0 : i32
    return %arg0, %c0_i32, %c0_i32_0, %c0_i32_1 : i32, i32, i32, i32
  }
  func.func @transform_1(%arg0: i32) -> (i32, i32, i32, i32) {
    %c0_i32 = arith.constant 0 : i32
    %c0_i32_0 = arith.constant 0 : i32
    %c0_i32_1 = arith.constant 0 : i32
    %c0_i32_2 = arith.constant 0 : i32
    %c0_i32_3 = arith.constant 0 : i32
    return %c0_i32, %c0_i32_0, %c0_i32_1, %c0_i32_2 : i32, i32, i32, i32
  }
  func.func @transform_2(%arg0: i32) -> (i32, i32) {
    %c0_i32 = arith.constant 0 : i32
    %c0_i32_0 = arith.constant 0 : i32
    %c0_i32_1 = arith.constant 0 : i32
    return %c0_i32, %c0_i32_0 : i32, i32
  }
  func.func @transform_3(%arg0: i32) -> (i32, i32, i32, i32) {
    %c0_i32 = arith.constant 0 : i32
    %c0_i32_0 = arith.constant 0 : i32
    %c0_i32_1 = arith.constant 0 : i32
    %c0_i32_2 = arith.constant 0 : i32
    return %arg0, %c0_i32, %c0_i32_0, %c0_i32_1 : i32, i32, i32, i32
  }
}

module attributes {stable_mosaic.version = 11 : i64} {
  func.func @kernel(%arg0: i32, %arg1: memref<1x6x6x128xf32, #tpu.memory_space<vmem>>, %arg2: memref<3x3x128x128xbf16, #tpu.memory_space<vmem>>, %arg3: memref<1x128xf32, #tpu.memory_space<vmem>>, %arg4: memref<1x2x2x128xf32, #tpu.memory_space<vmem>>) attributes {dimension_semantics = [#tpu.dimension_semantics<parallel>], iteration_bounds = array<i64: 2>, scalar_prefetch = 0 : i64, scratch_operands = 0 : i64, tpu.core_type = #tpu.core_type<tc>, window_params = [{transform_indices = @transform_0, window_bounds = array<i64: 1, 6, 6, 128>}, {pipeline_mode = #tpu.pipeline_mode<synchronous>, transform_indices = @transform_1, window_bounds = array<i64: 3, 3, 128, 128>}, {pipeline_mode = #tpu.pipeline_mode<synchronous>, transform_indices = @transform_2, window_bounds = array<i64: 1, 128>}, {transform_indices = @transform_3, window_bounds = array<i64: 1, 2, 2, 128>}]} {
    %c0 = arith.constant 0 : index
    %c0_0 = arith.constant 0 : index
    %0 = vector.load %arg3[%c0, %c0_0] : memref<1x128xf32, #tpu.memory_space<vmem>>, vector<1x128xf32>
    %1 = tpu.iota {dimensions = array<i32: 0>} : vector<2x4xi32>
    %2 = tpu.iota {dimensions = array<i32: 1>} : vector<2x4xi32>
    %c2_i32 = arith.constant 2 : i32
    %3 = vector.broadcast %c2_i32 : i32 to vector<2x4xi32>
    %4 = arith.muli %3, %1 : vector<2x4xi32>
    %5 = arith.cmpi eq, %2, %4 : vector<2x4xi32>
    %6 = arith.extui %5 : vector<2x4xi1> to vector<2x4xi32>
    %7 = arith.sitofp %6 : vector<2x4xi32> to vector<2x4xf32>
    %c2_i32_1 = arith.constant 2 : i32
    %8 = vector.broadcast %c2_i32_1 : i32 to vector<2x4xi32>
    %9 = arith.muli %8, %1 : vector<2x4xi32>
    %c1_i32 = arith.constant 1 : i32
    %10 = vector.broadcast %c1_i32 : i32 to vector<2x4xi32>
    %11 = arith.addi %9, %10 : vector<2x4xi32>
    %12 = arith.cmpi eq, %2, %11 : vector<2x4xi32>
    %13 = arith.extui %12 : vector<2x4xi1> to vector<2x4xi32>
    %14 = arith.sitofp %13 : vector<2x4xi32> to vector<2x4xf32>
    %c0_i32 = arith.constant 0 : i32
    %c2_i32_2 = arith.constant 2 : i32
    %15 = arith.addi %c0_i32, %c2_i32_2 : i32
    %c1_i32_3 = arith.constant 1 : i32
    scf.for %arg5 = %c0_i32 to %15 step %c1_i32_3  : i32 {
      %c2_i32_5 = arith.constant 2 : i32
      %16 = arith.muli %c2_i32_5, %arg5 : i32
      %cst = arith.constant 0.000000e+00 : f32
      %17 = vector.broadcast %cst : f32 to vector<4x128xf32>
      %c0_i32_6 = arith.constant 0 : i32
      %18 = arith.addi %16, %c0_i32_6 : i32
      %c0_7 = arith.constant 0 : index
      %19 = arith.index_cast %18 : i32 to index
      %c0_8 = arith.constant 0 : index
      %c0_9 = arith.constant 0 : index
      %20 = vector.load %arg1[%c0_7, %19, %c0_8, %c0_9] : memref<1x6x6x128xf32, #tpu.memory_space<vmem>>, vector<1x1x4x128xf32>
      %21 = vector.shape_cast %20 : vector<1x1x4x128xf32> to vector<4x128xf32>
      %22 = arith.truncf %21 : vector<4x128xf32> to vector<4x128xbf16>
      %c0_10 = arith.constant 0 : index
      %c0_11 = arith.constant 0 : index
      %c0_12 = arith.constant 0 : index
      %c0_13 = arith.constant 0 : index
      %23 = vector.load %arg2[%c0_10, %c0_11, %c0_12, %c0_13] : memref<3x3x128x128xbf16, #tpu.memory_space<vmem>>, vector<1x1x128x128xbf16>
      %24 = vector.shape_cast %23 : vector<1x1x128x128xbf16> to vector<128x128xbf16>
      %cst_14 = arith.constant dense<0.000000e+00> : vector<4x128xf32>
      %25 = tpu.matmul %22, %24, %cst_14 {dimension_numbers = #tpu.dot_dimension_numbers<[1], [0], [0], [1], [0, 0, 1, 1], [], []>} : vector<4x128xbf16>, vector<128x128xbf16>, vector<4x128xf32> -> vector<4x128xf32>
      %26 = arith.addf %17, %25 : vector<4x128xf32>
      %c0_i32_15 = arith.constant 0 : i32
      %27 = arith.addi %16, %c0_i32_15 : i32
      %c0_16 = arith.constant 0 : index
      %28 = arith.index_cast %27 : i32 to index
      %c1 = arith.constant 1 : index
      %c0_17 = arith.constant 0 : index
      %29 = vector.load %arg1[%c0_16, %28, %c1, %c0_17] : memref<1x6x6x128xf32, #tpu.memory_space<vmem>>, vector<1x1x4x128xf32>
      %30 = vector.shape_cast %29 : vector<1x1x4x128xf32> to vector<4x128xf32>
      %31 = arith.truncf %30 : vector<4x128xf32> to vector<4x128xbf16>
      %c0_18 = arith.constant 0 : index
      %c1_19 = arith.constant 1 : index
      %c0_20 = arith.constant 0 : index
      %c0_21 = arith.constant 0 : index
      %32 = vector.load %arg2[%c0_18, %c1_19, %c0_20, %c0_21] : memref<3x3x128x128xbf16, #tpu.memory_space<vmem>>, vector<1x1x128x128xbf16>
      %33 = vector.shape_cast %32 : vector<1x1x128x128xbf16> to vector<128x128xbf16>
      %cst_22 = arith.constant dense<0.000000e+00> : vector<4x128xf32>
      %34 = tpu.matmul %31, %33, %cst_22 {dimension_numbers = #tpu.dot_dimension_numbers<[1], [0], [0], [1], [0, 0, 1, 1], [], []>} : vector<4x128xbf16>, vector<128x128xbf16>, vector<4x128xf32> -> vector<4x128xf32>
      %35 = arith.addf %26, %34 : vector<4x128xf32>
      %c0_i32_23 = arith.constant 0 : i32
      %36 = arith.addi %16, %c0_i32_23 : i32
      %c0_24 = arith.constant 0 : index
      %37 = arith.index_cast %36 : i32 to index
      %c2 = arith.constant 2 : index
      %c0_25 = arith.constant 0 : index
      %38 = vector.load %arg1[%c0_24, %37, %c2, %c0_25] : memref<1x6x6x128xf32, #tpu.memory_space<vmem>>, vector<1x1x4x128xf32>
      %39 = vector.shape_cast %38 : vector<1x1x4x128xf32> to vector<4x128xf32>
      %40 = arith.truncf %39 : vector<4x128xf32> to vector<4x128xbf16>
      %c0_26 = arith.constant 0 : index
      %c2_27 = arith.constant 2 : index
      %c0_28 = arith.constant 0 : index
      %c0_29 = arith.constant 0 : index
      %41 = vector.load %arg2[%c0_26, %c2_27, %c0_28, %c0_29] : memref<3x3x128x128xbf16, #tpu.memory_space<vmem>>, vector<1x1x128x128xbf16>
      %42 = vector.shape_cast %41 : vector<1x1x128x128xbf16> to vector<128x128xbf16>
      %cst_30 = arith.constant dense<0.000000e+00> : vector<4x128xf32>
      %43 = tpu.matmul %40, %42, %cst_30 {dimension_numbers = #tpu.dot_dimension_numbers<[1], [0], [0], [1], [0, 0, 1, 1], [], []>} : vector<4x128xbf16>, vector<128x128xbf16>, vector<4x128xf32> -> vector<4x128xf32>
      %44 = arith.addf %35, %43 : vector<4x128xf32>
      %c1_i32_31 = arith.constant 1 : i32
      %45 = arith.addi %16, %c1_i32_31 : i32
      %c0_32 = arith.constant 0 : index
      %46 = arith.index_cast %45 : i32 to index
      %c0_33 = arith.constant 0 : index
      %c0_34 = arith.constant 0 : index
      %47 = vector.load %arg1[%c0_32, %46, %c0_33, %c0_34] : memref<1x6x6x128xf32, #tpu.memory_space<vmem>>, vector<1x1x4x128xf32>
      %48 = vector.shape_cast %47 : vector<1x1x4x128xf32> to vector<4x128xf32>
      %49 = arith.truncf %48 : vector<4x128xf32> to vector<4x128xbf16>
      %c1_35 = arith.constant 1 : index
      %c0_36 = arith.constant 0 : index
      %c0_37 = arith.constant 0 : index
      %c0_38 = arith.constant 0 : index
      %50 = vector.load %arg2[%c1_35, %c0_36, %c0_37, %c0_38] : memref<3x3x128x128xbf16, #tpu.memory_space<vmem>>, vector<1x1x128x128xbf16>
      %51 = vector.shape_cast %50 : vector<1x1x128x128xbf16> to vector<128x128xbf16>
      %cst_39 = arith.constant dense<0.000000e+00> : vector<4x128xf32>
      %52 = tpu.matmul %49, %51, %cst_39 {dimension_numbers = #tpu.dot_dimension_numbers<[1], [0], [0], [1], [0, 0, 1, 1], [], []>} : vector<4x128xbf16>, vector<128x128xbf16>, vector<4x128xf32> -> vector<4x128xf32>
      %53 = arith.addf %44, %52 : vector<4x128xf32>
      %c1_i32_40 = arith.constant 1 : i32
      %54 = arith.addi %16, %c1_i32_40 : i32
      %c0_41 = arith.constant 0 : index
      %55 = arith.index_cast %54 : i32 to index
      %c1_42 = arith.constant 1 : index
      %c0_43 = arith.constant 0 : index
      %56 = vector.load %arg1[%c0_41, %55, %c1_42, %c0_43] : memref<1x6x6x128xf32, #tpu.memory_space<vmem>>, vector<1x1x4x128xf32>
      %57 = vector.shape_cast %56 : vector<1x1x4x128xf32> to vector<4x128xf32>
      %58 = arith.truncf %57 : vector<4x128xf32> to vector<4x128xbf16>
      %c1_44 = arith.constant 1 : index
      %c1_45 = arith.constant 1 : index
      %c0_46 = arith.constant 0 : index
      %c0_47 = arith.constant 0 : index
      %59 = vector.load %arg2[%c1_44, %c1_45, %c0_46, %c0_47] : memref<3x3x128x128xbf16, #tpu.memory_space<vmem>>, vector<1x1x128x128xbf16>
      %60 = vector.shape_cast %59 : vector<1x1x128x128xbf16> to vector<128x128xbf16>
      %cst_48 = arith.constant dense<0.000000e+00> : vector<4x128xf32>
      %61 = tpu.matmul %58, %60, %cst_48 {dimension_numbers = #tpu.dot_dimension_numbers<[1], [0], [0], [1], [0, 0, 1, 1], [], []>} : vector<4x128xbf16>, vector<128x128xbf16>, vector<4x128xf32> -> vector<4x128xf32>
      %62 = arith.addf %53, %61 : vector<4x128xf32>
      %c1_i32_49 = arith.constant 1 : i32
      %63 = arith.addi %16, %c1_i32_49 : i32
      %c0_50 = arith.constant 0 : index
      %64 = arith.index_cast %63 : i32 to index
      %c2_51 = arith.constant 2 : index
      %c0_52 = arith.constant 0 : index
      %65 = vector.load %arg1[%c0_50, %64, %c2_51, %c0_52] : memref<1x6x6x128xf32, #tpu.memory_space<vmem>>, vector<1x1x4x128xf32>
      %66 = vector.shape_cast %65 : vector<1x1x4x128xf32> to vector<4x128xf32>
      %67 = arith.truncf %66 : vector<4x128xf32> to vector<4x128xbf16>
      %c1_53 = arith.constant 1 : index
      %c2_54 = arith.constant 2 : index
      %c0_55 = arith.constant 0 : index
      %c0_56 = arith.constant 0 : index
      %68 = vector.load %arg2[%c1_53, %c2_54, %c0_55, %c0_56] : memref<3x3x128x128xbf16, #tpu.memory_space<vmem>>, vector<1x1x128x128xbf16>
      %69 = vector.shape_cast %68 : vector<1x1x128x128xbf16> to vector<128x128xbf16>
      %cst_57 = arith.constant dense<0.000000e+00> : vector<4x128xf32>
      %70 = tpu.matmul %67, %69, %cst_57 {dimension_numbers = #tpu.dot_dimension_numbers<[1], [0], [0], [1], [0, 0, 1, 1], [], []>} : vector<4x128xbf16>, vector<128x128xbf16>, vector<4x128xf32> -> vector<4x128xf32>
      %71 = arith.addf %62, %70 : vector<4x128xf32>
      %c2_i32_58 = arith.constant 2 : i32
      %72 = arith.addi %16, %c2_i32_58 : i32
      %c0_59 = arith.constant 0 : index
      %73 = arith.index_cast %72 : i32 to index
      %c0_60 = arith.constant 0 : index
      %c0_61 = arith.constant 0 : index
      %74 = vector.load %arg1[%c0_59, %73, %c0_60, %c0_61] : memref<1x6x6x128xf32, #tpu.memory_space<vmem>>, vector<1x1x4x128xf32>
      %75 = vector.shape_cast %74 : vector<1x1x4x128xf32> to vector<4x128xf32>
      %76 = arith.truncf %75 : vector<4x128xf32> to vector<4x128xbf16>
      %c2_62 = arith.constant 2 : index
      %c0_63 = arith.constant 0 : index
      %c0_64 = arith.constant 0 : index
      %c0_65 = arith.constant 0 : index
      %77 = vector.load %arg2[%c2_62, %c0_63, %c0_64, %c0_65] : memref<3x3x128x128xbf16, #tpu.memory_space<vmem>>, vector<1x1x128x128xbf16>
      %78 = vector.shape_cast %77 : vector<1x1x128x128xbf16> to vector<128x128xbf16>
      %cst_66 = arith.constant dense<0.000000e+00> : vector<4x128xf32>
      %79 = tpu.matmul %76, %78, %cst_66 {dimension_numbers = #tpu.dot_dimension_numbers<[1], [0], [0], [1], [0, 0, 1, 1], [], []>} : vector<4x128xbf16>, vector<128x128xbf16>, vector<4x128xf32> -> vector<4x128xf32>
      %80 = arith.addf %71, %79 : vector<4x128xf32>
      %c2_i32_67 = arith.constant 2 : i32
      %81 = arith.addi %16, %c2_i32_67 : i32
      %c0_68 = arith.constant 0 : index
      %82 = arith.index_cast %81 : i32 to index
      %c1_69 = arith.constant 1 : index
      %c0_70 = arith.constant 0 : index
      %83 = vector.load %arg1[%c0_68, %82, %c1_69, %c0_70] : memref<1x6x6x128xf32, #tpu.memory_space<vmem>>, vector<1x1x4x128xf32>
      %84 = vector.shape_cast %83 : vector<1x1x4x128xf32> to vector<4x128xf32>
      %85 = arith.truncf %84 : vector<4x128xf32> to vector<4x128xbf16>
      %c2_71 = arith.constant 2 : index
      %c1_72 = arith.constant 1 : index
      %c0_73 = arith.constant 0 : index
      %c0_74 = arith.constant 0 : index
      %86 = vector.load %arg2[%c2_71, %c1_72, %c0_73, %c0_74] : memref<3x3x128x128xbf16, #tpu.memory_space<vmem>>, vector<1x1x128x128xbf16>
      %87 = vector.shape_cast %86 : vector<1x1x128x128xbf16> to vector<128x128xbf16>
      %cst_75 = arith.constant dense<0.000000e+00> : vector<4x128xf32>
      %88 = tpu.matmul %85, %87, %cst_75 {dimension_numbers = #tpu.dot_dimension_numbers<[1], [0], [0], [1], [0, 0, 1, 1], [], []>} : vector<4x128xbf16>, vector<128x128xbf16>, vector<4x128xf32> -> vector<4x128xf32>
      %89 = arith.addf %80, %88 : vector<4x128xf32>
      %c2_i32_76 = arith.constant 2 : i32
      %90 = arith.addi %16, %c2_i32_76 : i32
      %c0_77 = arith.constant 0 : index
      %91 = arith.index_cast %90 : i32 to index
      %c2_78 = arith.constant 2 : index
      %c0_79 = arith.constant 0 : index
      %92 = vector.load %arg1[%c0_77, %91, %c2_78, %c0_79] : memref<1x6x6x128xf32, #tpu.memory_space<vmem>>, vector<1x1x4x128xf32>
      %93 = vector.shape_cast %92 : vector<1x1x4x128xf32> to vector<4x128xf32>
      %94 = arith.truncf %93 : vector<4x128xf32> to vector<4x128xbf16>
      %c2_80 = arith.constant 2 : index
      %c2_81 = arith.constant 2 : index
      %c0_82 = arith.constant 0 : index
      %c0_83 = arith.constant 0 : index
      %95 = vector.load %arg2[%c2_80, %c2_81, %c0_82, %c0_83] : memref<3x3x128x128xbf16, #tpu.memory_space<vmem>>, vector<1x1x128x128xbf16>
      %96 = vector.shape_cast %95 : vector<1x1x128x128xbf16> to vector<128x128xbf16>
      %cst_84 = arith.constant dense<0.000000e+00> : vector<4x128xf32>
      %97 = tpu.matmul %94, %96, %cst_84 {dimension_numbers = #tpu.dot_dimension_numbers<[1], [0], [0], [1], [0, 0, 1, 1], [], []>} : vector<4x128xbf16>, vector<128x128xbf16>, vector<4x128xf32> -> vector<4x128xf32>
      %98 = arith.addf %89, %97 : vector<4x128xf32>
      %99 = vector.broadcast %0 : vector<1x128xf32> to vector<4x128xf32>
      %100 = arith.addf %98, %99 : vector<4x128xf32>
      %cst_85 = arith.constant 0.000000e+00 : f32
      %101 = vector.broadcast %cst_85 : f32 to vector<4x128xf32>
      %102 = arith.maximumf %100, %101 : vector<4x128xf32>
      %c2_i32_86 = arith.constant 2 : i32
      %103 = arith.muli %c2_i32_86, %arg5 : i32
      %c1_i32_87 = arith.constant 1 : i32
      %104 = arith.addi %103, %c1_i32_87 : i32
      %cst_88 = arith.constant 0.000000e+00 : f32
      %105 = vector.broadcast %cst_88 : f32 to vector<4x128xf32>
      %c0_i32_89 = arith.constant 0 : i32
      %106 = arith.addi %104, %c0_i32_89 : i32
      %c0_90 = arith.constant 0 : index
      %107 = arith.index_cast %106 : i32 to index
      %c0_91 = arith.constant 0 : index
      %c0_92 = arith.constant 0 : index
      %108 = vector.load %arg1[%c0_90, %107, %c0_91, %c0_92] : memref<1x6x6x128xf32, #tpu.memory_space<vmem>>, vector<1x1x4x128xf32>
      %109 = vector.shape_cast %108 : vector<1x1x4x128xf32> to vector<4x128xf32>
      %110 = arith.truncf %109 : vector<4x128xf32> to vector<4x128xbf16>
      %c0_93 = arith.constant 0 : index
      %c0_94 = arith.constant 0 : index
      %c0_95 = arith.constant 0 : index
      %c0_96 = arith.constant 0 : index
      %111 = vector.load %arg2[%c0_93, %c0_94, %c0_95, %c0_96] : memref<3x3x128x128xbf16, #tpu.memory_space<vmem>>, vector<1x1x128x128xbf16>
      %112 = vector.shape_cast %111 : vector<1x1x128x128xbf16> to vector<128x128xbf16>
      %cst_97 = arith.constant dense<0.000000e+00> : vector<4x128xf32>
      %113 = tpu.matmul %110, %112, %cst_97 {dimension_numbers = #tpu.dot_dimension_numbers<[1], [0], [0], [1], [0, 0, 1, 1], [], []>} : vector<4x128xbf16>, vector<128x128xbf16>, vector<4x128xf32> -> vector<4x128xf32>
      %114 = arith.addf %105, %113 : vector<4x128xf32>
      %c0_i32_98 = arith.constant 0 : i32
      %115 = arith.addi %104, %c0_i32_98 : i32
      %c0_99 = arith.constant 0 : index
      %116 = arith.index_cast %115 : i32 to index
      %c1_100 = arith.constant 1 : index
      %c0_101 = arith.constant 0 : index
      %117 = vector.load %arg1[%c0_99, %116, %c1_100, %c0_101] : memref<1x6x6x128xf32, #tpu.memory_space<vmem>>, vector<1x1x4x128xf32>
      %118 = vector.shape_cast %117 : vector<1x1x4x128xf32> to vector<4x128xf32>
      %119 = arith.truncf %118 : vector<4x128xf32> to vector<4x128xbf16>
      %c0_102 = arith.constant 0 : index
      %c1_103 = arith.constant 1 : index
      %c0_104 = arith.constant 0 : index
      %c0_105 = arith.constant 0 : index
      %120 = vector.load %arg2[%c0_102, %c1_103, %c0_104, %c0_105] : memref<3x3x128x128xbf16, #tpu.memory_space<vmem>>, vector<1x1x128x128xbf16>
      %121 = vector.shape_cast %120 : vector<1x1x128x128xbf16> to vector<128x128xbf16>
      %cst_106 = arith.constant dense<0.000000e+00> : vector<4x128xf32>
      %122 = tpu.matmul %119, %121, %cst_106 {dimension_numbers = #tpu.dot_dimension_numbers<[1], [0], [0], [1], [0, 0, 1, 1], [], []>} : vector<4x128xbf16>, vector<128x128xbf16>, vector<4x128xf32> -> vector<4x128xf32>
      %123 = arith.addf %114, %122 : vector<4x128xf32>
      %c0_i32_107 = arith.constant 0 : i32
      %124 = arith.addi %104, %c0_i32_107 : i32
      %c0_108 = arith.constant 0 : index
      %125 = arith.index_cast %124 : i32 to index
      %c2_109 = arith.constant 2 : index
      %c0_110 = arith.constant 0 : index
      %126 = vector.load %arg1[%c0_108, %125, %c2_109, %c0_110] : memref<1x6x6x128xf32, #tpu.memory_space<vmem>>, vector<1x1x4x128xf32>
      %127 = vector.shape_cast %126 : vector<1x1x4x128xf32> to vector<4x128xf32>
      %128 = arith.truncf %127 : vector<4x128xf32> to vector<4x128xbf16>
      %c0_111 = arith.constant 0 : index
      %c2_112 = arith.constant 2 : index
      %c0_113 = arith.constant 0 : index
      %c0_114 = arith.constant 0 : index
      %129 = vector.load %arg2[%c0_111, %c2_112, %c0_113, %c0_114] : memref<3x3x128x128xbf16, #tpu.memory_space<vmem>>, vector<1x1x128x128xbf16>
      %130 = vector.shape_cast %129 : vector<1x1x128x128xbf16> to vector<128x128xbf16>
      %cst_115 = arith.constant dense<0.000000e+00> : vector<4x128xf32>
      %131 = tpu.matmul %128, %130, %cst_115 {dimension_numbers = #tpu.dot_dimension_numbers<[1], [0], [0], [1], [0, 0, 1, 1], [], []>} : vector<4x128xbf16>, vector<128x128xbf16>, vector<4x128xf32> -> vector<4x128xf32>
      %132 = arith.addf %123, %131 : vector<4x128xf32>
      %c1_i32_116 = arith.constant 1 : i32
      %133 = arith.addi %104, %c1_i32_116 : i32
      %c0_117 = arith.constant 0 : index
      %134 = arith.index_cast %133 : i32 to index
      %c0_118 = arith.constant 0 : index
      %c0_119 = arith.constant 0 : index
      %135 = vector.load %arg1[%c0_117, %134, %c0_118, %c0_119] : memref<1x6x6x128xf32, #tpu.memory_space<vmem>>, vector<1x1x4x128xf32>
      %136 = vector.shape_cast %135 : vector<1x1x4x128xf32> to vector<4x128xf32>
      %137 = arith.truncf %136 : vector<4x128xf32> to vector<4x128xbf16>
      %c1_120 = arith.constant 1 : index
      %c0_121 = arith.constant 0 : index
      %c0_122 = arith.constant 0 : index
      %c0_123 = arith.constant 0 : index
      %138 = vector.load %arg2[%c1_120, %c0_121, %c0_122, %c0_123] : memref<3x3x128x128xbf16, #tpu.memory_space<vmem>>, vector<1x1x128x128xbf16>
      %139 = vector.shape_cast %138 : vector<1x1x128x128xbf16> to vector<128x128xbf16>
      %cst_124 = arith.constant dense<0.000000e+00> : vector<4x128xf32>
      %140 = tpu.matmul %137, %139, %cst_124 {dimension_numbers = #tpu.dot_dimension_numbers<[1], [0], [0], [1], [0, 0, 1, 1], [], []>} : vector<4x128xbf16>, vector<128x128xbf16>, vector<4x128xf32> -> vector<4x128xf32>
      %141 = arith.addf %132, %140 : vector<4x128xf32>
      %c1_i32_125 = arith.constant 1 : i32
      %142 = arith.addi %104, %c1_i32_125 : i32
      %c0_126 = arith.constant 0 : index
      %143 = arith.index_cast %142 : i32 to index
      %c1_127 = arith.constant 1 : index
      %c0_128 = arith.constant 0 : index
      %144 = vector.load %arg1[%c0_126, %143, %c1_127, %c0_128] : memref<1x6x6x128xf32, #tpu.memory_space<vmem>>, vector<1x1x4x128xf32>
      %145 = vector.shape_cast %144 : vector<1x1x4x128xf32> to vector<4x128xf32>
      %146 = arith.truncf %145 : vector<4x128xf32> to vector<4x128xbf16>
      %c1_129 = arith.constant 1 : index
      %c1_130 = arith.constant 1 : index
      %c0_131 = arith.constant 0 : index
      %c0_132 = arith.constant 0 : index
      %147 = vector.load %arg2[%c1_129, %c1_130, %c0_131, %c0_132] : memref<3x3x128x128xbf16, #tpu.memory_space<vmem>>, vector<1x1x128x128xbf16>
      %148 = vector.shape_cast %147 : vector<1x1x128x128xbf16> to vector<128x128xbf16>
      %cst_133 = arith.constant dense<0.000000e+00> : vector<4x128xf32>
      %149 = tpu.matmul %146, %148, %cst_133 {dimension_numbers = #tpu.dot_dimension_numbers<[1], [0], [0], [1], [0, 0, 1, 1], [], []>} : vector<4x128xbf16>, vector<128x128xbf16>, vector<4x128xf32> -> vector<4x128xf32>
      %150 = arith.addf %141, %149 : vector<4x128xf32>
      %c1_i32_134 = arith.constant 1 : i32
      %151 = arith.addi %104, %c1_i32_134 : i32
      %c0_135 = arith.constant 0 : index
      %152 = arith.index_cast %151 : i32 to index
      %c2_136 = arith.constant 2 : index
      %c0_137 = arith.constant 0 : index
      %153 = vector.load %arg1[%c0_135, %152, %c2_136, %c0_137] : memref<1x6x6x128xf32, #tpu.memory_space<vmem>>, vector<1x1x4x128xf32>
      %154 = vector.shape_cast %153 : vector<1x1x4x128xf32> to vector<4x128xf32>
      %155 = arith.truncf %154 : vector<4x128xf32> to vector<4x128xbf16>
      %c1_138 = arith.constant 1 : index
      %c2_139 = arith.constant 2 : index
      %c0_140 = arith.constant 0 : index
      %c0_141 = arith.constant 0 : index
      %156 = vector.load %arg2[%c1_138, %c2_139, %c0_140, %c0_141] : memref<3x3x128x128xbf16, #tpu.memory_space<vmem>>, vector<1x1x128x128xbf16>
      %157 = vector.shape_cast %156 : vector<1x1x128x128xbf16> to vector<128x128xbf16>
      %cst_142 = arith.constant dense<0.000000e+00> : vector<4x128xf32>
      %158 = tpu.matmul %155, %157, %cst_142 {dimension_numbers = #tpu.dot_dimension_numbers<[1], [0], [0], [1], [0, 0, 1, 1], [], []>} : vector<4x128xbf16>, vector<128x128xbf16>, vector<4x128xf32> -> vector<4x128xf32>
      %159 = arith.addf %150, %158 : vector<4x128xf32>
      %c2_i32_143 = arith.constant 2 : i32
      %160 = arith.addi %104, %c2_i32_143 : i32
      %c0_144 = arith.constant 0 : index
      %161 = arith.index_cast %160 : i32 to index
      %c0_145 = arith.constant 0 : index
      %c0_146 = arith.constant 0 : index
      %162 = vector.load %arg1[%c0_144, %161, %c0_145, %c0_146] : memref<1x6x6x128xf32, #tpu.memory_space<vmem>>, vector<1x1x4x128xf32>
      %163 = vector.shape_cast %162 : vector<1x1x4x128xf32> to vector<4x128xf32>
      %164 = arith.truncf %163 : vector<4x128xf32> to vector<4x128xbf16>
      %c2_147 = arith.constant 2 : index
      %c0_148 = arith.constant 0 : index
      %c0_149 = arith.constant 0 : index
      %c0_150 = arith.constant 0 : index
      %165 = vector.load %arg2[%c2_147, %c0_148, %c0_149, %c0_150] : memref<3x3x128x128xbf16, #tpu.memory_space<vmem>>, vector<1x1x128x128xbf16>
      %166 = vector.shape_cast %165 : vector<1x1x128x128xbf16> to vector<128x128xbf16>
      %cst_151 = arith.constant dense<0.000000e+00> : vector<4x128xf32>
      %167 = tpu.matmul %164, %166, %cst_151 {dimension_numbers = #tpu.dot_dimension_numbers<[1], [0], [0], [1], [0, 0, 1, 1], [], []>} : vector<4x128xbf16>, vector<128x128xbf16>, vector<4x128xf32> -> vector<4x128xf32>
      %168 = arith.addf %159, %167 : vector<4x128xf32>
      %c2_i32_152 = arith.constant 2 : i32
      %169 = arith.addi %104, %c2_i32_152 : i32
      %c0_153 = arith.constant 0 : index
      %170 = arith.index_cast %169 : i32 to index
      %c1_154 = arith.constant 1 : index
      %c0_155 = arith.constant 0 : index
      %171 = vector.load %arg1[%c0_153, %170, %c1_154, %c0_155] : memref<1x6x6x128xf32, #tpu.memory_space<vmem>>, vector<1x1x4x128xf32>
      %172 = vector.shape_cast %171 : vector<1x1x4x128xf32> to vector<4x128xf32>
      %173 = arith.truncf %172 : vector<4x128xf32> to vector<4x128xbf16>
      %c2_156 = arith.constant 2 : index
      %c1_157 = arith.constant 1 : index
      %c0_158 = arith.constant 0 : index
      %c0_159 = arith.constant 0 : index
      %174 = vector.load %arg2[%c2_156, %c1_157, %c0_158, %c0_159] : memref<3x3x128x128xbf16, #tpu.memory_space<vmem>>, vector<1x1x128x128xbf16>
      %175 = vector.shape_cast %174 : vector<1x1x128x128xbf16> to vector<128x128xbf16>
      %cst_160 = arith.constant dense<0.000000e+00> : vector<4x128xf32>
      %176 = tpu.matmul %173, %175, %cst_160 {dimension_numbers = #tpu.dot_dimension_numbers<[1], [0], [0], [1], [0, 0, 1, 1], [], []>} : vector<4x128xbf16>, vector<128x128xbf16>, vector<4x128xf32> -> vector<4x128xf32>
      %177 = arith.addf %168, %176 : vector<4x128xf32>
      %c2_i32_161 = arith.constant 2 : i32
      %178 = arith.addi %104, %c2_i32_161 : i32
      %c0_162 = arith.constant 0 : index
      %179 = arith.index_cast %178 : i32 to index
      %c2_163 = arith.constant 2 : index
      %c0_164 = arith.constant 0 : index
      %180 = vector.load %arg1[%c0_162, %179, %c2_163, %c0_164] : memref<1x6x6x128xf32, #tpu.memory_space<vmem>>, vector<1x1x4x128xf32>
      %181 = vector.shape_cast %180 : vector<1x1x4x128xf32> to vector<4x128xf32>
      %182 = arith.truncf %181 : vector<4x128xf32> to vector<4x128xbf16>
      %c2_165 = arith.constant 2 : index
      %c2_166 = arith.constant 2 : index
      %c0_167 = arith.constant 0 : index
      %c0_168 = arith.constant 0 : index
      %183 = vector.load %arg2[%c2_165, %c2_166, %c0_167, %c0_168] : memref<3x3x128x128xbf16, #tpu.memory_space<vmem>>, vector<1x1x128x128xbf16>
      %184 = vector.shape_cast %183 : vector<1x1x128x128xbf16> to vector<128x128xbf16>
      %cst_169 = arith.constant dense<0.000000e+00> : vector<4x128xf32>
      %185 = tpu.matmul %182, %184, %cst_169 {dimension_numbers = #tpu.dot_dimension_numbers<[1], [0], [0], [1], [0, 0, 1, 1], [], []>} : vector<4x128xbf16>, vector<128x128xbf16>, vector<4x128xf32> -> vector<4x128xf32>
      %186 = arith.addf %177, %185 : vector<4x128xf32>
      %187 = vector.broadcast %0 : vector<1x128xf32> to vector<4x128xf32>
      %188 = arith.addf %186, %187 : vector<4x128xf32>
      %cst_170 = arith.constant 0.000000e+00 : f32
      %189 = vector.broadcast %cst_170 : f32 to vector<4x128xf32>
      %190 = arith.maximumf %188, %189 : vector<4x128xf32>
      %191 = arith.maximumf %102, %190 : vector<4x128xf32>
      %cst_171 = arith.constant dense<0.000000e+00> : vector<2x128xf32>
      %192 = tpu.matmul %7, %191, %cst_171 {dimension_numbers = #tpu.dot_dimension_numbers<[1], [0], [0], [1], [0, 0, 1, 1], [], []>} : vector<2x4xf32>, vector<4x128xf32>, vector<2x128xf32> -> vector<2x128xf32>
      %cst_172 = arith.constant dense<0.000000e+00> : vector<2x128xf32>
      %193 = tpu.matmul %14, %191, %cst_172 {dimension_numbers = #tpu.dot_dimension_numbers<[1], [0], [0], [1], [0, 0, 1, 1], [], []>} : vector<2x4xf32>, vector<4x128xf32>, vector<2x128xf32> -> vector<2x128xf32>
      %194 = arith.maximumf %192, %193 : vector<2x128xf32>
      %c0_173 = arith.constant 0 : index
      %195 = arith.index_cast %arg5 : i32 to index
      %c0_174 = arith.constant 0 : index
      %c0_175 = arith.constant 0 : index
      %196 = vector.load %arg4[%c0_173, %195, %c0_174, %c0_175] : memref<1x2x2x128xf32, #tpu.memory_space<vmem>>, vector<1x1x2x128xf32>
      %197 = vector.shape_cast %196 : vector<1x1x2x128xf32> to vector<2x128xf32>
      %198 = vector.shape_cast %194 : vector<2x128xf32> to vector<1x1x2x128xf32>
      tpu.vector_store %arg4[%c0_173, %195, %c0_174, %c0_175], %198 {strides = array<i32>} : memref<1x2x2x128xf32, #tpu.memory_space<vmem>>, vector<1x1x2x128xf32>,
    }
    %c2_i32_4 = arith.constant 2 : i32
    return
  }
  func.func @transform_0(%arg0: i32) -> (i32, i32, i32, i32) {
    %c0_i32 = arith.constant 0 : i32
    %c0_i32_0 = arith.constant 0 : i32
    %c0_i32_1 = arith.constant 0 : i32
    %c0_i32_2 = arith.constant 0 : i32
    return %arg0, %c0_i32, %c0_i32_0, %c0_i32_1 : i32, i32, i32, i32
  }
  func.func @transform_1(%arg0: i32) -> (i32, i32, i32, i32) {
    %c0_i32 = arith.constant 0 : i32
    %c0_i32_0 = arith.constant 0 : i32
    %c0_i32_1 = arith.constant 0 : i32
    %c0_i32_2 = arith.constant 0 : i32
    %c0_i32_3 = arith.constant 0 : i32
    return %c0_i32, %c0_i32_0, %c0_i32_1, %c0_i32_2 : i32, i32, i32, i32
  }
  func.func @transform_2(%arg0: i32) -> (i32, i32) {
    %c0_i32 = arith.constant 0 : i32
    %c0_i32_0 = arith.constant 0 : i32
    %c0_i32_1 = arith.constant 0 : i32
    return %c0_i32, %c0_i32_0 : i32, i32
  }
  func.func @transform_3(%arg0: i32) -> (i32, i32, i32, i32) {
    %c0_i32 = arith.constant 0 : i32
    %c0_i32_0 = arith.constant 0 : i32
    %c0_i32_1 = arith.constant 0 : i32
    %c0_i32_2 = arith.constant 0 : i32
    return %arg0, %c0_i32, %c0_i32_0, %c0_i32_1 : i32, i32, i32, i32
  }
}

module attributes {stable_mosaic.version = 11 : i64} {
  func.func @kernel(%arg0: i32, %arg1: memref<1x4x4x128xf32, #tpu.memory_space<vmem>>, %arg2: memref<3x3x128x128xbf16, #tpu.memory_space<vmem>>, %arg3: memref<1x128xf32, #tpu.memory_space<vmem>>, %arg4: memref<1x1x1x128xf32, #tpu.memory_space<vmem>>) attributes {dimension_semantics = [#tpu.dimension_semantics<parallel>], iteration_bounds = array<i64: 2>, scalar_prefetch = 0 : i64, scratch_operands = 0 : i64, tpu.core_type = #tpu.core_type<tc>, window_params = [{transform_indices = @transform_0, window_bounds = array<i64: 1, 4, 4, 128>}, {pipeline_mode = #tpu.pipeline_mode<synchronous>, transform_indices = @transform_1, window_bounds = array<i64: 3, 3, 128, 128>}, {pipeline_mode = #tpu.pipeline_mode<synchronous>, transform_indices = @transform_2, window_bounds = array<i64: 1, 128>}, {transform_indices = @transform_3, window_bounds = array<i64: 1, 1, 1, 128>}]} {
    %c0 = arith.constant 0 : index
    %c0_0 = arith.constant 0 : index
    %0 = vector.load %arg3[%c0, %c0_0] : memref<1x128xf32, #tpu.memory_space<vmem>>, vector<1x128xf32>
    %1 = tpu.iota {dimensions = array<i32: 0>} : vector<1x2xi32>
    %2 = tpu.iota {dimensions = array<i32: 1>} : vector<1x2xi32>
    %c2_i32 = arith.constant 2 : i32
    %3 = vector.broadcast %c2_i32 : i32 to vector<1x2xi32>
    %4 = arith.muli %3, %1 : vector<1x2xi32>
    %5 = arith.cmpi eq, %2, %4 : vector<1x2xi32>
    %6 = arith.extui %5 : vector<1x2xi1> to vector<1x2xi32>
    %7 = arith.sitofp %6 : vector<1x2xi32> to vector<1x2xf32>
    %c2_i32_1 = arith.constant 2 : i32
    %8 = vector.broadcast %c2_i32_1 : i32 to vector<1x2xi32>
    %9 = arith.muli %8, %1 : vector<1x2xi32>
    %c1_i32 = arith.constant 1 : i32
    %10 = vector.broadcast %c1_i32 : i32 to vector<1x2xi32>
    %11 = arith.addi %9, %10 : vector<1x2xi32>
    %12 = arith.cmpi eq, %2, %11 : vector<1x2xi32>
    %13 = arith.extui %12 : vector<1x2xi1> to vector<1x2xi32>
    %14 = arith.sitofp %13 : vector<1x2xi32> to vector<1x2xf32>
    %c0_i32 = arith.constant 0 : i32
    %c2_i32_2 = arith.constant 2 : i32
    %15 = arith.muli %c2_i32_2, %c0_i32 : i32
    %cst = arith.constant 0.000000e+00 : f32
    %16 = vector.broadcast %cst : f32 to vector<2x128xf32>
    %c0_i32_3 = arith.constant 0 : i32
    %17 = arith.addi %15, %c0_i32_3 : i32
    %c0_4 = arith.constant 0 : index
    %18 = arith.index_cast %17 : i32 to index
    %c0_5 = arith.constant 0 : index
    %c0_6 = arith.constant 0 : index
    %19 = vector.load %arg1[%c0_4, %18, %c0_5, %c0_6] : memref<1x4x4x128xf32, #tpu.memory_space<vmem>>, vector<1x1x2x128xf32>
    %20 = vector.shape_cast %19 : vector<1x1x2x128xf32> to vector<2x128xf32>
    %21 = arith.truncf %20 : vector<2x128xf32> to vector<2x128xbf16>
    %c0_7 = arith.constant 0 : index
    %c0_8 = arith.constant 0 : index
    %c0_9 = arith.constant 0 : index
    %c0_10 = arith.constant 0 : index
    %22 = vector.load %arg2[%c0_7, %c0_8, %c0_9, %c0_10] : memref<3x3x128x128xbf16, #tpu.memory_space<vmem>>, vector<1x1x128x128xbf16>
    %23 = vector.shape_cast %22 : vector<1x1x128x128xbf16> to vector<128x128xbf16>
    %cst_11 = arith.constant dense<0.000000e+00> : vector<2x128xf32>
    %24 = tpu.matmul %21, %23, %cst_11 {dimension_numbers = #tpu.dot_dimension_numbers<[1], [0], [0], [1], [0, 0, 1, 1], [], []>} : vector<2x128xbf16>, vector<128x128xbf16>, vector<2x128xf32> -> vector<2x128xf32>
    %25 = arith.addf %16, %24 : vector<2x128xf32>
    %c0_i32_12 = arith.constant 0 : i32
    %26 = arith.addi %15, %c0_i32_12 : i32
    %c0_13 = arith.constant 0 : index
    %27 = arith.index_cast %26 : i32 to index
    %c1 = arith.constant 1 : index
    %c0_14 = arith.constant 0 : index
    %28 = vector.load %arg1[%c0_13, %27, %c1, %c0_14] : memref<1x4x4x128xf32, #tpu.memory_space<vmem>>, vector<1x1x2x128xf32>
    %29 = vector.shape_cast %28 : vector<1x1x2x128xf32> to vector<2x128xf32>
    %30 = arith.truncf %29 : vector<2x128xf32> to vector<2x128xbf16>
    %c0_15 = arith.constant 0 : index
    %c1_16 = arith.constant 1 : index
    %c0_17 = arith.constant 0 : index
    %c0_18 = arith.constant 0 : index
    %31 = vector.load %arg2[%c0_15, %c1_16, %c0_17, %c0_18] : memref<3x3x128x128xbf16, #tpu.memory_space<vmem>>, vector<1x1x128x128xbf16>
    %32 = vector.shape_cast %31 : vector<1x1x128x128xbf16> to vector<128x128xbf16>
    %cst_19 = arith.constant dense<0.000000e+00> : vector<2x128xf32>
    %33 = tpu.matmul %30, %32, %cst_19 {dimension_numbers = #tpu.dot_dimension_numbers<[1], [0], [0], [1], [0, 0, 1, 1], [], []>} : vector<2x128xbf16>, vector<128x128xbf16>, vector<2x128xf32> -> vector<2x128xf32>
    %34 = arith.addf %25, %33 : vector<2x128xf32>
    %c0_i32_20 = arith.constant 0 : i32
    %35 = arith.addi %15, %c0_i32_20 : i32
    %c0_21 = arith.constant 0 : index
    %36 = arith.index_cast %35 : i32 to index
    %c2 = arith.constant 2 : index
    %c0_22 = arith.constant 0 : index
    %37 = vector.load %arg1[%c0_21, %36, %c2, %c0_22] : memref<1x4x4x128xf32, #tpu.memory_space<vmem>>, vector<1x1x2x128xf32>
    %38 = vector.shape_cast %37 : vector<1x1x2x128xf32> to vector<2x128xf32>
    %39 = arith.truncf %38 : vector<2x128xf32> to vector<2x128xbf16>
    %c0_23 = arith.constant 0 : index
    %c2_24 = arith.constant 2 : index
    %c0_25 = arith.constant 0 : index
    %c0_26 = arith.constant 0 : index
    %40 = vector.load %arg2[%c0_23, %c2_24, %c0_25, %c0_26] : memref<3x3x128x128xbf16, #tpu.memory_space<vmem>>, vector<1x1x128x128xbf16>
    %41 = vector.shape_cast %40 : vector<1x1x128x128xbf16> to vector<128x128xbf16>
    %cst_27 = arith.constant dense<0.000000e+00> : vector<2x128xf32>
    %42 = tpu.matmul %39, %41, %cst_27 {dimension_numbers = #tpu.dot_dimension_numbers<[1], [0], [0], [1], [0, 0, 1, 1], [], []>} : vector<2x128xbf16>, vector<128x128xbf16>, vector<2x128xf32> -> vector<2x128xf32>
    %43 = arith.addf %34, %42 : vector<2x128xf32>
    %c1_i32_28 = arith.constant 1 : i32
    %44 = arith.addi %15, %c1_i32_28 : i32
    %c0_29 = arith.constant 0 : index
    %45 = arith.index_cast %44 : i32 to index
    %c0_30 = arith.constant 0 : index
    %c0_31 = arith.constant 0 : index
    %46 = vector.load %arg1[%c0_29, %45, %c0_30, %c0_31] : memref<1x4x4x128xf32, #tpu.memory_space<vmem>>, vector<1x1x2x128xf32>
    %47 = vector.shape_cast %46 : vector<1x1x2x128xf32> to vector<2x128xf32>
    %48 = arith.truncf %47 : vector<2x128xf32> to vector<2x128xbf16>
    %c1_32 = arith.constant 1 : index
    %c0_33 = arith.constant 0 : index
    %c0_34 = arith.constant 0 : index
    %c0_35 = arith.constant 0 : index
    %49 = vector.load %arg2[%c1_32, %c0_33, %c0_34, %c0_35] : memref<3x3x128x128xbf16, #tpu.memory_space<vmem>>, vector<1x1x128x128xbf16>
    %50 = vector.shape_cast %49 : vector<1x1x128x128xbf16> to vector<128x128xbf16>
    %cst_36 = arith.constant dense<0.000000e+00> : vector<2x128xf32>
    %51 = tpu.matmul %48, %50, %cst_36 {dimension_numbers = #tpu.dot_dimension_numbers<[1], [0], [0], [1], [0, 0, 1, 1], [], []>} : vector<2x128xbf16>, vector<128x128xbf16>, vector<2x128xf32> -> vector<2x128xf32>
    %52 = arith.addf %43, %51 : vector<2x128xf32>
    %c1_i32_37 = arith.constant 1 : i32
    %53 = arith.addi %15, %c1_i32_37 : i32
    %c0_38 = arith.constant 0 : index
    %54 = arith.index_cast %53 : i32 to index
    %c1_39 = arith.constant 1 : index
    %c0_40 = arith.constant 0 : index
    %55 = vector.load %arg1[%c0_38, %54, %c1_39, %c0_40] : memref<1x4x4x128xf32, #tpu.memory_space<vmem>>, vector<1x1x2x128xf32>
    %56 = vector.shape_cast %55 : vector<1x1x2x128xf32> to vector<2x128xf32>
    %57 = arith.truncf %56 : vector<2x128xf32> to vector<2x128xbf16>
    %c1_41 = arith.constant 1 : index
    %c1_42 = arith.constant 1 : index
    %c0_43 = arith.constant 0 : index
    %c0_44 = arith.constant 0 : index
    %58 = vector.load %arg2[%c1_41, %c1_42, %c0_43, %c0_44] : memref<3x3x128x128xbf16, #tpu.memory_space<vmem>>, vector<1x1x128x128xbf16>
    %59 = vector.shape_cast %58 : vector<1x1x128x128xbf16> to vector<128x128xbf16>
    %cst_45 = arith.constant dense<0.000000e+00> : vector<2x128xf32>
    %60 = tpu.matmul %57, %59, %cst_45 {dimension_numbers = #tpu.dot_dimension_numbers<[1], [0], [0], [1], [0, 0, 1, 1], [], []>} : vector<2x128xbf16>, vector<128x128xbf16>, vector<2x128xf32> -> vector<2x128xf32>
    %61 = arith.addf %52, %60 : vector<2x128xf32>
    %c1_i32_46 = arith.constant 1 : i32
    %62 = arith.addi %15, %c1_i32_46 : i32
    %c0_47 = arith.constant 0 : index
    %63 = arith.index_cast %62 : i32 to index
    %c2_48 = arith.constant 2 : index
    %c0_49 = arith.constant 0 : index
    %64 = vector.load %arg1[%c0_47, %63, %c2_48, %c0_49] : memref<1x4x4x128xf32, #tpu.memory_space<vmem>>, vector<1x1x2x128xf32>
    %65 = vector.shape_cast %64 : vector<1x1x2x128xf32> to vector<2x128xf32>
    %66 = arith.truncf %65 : vector<2x128xf32> to vector<2x128xbf16>
    %c1_50 = arith.constant 1 : index
    %c2_51 = arith.constant 2 : index
    %c0_52 = arith.constant 0 : index
    %c0_53 = arith.constant 0 : index
    %67 = vector.load %arg2[%c1_50, %c2_51, %c0_52, %c0_53] : memref<3x3x128x128xbf16, #tpu.memory_space<vmem>>, vector<1x1x128x128xbf16>
    %68 = vector.shape_cast %67 : vector<1x1x128x128xbf16> to vector<128x128xbf16>
    %cst_54 = arith.constant dense<0.000000e+00> : vector<2x128xf32>
    %69 = tpu.matmul %66, %68, %cst_54 {dimension_numbers = #tpu.dot_dimension_numbers<[1], [0], [0], [1], [0, 0, 1, 1], [], []>} : vector<2x128xbf16>, vector<128x128xbf16>, vector<2x128xf32> -> vector<2x128xf32>
    %70 = arith.addf %61, %69 : vector<2x128xf32>
    %c2_i32_55 = arith.constant 2 : i32
    %71 = arith.addi %15, %c2_i32_55 : i32
    %c0_56 = arith.constant 0 : index
    %72 = arith.index_cast %71 : i32 to index
    %c0_57 = arith.constant 0 : index
    %c0_58 = arith.constant 0 : index
    %73 = vector.load %arg1[%c0_56, %72, %c0_57, %c0_58] : memref<1x4x4x128xf32, #tpu.memory_space<vmem>>, vector<1x1x2x128xf32>
    %74 = vector.shape_cast %73 : vector<1x1x2x128xf32> to vector<2x128xf32>
    %75 = arith.truncf %74 : vector<2x128xf32> to vector<2x128xbf16>
    %c2_59 = arith.constant 2 : index
    %c0_60 = arith.constant 0 : index
    %c0_61 = arith.constant 0 : index
    %c0_62 = arith.constant 0 : index
    %76 = vector.load %arg2[%c2_59, %c0_60, %c0_61, %c0_62] : memref<3x3x128x128xbf16, #tpu.memory_space<vmem>>, vector<1x1x128x128xbf16>
    %77 = vector.shape_cast %76 : vector<1x1x128x128xbf16> to vector<128x128xbf16>
    %cst_63 = arith.constant dense<0.000000e+00> : vector<2x128xf32>
    %78 = tpu.matmul %75, %77, %cst_63 {dimension_numbers = #tpu.dot_dimension_numbers<[1], [0], [0], [1], [0, 0, 1, 1], [], []>} : vector<2x128xbf16>, vector<128x128xbf16>, vector<2x128xf32> -> vector<2x128xf32>
    %79 = arith.addf %70, %78 : vector<2x128xf32>
    %c2_i32_64 = arith.constant 2 : i32
    %80 = arith.addi %15, %c2_i32_64 : i32
    %c0_65 = arith.constant 0 : index
    %81 = arith.index_cast %80 : i32 to index
    %c1_66 = arith.constant 1 : index
    %c0_67 = arith.constant 0 : index
    %82 = vector.load %arg1[%c0_65, %81, %c1_66, %c0_67] : memref<1x4x4x128xf32, #tpu.memory_space<vmem>>, vector<1x1x2x128xf32>
    %83 = vector.shape_cast %82 : vector<1x1x2x128xf32> to vector<2x128xf32>
    %84 = arith.truncf %83 : vector<2x128xf32> to vector<2x128xbf16>
    %c2_68 = arith.constant 2 : index
    %c1_69 = arith.constant 1 : index
    %c0_70 = arith.constant 0 : index
    %c0_71 = arith.constant 0 : index
    %85 = vector.load %arg2[%c2_68, %c1_69, %c0_70, %c0_71] : memref<3x3x128x128xbf16, #tpu.memory_space<vmem>>, vector<1x1x128x128xbf16>
    %86 = vector.shape_cast %85 : vector<1x1x128x128xbf16> to vector<128x128xbf16>
    %cst_72 = arith.constant dense<0.000000e+00> : vector<2x128xf32>
    %87 = tpu.matmul %84, %86, %cst_72 {dimension_numbers = #tpu.dot_dimension_numbers<[1], [0], [0], [1], [0, 0, 1, 1], [], []>} : vector<2x128xbf16>, vector<128x128xbf16>, vector<2x128xf32> -> vector<2x128xf32>
    %88 = arith.addf %79, %87 : vector<2x128xf32>
    %c2_i32_73 = arith.constant 2 : i32
    %89 = arith.addi %15, %c2_i32_73 : i32
    %c0_74 = arith.constant 0 : index
    %90 = arith.index_cast %89 : i32 to index
    %c2_75 = arith.constant 2 : index
    %c0_76 = arith.constant 0 : index
    %91 = vector.load %arg1[%c0_74, %90, %c2_75, %c0_76] : memref<1x4x4x128xf32, #tpu.memory_space<vmem>>, vector<1x1x2x128xf32>
    %92 = vector.shape_cast %91 : vector<1x1x2x128xf32> to vector<2x128xf32>
    %93 = arith.truncf %92 : vector<2x128xf32> to vector<2x128xbf16>
    %c2_77 = arith.constant 2 : index
    %c2_78 = arith.constant 2 : index
    %c0_79 = arith.constant 0 : index
    %c0_80 = arith.constant 0 : index
    %94 = vector.load %arg2[%c2_77, %c2_78, %c0_79, %c0_80] : memref<3x3x128x128xbf16, #tpu.memory_space<vmem>>, vector<1x1x128x128xbf16>
    %95 = vector.shape_cast %94 : vector<1x1x128x128xbf16> to vector<128x128xbf16>
    %cst_81 = arith.constant dense<0.000000e+00> : vector<2x128xf32>
    %96 = tpu.matmul %93, %95, %cst_81 {dimension_numbers = #tpu.dot_dimension_numbers<[1], [0], [0], [1], [0, 0, 1, 1], [], []>} : vector<2x128xbf16>, vector<128x128xbf16>, vector<2x128xf32> -> vector<2x128xf32>
    %97 = arith.addf %88, %96 : vector<2x128xf32>
    %98 = vector.broadcast %0 : vector<1x128xf32> to vector<2x128xf32>
    %99 = arith.addf %97, %98 : vector<2x128xf32>
    %cst_82 = arith.constant 0.000000e+00 : f32
    %100 = vector.broadcast %cst_82 : f32 to vector<2x128xf32>
    %101 = arith.maximumf %99, %100 : vector<2x128xf32>
    %c2_i32_83 = arith.constant 2 : i32
    %102 = arith.muli %c2_i32_83, %c0_i32 : i32
    %c1_i32_84 = arith.constant 1 : i32
    %103 = arith.addi %102, %c1_i32_84 : i32
    %cst_85 = arith.constant 0.000000e+00 : f32
    %104 = vector.broadcast %cst_85 : f32 to vector<2x128xf32>
    %c0_i32_86 = arith.constant 0 : i32
    %105 = arith.addi %103, %c0_i32_86 : i32
    %c0_87 = arith.constant 0 : index
    %106 = arith.index_cast %105 : i32 to index
    %c0_88 = arith.constant 0 : index
    %c0_89 = arith.constant 0 : index
    %107 = vector.load %arg1[%c0_87, %106, %c0_88, %c0_89] : memref<1x4x4x128xf32, #tpu.memory_space<vmem>>, vector<1x1x2x128xf32>
    %108 = vector.shape_cast %107 : vector<1x1x2x128xf32> to vector<2x128xf32>
    %109 = arith.truncf %108 : vector<2x128xf32> to vector<2x128xbf16>
    %c0_90 = arith.constant 0 : index
    %c0_91 = arith.constant 0 : index
    %c0_92 = arith.constant 0 : index
    %c0_93 = arith.constant 0 : index
    %110 = vector.load %arg2[%c0_90, %c0_91, %c0_92, %c0_93] : memref<3x3x128x128xbf16, #tpu.memory_space<vmem>>, vector<1x1x128x128xbf16>
    %111 = vector.shape_cast %110 : vector<1x1x128x128xbf16> to vector<128x128xbf16>
    %cst_94 = arith.constant dense<0.000000e+00> : vector<2x128xf32>
    %112 = tpu.matmul %109, %111, %cst_94 {dimension_numbers = #tpu.dot_dimension_numbers<[1], [0], [0], [1], [0, 0, 1, 1], [], []>} : vector<2x128xbf16>, vector<128x128xbf16>, vector<2x128xf32> -> vector<2x128xf32>
    %113 = arith.addf %104, %112 : vector<2x128xf32>
    %c0_i32_95 = arith.constant 0 : i32
    %114 = arith.addi %103, %c0_i32_95 : i32
    %c0_96 = arith.constant 0 : index
    %115 = arith.index_cast %114 : i32 to index
    %c1_97 = arith.constant 1 : index
    %c0_98 = arith.constant 0 : index
    %116 = vector.load %arg1[%c0_96, %115, %c1_97, %c0_98] : memref<1x4x4x128xf32, #tpu.memory_space<vmem>>, vector<1x1x2x128xf32>
    %117 = vector.shape_cast %116 : vector<1x1x2x128xf32> to vector<2x128xf32>
    %118 = arith.truncf %117 : vector<2x128xf32> to vector<2x128xbf16>
    %c0_99 = arith.constant 0 : index
    %c1_100 = arith.constant 1 : index
    %c0_101 = arith.constant 0 : index
    %c0_102 = arith.constant 0 : index
    %119 = vector.load %arg2[%c0_99, %c1_100, %c0_101, %c0_102] : memref<3x3x128x128xbf16, #tpu.memory_space<vmem>>, vector<1x1x128x128xbf16>
    %120 = vector.shape_cast %119 : vector<1x1x128x128xbf16> to vector<128x128xbf16>
    %cst_103 = arith.constant dense<0.000000e+00> : vector<2x128xf32>
    %121 = tpu.matmul %118, %120, %cst_103 {dimension_numbers = #tpu.dot_dimension_numbers<[1], [0], [0], [1], [0, 0, 1, 1], [], []>} : vector<2x128xbf16>, vector<128x128xbf16>, vector<2x128xf32> -> vector<2x128xf32>
    %122 = arith.addf %113, %121 : vector<2x128xf32>
    %c0_i32_104 = arith.constant 0 : i32
    %123 = arith.addi %103, %c0_i32_104 : i32
    %c0_105 = arith.constant 0 : index
    %124 = arith.index_cast %123 : i32 to index
    %c2_106 = arith.constant 2 : index
    %c0_107 = arith.constant 0 : index
    %125 = vector.load %arg1[%c0_105, %124, %c2_106, %c0_107] : memref<1x4x4x128xf32, #tpu.memory_space<vmem>>, vector<1x1x2x128xf32>
    %126 = vector.shape_cast %125 : vector<1x1x2x128xf32> to vector<2x128xf32>
    %127 = arith.truncf %126 : vector<2x128xf32> to vector<2x128xbf16>
    %c0_108 = arith.constant 0 : index
    %c2_109 = arith.constant 2 : index
    %c0_110 = arith.constant 0 : index
    %c0_111 = arith.constant 0 : index
    %128 = vector.load %arg2[%c0_108, %c2_109, %c0_110, %c0_111] : memref<3x3x128x128xbf16, #tpu.memory_space<vmem>>, vector<1x1x128x128xbf16>
    %129 = vector.shape_cast %128 : vector<1x1x128x128xbf16> to vector<128x128xbf16>
    %cst_112 = arith.constant dense<0.000000e+00> : vector<2x128xf32>
    %130 = tpu.matmul %127, %129, %cst_112 {dimension_numbers = #tpu.dot_dimension_numbers<[1], [0], [0], [1], [0, 0, 1, 1], [], []>} : vector<2x128xbf16>, vector<128x128xbf16>, vector<2x128xf32> -> vector<2x128xf32>
    %131 = arith.addf %122, %130 : vector<2x128xf32>
    %c1_i32_113 = arith.constant 1 : i32
    %132 = arith.addi %103, %c1_i32_113 : i32
    %c0_114 = arith.constant 0 : index
    %133 = arith.index_cast %132 : i32 to index
    %c0_115 = arith.constant 0 : index
    %c0_116 = arith.constant 0 : index
    %134 = vector.load %arg1[%c0_114, %133, %c0_115, %c0_116] : memref<1x4x4x128xf32, #tpu.memory_space<vmem>>, vector<1x1x2x128xf32>
    %135 = vector.shape_cast %134 : vector<1x1x2x128xf32> to vector<2x128xf32>
    %136 = arith.truncf %135 : vector<2x128xf32> to vector<2x128xbf16>
    %c1_117 = arith.constant 1 : index
    %c0_118 = arith.constant 0 : index
    %c0_119 = arith.constant 0 : index
    %c0_120 = arith.constant 0 : index
    %137 = vector.load %arg2[%c1_117, %c0_118, %c0_119, %c0_120] : memref<3x3x128x128xbf16, #tpu.memory_space<vmem>>, vector<1x1x128x128xbf16>
    %138 = vector.shape_cast %137 : vector<1x1x128x128xbf16> to vector<128x128xbf16>
    %cst_121 = arith.constant dense<0.000000e+00> : vector<2x128xf32>
    %139 = tpu.matmul %136, %138, %cst_121 {dimension_numbers = #tpu.dot_dimension_numbers<[1], [0], [0], [1], [0, 0, 1, 1], [], []>} : vector<2x128xbf16>, vector<128x128xbf16>, vector<2x128xf32> -> vector<2x128xf32>
    %140 = arith.addf %131, %139 : vector<2x128xf32>
    %c1_i32_122 = arith.constant 1 : i32
    %141 = arith.addi %103, %c1_i32_122 : i32
    %c0_123 = arith.constant 0 : index
    %142 = arith.index_cast %141 : i32 to index
    %c1_124 = arith.constant 1 : index
    %c0_125 = arith.constant 0 : index
    %143 = vector.load %arg1[%c0_123, %142, %c1_124, %c0_125] : memref<1x4x4x128xf32, #tpu.memory_space<vmem>>, vector<1x1x2x128xf32>
    %144 = vector.shape_cast %143 : vector<1x1x2x128xf32> to vector<2x128xf32>
    %145 = arith.truncf %144 : vector<2x128xf32> to vector<2x128xbf16>
    %c1_126 = arith.constant 1 : index
    %c1_127 = arith.constant 1 : index
    %c0_128 = arith.constant 0 : index
    %c0_129 = arith.constant 0 : index
    %146 = vector.load %arg2[%c1_126, %c1_127, %c0_128, %c0_129] : memref<3x3x128x128xbf16, #tpu.memory_space<vmem>>, vector<1x1x128x128xbf16>
    %147 = vector.shape_cast %146 : vector<1x1x128x128xbf16> to vector<128x128xbf16>
    %cst_130 = arith.constant dense<0.000000e+00> : vector<2x128xf32>
    %148 = tpu.matmul %145, %147, %cst_130 {dimension_numbers = #tpu.dot_dimension_numbers<[1], [0], [0], [1], [0, 0, 1, 1], [], []>} : vector<2x128xbf16>, vector<128x128xbf16>, vector<2x128xf32> -> vector<2x128xf32>
    %149 = arith.addf %140, %148 : vector<2x128xf32>
    %c1_i32_131 = arith.constant 1 : i32
    %150 = arith.addi %103, %c1_i32_131 : i32
    %c0_132 = arith.constant 0 : index
    %151 = arith.index_cast %150 : i32 to index
    %c2_133 = arith.constant 2 : index
    %c0_134 = arith.constant 0 : index
    %152 = vector.load %arg1[%c0_132, %151, %c2_133, %c0_134] : memref<1x4x4x128xf32, #tpu.memory_space<vmem>>, vector<1x1x2x128xf32>
    %153 = vector.shape_cast %152 : vector<1x1x2x128xf32> to vector<2x128xf32>
    %154 = arith.truncf %153 : vector<2x128xf32> to vector<2x128xbf16>
    %c1_135 = arith.constant 1 : index
    %c2_136 = arith.constant 2 : index
    %c0_137 = arith.constant 0 : index
    %c0_138 = arith.constant 0 : index
    %155 = vector.load %arg2[%c1_135, %c2_136, %c0_137, %c0_138] : memref<3x3x128x128xbf16, #tpu.memory_space<vmem>>, vector<1x1x128x128xbf16>
    %156 = vector.shape_cast %155 : vector<1x1x128x128xbf16> to vector<128x128xbf16>
    %cst_139 = arith.constant dense<0.000000e+00> : vector<2x128xf32>
    %157 = tpu.matmul %154, %156, %cst_139 {dimension_numbers = #tpu.dot_dimension_numbers<[1], [0], [0], [1], [0, 0, 1, 1], [], []>} : vector<2x128xbf16>, vector<128x128xbf16>, vector<2x128xf32> -> vector<2x128xf32>
    %158 = arith.addf %149, %157 : vector<2x128xf32>
    %c2_i32_140 = arith.constant 2 : i32
    %159 = arith.addi %103, %c2_i32_140 : i32
    %c0_141 = arith.constant 0 : index
    %160 = arith.index_cast %159 : i32 to index
    %c0_142 = arith.constant 0 : index
    %c0_143 = arith.constant 0 : index
    %161 = vector.load %arg1[%c0_141, %160, %c0_142, %c0_143] : memref<1x4x4x128xf32, #tpu.memory_space<vmem>>, vector<1x1x2x128xf32>
    %162 = vector.shape_cast %161 : vector<1x1x2x128xf32> to vector<2x128xf32>
    %163 = arith.truncf %162 : vector<2x128xf32> to vector<2x128xbf16>
    %c2_144 = arith.constant 2 : index
    %c0_145 = arith.constant 0 : index
    %c0_146 = arith.constant 0 : index
    %c0_147 = arith.constant 0 : index
    %164 = vector.load %arg2[%c2_144, %c0_145, %c0_146, %c0_147] : memref<3x3x128x128xbf16, #tpu.memory_space<vmem>>, vector<1x1x128x128xbf16>
    %165 = vector.shape_cast %164 : vector<1x1x128x128xbf16> to vector<128x128xbf16>
    %cst_148 = arith.constant dense<0.000000e+00> : vector<2x128xf32>
    %166 = tpu.matmul %163, %165, %cst_148 {dimension_numbers = #tpu.dot_dimension_numbers<[1], [0], [0], [1], [0, 0, 1, 1], [], []>} : vector<2x128xbf16>, vector<128x128xbf16>, vector<2x128xf32> -> vector<2x128xf32>
    %167 = arith.addf %158, %166 : vector<2x128xf32>
    %c2_i32_149 = arith.constant 2 : i32
    %168 = arith.addi %103, %c2_i32_149 : i32
    %c0_150 = arith.constant 0 : index
    %169 = arith.index_cast %168 : i32 to index
    %c1_151 = arith.constant 1 : index
    %c0_152 = arith.constant 0 : index
    %170 = vector.load %arg1[%c0_150, %169, %c1_151, %c0_152] : memref<1x4x4x128xf32, #tpu.memory_space<vmem>>, vector<1x1x2x128xf32>
    %171 = vector.shape_cast %170 : vector<1x1x2x128xf32> to vector<2x128xf32>
    %172 = arith.truncf %171 : vector<2x128xf32> to vector<2x128xbf16>
    %c2_153 = arith.constant 2 : index
    %c1_154 = arith.constant 1 : index
    %c0_155 = arith.constant 0 : index
    %c0_156 = arith.constant 0 : index
    %173 = vector.load %arg2[%c2_153, %c1_154, %c0_155, %c0_156] : memref<3x3x128x128xbf16, #tpu.memory_space<vmem>>, vector<1x1x128x128xbf16>
    %174 = vector.shape_cast %173 : vector<1x1x128x128xbf16> to vector<128x128xbf16>
    %cst_157 = arith.constant dense<0.000000e+00> : vector<2x128xf32>
    %175 = tpu.matmul %172, %174, %cst_157 {dimension_numbers = #tpu.dot_dimension_numbers<[1], [0], [0], [1], [0, 0, 1, 1], [], []>} : vector<2x128xbf16>, vector<128x128xbf16>, vector<2x128xf32> -> vector<2x128xf32>
    %176 = arith.addf %167, %175 : vector<2x128xf32>
    %c2_i32_158 = arith.constant 2 : i32
    %177 = arith.addi %103, %c2_i32_158 : i32
    %c0_159 = arith.constant 0 : index
    %178 = arith.index_cast %177 : i32 to index
    %c2_160 = arith.constant 2 : index
    %c0_161 = arith.constant 0 : index
    %179 = vector.load %arg1[%c0_159, %178, %c2_160, %c0_161] : memref<1x4x4x128xf32, #tpu.memory_space<vmem>>, vector<1x1x2x128xf32>
    %180 = vector.shape_cast %179 : vector<1x1x2x128xf32> to vector<2x128xf32>
    %181 = arith.truncf %180 : vector<2x128xf32> to vector<2x128xbf16>
    %c2_162 = arith.constant 2 : index
    %c2_163 = arith.constant 2 : index
    %c0_164 = arith.constant 0 : index
    %c0_165 = arith.constant 0 : index
    %182 = vector.load %arg2[%c2_162, %c2_163, %c0_164, %c0_165] : memref<3x3x128x128xbf16, #tpu.memory_space<vmem>>, vector<1x1x128x128xbf16>
    %183 = vector.shape_cast %182 : vector<1x1x128x128xbf16> to vector<128x128xbf16>
    %cst_166 = arith.constant dense<0.000000e+00> : vector<2x128xf32>
    %184 = tpu.matmul %181, %183, %cst_166 {dimension_numbers = #tpu.dot_dimension_numbers<[1], [0], [0], [1], [0, 0, 1, 1], [], []>} : vector<2x128xbf16>, vector<128x128xbf16>, vector<2x128xf32> -> vector<2x128xf32>
    %185 = arith.addf %176, %184 : vector<2x128xf32>
    %186 = vector.broadcast %0 : vector<1x128xf32> to vector<2x128xf32>
    %187 = arith.addf %185, %186 : vector<2x128xf32>
    %cst_167 = arith.constant 0.000000e+00 : f32
    %188 = vector.broadcast %cst_167 : f32 to vector<2x128xf32>
    %189 = arith.maximumf %187, %188 : vector<2x128xf32>
    %190 = arith.maximumf %101, %189 : vector<2x128xf32>
    %cst_168 = arith.constant dense<0.000000e+00> : vector<1x128xf32>
    %191 = tpu.matmul %7, %190, %cst_168 {dimension_numbers = #tpu.dot_dimension_numbers<[1], [0], [0], [1], [0, 0, 1, 1], [], []>} : vector<1x2xf32>, vector<2x128xf32>, vector<1x128xf32> -> vector<1x128xf32>
    %cst_169 = arith.constant dense<0.000000e+00> : vector<1x128xf32>
    %192 = tpu.matmul %14, %190, %cst_169 {dimension_numbers = #tpu.dot_dimension_numbers<[1], [0], [0], [1], [0, 0, 1, 1], [], []>} : vector<1x2xf32>, vector<2x128xf32>, vector<1x128xf32> -> vector<1x128xf32>
    %193 = arith.maximumf %191, %192 : vector<1x128xf32>
    %c0_170 = arith.constant 0 : index
    %194 = arith.index_cast %c0_i32 : i32 to index
    %c0_171 = arith.constant 0 : index
    %c0_172 = arith.constant 0 : index
    %195 = vector.load %arg4[%c0_170, %194, %c0_171, %c0_172] : memref<1x1x1x128xf32, #tpu.memory_space<vmem>>, vector<1x1x1x128xf32>
    %196 = vector.shape_cast %195 : vector<1x1x1x128xf32> to vector<1x128xf32>
    %197 = vector.shape_cast %193 : vector<1x128xf32> to vector<1x1x1x128xf32>
    tpu.vector_store %arg4[%c0_170, %194, %c0_171, %c0_172], %197 {strides = array<i32>} : memref<1x1x1x128xf32, #tpu.memory_space<vmem>>, vector<1x1x1x128xf32>,
    %c1_i32_173 = arith.constant 1 : i32
    return
  }
  func.func @transform_0(%arg0: i32) -> (i32, i32, i32, i32) {
    %c0_i32 = arith.constant 0 : i32
    %c0_i32_0 = arith.constant 0 : i32
    %c0_i32_1 = arith.constant 0 : i32
    %c0_i32_2 = arith.constant 0 : i32
    return %arg0, %c0_i32, %c0_i32_0, %c0_i32_1 : i32, i32, i32, i32
  }
  func.func @transform_1(%arg0: i32) -> (i32, i32, i32, i32) {
    %c0_i32 = arith.constant 0 : i32
    %c0_i32_0 = arith.constant 0 : i32
    %c0_i32_1 = arith.constant 0 : i32
    %c0_i32_2 = arith.constant 0 : i32
    %c0_i32_3 = arith.constant 0 : i32
    return %c0_i32, %c0_i32_0, %c0_i32_1, %c0_i32_2 : i32, i32, i32, i32
  }
  func.func @transform_2(%arg0: i32) -> (i32, i32) {
    %c0_i32 = arith.constant 0 : i32
    %c0_i32_0 = arith.constant 0 : i32
    %c0_i32_1 = arith.constant 0 : i32
    return %c0_i32, %c0_i32_0 : i32, i32
  }
  func.func @transform_3(%arg0: i32) -> (i32, i32, i32, i32) {
    %c0_i32 = arith.constant 0 : i32
    %c0_i32_0 = arith.constant 0 : i32
    %c0_i32_1 = arith.constant 0 : i32
    %c0_i32_2 = arith.constant 0 : i32
    return %arg0, %c0_i32, %c0_i32_0, %c0_i32_1 : i32, i32, i32, i32
  }
}

module attributes {stable_mosaic.version = 11 : i64} {
  func.func @_mlp_kernel(%arg0: memref<2x128xf32, #tpu.memory_space<vmem>>, %arg1: memref<128x128xbf16, #tpu.memory_space<vmem>>, %arg2: memref<1x128xf32, #tpu.memory_space<vmem>>, %arg3: memref<128x128xbf16, #tpu.memory_space<vmem>>, %arg4: memref<1x128xf32, #tpu.memory_space<vmem>>, %arg5: memref<128x128xbf16, #tpu.memory_space<vmem>>, %arg6: memref<1x128xf32, #tpu.memory_space<vmem>>, %arg7: memref<2x128xf32, #tpu.memory_space<vmem>>) attributes {dimension_semantics = [], scalar_prefetch = 0 : i64, scratch_operands = 0 : i64, tpu.core_type = #tpu.core_type<tc>} {
    %c0 = arith.constant 0 : index
    %c0_0 = arith.constant 0 : index
    %0 = vector.load %arg0[%c0, %c0_0] : memref<2x128xf32, #tpu.memory_space<vmem>>, vector<2x128xf32>
    %1 = arith.truncf %0 : vector<2x128xf32> to vector<2x128xbf16>
    %c0_1 = arith.constant 0 : index
    %c0_2 = arith.constant 0 : index
    %2 = vector.load %arg1[%c0_1, %c0_2] : memref<128x128xbf16, #tpu.memory_space<vmem>>, vector<128x128xbf16>
    %cst = arith.constant dense<0.000000e+00> : vector<2x128xf32>
    %3 = tpu.matmul %1, %2, %cst {dimension_numbers = #tpu.dot_dimension_numbers<[1], [0], [0], [1], [0, 0, 1, 1], [], []>} : vector<2x128xbf16>, vector<128x128xbf16>, vector<2x128xf32> -> vector<2x128xf32>
    %c0_3 = arith.constant 0 : index
    %c0_4 = arith.constant 0 : index
    %4 = vector.load %arg2[%c0_3, %c0_4] : memref<1x128xf32, #tpu.memory_space<vmem>>, vector<1x128xf32>
    %5 = vector.broadcast %4 : vector<1x128xf32> to vector<2x128xf32>
    %6 = arith.addf %3, %5 : vector<2x128xf32>
    %cst_5 = arith.constant 0.000000e+00 : f32
    %7 = vector.broadcast %cst_5 : f32 to vector<2x128xf32>
    %8 = arith.maximumf %6, %7 : vector<2x128xf32>
    %9 = arith.truncf %8 : vector<2x128xf32> to vector<2x128xbf16>
    %c0_6 = arith.constant 0 : index
    %c0_7 = arith.constant 0 : index
    %10 = vector.load %arg3[%c0_6, %c0_7] : memref<128x128xbf16, #tpu.memory_space<vmem>>, vector<128x128xbf16>
    %cst_8 = arith.constant dense<0.000000e+00> : vector<2x128xf32>
    %11 = tpu.matmul %9, %10, %cst_8 {dimension_numbers = #tpu.dot_dimension_numbers<[1], [0], [0], [1], [0, 0, 1, 1], [], []>} : vector<2x128xbf16>, vector<128x128xbf16>, vector<2x128xf32> -> vector<2x128xf32>
    %c0_9 = arith.constant 0 : index
    %c0_10 = arith.constant 0 : index
    %12 = vector.load %arg4[%c0_9, %c0_10] : memref<1x128xf32, #tpu.memory_space<vmem>>, vector<1x128xf32>
    %13 = vector.broadcast %12 : vector<1x128xf32> to vector<2x128xf32>
    %14 = arith.addf %11, %13 : vector<2x128xf32>
    %cst_11 = arith.constant 0.000000e+00 : f32
    %15 = vector.broadcast %cst_11 : f32 to vector<2x128xf32>
    %16 = arith.maximumf %14, %15 : vector<2x128xf32>
    %17 = arith.truncf %16 : vector<2x128xf32> to vector<2x128xbf16>
    %c0_12 = arith.constant 0 : index
    %c0_13 = arith.constant 0 : index
    %18 = vector.load %arg5[%c0_12, %c0_13] : memref<128x128xbf16, #tpu.memory_space<vmem>>, vector<128x128xbf16>
    %cst_14 = arith.constant dense<0.000000e+00> : vector<2x128xf32>
    %19 = tpu.matmul %17, %18, %cst_14 {dimension_numbers = #tpu.dot_dimension_numbers<[1], [0], [0], [1], [0, 0, 1, 1], [], []>} : vector<2x128xbf16>, vector<128x128xbf16>, vector<2x128xf32> -> vector<2x128xf32>
    %c0_15 = arith.constant 0 : index
    %c0_16 = arith.constant 0 : index
    %20 = vector.load %arg6[%c0_15, %c0_16] : memref<1x128xf32, #tpu.memory_space<vmem>>, vector<1x128xf32>
    %21 = vector.broadcast %20 : vector<1x128xf32> to vector<2x128xf32>
    %22 = arith.addf %19, %21 : vector<2x128xf32>
    %c0_17 = arith.constant 0 : index
    %c0_18 = arith.constant 0 : index
    %23 = vector.load %arg7[%c0_17, %c0_18] : memref<2x128xf32, #tpu.memory_space<vmem>>, vector<2x128xf32>
    tpu.vector_store %arg7[%c0_17, %c0_18], %22 {strides = array<i32>} : memref<2x128xf32, #tpu.memory_space<vmem>>, vector<2x128xf32>,
    return
  }
}

</mosaic_0001>

<bundles_post_ra>
// kernel: vgg_s_forward.6
= control target key start
LH: loop header
LB: loop body
LE: loop exit
PB: predicated region body
PF: predicated region fallthrough
CT: control target
= control target key end

     0   :  { %s3123_s12 = smov 0   ;;  %s3499_s0 = inlined_call_operand.vmem [shape: f32[2,34,34,128], index: 0, kind: input, shape index: {}]   ;;  %s3500_s1 = inlined_call_operand.vmem [shape: bf16[3,3,128,128], index: 1, kind: input, shape index: {}]   ;;  %s3501_s2 = inlined_call_operand.vmem [shape: f32[1,128], index: 2, kind: input, shape index: {}]   ;;  %s3502_s3 = inlined_call_operand.vmem [shape: f32[2,16,16,128], index: 3, kind: output, shape index: {}]  }
   0x1 LB: > { %s2077_s13 = sadd.s32 4294967295, %s3096_s12   ;;  %p2081_p0 = scmp.ge.s32.totalorder %s3096_s12, 1  ;;  %s3096_s12 = sphi %s3123_s12, %s13_s12  }
   0x2   : > { %p137_p1 = scmp.lt.s32.totalorder %s3096_s12, 3 }
   0x4   : > { %p138_p2 = pnand %p2081_p0, %p137_p1 }
   0x5   : > { %p161_p3 = scmp.lt.s32.totalorder (!%p138_p2), %s2077_s13, 1  ;;  %v3134_v0 = vld [vmem:[%s3501_s2] ss:$0 sm:$0xff] (!%p138_p2)  ;;  %v173_v1 = vlaneseq (!%p138_p2)  ;;  %v3102_v8 = vmov (!%p138_p2), 0.0   ;;  %s3154_s24 = smov (!%p138_p2), 0  }
   0x6   : > { %141 = sbr.rel (%p138_p2) target bundleno = 753 (0x2f1), region = 32 }
   0x7   : > { %v174_v2 = vshrl.u32 (!%p138_p2), %v173_v1, 7  ;;  %v177_v3 = vand.u32 (!%p138_p2), 127, %v173_v1 }
   0x9   : > { %v175_v4 = vadd.s32 (!%p138_p2), 8, %v174_v2  ;;  %v178_v5 = vmul.u32 (!%p138_p2), 2, %v174_v2 }
   0xb   : > { %v179_v6 = vmul.u32 (!%p138_p2), 2, %v175_v4  ;;  %vm180_vm0 = vcmp.eq.s32.totalorder (!%p138_p2), %v177_v3, %v178_v5  ;;  %v186_v7 = vadd.s32 (!%p138_p2), 1, %v178_v5 }
   0xc   : > { %v3146_v9 = vsel (!%p138_p2), %vm180_vm0, 1.0, %v3102_v8 }
   0xd   : > { %s3504_s13 = smov (!%p161_p3, %s2077_s13), 1  ;;  %vm181_vm1 = vcmp.eq.s32.totalorder %v177_v3, %v179_v6  ;;  %v187_v10 = vadd.s32 1, %v179_v6  ;;  %vm188_vm2 = vcmp.eq.s32.totalorder %v177_v3, %v186_v7 }
   0xe   : > { %s2996_s16 = smul.u32 1360, %s3504_s13  ;;  %s2341_s17 = sshll.u32 %s3504_s13, 8  ;;  %v3148_v11 = vsel %vm181_vm1, 1.0, %v3102_v8  ;;  %v3150_v12 = vsel %vm188_vm2, 1.0, %v3102_v8 }
   0xf   : > { %s3139_s20 = scalar_lea.vmem %s3502_s3, %s2341_s17  ;;  %vm189_vm3 = vcmp.eq.s32.totalorder %v177_v3, %v187_v10 }
  0x10   : > { %s3144_s23 = scalar_lea.vmem %s3499_s0, %s2996_s16  ;;  %v3152_v13 = vsel %vm189_vm3, 1.0, %v3102_v8 }
  0x11 LB: >> { %v3014_v14 = vld [vmem:[%s3500_s1 + $0x40] sm:$0xff]   ;;  %v3015_v15 = vld [vmem:[%s3500_s1 + $0x48] sm:$0xff]   ;;  %s2090_s29 = smul.u32 80, %s3100_s24  ;;  %v3016_v16 = vld [vmem:[%s3500_s1 + $0x50] sm:$0xff]   ;;  %vm1832_vm4 = vcmask 261120   ;;  %s3100_s24 = sphi %s3154_s24, %s199_s24  }
  0x12   : >> { %2534 = vmatprep.subr.bf16.mxu0 %v3014_v14  ;;  %2714 = vmatprep.subr.bf16.mxu1 %v3014_v14  ;;  %v3017_v17 = vld [vmem:[%s3500_s1 + $0x58] sm:$0xff]   ;;  %v3018_v24 = vld [vmem:[%s3500_s1 + $0x60] sm:$0xff]   ;;  %v3019_v25 = vld [vmem:[%s3500_s1 + $0x68] sm:$0xff]  }
  0x13   : >> { %2535 = vmatpush3.bf16.msra.mxu0 %v3014_v14  ;;  %2715 = vmatpush3.bf16.msra.mxu1 %v3014_v14  ;;  %s3170_s5 = scalar_lea.vmem %s3144_s23, %s2090_s29  ;;  %v3020_v26 = vld [vmem:[%s3500_s1 + $0x70] sm:$0xff]   ;;  %v3021_v27 = vld [vmem:[%s3500_s1 + $0x78] sm:$0xff]   ;;  %v3022_v32 = vld [vmem:[%s3500_s1] sm:$0xff]  }
  0x14   : >> { %2536 = vmatprep.subr.bf16.mxu0 %v3015_v15  ;;  %2716 = vmatprep.subr.bf16.mxu1 %v3015_v15  ;;  %v225_v18 = vld [vmem:[%s3170_s5 + $0x1] sm:$0xff]  ;;  %v226_v19 = vld [vmem:[%s3170_s5 + $0x9] sm:$0xff]  ;;  %v2178_v22 = vld [vmem:[%s3170_s5 + $0x31] sm:$0xff] }
  0x15   : >> { %v229_v20 = vpack.c.bf16 %v226_v19, %v225_v18  ;;  %v2177_v21 = vld [vmem:[%s3170_s5 + $0x29] sm:$0xff]  ;;  %v227_v28 = vld [vmem:[%s3170_s5 + $0x11] sm:$0xff]  ;;  %v228_v29 = vld [vmem:[%s3170_s5 + $0x19] sm:$0xff] }
  0x16   : >> { %v3179_v23 = vpack.c.bf16 %v2178_v22, %v2177_v21  ;;  %v2179_v30 = vld [vmem:[%s3170_s5 + $0x39] sm:$0xff]  ;;  %v2180_v31 = vld [vmem:[%s3170_s5 + $0x41] sm:$0xff]  ;;  %v230_v36 = vpack.c.bf16 %v228_v29, %v227_v28  ;;  %v2150_v38 = vld [vmem:[%s3170_s5 + $0x30] sm:$0xff] }
  0x17   : >> { %2537 = vmatpush3.bf16.msra.mxu0 %v3015_v15  ;;  %2717 = vmatpush3.bf16.msra.mxu1 %v3015_v15  ;;  %v203_v33 = vld [vmem:[%s3170_s5] sm:$0xff]  ;;  %v204_v34 = vld [vmem:[%s3170_s5 + $0x8] sm:$0xff]  ;;  %v3204_v37 = vpack.c.bf16 %v2180_v31, %v2179_v30  ;;  %v3024_v42 = vld [vmem:[%s3500_s1 + $0x10] sm:$0xff]  }
  0x18   : >> { %2538 = vmatprep.subr.bf16.mxu0 %v3016_v16  ;;  %2718 = vmatprep.subr.bf16.mxu1 %v3016_v16  ;;  %v2149_v35 = vld [vmem:[%s3170_s5 + $0x28] sm:$0xff]  ;;  %v207_v40 = vpack.c.bf16 %v204_v34, %v203_v33  ;;  %v3025_v43 = vld [vmem:[%s3500_s1 + $0x18] sm:$0xff]   ;;  %v3026_v44 = vld [vmem:[%s3500_s1 + $0x20] sm:$0xff]  }
  0x19   : >> { %2550 = vmatprep.mubr.bf16.mxu0 %v229_v20  ;;  %2730 = vmatprep.mubr.bf16.mxu1 %v3179_v23  ;;  %v3023_v39 = vld [vmem:[%s3500_s1 + $0x8] sm:$0xff]   ;;  %v3210_v41 = vpack.c.bf16 %v2150_v38, %v2149_v35  ;;  %v3028_v46 = vld [vmem:[%s3500_s1 + $0x30] sm:$0xff]   ;;  %v3029_v47 = vld [vmem:[%s3500_s1 + $0x38] sm:$0xff]  }
  0x1a   : >> { %v3027_v45 = vld [vmem:[%s3500_s1 + $0x28] sm:$0xff]   ;;  %v205_v48 = vld [vmem:[%s3170_s5 + $0x10] sm:$0xff]  ;;  %v206_v49 = vld [vmem:[%s3170_s5 + $0x18] sm:$0xff] }
  0x1b   : >> { %2539 = vmatpush3.bf16.msra.mxu0 %v3016_v16  ;;  %2719 = vmatpush3.bf16.msra.mxu1 %v3016_v16  ;;  %v2151_v50 = vld [vmem:[%s3170_s5 + $0x38] sm:$0xff]  ;;  %v3030_v51 = vld [vmem:[%s3500_s1 + $0x80] sm:$0xff]   ;;  %v443_v54 = vld [vmem:[%s3170_s5 + $0xa] sm:$0xff]  ;;  %v208_v57 = vpack.c.bf16 %v206_v49, %v205_v48 }
  0x1c   : >> { %2540 = vmatprep.subr.bf16.mxu0 %v3017_v17  ;;  %2720 = vmatprep.subr.bf16.mxu1 %v3017_v17  ;;  %v2152_v52 = vld [vmem:[%s3170_s5 + $0x40] sm:$0xff]  ;;  %v2205_v55 = vld [vmem:[%s3170_s5 + $0x2a] sm:$0xff]  ;;  %v2206_v56 = vld [vmem:[%s3170_s5 + $0x32] sm:$0xff] }
  0x1d   : >> { %v442_v53 = vld [vmem:[%s3170_s5 + $0x2] sm:$0xff]  ;;  %v3243_v58 = vpack.c.bf16 %v2152_v52, %v2151_v50  ;;  %v3248_v61 = vpack.c.bf16 %v2206_v56, %v2205_v55  ;;  %v3032_v62 = vld [vmem:[%s3500_s1 + $0x90] sm:$0xff]   ;;  %v3033_v63 = vld [vmem:[%s3500_s1 + $0x98] sm:$0xff]  }
  0x1e   : >> { %v3031_v59 = vld [vmem:[%s3500_s1 + $0x88] sm:$0xff]   ;;  %v446_v60 = vpack.c.bf16 %v443_v54, %v442_v53  ;;  %v3034_v1 = vld [vmem:[%s3500_s1 + $0xa0] sm:$0xff]   ;;  %v3036_v3 = vld [vmem:[%s3500_s1 + $0xb0] sm:$0xff]  }
  0x1f   : >> { %2541 = vmatpush3.bf16.msra.mxu0 %v3017_v17  ;;  %2721 = vmatpush3.bf16.msra.mxu1 %v3017_v17  ;;  %v3035_v2 = vld [vmem:[%s3500_s1 + $0xa8] sm:$0xff]   ;;  %v3037_v4 = vld [vmem:[%s3500_s1 + $0xb8] sm:$0xff]   ;;  %v3038_v10 = vld [vmem:[%s3500_s1 + $0xc0] sm:$0xff]  }
  0x20   : >> { %2542 = vmatprep.subr.bf16.mxu0 %v3018_v24  ;;  %2722 = vmatprep.subr.bf16.mxu1 %v3018_v24  ;;  %v444_v5 = vld [vmem:[%s3170_s5 + $0x12] sm:$0xff]  ;;  %v445_v6 = vld [vmem:[%s3170_s5 + $0x1a] sm:$0xff]  ;;  %v2208_v8 = vld [vmem:[%s3170_s5 + $0x42] sm:$0xff] }
  0x21   : >> { %v2207_v7 = vld [vmem:[%s3170_s5 + $0x3a] sm:$0xff]  ;;  %v447_v14 = vpack.c.bf16 %v445_v6, %v444_v5  ;;  %v2235_v16 = vld [vmem:[%s3170_s5 + $0x50] sm:$0xff]  ;;  %v3039_v18 = vld [vmem:[%s3500_s1 + $0xc8] sm:$0xff]  }
  0x22   : >> { %v3277_v15 = vpack.c.bf16 %v2208_v8, %v2207_v7  ;;  %v2236_v17 = vld [vmem:[%s3170_s5 + $0x58] sm:$0xff]  ;;  %v3040_v20 = vld [vmem:[%s3500_s1 + $0xd0] sm:$0xff]   ;;  %v3042_v22 = vld [vmem:[%s3500_s1 + $0xe0] sm:$0xff]  }
  0x23   : >> { %2543 = vmatpush3.bf16.msra.mxu0 %v3018_v24  ;;  %2723 = vmatpush3.bf16.msra.mxu1 %v3018_v24  ;;  %v3284_v19 = vpack.c.bf16 %v2236_v17, %v2235_v16  ;;  %v3041_v21 = vld [vmem:[%s3500_s1 + $0xd8] sm:$0xff]   ;;  %v3043_v24 = vld [vmem:[%s3500_s1 + $0xe8] sm:$0xff]   ;;  %v3046_v29 = vld [vmem:[%s3500_s1 + $0x100] sm:$0xff]  }
  0x24   : >> { %2544 = vmatprep.subr.bf16.mxu0 %v3019_v25  ;;  %2724 = vmatprep.subr.bf16.mxu1 %v3019_v25  ;;  %v2238_v28 = vld [vmem:[%s3170_s5 + $0x68] sm:$0xff]  ;;  %v2263_v31 = vld [vmem:[%s3170_s5 + $0x51] sm:$0xff]  ;;  %v3050_v38 = vld [vmem:[%s3500_s1 + $0x120] sm:$0xff]  }
  0x25   : >> { %v3047_v33 = vld [vmem:[%s3500_s1 + $0x108] sm:$0xff]   ;;  %v3048_v35 = vld [vmem:[%s3500_s1 + $0x110] sm:$0xff]   ;;  %v3058_v50 = vld [vmem:[%s3500_s1 + $0x160] sm:$0xff]  }
  0x26   : >> { %v3056_v49 = vld [vmem:[%s3500_s1 + $0x150] sm:$0xff]   ;;  %v3061_v53 = vld [vmem:[%s3500_s1 + $0x178] sm:$0xff]   ;;  %v2293_v54 = vld [vmem:[%s3170_s5 + $0x62] sm:$0xff] }
  0x27   : >> { %2545 = vmatpush3.bf16.msra.mxu0 %v3019_v25  ;;  %2725 = vmatpush3.bf16.msra.mxu1 %v3019_v25  ;;  %v3044_v25 = vld [vmem:[%s3500_s1 + $0xf0] sm:$0xff]   ;;  %v3062_v56 = vld [vmem:[%s3500_s1 + $0x180] sm:$0xff]   ;;  %v2324_v5 = vld [vmem:[%s3170_s5 + $0x88] sm:$0xff] }
  0x28   : >> { %2546 = vmatprep.subr.bf16.mxu0 %v3020_v26  ;;  %2726 = vmatprep.subr.bf16.mxu1 %v3020_v26  ;;  %v3060_v52 = vld [vmem:[%s3500_s1 + $0x170] sm:$0xff]   ;;  %v3070_v7 = vld [vmem:[%s3500_s1 + $0x1c0] sm:$0xff]  }
  0x29   : >> { %v2294_v55 = vld [vmem:[%s3170_s5 + $0x6a] sm:$0xff] }
  0x2a   : >> { %v2325_v6 = vld [vmem:[%s3170_s5 + $0x90] sm:$0xff] }
  0x2b   : >> { %2547 = vmatpush3.bf16.msra.mxu0 %v3020_v26  ;;  %2727 = vmatpush3.bf16.msra.mxu1 %v3020_v26  ;;  %v3045_v26 = vld [vmem:[%s3500_s1 + $0xf8] sm:$0xff]   ;;  %v1648_v8 = vpack.c.bf16 %v2325_v6, %v2324_v5  ;;  %v3072_v17 = vld [vmem:[%s3500_s1 + $0x1d0] sm:$0xff]  }
  0x2c   : >> { %2548 = vmatprep.subr.bf16.mxu0 %v3021_v27  ;;  %2728 = vmatprep.subr.bf16.mxu1 %v3021_v27 }
  0x2f   : >> { %2549 = vmatpush3.bf16.msra.mxu0 %v3021_v27  ;;  %2729 = vmatpush3.bf16.msra.mxu1 %v3021_v27  ;;  %v2237_v27 = vld [vmem:[%s3170_s5 + $0x60] sm:$0xff] }
  0x30   : >> { %2554 = vmatprep.subr.bf16.mxu0 %v3022_v32  ;;  %2734 = vmatprep.subr.bf16.mxu1 %v3022_v32  ;;  %v3312_v30 = vpack.c.bf16 %v2238_v28, %v2237_v27  ;;  %v2330_v28 = vld [vmem:[%s3170_s5 + $0x7a] sm:$0xff] }
  0x32   : >> { %2551 = vmatmul.mubr.bf16.vlgmr.msra.gmra.mrb[0].mxu0 %v230_v36  ;;  %2731 = vmatmul.mubr.bf16.vlgmr.msra.gmra.mrb[0].mxu1 %v3204_v37  ;;  %v3049_v36 = vld [vmem:[%s3500_s1 + $0x118] sm:$0xff]  }
  0x33   : >> { %2555 = vmatpush3.bf16.msra.mxu0 %v3022_v32  ;;  %2735 = vmatpush3.bf16.msra.mxu1 %v3022_v32  ;;  %v2264_v32 = vld [vmem:[%s3170_s5 + $0x59] sm:$0xff] }
  0x34   : >> { %2556 = vmatprep.subr.bf16.mxu0 %v3023_v39  ;;  %2736 = vmatprep.subr.bf16.mxu1 %v3023_v39  ;;  %v3319_v34 = vpack.c.bf16 %v2264_v32, %v2263_v31  ;;  %v3080_v32 = vld [vmem:[%s3500_s1 + $0x210] sm:$0xff]  }
  0x35   : >> { %2570 = vmatprep.mubr.bf16.mxu0 %v207_v40  ;;  %2750 = vmatprep.mubr.bf16.mxu1 %v3210_v41  ;;  %v3053_v40 = vld [vmem:[%s3500_s1 + $0x138] sm:$0xff]  }
  0x37   : >> { %2557 = vmatpush3.bf16.msra.mxu0 %v3023_v39  ;;  %2737 = vmatpush3.bf16.msra.mxu1 %v3023_v39  ;;  %v3052_v39 = vld [vmem:[%s3500_s1 + $0x130] sm:$0xff]  }
  0x38   : >> { %2558 = vmatprep.subr.bf16.mxu0 %v3024_v42  ;;  %2738 = vmatprep.subr.bf16.mxu1 %v3024_v42 }
  0x3b   : >> { %2559 = vmatpush3.bf16.msra.mxu0 %v3024_v42  ;;  %2739 = vmatpush3.bf16.msra.mxu1 %v3024_v42  ;;  %v2266_v42 = vld [vmem:[%s3170_s5 + $0x69] sm:$0xff] }
  0x3c   : >> { %2560 = vmatprep.subr.bf16.mxu0 %v3025_v43  ;;  %2740 = vmatprep.subr.bf16.mxu1 %v3025_v43 }
  0x3f   : >> { %2561 = vmatpush3.bf16.msra.mxu0 %v3025_v43  ;;  %2741 = vmatpush3.bf16.msra.mxu1 %v3025_v43  ;;  %v3054_v43 = vld [vmem:[%s3500_s1 + $0x140] sm:$0xff]  }
  0x40   : >> { %2562 = vmatprep.subr.bf16.mxu0 %v3026_v44  ;;  %2742 = vmatprep.subr.bf16.mxu1 %v3026_v44 }
  0x43   : >> { %2563 = vmatpush3.bf16.msra.mxu0 %v3026_v44  ;;  %2743 = vmatpush3.bf16.msra.mxu1 %v3026_v44 }
  0x44   : >> { %2564 = vmatprep.subr.bf16.mxu0 %v3027_v45  ;;  %2744 = vmatprep.subr.bf16.mxu1 %v3027_v45 }
  0x47   : >> { %2565 = vmatpush3.bf16.msra.mxu0 %v3027_v45  ;;  %2745 = vmatpush3.bf16.msra.mxu1 %v3027_v45  ;;  %v2291_v45 = vld [vmem:[%s3170_s5 + $0x52] sm:$0xff] }
  0x48   : >> { %2566 = vmatprep.subr.bf16.mxu0 %v3028_v46  ;;  %2746 = vmatprep.subr.bf16.mxu1 %v3028_v46 }
  0x4b   : >> { %2567 = vmatpush3.bf16.msra.mxu0 %v3028_v46  ;;  %2747 = vmatpush3.bf16.msra.mxu1 %v3028_v46  ;;  %v2292_v46 = vld [vmem:[%s3170_s5 + $0x5a] sm:$0xff] }
  0x4c   : >> { %2568 = vmatprep.subr.bf16.mxu0 %v3029_v47  ;;  %2748 = vmatprep.subr.bf16.mxu1 %v3029_v47  ;;  %v3355_v48 = vpack.c.bf16 %v2292_v46, %v2291_v45 }
  0x4f   : >> { %2569 = vmatpush3.bf16.msra.mxu0 %v3029_v47  ;;  %2749 = vmatpush3.bf16.msra.mxu1 %v3029_v47  ;;  %v3055_v47 = vld [vmem:[%s3500_s1 + $0x148] sm:$0xff]  }
  0x50   : >> { %2574 = vmatprep.subr.bf16.mxu0 %v3030_v51  ;;  %2754 = vmatprep.subr.bf16.mxu1 %v3030_v51 }
  0x52   : >> { %2571 = vmatmul.mubr.bf16.vlgmr.msra.gmra.mrb[0].mxu0 %v208_v57  ;;  %2751 = vmatmul.mubr.bf16.vlgmr.msra.gmra.mrb[0].mxu1 %v3243_v58  ;;  %v3384_v57 = vpack.c.bf16 %v2294_v55, %v2293_v54 }
  0x53   : >> { %2575 = vmatpush3.bf16.msra.mxu0 %v3030_v51  ;;  %2755 = vmatpush3.bf16.msra.mxu1 %v3030_v51  ;;  %v3059_v51 = vld [vmem:[%s3500_s1 + $0x168] sm:$0xff]  }
  0x54   : >> { %2576 = vmatprep.subr.bf16.mxu0 %v3031_v59  ;;  %2756 = vmatprep.subr.bf16.mxu1 %v3031_v59 }
  0x55   : >> { %2590 = vmatprep.mubr.bf16.mxu0 %v446_v60  ;;  %2770 = vmatprep.mubr.bf16.mxu1 %v3248_v61  ;;  %v3063_v60 = vld [vmem:[%s3500_s1 + $0x188] sm:$0xff]  }
  0x57   : >> { %2577 = vmatpush3.bf16.msra.mxu0 %v3031_v59  ;;  %2757 = vmatpush3.bf16.msra.mxu1 %v3031_v59  ;;  %v2323_v59 = vld [vmem:[%s3170_s5 + $0x80] sm:$0xff] }
  0x58   : >> { %2578 = vmatprep.subr.bf16.mxu0 %v3032_v62  ;;  %2758 = vmatprep.subr.bf16.mxu1 %v3032_v62 }
  0x5b   : >> { %2579 = vmatpush3.bf16.msra.mxu0 %v3032_v62  ;;  %2759 = vmatpush3.bf16.msra.mxu1 %v3032_v62  ;;  %v3064_v62 = vld [vmem:[%s3500_s1 + $0x190] sm:$0xff]  }
  0x5c   : >> { %2580 = vmatprep.subr.bf16.mxu0 %v3033_v63  ;;  %2760 = vmatprep.subr.bf16.mxu1 %v3033_v63 }
  0x5f   : >> { %2581 = vmatpush3.bf16.msra.mxu0 %v3033_v63  ;;  %2761 = vmatpush3.bf16.msra.mxu1 %v3033_v63  ;;  %v3065_v63 = vld [vmem:[%s3500_s1 + $0x198] sm:$0xff]  }
  0x60   : >> { %2582 = vmatprep.subr.bf16.mxu0 %v3034_v1  ;;  %2762 = vmatprep.subr.bf16.mxu1 %v3034_v1 }
  0x63   : >> { %2583 = vmatpush3.bf16.msra.mxu0 %v3034_v1  ;;  %2763 = vmatpush3.bf16.msra.mxu1 %v3034_v1  ;;  %v3066_v1 = vld [vmem:[%s3500_s1 + $0x1a0] sm:$0xff]  }
  0x64   : >> { %2584 = vmatprep.subr.bf16.mxu0 %v3035_v2  ;;  %2764 = vmatprep.subr.bf16.mxu1 %v3035_v2 }
  0x67   : >> { %2585 = vmatpush3.bf16.msra.mxu0 %v3035_v2  ;;  %2765 = vmatpush3.bf16.msra.mxu1 %v3035_v2  ;;  %v3067_v2 = vld [vmem:[%s3500_s1 + $0x1a8] sm:$0xff]  }
  0x68   : >> { %2586 = vmatprep.subr.bf16.mxu0 %v3036_v3  ;;  %2766 = vmatprep.subr.bf16.mxu1 %v3036_v3 }
  0x6b   : >> { %2587 = vmatpush3.bf16.msra.mxu0 %v3036_v3  ;;  %2767 = vmatpush3.bf16.msra.mxu1 %v3036_v3  ;;  %v3068_v3 = vld [vmem:[%s3500_s1 + $0x1b0] sm:$0xff]  }
  0x6c   : >> { %2588 = vmatprep.subr.bf16.mxu0 %v3037_v4  ;;  %2768 = vmatprep.subr.bf16.mxu1 %v3037_v4 }
  0x6f   : >> { %2589 = vmatpush3.bf16.msra.mxu0 %v3037_v4  ;;  %2769 = vmatpush3.bf16.msra.mxu1 %v3037_v4  ;;  %v3069_v4 = vld [vmem:[%s3500_s1 + $0x1b8] sm:$0xff]  }
  0x70   : >> { %2594 = vmatprep.subr.bf16.mxu0 %v3038_v10  ;;  %2774 = vmatprep.subr.bf16.mxu1 %v3038_v10 }
  0x72   : >> { %2591 = vmatmul.mubr.bf16.vlgmr.msra.gmra.mrb[0].mxu0 %v447_v14  ;;  %2771 = vmatmul.mubr.bf16.vlgmr.msra.gmra.mrb[0].mxu1 %v3277_v15  ;;  %v2327_v14 = vld [vmem:[%s3170_s5 + $0x81] sm:$0xff] }
  0x73   : >> { %2595 = vmatpush3.bf16.msra.mxu0 %v3038_v10  ;;  %2775 = vmatpush3.bf16.msra.mxu1 %v3038_v10  ;;  %v2326_v10 = vld [vmem:[%s3170_s5 + $0x79] sm:$0xff] }
  0x74   : >> { %2596 = vmatprep.subr.bf16.mxu0 %v3039_v18  ;;  %2776 = vmatprep.subr.bf16.mxu1 %v3039_v18  ;;  %v1706_v16 = vpack.c.bf16 %v2327_v14, %v2326_v10 }
  0x75   : >> { %2610 = vmatprep.mubr.bf16.mxu0 %v3210_v41  ;;  %2790 = vmatprep.mubr.bf16.mxu1 %v3284_v19  ;;  %v2265_v41 = vld [vmem:[%s3170_s5 + $0x61] sm:$0xff] }
  0x76   : >> { %v3348_v44 = vpack.c.bf16 %v2266_v42, %v2265_v41 }
  0x77   : >> { %2597 = vmatpush3.bf16.msra.mxu0 %v3039_v18  ;;  %2777 = vmatpush3.bf16.msra.mxu1 %v3039_v18  ;;  %v3073_v18 = vld [vmem:[%s3500_s1 + $0x1d8] sm:$0xff]  }
  0x78   : >> { %2598 = vmatprep.subr.bf16.mxu0 %v3040_v20  ;;  %2778 = vmatprep.subr.bf16.mxu1 %v3040_v20 }
  0x7b   : >> { %2599 = vmatpush3.bf16.msra.mxu0 %v3040_v20  ;;  %2779 = vmatpush3.bf16.msra.mxu1 %v3040_v20  ;;  %v3075_v20 = vld [vmem:[%s3500_s1 + $0x1e8] sm:$0xff]  }
  0x7c   : >> { %2600 = vmatprep.subr.bf16.mxu0 %v3041_v21  ;;  %2780 = vmatprep.subr.bf16.mxu1 %v3041_v21 }
  0x7f   : >> { %2601 = vmatpush3.bf16.msra.mxu0 %v3041_v21  ;;  %2781 = vmatpush3.bf16.msra.mxu1 %v3041_v21  ;;  %v3076_v21 = vld [vmem:[%s3500_s1 + $0x1f0] sm:$0xff]  }
  0x80   : >> { %2602 = vmatprep.subr.bf16.mxu0 %v3042_v22  ;;  %2782 = vmatprep.subr.bf16.mxu1 %v3042_v22 }
  0x83   : >> { %2603 = vmatpush3.bf16.msra.mxu0 %v3042_v22  ;;  %2783 = vmatpush3.bf16.msra.mxu1 %v3042_v22  ;;  %v3077_v22 = vld [vmem:[%s3500_s1 + $0x1f8] sm:$0xff]  }
  0x84   : >> { %2604 = vmatprep.subr.bf16.mxu0 %v3043_v24  ;;  %2784 = vmatprep.subr.bf16.mxu1 %v3043_v24 }
  0x87   : >> { %2605 = vmatpush3.bf16.msra.mxu0 %v3043_v24  ;;  %2785 = vmatpush3.bf16.msra.mxu1 %v3043_v24  ;;  %v2328_v24 = vld [vmem:[%s3170_s5 + $0x89] sm:$0xff] }
  0x88   : >> { %2606 = vmatprep.subr.bf16.mxu0 %v3044_v25  ;;  %2786 = vmatprep.subr.bf16.mxu1 %v3044_v25 }
  0x8b   : >> { %2607 = vmatpush3.bf16.msra.mxu0 %v3044_v25  ;;  %2787 = vmatpush3.bf16.msra.mxu1 %v3044_v25  ;;  %v2329_v25 = vld [vmem:[%s3170_s5 + $0x91] sm:$0xff] }
  0x8c   : >> { %2608 = vmatprep.subr.bf16.mxu0 %v3045_v26  ;;  %2788 = vmatprep.subr.bf16.mxu1 %v3045_v26  ;;  %v1707_v27 = vpack.c.bf16 %v2329_v25, %v2328_v24 }
  0x8f   : >> { %2609 = vmatpush3.bf16.msra.mxu0 %v3045_v26  ;;  %2789 = vmatpush3.bf16.msra.mxu1 %v3045_v26  ;;  %v3078_v26 = vld [vmem:[%s3500_s1 + $0x200] sm:$0xff]  }
  0x90   : >> { %2614 = vmatprep.subr.bf16.mxu0 %v3046_v29  ;;  %2794 = vmatprep.subr.bf16.mxu1 %v3046_v29 }
  0x92   : >> { %2611 = vmatmul.mubr.bf16.vlgmr.msra.gmra.mrb[0].mxu0 %v3243_v58  ;;  %2791 = vmatmul.mubr.bf16.vlgmr.msra.gmra.mrb[0].mxu1 %v3312_v30  ;;  %v2322_v58 = vld [vmem:[%s3170_s5 + $0x78] sm:$0xff] }
  0x93   : >> { %2615 = vmatpush3.bf16.msra.mxu0 %v3046_v29  ;;  %2795 = vmatpush3.bf16.msra.mxu1 %v3046_v29  ;;  %v2331_v29 = vld [vmem:[%s3170_s5 + $0x82] sm:$0xff] }
  0x94   : >> { %2616 = vmatprep.subr.bf16.mxu0 %v3047_v33  ;;  %2796 = vmatprep.subr.bf16.mxu1 %v3047_v33  ;;  %v1765_v31 = vpack.c.bf16 %v2331_v29, %v2330_v28 }
  0x95   : >> { %2630 = vmatprep.mubr.bf16.mxu0 %v3179_v23  ;;  %2810 = vmatprep.mubr.bf16.mxu1 %v3319_v34  ;;  %v3051_v23 = vld [vmem:[%s3500_s1 + $0x128] sm:$0xff]  }
  0x97   : >> { %2617 = vmatpush3.bf16.msra.mxu0 %v3047_v33  ;;  %2797 = vmatpush3.bf16.msra.mxu1 %v3047_v33  ;;  %v3081_v33 = vld [vmem:[%s3500_s1 + $0x218] sm:$0xff]  }
  0x98   : >> { %2618 = vmatprep.subr.bf16.mxu0 %v3048_v35  ;;  %2798 = vmatprep.subr.bf16.mxu1 %v3048_v35 }
  0x9b   : >> { %2619 = vmatpush3.bf16.msra.mxu0 %v3048_v35  ;;  %2799 = vmatpush3.bf16.msra.mxu1 %v3048_v35  ;;  %v3083_v35 = vld [vmem:[%s3500_s1 + $0x228] sm:$0xff]  }
  0x9c   : >> { %2620 = vmatprep.subr.bf16.mxu0 %v3049_v36  ;;  %2800 = vmatprep.subr.bf16.mxu1 %v3049_v36 }
  0x9f   : >> { %2621 = vmatpush3.bf16.msra.mxu0 %v3049_v36  ;;  %2801 = vmatpush3.bf16.msra.mxu1 %v3049_v36  ;;  %v3084_v36 = vld [vmem:[%s3500_s1 + $0x230] sm:$0xff]  }
  0xa0   : >> { %2622 = vmatprep.subr.bf16.mxu0 %v3050_v38  ;;  %2802 = vmatprep.subr.bf16.mxu1 %v3050_v38 }
  0xa3   : >> { %2623 = vmatpush3.bf16.msra.mxu0 %v3050_v38  ;;  %2803 = vmatpush3.bf16.msra.mxu1 %v3050_v38  ;;  %v3085_v38 = vld [vmem:[%s3500_s1 + $0x238] sm:$0xff]  }
  0xa4   : >> { %2624 = vmatprep.subr.bf16.mxu0 %v3051_v23  ;;  %2804 = vmatprep.subr.bf16.mxu1 %v3051_v23 }
  0xa7   : >> { %2625 = vmatpush3.bf16.msra.mxu0 %v3051_v23  ;;  %2805 = vmatpush3.bf16.msra.mxu1 %v3051_v23  ;;  %v2332_v23 = vld [vmem:[%s3170_s5 + $0x8a] sm:$0xff] }
  0xa8   : >> { %2626 = vmatprep.subr.bf16.mxu0 %v3052_v39  ;;  %2806 = vmatprep.subr.bf16.mxu1 %v3052_v39 }
  0xab   : >> { %2627 = vmatpush3.bf16.msra.mxu0 %v3052_v39  ;;  %2807 = vmatpush3.bf16.msra.mxu1 %v3052_v39  ;;  %v2333_v39 = vld [vmem:[%s3170_s5 + $0x92] sm:$0xff]  ;;  %s2338_s5 = sshll.u32 %s3100_s24, 4  ;;  %s199_s24 = sadd.s32 1, %s3100_s24  }
  0xac   : >> { %2628 = vmatprep.subr.bf16.mxu0 %v3053_v40  ;;  %2808 = vmatprep.subr.bf16.mxu1 %v3053_v40  ;;  %s1998_s13 = scalar_lea.vmem %s3139_s20, %s2338_s5  ;;  %p196_p4 = scmp.ge.s32.totalorder %s199_s24, 16  }
  0xaf   : >> { %2629 = vmatpush3.bf16.msra.mxu0 %v3053_v40  ;;  %2809 = vmatpush3.bf16.msra.mxu1 %v3053_v40  ;;  %v1766_v40 = vpack.c.bf16 %v2333_v39, %v2332_v23 }
  0xb0   : >> { %2634 = vmatprep.subr.bf16.mxu0 %v3054_v43  ;;  %2814 = vmatprep.subr.bf16.mxu1 %v3054_v43 }
  0xb2   : >> { %2631 = vmatmul.mubr.bf16.vlgmr.msra.gmra.mrb[0].mxu0 %v3204_v37  ;;  %2811 = vmatmul.mubr.bf16.vlgmr.msra.gmra.mrb[0].mxu1 %v3348_v44  ;;  %v3057_v37 = vld [vmem:[%s3500_s1 + $0x158] sm:$0xff]  }
  0xb3   : >> { %2635 = vmatpush3.bf16.msra.mxu0 %v3054_v43  ;;  %2815 = vmatpush3.bf16.msra.mxu1 %v3054_v43 }
  0xb4   : >> { %2636 = vmatprep.subr.bf16.mxu0 %v3055_v47  ;;  %2816 = vmatprep.subr.bf16.mxu1 %v3055_v47 }
  0xb5   : >> { %2650 = vmatprep.mubr.bf16.mxu0 %v3248_v61  ;;  %2830 = vmatprep.mubr.bf16.mxu1 %v3355_v48  ;;  %v1647_v61 = vpack.c.bf16 %v2323_v59, %v2322_v58 }
  0xb7   : >> { %2637 = vmatpush3.bf16.msra.mxu0 %v3055_v47  ;;  %2817 = vmatpush3.bf16.msra.mxu1 %v3055_v47 }
  0xb8   : >> { %2638 = vmatprep.subr.bf16.mxu0 %v3056_v49  ;;  %2818 = vmatprep.subr.bf16.mxu1 %v3056_v49 }
  0xbb   : >> { %2639 = vmatpush3.bf16.msra.mxu0 %v3056_v49  ;;  %2819 = vmatpush3.bf16.msra.mxu1 %v3056_v49 }
  0xbc   : >> { %2640 = vmatprep.subr.bf16.mxu0 %v3057_v37  ;;  %2820 = vmatprep.subr.bf16.mxu1 %v3057_v37 }
  0xbf   : >> { %2641 = vmatpush3.bf16.msra.mxu0 %v3057_v37  ;;  %2821 = vmatpush3.bf16.msra.mxu1 %v3057_v37 }
  0xc0   : >> { %2642 = vmatprep.subr.bf16.mxu0 %v3058_v50  ;;  %2822 = vmatprep.subr.bf16.mxu1 %v3058_v50 }
  0xc3   : >> { %2643 = vmatpush3.bf16.msra.mxu0 %v3058_v50  ;;  %2823 = vmatpush3.bf16.msra.mxu1 %v3058_v50 }
  0xc4   : >> { %2644 = vmatprep.subr.bf16.mxu0 %v3059_v51  ;;  %2824 = vmatprep.subr.bf16.mxu1 %v3059_v51 }
  0xc7   : >> { %2645 = vmatpush3.bf16.msra.mxu0 %v3059_v51  ;;  %2825 = vmatpush3.bf16.msra.mxu1 %v3059_v51 }
  0xc8   : >> { %2646 = vmatprep.subr.bf16.mxu0 %v3060_v52  ;;  %2826 = vmatprep.subr.bf16.mxu1 %v3060_v52 }
  0xcb   : >> { %2647 = vmatpush3.bf16.msra.mxu0 %v3060_v52  ;;  %2827 = vmatpush3.bf16.msra.mxu1 %v3060_v52 }
  0xcc   : >> { %2648 = vmatprep.subr.bf16.mxu0 %v3061_v53  ;;  %2828 = vmatprep.subr.bf16.mxu1 %v3061_v53 }
  0xcf   : >> { %2649 = vmatpush3.bf16.msra.mxu0 %v3061_v53  ;;  %2829 = vmatpush3.bf16.msra.mxu1 %v3061_v53 }
  0xd0   : >> { %2654 = vmatprep.subr.bf16.mxu0 %v3062_v56  ;;  %2834 = vmatprep.subr.bf16.mxu1 %v3062_v56 }
  0xd2   : >> { %2651 = vmatmul.mubr.bf16.vlgmr.msra.gmra.mrb[0].mxu0 %v3277_v15  ;;  %2831 = vmatmul.mubr.bf16.vlgmr.msra.gmra.mrb[0].mxu1 %v3384_v57  ;;  %v3071_v15 = vld [vmem:[%s3500_s1 + $0x1c8] sm:$0xff]  }
  0xd3   : >> { %2655 = vmatpush3.bf16.msra.mxu0 %v3062_v56  ;;  %2835 = vmatpush3.bf16.msra.mxu1 %v3062_v56 }
  0xd4   : >> { %2656 = vmatprep.subr.bf16.mxu0 %v3063_v60  ;;  %2836 = vmatprep.subr.bf16.mxu1 %v3063_v60 }
  0xd5   : >> { %2670 = vmatprep.mubr.bf16.mxu0 %v3284_v19  ;;  %2850 = vmatprep.mubr.bf16.mxu1 %v1647_v61  ;;  %v3074_v19 = vld [vmem:[%s3500_s1 + $0x1e0] sm:$0xff]  }
  0xd7   : >> { %2657 = vmatpush3.bf16.msra.mxu0 %v3063_v60  ;;  %2837 = vmatpush3.bf16.msra.mxu1 %v3063_v60 }
  0xd8   : >> { %2658 = vmatprep.subr.bf16.mxu0 %v3064_v62  ;;  %2838 = vmatprep.subr.bf16.mxu1 %v3064_v62 }
  0xdb   : >> { %2659 = vmatpush3.bf16.msra.mxu0 %v3064_v62  ;;  %2839 = vmatpush3.bf16.msra.mxu1 %v3064_v62 }
  0xdc   : >> { %2660 = vmatprep.subr.bf16.mxu0 %v3065_v63  ;;  %2840 = vmatprep.subr.bf16.mxu1 %v3065_v63 }
  0xdf   : >> { %2661 = vmatpush3.bf16.msra.mxu0 %v3065_v63  ;;  %2841 = vmatpush3.bf16.msra.mxu1 %v3065_v63 }
  0xe0   : >> { %2662 = vmatprep.subr.bf16.mxu0 %v3066_v1  ;;  %2842 = vmatprep.subr.bf16.mxu1 %v3066_v1 }
  0xe3   : >> { %2663 = vmatpush3.bf16.msra.mxu0 %v3066_v1  ;;  %2843 = vmatpush3.bf16.msra.mxu1 %v3066_v1 }
  0xe4   : >> { %2664 = vmatprep.subr.bf16.mxu0 %v3067_v2  ;;  %2844 = vmatprep.subr.bf16.mxu1 %v3067_v2 }
  0xe7   : >> { %2665 = vmatpush3.bf16.msra.mxu0 %v3067_v2  ;;  %2845 = vmatpush3.bf16.msra.mxu1 %v3067_v2 }
  0xe8   : >> { %2666 = vmatprep.subr.bf16.mxu0 %v3068_v3  ;;  %2846 = vmatprep.subr.bf16.mxu1 %v3068_v3 }
  0xeb   : >> { %2667 = vmatpush3.bf16.msra.mxu0 %v3068_v3  ;;  %2847 = vmatpush3.bf16.msra.mxu1 %v3068_v3 }
  0xec   : >> { %2668 = vmatprep.subr.bf16.mxu0 %v3069_v4  ;;  %2848 = vmatprep.subr.bf16.mxu1 %v3069_v4 }
  0xef   : >> { %2669 = vmatpush3.bf16.msra.mxu0 %v3069_v4  ;;  %2849 = vmatpush3.bf16.msra.mxu1 %v3069_v4 }
  0xf0   : >> { %2674 = vmatprep.subr.bf16.mxu0 %v3070_v7  ;;  %2854 = vmatprep.subr.bf16.mxu1 %v3070_v7 }
  0xf2   : >> { %2671 = vmatmul.mubr.bf16.vlgmr.msra.gmra.mrb[0].mxu0 %v3312_v30  ;;  %2851 = vmatmul.mubr.bf16.vlgmr.msra.gmra.mrb[0].mxu1 %v1648_v8  ;;  %v3079_v30 = vld [vmem:[%s3500_s1 + $0x208] sm:$0xff]  }
  0xf3   : >> { %2675 = vmatpush3.bf16.msra.mxu0 %v3070_v7  ;;  %2855 = vmatpush3.bf16.msra.mxu1 %v3070_v7 }
  0xf4   : >> { %2676 = vmatprep.subr.bf16.mxu0 %v3071_v15  ;;  %2856 = vmatprep.subr.bf16.mxu1 %v3071_v15 }
  0xf5   : >> { %2690 = vmatprep.mubr.bf16.mxu0 %v3319_v34  ;;  %2870 = vmatprep.mubr.bf16.mxu1 %v1706_v16  ;;  %v3082_v34 = vld [vmem:[%s3500_s1 + $0x220] sm:$0xff]  }
  0xf7   : >> { %2677 = vmatpush3.bf16.msra.mxu0 %v3071_v15  ;;  %2857 = vmatpush3.bf16.msra.mxu1 %v3071_v15 }
  0xf8   : >> { %2678 = vmatprep.subr.bf16.mxu0 %v3072_v17  ;;  %2858 = vmatprep.subr.bf16.mxu1 %v3072_v17 }
  0xfb   : >> { %2679 = vmatpush3.bf16.msra.mxu0 %v3072_v17  ;;  %2859 = vmatpush3.bf16.msra.mxu1 %v3072_v17 }
  0xfc   : >> { %2680 = vmatprep.subr.bf16.mxu0 %v3073_v18  ;;  %2860 = vmatprep.subr.bf16.mxu1 %v3073_v18 }
  0xff   : >> { %2681 = vmatpush3.bf16.msra.mxu0 %v3073_v18  ;;  %2861 = vmatpush3.bf16.msra.mxu1 %v3073_v18 }
 0x100   : >> { %2682 = vmatprep.subr.bf16.mxu0 %v3074_v19  ;;  %2862 = vmatprep.subr.bf16.mxu1 %v3074_v19 }
 0x103   : >> { %2683 = vmatpush3.bf16.msra.mxu0 %v3074_v19  ;;  %2863 = vmatpush3.bf16.msra.mxu1 %v3074_v19 }
 0x104   : >> { %2684 = vmatprep.subr.bf16.mxu0 %v3075_v20  ;;  %2864 = vmatprep.subr.bf16.mxu1 %v3075_v20 }
 0x107   : >> { %2685 = vmatpush3.bf16.msra.mxu0 %v3075_v20  ;;  %2865 = vmatpush3.bf16.msra.mxu1 %v3075_v20 }
 0x108   : >> { %2686 = vmatprep.subr.bf16.mxu0 %v3076_v21  ;;  %2866 = vmatprep.subr.bf16.mxu1 %v3076_v21 }
 0x10b   : >> { %2687 = vmatpush3.bf16.msra.mxu0 %v3076_v21  ;;  %2867 = vmatpush3.bf16.msra.mxu1 %v3076_v21 }
 0x10c   : >> { %2688 = vmatprep.subr.bf16.mxu0 %v3077_v22  ;;  %2868 = vmatprep.subr.bf16.mxu1 %v3077_v22 }
 0x10f   : >> { %2689 = vmatpush3.bf16.msra.mxu0 %v3077_v22  ;;  %2869 = vmatpush3.bf16.msra.mxu1 %v3077_v22 }
 0x110   : >> { %2694 = vmatprep.subr.bf16.mxu0 %v3078_v26  ;;  %2874 = vmatprep.subr.bf16.mxu1 %v3078_v26 }
 0x112   : >> { %2691 = vmatmul.mubr.bf16.vlgmr.msra.gmra.mrb[0].mxu0 %v3348_v44  ;;  %2871 = vmatmul.mubr.bf16.vlgmr.msra.gmra.mrb[0].mxu1 %v1707_v27 }
 0x113   : >> { %2695 = vmatpush3.bf16.msra.mxu0 %v3078_v26  ;;  %2875 = vmatpush3.bf16.msra.mxu1 %v3078_v26 }
 0x114   : >> { %2696 = vmatprep.subr.bf16.mxu0 %v3079_v30  ;;  %2876 = vmatprep.subr.bf16.mxu1 %v3079_v30 }
 0x115   : >> { %2710 = vmatprep.mubr.bf16.mxu0 %v3355_v48  ;;  %2890 = vmatprep.mubr.bf16.mxu1 %v1765_v31 }
 0x117   : >> { %2697 = vmatpush3.bf16.msra.mxu0 %v3079_v30  ;;  %2877 = vmatpush3.bf16.msra.mxu1 %v3079_v30 }
 0x118   : >> { %2698 = vmatprep.subr.bf16.mxu0 %v3080_v32  ;;  %2878 = vmatprep.subr.bf16.mxu1 %v3080_v32 }
 0x11b   : >> { %2699 = vmatpush3.bf16.msra.mxu0 %v3080_v32  ;;  %2879 = vmatpush3.bf16.msra.mxu1 %v3080_v32 }
 0x11c   : >> { %2700 = vmatprep.subr.bf16.mxu0 %v3081_v33  ;;  %2880 = vmatprep.subr.bf16.mxu1 %v3081_v33 }
 0x11f   : >> { %2701 = vmatpush3.bf16.msra.mxu0 %v3081_v33  ;;  %2881 = vmatpush3.bf16.msra.mxu1 %v3081_v33 }
 0x120   : >> { %2702 = vmatprep.subr.bf16.mxu0 %v3082_v34  ;;  %2882 = vmatprep.subr.bf16.mxu1 %v3082_v34 }
 0x123   : >> { %2703 = vmatpush3.bf16.msra.mxu0 %v3082_v34  ;;  %2883 = vmatpush3.bf16.msra.mxu1 %v3082_v34 }
 0x124   : >> { %2704 = vmatprep.subr.bf16.mxu0 %v3083_v35  ;;  %2884 = vmatprep.subr.bf16.mxu1 %v3083_v35 }
 0x127   : >> { %2705 = vmatpush3.bf16.msra.mxu0 %v3083_v35  ;;  %2885 = vmatpush3.bf16.msra.mxu1 %v3083_v35 }
 0x128   : >> { %2706 = vmatprep.subr.bf16.mxu0 %v3084_v36  ;;  %2886 = vmatprep.subr.bf16.mxu1 %v3084_v36 }
 0x12b   : >> { %2707 = vmatpush3.bf16.msra.mxu0 %v3084_v36  ;;  %2887 = vmatpush3.bf16.msra.mxu1 %v3084_v36 }
 0x12c   : >> { %2708 = vmatprep.subr.bf16.mxu0 %v3085_v38  ;;  %2888 = vmatprep.subr.bf16.mxu1 %v3085_v38 }
 0x12f   : >> { %2709 = vmatpush3.bf16.msra.mxu0 %v3085_v38  ;;  %2889 = vmatpush3.bf16.msra.mxu1 %v3085_v38 }
 0x132   : >> { %2711 = vmatmul.mubr.bf16.vlgmr.msra.gmra.mrb[0].mxu0 %v3384_v57  ;;  %2891 = vmatmul.mubr.bf16.vlgmr.msra.gmra.mrb[0].mxu1 %v1766_v40 }
 0x133   : >> { %2902 = vmatprep.mubr.msk.f32.mxu0 %vm1832_vm4, %v3146_v9  ;;  %2913 = vmatprep.mubr.msk.f32.mxu1 %vm1832_vm4, %v3150_v12 }
 0x205   : >> { %v2712_v41 = vpop.f32.mrb[0].mxu0  ;;  %v2892_v42 = vpop.f32.mrb[0].mxu1 }
 0x206   : >> { %v1324_v43 = vadd.f32 %v2712_v41, %v3134_v0  ;;  %v1822_v44 = vadd.f32 %v2892_v42, %v3134_v0  ;;  %v1297_v45 = vpop.f32.mrb[1].mxu0  ;;  %v1801_v46 = vpop.f32.mrb[1].mxu1 }
 0x207   : >> { %v1322_v47 = vadd.f32 %v3134_v0, %v1297_v45  ;;  %v1820_v48 = vadd.f32 %v3134_v0, %v1801_v46  ;;  %v2713_v49 = vpop.f32.mrb[2].mxu0  ;;  %v2893_v37 = vpop.f32.mrb[2].mxu1 }
 0x208   : >> { %v1328_v50 = vmax.f32 %v1324_v43, 0.0  ;;  %v1826_v51 = vmax.f32 %v1822_v44, 0.0  ;;  %v1325_v52 = vadd.f32 %v2713_v49, %v3134_v0  ;;  %v1823_v53 = vadd.f32 %v2893_v37, %v3134_v0  ;;  %v1300_v54 = vpop.f32.mrb[3].mxu0  ;;  %v1804_v55 = vpop.f32.mrb[3].mxu1 }
 0x209   : >> { %v1326_v56 = vmax.f32 %v1322_v47, 0.0  ;;  %v1824_v57 = vmax.f32 %v1820_v48, 0.0  ;;  %v1323_v58 = vadd.f32 %v3134_v0, %v1300_v54  ;;  %v1821_v59 = vadd.f32 %v3134_v0, %v1804_v55 }
 0x20a   : >> { %v1830_v60 = vmax.f32 %v1328_v50, %v1826_v51  ;;  %v1329_v61 = vmax.f32 %v1325_v52, 0.0  ;;  %v1827_v62 = vmax.f32 %v1823_v53, 0.0 }
 0x20b   : >> { %v1828_v63 = vmax.f32 %v1326_v56, %v1824_v57  ;;  %v1327_v1 = vmax.f32 %v1323_v58, 0.0  ;;  %v1825_v2 = vmax.f32 %v1821_v59, 0.0 }
 0x20c   : >> { %v1831_v3 = vmax.f32 %v1329_v61, %v1827_v62 }
 0x20d   : >> { %v1829_v4 = vmax.f32 %v1327_v1, %v1825_v2 }
 0x20e   : >> { %v2920_v5 = vpack.c.bf16 %v1831_v3, %v1830_v60 }
 0x20f   : >> { %v2916_v6 = vpack.c.bf16 %v1829_v4, %v1828_v63 }
 0x211   : >> { %2917 = vmatprep.subr.bf16.mxu0 %v2916_v6  ;;  %2925 = vmatprep.subr.bf16.mxu1 %v2916_v6 }
 0x212   : >> { %2919 = vmatpush3.bf16.msra.mxu0 %v2916_v6  ;;  %2927 = vmatpush3.bf16.msra.mxu1 %v2916_v6 }
 0x213   : >> { %2921 = vmatprep.subr.bf16.mxu0 %v2920_v5  ;;  %2929 = vmatprep.subr.bf16.mxu1 %v2920_v5 }
 0x216   : >> { %2923 = vmatpush3.bf16.msra.mxu0 %v2920_v5  ;;  %2931 = vmatpush3.bf16.msra.mxu1 %v2920_v5 }
 0x219   : >> { %2903 = vmatmul.mubr.msk.f32.vlgmr.msra.gmra.mrb[4].mxu0 %vm1832_vm4, %v3148_v11  ;;  %2914 = vmatmul.mubr.msk.f32.vlgmr.msra.gmra.mrb[4].mxu1 %vm1832_vm4, %v3152_v13 }
 0x2ea   : > { %198 = sbr.rel (!%p196_p4) target bundleno = 17 (0x11), region = 82 }
 0x2ec   : >> { %v2904_v7 = vpop.f32.mrb[4].mxu0  ;;  %v2915_v8 = vpop.f32.mrb[4].mxu1 }
 0x2ed   : >> { %v1996_v10 = vmax.f32 %v2904_v7, %v2915_v8  ;;  %v1905_v14 = vpop.f32.mrb[5].mxu0  ;;  %v1986_v15 = vpop.f32.mrb[5].mxu1 }
 0x2ee   : >> { %v1995_v16 = vmax.f32 %v1905_v14, %v1986_v15 }
 0x2ef   : >> { %2000 = vst [vmem:[%s1998_s13 + $0x8] sm:$0xff] %v1996_v10 }
 0x2f0   : >> { %1999 = vst [vmem:[%s1998_s13] sm:$0xff] %v1995_v16 }
 0x2f1 PF: > { %s13_s12 = sadd.s32 1, %s3096_s12  }
 0x2f2   : > { %p10_p5 = scmp.ge.s32.totalorder %s13_s12, 4  }
 0x2f4   :  { %12 = sbr.rel (!%p10_p5) target bundleno = 1 (0x1), region = 93 }

// kernel: vgg_s_forward.7
= control target key start
LH: loop header
LB: loop body
LE: loop exit
PB: predicated region body
PF: predicated region fallthrough
CT: control target
= control target key end

     0   :  { %s2756_s12 = smov 0   ;;  %s3542_s0 = inlined_call_operand.vmem [shape: f32[2,18,18,128], index: 0, kind: input, shape index: {}]   ;;  %s3543_s1 = inlined_call_operand.vmem [shape: bf16[3,3,128,128], index: 1, kind: input, shape index: {}]   ;;  %s3544_s2 = inlined_call_operand.vmem [shape: f32[1,128], index: 2, kind: input, shape index: {}]   ;;  %s3545_s3 = inlined_call_operand.vmem [shape: f32[2,8,8,128], index: 3, kind: output, shape index: {}]  }
   0x1 LB: > { %s1832_s13 = sadd.s32 4294967295, %s2726_s12   ;;  %p1836_p0 = scmp.ge.s32.totalorder %s2726_s12, 1  ;;  %s2726_s12 = sphi %s2756_s12, %s13_s12  }
   0x2   : > { %p137_p1 = scmp.lt.s32.totalorder %s2726_s12, 3 }
   0x4   : > { %p138_p2 = pnand %p1836_p0, %p137_p1 }
   0x5   : > { %p161_p3 = scmp.lt.s32.totalorder (!%p138_p2), %s1832_s13, 1  ;;  %v2767_v0 = vld [vmem:[%s3544_s2] ss:$0 sm:$0xff] (!%p138_p2)  ;;  %v173_v1 = vlaneseq (!%p138_p2)  ;;  %v2732_v6 = vmov (!%p138_p2), 0.0   ;;  %s2783_s24 = smov (!%p138_p2), 0  }
   0x6   : > { %141 = sbr.rel (%p138_p2) target bundleno = 750 (0x2ee), region = 32  ;;  %3558 = vst [vmem:[#allocation2_spill] sm:$0xff] (!%p138_p2), %v2767_v0 }
   0x7   : > { %v174_v2 = vshrl.u32 (!%p138_p2), %v173_v1, 7  ;;  %v176_v3 = vand.u32 (!%p138_p2), 127, %v173_v1 }
   0x9   : > { %v177_v4 = vmul.u32 (!%p138_p2), 2, %v174_v2 }
   0xb   : > { %vm178_vm0 = vcmp.eq.s32.totalorder (!%p138_p2), %v176_v3, %v177_v4  ;;  %v181_v5 = vadd.s32 (!%p138_p2), 1, %v177_v4 }
   0xc   : > { %v2779_v7 = vsel (!%p138_p2), %vm178_vm0, 1.0, %v2732_v6 }
   0xd   : > { %s3587_s13 = smov (!%p161_p3, %s1832_s13), 1  ;;  %3559 = vst [vmem:[#allocation3_spill] sm:$0xff] %v2779_v7  ;;  %vm182_vm1 = vcmp.eq.s32.totalorder %v176_v3, %v181_v5 }
   0xe   : > { %s2623_s16 = smul.u32 432, %s3587_s13  ;;  %s2074_s17 = sshll.u32 %s3587_s13, 6  ;;  %v2781_v8 = vsel %vm182_vm1, 1.0, %v2732_v6 }
   0xf   : > { %s2772_s20 = scalar_lea.vmem %s3545_s3, %s2074_s17  ;;  %3560 = vst [vmem:[#allocation4_spill] sm:$0xff] %v2781_v8 }
  0x10   : > { %s2777_s23 = scalar_lea.vmem %s3542_s0, %s2623_s16 }
  0x11 LB: >> { %v2791_v9 = vld [vmem:[%s3543_s1 + $0x40] sm:$0xff]   ;;  %v2733_v10 = vmov 0.0   ;;  %v2804_v12 = vld [vmem:[%s3543_s1 + $0x48] sm:$0xff]   ;;  %vm2734_vm2 = vmmov 0   ;;  %v2822_v14 = vld [vmem:[%s3543_s1 + $0x50] sm:$0xff]   ;;  %s1843_s19 = smul.u32 48, %s2730_s24  ;;  %s2730_s24 = sphi %s2783_s24, %s190_s24  }
  0x12   : >> { %2243 = vmatprep.subr.bf16.mxu0 %v2733_v10  ;;  %2263 = vmatprep.subr.bf16.mxu1 %v2733_v10  ;;  %v2798_v11 = vld [vmem:[%s3543_s1] sm:$0xff]   ;;  %v2813_v13 = vld [vmem:[%s3543_s1 + $0x8] sm:$0xff]   ;;  %v2829_v15 = vld [vmem:[%s3543_s1 + $0x10] sm:$0xff]   ;;  %vm1605_vm3 = vcmask 130048  }
  0x13   : >> { %2244 = vmatpush3.bf16.msra.mxu0 %v2791_v9  ;;  %2259 = vmatprep.mubr.msk.bf16.mxu0 %vm2734_vm2, %v2733_v10  ;;  %v2836_v16 = vld [vmem:[%s3543_s1 + $0x58] sm:$0xff]   ;;  %v2850_v18 = vld [vmem:[%s3543_s1 + $0x60] sm:$0xff]   ;;  %v2865_v20 = vld [vmem:[%s3543_s1 + $0x68] sm:$0xff]   ;;  %s2876_s27 = scalar_lea.vmem %s2777_s23, %s1843_s19 }
  0x14   : >> { %2264 = vmatpush3.bf16.msra.mxu1 %v2798_v11  ;;  %2245 = vmatprep.subr.bf16.mxu0 %v2733_v10  ;;  %v2843_v17 = vld [vmem:[%s3543_s1 + $0x18] sm:$0xff]   ;;  %v2857_v19 = vld [vmem:[%s3543_s1 + $0x20] sm:$0xff]   ;;  %v2872_v21 = vld [vmem:[%s3543_s1 + $0x28] sm:$0xff]  }
  0x15   : >> { %2265 = vmatprep.subr.bf16.mxu1 %v2733_v10  ;;  %2279 = vmatprep.mubr.msk.bf16.mxu1 %vm2734_vm2, %v2733_v10  ;;  %v2882_v22 = vld [vmem:[%s3543_s1 + $0x70] sm:$0xff]   ;;  %v2895_v24 = vld [vmem:[%s3543_s1 + $0x78] sm:$0xff]   ;;  %v213_v25 = vld [vmem:[%s2876_s27 + $0x1] sm:$0xff] }
  0x16   : >> { %v2889_v23 = vld [vmem:[%s3543_s1 + $0x30] sm:$0xff]   ;;  %v2901_v26 = vld [vmem:[%s3543_s1 + $0x38] sm:$0xff]   ;;  %v194_v28 = vld [vmem:[%s2876_s27] sm:$0xff] }
  0x17   : >> { %2246 = vmatpush3.bf16.msra.mxu0 %v2804_v12  ;;  %v214_v27 = vld [vmem:[%s2876_s27 + $0x9] sm:$0xff]  ;;  %v2914_v32 = vld [vmem:[%s3543_s1 + $0x80] sm:$0xff]   ;;  %v2960_v38 = vld [vmem:[%s3543_s1 + $0x98] sm:$0xff]  }
  0x18   : >> { %2266 = vmatpush3.bf16.msra.mxu1 %v2813_v13  ;;  %2247 = vmatprep.subr.bf16.mxu0 %v2733_v10  ;;  %v195_v29 = vld [vmem:[%s2876_s27 + $0x8] sm:$0xff]  ;;  %v215_v30 = vpack.c.bf16 %v214_v27, %v213_v25  ;;  %v2921_v33 = vld [vmem:[%s3543_s1 + $0xc0] sm:$0xff]   ;;  %v2946_v36 = vld [vmem:[%s3543_s1 + $0x90] sm:$0xff]  }
  0x19   : >> { %2267 = vmatprep.subr.bf16.mxu1 %v2733_v10  ;;  %v196_v31 = vpack.c.bf16 %v195_v29, %v194_v28  ;;  %v2928_v34 = vld [vmem:[%s3543_s1 + $0x88] sm:$0xff]   ;;  %v2953_v37 = vld [vmem:[%s3543_s1 + $0xd0] sm:$0xff]   ;;  %v2967_v39 = vld [vmem:[%s3543_s1 + $0xd8] sm:$0xff]  }
  0x1a   : >> { %v2935_v35 = vld [vmem:[%s3543_s1 + $0xc8] sm:$0xff]   ;;  %v2974_v40 = vld [vmem:[%s3543_s1 + $0xa0] sm:$0xff]   ;;  %v3002_v44 = vld [vmem:[%s3543_s1 + $0xb0] sm:$0xff]  }
  0x1b   : >> { %2248 = vmatpush3.bf16.msra.mxu0 %v2822_v14  ;;  %v2981_v41 = vld [vmem:[%s3543_s1 + $0xe0] sm:$0xff]   ;;  %v2988_v42 = vld [vmem:[%s3543_s1 + $0xa8] sm:$0xff]   ;;  %v3009_v45 = vld [vmem:[%s3543_s1 + $0xf0] sm:$0xff]  }
  0x1c   : >> { %2268 = vmatpush3.bf16.msra.mxu1 %v2829_v15  ;;  %2249 = vmatprep.subr.bf16.mxu0 %v2733_v10  ;;  %v2995_v43 = vld [vmem:[%s3543_s1 + $0xe8] sm:$0xff]   ;;  %v3015_v46 = vld [vmem:[%s3543_s1 + $0xb8] sm:$0xff]   ;;  %v1903_v51 = vld [vmem:[%s2876_s27 + $0x20] sm:$0xff] }
  0x1d   : >> { %2269 = vmatprep.subr.bf16.mxu1 %v2733_v10  ;;  %v411_v47 = vld [vmem:[%s2876_s27 + $0x2] sm:$0xff]  ;;  %v3021_v48 = vld [vmem:[%s3543_s1 + $0xf8] sm:$0xff]   ;;  %v412_v49 = vld [vmem:[%s2876_s27 + $0xa] sm:$0xff] }
  0x1e   : >> { %v1902_v50 = vld [vmem:[%s2876_s27 + $0x18] sm:$0xff]  ;;  %v413_v52 = vpack.c.bf16 %v412_v49, %v411_v47  ;;  %v3036_v54 = vld [vmem:[%s3543_s1 + $0x100] sm:$0xff]   ;;  %v3051_v56 = vld [vmem:[%s3543_s1 + $0x108] sm:$0xff]  }
  0x1f   : >> { %2250 = vmatpush3.bf16.msra.mxu0 %v2836_v16  ;;  %v3031_v53 = vpack.c.bf16 %v1903_v51, %v1902_v50  ;;  %v3043_v55 = vld [vmem:[%s3543_s1 + $0x140] sm:$0xff]   ;;  %v3058_v57 = vld [vmem:[%s3543_s1 + $0x148] sm:$0xff]   ;;  %v3069_v58 = vld [vmem:[%s3543_s1 + $0x110] sm:$0xff]  }
  0x20   : >> { %2270 = vmatpush3.bf16.msra.mxu1 %v2843_v17  ;;  %2251 = vmatprep.subr.bf16.mxu0 %v2733_v10  ;;  %v3076_v59 = vld [vmem:[%s3543_s1 + $0x150] sm:$0xff]   ;;  %v3083_v60 = vld [vmem:[%s3543_s1 + $0x118] sm:$0xff]   ;;  %v3097_v62 = vld [vmem:[%s3543_s1 + $0x120] sm:$0xff]  }
  0x21   : >> { %2271 = vmatprep.subr.bf16.mxu1 %v2733_v10  ;;  %v3090_v61 = vld [vmem:[%s3543_s1 + $0x158] sm:$0xff]   ;;  %v3104_v63 = vld [vmem:[%s3543_s1 + $0x160] sm:$0xff]   ;;  %v3111_v1 = vld [vmem:[%s3543_s1 + $0x128] sm:$0xff]  }
  0x22   : >> { %v3118_v2 = vld [vmem:[%s3543_s1 + $0x168] sm:$0xff]   ;;  %v3125_v3 = vld [vmem:[%s3543_s1 + $0x130] sm:$0xff]   ;;  %v3139_v5 = vld [vmem:[%s3543_s1 + $0x138] sm:$0xff]  }
  0x23   : >> { %2252 = vmatpush3.bf16.msra.mxu0 %v2850_v18  ;;  %v3132_v4 = vld [vmem:[%s3543_s1 + $0x170] sm:$0xff]   ;;  %v1928_v6 = vld [vmem:[%s2876_s27 + $0x19] sm:$0xff]  ;;  %v1929_v25 = vld [vmem:[%s2876_s27 + $0x21] sm:$0xff] }
  0x24   : >> { %2272 = vmatpush3.bf16.msra.mxu1 %v2857_v19  ;;  %2253 = vmatprep.subr.bf16.mxu0 %v2733_v10  ;;  %3561 = vst [vmem:[#allocation5_spill] sm:$0xff] %v3132_v4  ;;  %v3148_v27 = vld [vmem:[%s3543_s1 + $0x178] sm:$0xff]   ;;  %v1955_v29 = vld [vmem:[%s2876_s27 + $0x22] sm:$0xff] }
  0x25   : >> { %2273 = vmatprep.subr.bf16.mxu1 %v2733_v10  ;;  %3562 = vst [vmem:[#allocation6_spill] sm:$0xff] %v3148_v27  ;;  %v1954_v28 = vld [vmem:[%s2876_s27 + $0x1a] sm:$0xff]  ;;  %v3177_v50 = vld [vmem:[%s3543_s1 + $0x188] sm:$0xff]  }
  0x26   : >> { %v3161_v47 = vld [vmem:[%s3543_s1 + $0x180] sm:$0xff]   ;;  %v3184_v51 = vld [vmem:[%s3543_s1 + $0x1c8] sm:$0xff]  }
  0x27   : >> { %2254 = vmatpush3.bf16.msra.mxu0 %v2865_v20  ;;  %v3168_v49 = vld [vmem:[%s3543_s1 + $0x1c0] sm:$0xff]   ;;  %3564 = vst [vmem:[#allocation8_spill] sm:$0xff] %v3184_v51  ;;  %v3237_v7 = vld [vmem:[%s3543_s1 + $0x1a8] sm:$0xff]  }
  0x28   : >> { %2274 = vmatpush3.bf16.msra.mxu1 %v2872_v21  ;;  %2255 = vmatprep.subr.bf16.mxu0 %v2733_v10  ;;  %3563 = vst [vmem:[#allocation7_spill] sm:$0xff] %v3168_v49  ;;  %v3230_v8 = vld [vmem:[%s3543_s1 + $0x1e0] sm:$0xff]   ;;  %3568 = vst [vmem:[#allocation12_spill] sm:$0xff] %v3237_v7  ;;  %v3244_v0 = vld [vmem:[%s3543_s1 + $0x1e8] sm:$0xff]  }
  0x29   : >> { %2275 = vmatprep.subr.bf16.mxu1 %v2733_v10  ;;  %3567 = vst [vmem:[#allocation11_spill] sm:$0xff] %v3230_v8  ;;  %3569 = vst [vmem:[#allocation13_spill] sm:$0xff] %v3244_v0 }
  0x2b   : >> { %2256 = vmatpush3.bf16.msra.mxu0 %v2882_v22 }
  0x2c   : >> { %2276 = vmatpush3.bf16.msra.mxu1 %v2889_v23  ;;  %2257 = vmatprep.subr.bf16.mxu0 %v2733_v10 }
  0x2d   : >> { %2277 = vmatprep.subr.bf16.mxu1 %v2733_v10 }
  0x2f   : >> { %2258 = vmatpush3.bf16.msra.mxu0 %v2895_v24 }
  0x30   : >> { %2278 = vmatpush3.bf16.msra.mxu1 %v2901_v26  ;;  %2283 = vmatprep.subr.bf16.mxu0 %v2733_v10 }
  0x31   : >> { %2303 = vmatprep.subr.bf16.mxu1 %v2733_v10 }
  0x32   : >> { %2260 = vmatmul.mubr.bf16.vlgmr.msra.gmra.mrb[0].mxu0 %v215_v30  ;;  %v3153_v30 = vpack.c.bf16 %v1929_v25, %v1928_v6  ;;  %v3202_v6 = vld [vmem:[%s3543_s1 + $0x1d0] sm:$0xff]   ;;  %v3209_v25 = vld [vmem:[%s3543_s1 + $0x198] sm:$0xff]  }
  0x33   : >> { %2280 = vmatmul.mubr.bf16.vlgmr.msra.gmra.mrb[0].mxu1 %v196_v31  ;;  %2284 = vmatpush3.bf16.msra.mxu0 %v2914_v32  ;;  %v3156_v31 = vpack.c.bf16 %v1955_v29, %v1954_v28  ;;  %3565 = vst [vmem:[#allocation9_spill] sm:$0xff] %v3202_v6  ;;  %v3216_v28 = vld [vmem:[%s3543_s1 + $0x1d8] sm:$0xff]   ;;  %v3223_v29 = vld [vmem:[%s3543_s1 + $0x1a0] sm:$0xff]  }
  0x34   : >> { %2304 = vmatpush3.bf16.msra.mxu1 %v2921_v33  ;;  %2285 = vmatprep.subr.bf16.mxu0 %v2733_v10  ;;  %3566 = vst [vmem:[#allocation10_spill] sm:$0xff] %v3216_v28 }
  0x35   : >> { %2305 = vmatprep.subr.bf16.mxu1 %v2733_v10  ;;  %2299 = vmatprep.mubr.msk.bf16.mxu0 %vm2734_vm2, %v2733_v10 }
  0x36   : >> { %2319 = vmatprep.mubr.msk.bf16.mxu1 %vm2734_vm2, %v2733_v10 }
  0x37   : >> { %2286 = vmatpush3.bf16.msra.mxu0 %v2928_v34 }
  0x38   : >> { %2306 = vmatpush3.bf16.msra.mxu1 %v2935_v35  ;;  %2287 = vmatprep.subr.bf16.mxu0 %v2733_v10 }
  0x39   : >> { %2307 = vmatprep.subr.bf16.mxu1 %v2733_v10 }
  0x3b   : >> { %2288 = vmatpush3.bf16.msra.mxu0 %v2946_v36 }
  0x3c   : >> { %2308 = vmatpush3.bf16.msra.mxu1 %v2953_v37  ;;  %2289 = vmatprep.subr.bf16.mxu0 %v2733_v10 }
  0x3d   : >> { %2309 = vmatprep.subr.bf16.mxu1 %v2733_v10 }
  0x3f   : >> { %2290 = vmatpush3.bf16.msra.mxu0 %v2960_v38 }
  0x40   : >> { %2310 = vmatpush3.bf16.msra.mxu1 %v2967_v39  ;;  %2291 = vmatprep.subr.bf16.mxu0 %v2733_v10 }
  0x41   : >> { %2311 = vmatprep.subr.bf16.mxu1 %v2733_v10 }
  0x43   : >> { %2292 = vmatpush3.bf16.msra.mxu0 %v2974_v40 }
  0x44   : >> { %2312 = vmatpush3.bf16.msra.mxu1 %v2981_v41  ;;  %2293 = vmatprep.subr.bf16.mxu0 %v2733_v10 }
  0x45   : >> { %2313 = vmatprep.subr.bf16.mxu1 %v2733_v10 }
  0x47   : >> { %2294 = vmatpush3.bf16.msra.mxu0 %v2988_v42 }
  0x48   : >> { %2314 = vmatpush3.bf16.msra.mxu1 %v2995_v43  ;;  %2295 = vmatprep.subr.bf16.mxu0 %v2733_v10 }
  0x49   : >> { %2315 = vmatprep.subr.bf16.mxu1 %v2733_v10 }
  0x4b   : >> { %2296 = vmatpush3.bf16.msra.mxu0 %v3002_v44 }
  0x4c   : >> { %2316 = vmatpush3.bf16.msra.mxu1 %v3009_v45  ;;  %2297 = vmatprep.subr.bf16.mxu0 %v2733_v10 }
  0x4d   : >> { %2317 = vmatprep.subr.bf16.mxu1 %v2733_v10 }
  0x4f   : >> { %2298 = vmatpush3.bf16.msra.mxu0 %v3015_v46 }
  0x50   : >> { %2318 = vmatpush3.bf16.msra.mxu1 %v3021_v48  ;;  %2323 = vmatprep.subr.bf16.mxu0 %v2733_v10 }
  0x51   : >> { %2343 = vmatprep.subr.bf16.mxu1 %v2733_v10 }
  0x52   : >> { %2300 = vmatmul.mubr.bf16.vlgmr.msra.gmra.mrb[4].mxu0 %v413_v52  ;;  %v3195_v52 = vld [vmem:[%s3543_s1 + $0x190] sm:$0xff]  }
  0x53   : >> { %2320 = vmatmul.mubr.bf16.vlgmr.msra.gmra.mrb[4].mxu1 %v3031_v53  ;;  %2324 = vmatpush3.bf16.msra.mxu0 %v3036_v54 }
  0x54   : >> { %2344 = vmatpush3.bf16.msra.mxu1 %v3043_v55  ;;  %2325 = vmatprep.subr.bf16.mxu0 %v2733_v10 }
  0x55   : >> { %2345 = vmatprep.subr.bf16.mxu1 %v2733_v10  ;;  %2339 = vmatprep.mubr.msk.bf16.mxu0 %vm2734_vm2, %v2733_v10 }
  0x56   : >> { %2359 = vmatprep.mubr.msk.bf16.mxu1 %vm2734_vm2, %v2733_v10 }
  0x57   : >> { %2326 = vmatpush3.bf16.msra.mxu0 %v3051_v56 }
  0x58   : >> { %2346 = vmatpush3.bf16.msra.mxu1 %v3058_v57  ;;  %2327 = vmatprep.subr.bf16.mxu0 %v2733_v10 }
  0x59   : >> { %2347 = vmatprep.subr.bf16.mxu1 %v2733_v10 }
  0x5b   : >> { %2328 = vmatpush3.bf16.msra.mxu0 %v3069_v58 }
  0x5c   : >> { %2348 = vmatpush3.bf16.msra.mxu1 %v3076_v59  ;;  %2329 = vmatprep.subr.bf16.mxu0 %v2733_v10 }
  0x5d   : >> { %2349 = vmatprep.subr.bf16.mxu1 %v2733_v10 }
  0x5f   : >> { %2330 = vmatpush3.bf16.msra.mxu0 %v3083_v60 }
  0x60   : >> { %2350 = vmatpush3.bf16.msra.mxu1 %v3090_v61  ;;  %2331 = vmatprep.subr.bf16.mxu0 %v2733_v10 }
  0x61   : >> { %2351 = vmatprep.subr.bf16.mxu1 %v2733_v10 }
  0x63   : >> { %2332 = vmatpush3.bf16.msra.mxu0 %v3097_v62 }
  0x64   : >> { %2352 = vmatpush3.bf16.msra.mxu1 %v3104_v63  ;;  %2333 = vmatprep.subr.bf16.mxu0 %v2733_v10 }
  0x65   : >> { %2353 = vmatprep.subr.bf16.mxu1 %v2733_v10 }
  0x67   : >> { %2334 = vmatpush3.bf16.msra.mxu0 %v3111_v1 }
  0x68   : >> { %2354 = vmatpush3.bf16.msra.mxu1 %v3118_v2  ;;  %2335 = vmatprep.subr.bf16.mxu0 %v2733_v10 }
  0x69   : >> { %2355 = vmatprep.subr.bf16.mxu1 %v2733_v10 }
  0x6b   : >> { %2336 = vmatpush3.bf16.msra.mxu0 %v3125_v3 }
  0x6c   : >> { %2356 = vmatpush3.bf16.msra.mxu1 %v3132_v4  ;;  %2337 = vmatprep.subr.bf16.mxu0 %v2733_v10  ;;  %v2009_v4 = vld [vmem:[%s2876_s27 + $0x39] sm:$0xff] }
  0x6d   : >> { %2357 = vmatprep.subr.bf16.mxu1 %v2733_v10 }
  0x6f   : >> { %2338 = vmatpush3.bf16.msra.mxu0 %v3139_v5 }
  0x70   : >> { %2358 = vmatpush3.bf16.msra.mxu1 %v3148_v27  ;;  %2363 = vmatprep.subr.bf16.mxu0 %v2733_v10  ;;  %v2008_v27 = vld [vmem:[%s2876_s27 + $0x31] sm:$0xff] }
  0x71   : >> { %2383 = vmatprep.subr.bf16.mxu1 %v2733_v10 }
  0x72   : >> { %2340 = vmatmul.mubr.bf16.vlgmr.msra.gmra.mrb[8].mxu0 %v3153_v30 }
  0x73   : >> { %2360 = vmatmul.mubr.bf16.vlgmr.msra.gmra.mrb[8].mxu1 %v3156_v31  ;;  %2364 = vmatpush3.bf16.msra.mxu0 %v3161_v47 }
  0x74   : >> { %2384 = vmatpush3.bf16.msra.mxu1 %v3168_v49  ;;  %2365 = vmatprep.subr.bf16.mxu0 %v2733_v10  ;;  %v1983_v49 = vld [vmem:[%s2876_s27 + $0x38] sm:$0xff] }
  0x75   : >> { %2385 = vmatprep.subr.bf16.mxu1 %v2733_v10  ;;  %2379 = vmatprep.mubr.msk.bf16.mxu0 %vm2734_vm2, %v2733_v10 }
  0x76   : >> { %2399 = vmatprep.mubr.msk.bf16.mxu1 %vm2734_vm2, %v2733_v10 }
  0x77   : >> { %2366 = vmatpush3.bf16.msra.mxu0 %v3177_v50 }
  0x78   : >> { %2386 = vmatpush3.bf16.msra.mxu1 %v3184_v51  ;;  %2367 = vmatprep.subr.bf16.mxu0 %v2733_v10  ;;  %v1982_v51 = vld [vmem:[%s2876_s27 + $0x30] sm:$0xff] }
  0x79   : >> { %2387 = vmatprep.subr.bf16.mxu1 %v2733_v10 }
  0x7b   : >> { %2368 = vmatpush3.bf16.msra.mxu0 %v3195_v52 }
  0x7c   : >> { %2388 = vmatpush3.bf16.msra.mxu1 %v3202_v6  ;;  %2369 = vmatprep.subr.bf16.mxu0 %v2733_v10  ;;  %v3265_v6 = vld [vmem:[%s3543_s1 + $0x1b8] sm:$0xff]  }
  0x7d   : >> { %2389 = vmatprep.subr.bf16.mxu1 %v2733_v10 }
  0x7f   : >> { %2370 = vmatpush3.bf16.msra.mxu0 %v3209_v25 }
  0x80   : >> { %2390 = vmatpush3.bf16.msra.mxu1 %v3216_v28  ;;  %2371 = vmatprep.subr.bf16.mxu0 %v2733_v10  ;;  %v3251_v28 = vld [vmem:[%s3543_s1 + $0x1b0] sm:$0xff]  }
  0x81   : >> { %2391 = vmatprep.subr.bf16.mxu1 %v2733_v10  ;;  %3570 = vst [vmem:[#allocation14_spill] sm:$0xff] %v3251_v28 }
  0x83   : >> { %2372 = vmatpush3.bf16.msra.mxu0 %v3223_v29 }
  0x84   : >> { %2392 = vmatpush3.bf16.msra.mxu1 %v3230_v8  ;;  %2373 = vmatprep.subr.bf16.mxu0 %v2733_v10  ;;  %v3258_v8 = vld [vmem:[%s3543_s1 + $0x1f0] sm:$0xff]  }
  0x85   : >> { %2393 = vmatprep.subr.bf16.mxu1 %v2733_v10  ;;  %3571 = vst [vmem:[#allocation15_spill] sm:$0xff] %v3258_v8 }
  0x87   : >> { %2374 = vmatpush3.bf16.msra.mxu0 %v3237_v7  ;;  %v3282_v7 = vpack.c.bf16 %v2009_v4, %v2008_v27  ;;  %v3298_v4 = vld [vmem:[%s3543_s1 + $0x208] sm:$0xff]   ;;  %v3311_v27 = vld [vmem:[%s3543_s1 + $0x210] sm:$0xff]  }
  0x88   : >> { %2394 = vmatpush3.bf16.msra.mxu1 %v3244_v0  ;;  %2375 = vmatprep.subr.bf16.mxu0 %v2733_v10  ;;  %v3274_v0 = vld [vmem:[%s3543_s1 + $0x1f8] sm:$0xff]  }
  0x89   : >> { %2395 = vmatprep.subr.bf16.mxu1 %v2733_v10 }
  0x8b   : >> { %2376 = vmatpush3.bf16.msra.mxu0 %v3251_v28  ;;  %v3279_v28 = vpack.c.bf16 %v1983_v49, %v1982_v51  ;;  %v2034_v49 = vld [vmem:[%s2876_s27 + $0x32] sm:$0xff]  ;;  %v2035_v51 = vld [vmem:[%s2876_s27 + $0x3a] sm:$0xff] }
  0x8c   : >> { %2396 = vmatpush3.bf16.msra.mxu1 %v3258_v8  ;;  %2377 = vmatprep.subr.bf16.mxu0 %v2733_v10  ;;  %v3287_v8 = vld [vmem:[%s3543_s1 + $0x200] sm:$0xff]  }
  0x8d   : >> { %2397 = vmatprep.subr.bf16.mxu1 %v2733_v10 }
  0x8f   : >> { %2378 = vmatpush3.bf16.msra.mxu0 %v3265_v6 }
  0x90   : >> { %2398 = vmatpush3.bf16.msra.mxu1 %v3274_v0  ;;  %2403 = vmatprep.subr.bf16.mxu0 %v2733_v10 }
  0x91   : >> { %2423 = vmatprep.subr.bf16.mxu1 %v2733_v10 }
  0x92   : >> { %2380 = vmatmul.mubr.bf16.vlgmr.msra.gmra.mrb[12].mxu0 %v3279_v28 }
  0x93   : >> { %2400 = vmatmul.mubr.bf16.vlgmr.msra.gmra.mrb[12].mxu1 %v3282_v7  ;;  %2404 = vmatpush3.bf16.msra.mxu0 %v3287_v8 }
  0x94   : >> { %2424 = vmatpush3.bf16.msra.mxu1 %v2791_v9  ;;  %2405 = vmatprep.subr.bf16.mxu0 %v2733_v10  ;;  %v3320_v9 = vld [vmem:[%s3543_s1 + $0x218] sm:$0xff]  }
  0x95   : >> { %2425 = vmatprep.subr.bf16.mxu1 %v2733_v10  ;;  %2419 = vmatprep.mubr.msk.bf16.mxu0 %vm2734_vm2, %v2733_v10 }
  0x96   : >> { %2439 = vmatprep.mubr.msk.bf16.mxu1 %vm2734_vm2, %v2733_v10 }
  0x97   : >> { %2406 = vmatpush3.bf16.msra.mxu0 %v3298_v4 }
  0x98   : >> { %2426 = vmatpush3.bf16.msra.mxu1 %v2804_v12  ;;  %2407 = vmatprep.subr.bf16.mxu0 %v2733_v10  ;;  %v3329_v12 = vld [vmem:[%s3543_s1 + $0x220] sm:$0xff]  }
  0x99   : >> { %2427 = vmatprep.subr.bf16.mxu1 %v2733_v10 }
  0x9b   : >> { %2408 = vmatpush3.bf16.msra.mxu0 %v3311_v27 }
  0x9c   : >> { %2428 = vmatpush3.bf16.msra.mxu1 %v2822_v14  ;;  %2409 = vmatprep.subr.bf16.mxu0 %v2733_v10  ;;  %v3338_v14 = vld [vmem:[%s3543_s1 + $0x228] sm:$0xff]  }
  0x9d   : >> { %2429 = vmatprep.subr.bf16.mxu1 %v2733_v10 }
  0x9f   : >> { %2410 = vmatpush3.bf16.msra.mxu0 %v3320_v9 }
  0xa0   : >> { %2430 = vmatpush3.bf16.msra.mxu1 %v2836_v16  ;;  %2411 = vmatprep.subr.bf16.mxu0 %v2733_v10  ;;  %v3347_v16 = vld [vmem:[%s3543_s1 + $0x230] sm:$0xff]  }
  0xa1   : >> { %2431 = vmatprep.subr.bf16.mxu1 %v2733_v10 }
  0xa3   : >> { %2412 = vmatpush3.bf16.msra.mxu0 %v3329_v12 }
  0xa4   : >> { %2432 = vmatpush3.bf16.msra.mxu1 %v2850_v18  ;;  %2413 = vmatprep.subr.bf16.mxu0 %v2733_v10  ;;  %v3356_v18 = vld [vmem:[%s3543_s1 + $0x238] sm:$0xff]  }
  0xa5   : >> { %2433 = vmatprep.subr.bf16.mxu1 %v2733_v10 }
  0xa7   : >> { %2414 = vmatpush3.bf16.msra.mxu0 %v3338_v14 }
  0xa8   : >> { %2434 = vmatpush3.bf16.msra.mxu1 %v2865_v20  ;;  %2415 = vmatprep.subr.bf16.mxu0 %v2733_v10  ;;  %v3363_v20 = vpack.c.bf16 %v2035_v51, %v2034_v49 }
  0xa9   : >> { %2435 = vmatprep.subr.bf16.mxu1 %v2733_v10 }
  0xab   : >> { %2416 = vmatpush3.bf16.msra.mxu0 %v3347_v16 }
  0xac   : >> { %2436 = vmatpush3.bf16.msra.mxu1 %v2882_v22  ;;  %2417 = vmatprep.subr.bf16.mxu0 %v2733_v10  ;;  %v3572_v22 = vld [vmem:[#allocation12_spill] sm:$0xff] }
  0xad   : >> { %2437 = vmatprep.subr.bf16.mxu1 %v2733_v10 }
  0xaf   : >> { %2418 = vmatpush3.bf16.msra.mxu0 %v3356_v18 }
  0xb0   : >> { %2438 = vmatpush3.bf16.msra.mxu1 %v2895_v24  ;;  %2443 = vmatprep.subr.bf16.mxu0 %v2733_v10 }
  0xb1   : >> { %2463 = vmatprep.subr.bf16.mxu1 %v2733_v10 }
  0xb2   : >> { %2420 = vmatmul.mubr.bf16.vlgmr.msra.gmra.mrb[16].mxu0 %v3363_v20 }
  0xb3   : >> { %2440 = vmatmul.mubr.bf16.vlgmr.msra.gmra.mrb[16].mxu1 %v3153_v30  ;;  %2444 = vmatpush3.bf16.msra.mxu0 %v2798_v11 }
  0xb4   : >> { %2464 = vmatpush3.bf16.msra.mxu1 %v2914_v32  ;;  %2445 = vmatprep.subr.bf16.mxu0 %v2733_v10  ;;  %v3573_v32 = vld [vmem:[#allocation5_spill] sm:$0xff] }
  0xb5   : >> { %2465 = vmatprep.subr.bf16.mxu1 %v2733_v10  ;;  %2459 = vmatprep.mubr.msk.bf16.mxu0 %vm2734_vm2, %v2733_v10 }
  0xb6   : >> { %2479 = vmatprep.mubr.msk.bf16.mxu1 %vm2734_vm2, %v2733_v10 }
  0xb7   : >> { %2446 = vmatpush3.bf16.msra.mxu0 %v2813_v13 }
  0xb8   : >> { %2466 = vmatpush3.bf16.msra.mxu1 %v2928_v34  ;;  %2447 = vmatprep.subr.bf16.mxu0 %v2733_v10  ;;  %v2063_v34 = vld [vmem:[%s2876_s27 + $0x48] sm:$0xff] }
  0xb9   : >> { %2467 = vmatprep.subr.bf16.mxu1 %v2733_v10 }
  0xbb   : >> { %2448 = vmatpush3.bf16.msra.mxu0 %v2829_v15 }
  0xbc   : >> { %2468 = vmatpush3.bf16.msra.mxu1 %v2946_v36  ;;  %2449 = vmatprep.subr.bf16.mxu0 %v2733_v10  ;;  %v3575_v36 = vld [vmem:[#allocation6_spill] sm:$0xff] }
  0xbd   : >> { %2469 = vmatprep.subr.bf16.mxu1 %v2733_v10 }
  0xbf   : >> { %2450 = vmatpush3.bf16.msra.mxu0 %v2843_v17 }
  0xc0   : >> { %2470 = vmatpush3.bf16.msra.mxu1 %v2960_v38  ;;  %2451 = vmatprep.subr.bf16.mxu0 %v2733_v10  ;;  %v3576_v38 = vld [vmem:[#allocation7_spill] sm:$0xff] }
  0xc1   : >> { %2471 = vmatprep.subr.bf16.mxu1 %v2733_v10 }
  0xc3   : >> { %2452 = vmatpush3.bf16.msra.mxu0 %v2857_v19 }
  0xc4   : >> { %2472 = vmatpush3.bf16.msra.mxu1 %v2974_v40  ;;  %2453 = vmatprep.subr.bf16.mxu0 %v2733_v10  ;;  %v3578_v40 = vld [vmem:[#allocation9_spill] sm:$0xff] }
  0xc5   : >> { %2473 = vmatprep.subr.bf16.mxu1 %v2733_v10 }
  0xc7   : >> { %2454 = vmatpush3.bf16.msra.mxu0 %v2872_v21 }
  0xc8   : >> { %2474 = vmatpush3.bf16.msra.mxu1 %v2988_v42  ;;  %2455 = vmatprep.subr.bf16.mxu0 %v2733_v10 }
  0xc9   : >> { %2475 = vmatprep.subr.bf16.mxu1 %v2733_v10 }
  0xcb   : >> { %2456 = vmatpush3.bf16.msra.mxu0 %v2889_v23 }
  0xcc   : >> { %2476 = vmatpush3.bf16.msra.mxu1 %v3002_v44  ;;  %2457 = vmatprep.subr.bf16.mxu0 %v2733_v10 }
  0xcd   : >> { %2477 = vmatprep.subr.bf16.mxu1 %v2733_v10 }
  0xcf   : >> { %2458 = vmatpush3.bf16.msra.mxu0 %v2901_v26 }
  0xd0   : >> { %2478 = vmatpush3.bf16.msra.mxu1 %v3015_v46  ;;  %2483 = vmatprep.subr.bf16.mxu0 %v2733_v10 }
  0xd1   : >> { %2503 = vmatprep.subr.bf16.mxu1 %v2733_v10 }
  0xd2   : >> { %2460 = vmatmul.mubr.bf16.vlgmr.msra.gmra.mrb[20].mxu0 %v3031_v53  ;;  %v3581_v53 = vld [vmem:[#allocation13_spill] sm:$0xff] }
  0xd3   : >> { %2480 = vmatmul.mubr.bf16.vlgmr.msra.gmra.mrb[20].mxu1 %v3156_v31  ;;  %2484 = vmatpush3.bf16.msra.mxu0 %v2921_v33  ;;  %v3574_v33 = vld [vmem:[#allocation14_spill] sm:$0xff] }
  0xd4   : >> { %2504 = vmatpush3.bf16.msra.mxu1 %v3036_v54  ;;  %2485 = vmatprep.subr.bf16.mxu0 %v2733_v10 }
  0xd5   : >> { %2505 = vmatprep.subr.bf16.mxu1 %v2733_v10  ;;  %2499 = vmatprep.mubr.msk.bf16.mxu0 %vm2734_vm2, %v2733_v10 }
  0xd6   : >> { %2519 = vmatprep.mubr.msk.bf16.mxu1 %vm2734_vm2, %v2733_v10 }
  0xd7   : >> { %2486 = vmatpush3.bf16.msra.mxu0 %v2935_v35  ;;  %v2064_v35 = vld [vmem:[%s2876_s27 + $0x50] sm:$0xff] }
  0xd8   : >> { %2506 = vmatpush3.bf16.msra.mxu1 %v3051_v56  ;;  %2487 = vmatprep.subr.bf16.mxu0 %v2733_v10 }
  0xd9   : >> { %2507 = vmatprep.subr.bf16.mxu1 %v2733_v10 }
  0xdb   : >> { %2488 = vmatpush3.bf16.msra.mxu0 %v2953_v37  ;;  %v1463_v37 = vpack.c.bf16 %v2064_v35, %v2063_v34 }
  0xdc   : >> { %2508 = vmatpush3.bf16.msra.mxu1 %v3069_v58  ;;  %2489 = vmatprep.subr.bf16.mxu0 %v2733_v10 }
  0xdd   : >> { %2509 = vmatprep.subr.bf16.mxu1 %v2733_v10 }
  0xdf   : >> { %2490 = vmatpush3.bf16.msra.mxu0 %v2967_v39  ;;  %v3577_v39 = vld [vmem:[#allocation8_spill] sm:$0xff] }
  0xe0   : >> { %2510 = vmatpush3.bf16.msra.mxu1 %v3083_v60  ;;  %2491 = vmatprep.subr.bf16.mxu0 %v2733_v10  ;;  %v3582_v60 = vld [vmem:[#allocation15_spill] sm:$0xff] }
  0xe1   : >> { %2511 = vmatprep.subr.bf16.mxu1 %v2733_v10 }
  0xe3   : >> { %2492 = vmatpush3.bf16.msra.mxu0 %v2981_v41  ;;  %v3580_v41 = vld [vmem:[#allocation11_spill] sm:$0xff] }
  0xe4   : >> { %2512 = vmatpush3.bf16.msra.mxu1 %v3097_v62  ;;  %2493 = vmatprep.subr.bf16.mxu0 %v2733_v10  ;;  %v2066_v62 = vld [vmem:[%s2876_s27 + $0x51] sm:$0xff] }
  0xe5   : >> { %2513 = vmatprep.subr.bf16.mxu1 %v2733_v10 }
  0xe7   : >> { %2494 = vmatpush3.bf16.msra.mxu0 %v2995_v43 }
  0xe8   : >> { %2514 = vmatpush3.bf16.msra.mxu1 %v3111_v1  ;;  %2495 = vmatprep.subr.bf16.mxu0 %v2733_v10  ;;  %v2068_v1 = vld [vmem:[%s2876_s27 + $0x52] sm:$0xff] }
  0xe9   : >> { %2515 = vmatprep.subr.bf16.mxu1 %v2733_v10 }
  0xeb   : >> { %2496 = vmatpush3.bf16.msra.mxu0 %v3009_v45 }
  0xec   : >> { %2516 = vmatpush3.bf16.msra.mxu1 %v3125_v3  ;;  %2497 = vmatprep.subr.bf16.mxu0 %v2733_v10 }
  0xed   : >> { %2517 = vmatprep.subr.bf16.mxu1 %v2733_v10 }
  0xef   : >> { %2498 = vmatpush3.bf16.msra.mxu0 %v3021_v48 }
  0xf0   : >> { %2518 = vmatpush3.bf16.msra.mxu1 %v3139_v5  ;;  %2523 = vmatprep.subr.bf16.mxu0 %v2733_v10 }
  0xf1   : >> { %2543 = vmatprep.subr.bf16.mxu1 %v2733_v10 }
  0xf2   : >> { %2500 = vmatmul.mubr.bf16.vlgmr.msra.gmra.mrb[24].mxu0 %v3279_v28 }
  0xf3   : >> { %2520 = vmatmul.mubr.bf16.vlgmr.msra.gmra.mrb[24].mxu1 %v3282_v7  ;;  %2524 = vmatpush3.bf16.msra.mxu0 %v3043_v55 }
  0xf4   : >> { %2544 = vmatpush3.bf16.msra.mxu1 %v3161_v47  ;;  %2525 = vmatprep.subr.bf16.mxu0 %v2733_v10 }
  0xf5   : >> { %2545 = vmatprep.subr.bf16.mxu1 %v2733_v10  ;;  %2539 = vmatprep.mubr.msk.bf16.mxu0 %vm2734_vm2, %v2733_v10 }
  0xf6   : >> { %2559 = vmatprep.mubr.msk.bf16.mxu1 %vm2734_vm2, %v2733_v10 }
  0xf7   : >> { %2526 = vmatpush3.bf16.msra.mxu0 %v3058_v57 }
  0xf8   : >> { %2546 = vmatpush3.bf16.msra.mxu1 %v3177_v50  ;;  %2527 = vmatprep.subr.bf16.mxu0 %v2733_v10 }
  0xf9   : >> { %2547 = vmatprep.subr.bf16.mxu1 %v2733_v10 }
  0xfb   : >> { %2528 = vmatpush3.bf16.msra.mxu0 %v3076_v59 }
  0xfc   : >> { %2548 = vmatpush3.bf16.msra.mxu1 %v3195_v52  ;;  %2529 = vmatprep.subr.bf16.mxu0 %v2733_v10 }
  0xfd   : >> { %2549 = vmatprep.subr.bf16.mxu1 %v2733_v10 }
  0xff   : >> { %2530 = vmatpush3.bf16.msra.mxu0 %v3090_v61  ;;  %v2065_v61 = vld [vmem:[%s2876_s27 + $0x49] sm:$0xff] }
 0x100   : >> { %2550 = vmatpush3.bf16.msra.mxu1 %v3209_v25  ;;  %2531 = vmatprep.subr.bf16.mxu0 %v2733_v10 }
 0x101   : >> { %2551 = vmatprep.subr.bf16.mxu1 %v2733_v10 }
 0x103   : >> { %2532 = vmatpush3.bf16.msra.mxu0 %v3104_v63  ;;  %v2067_v63 = vld [vmem:[%s2876_s27 + $0x4a] sm:$0xff]  ;;  %s2071_s27 = sshll.u32 %s2730_s24, 3  ;;  %s190_s24 = sadd.s32 1, %s2730_s24  }
 0x104   : >> { %2552 = vmatpush3.bf16.msra.mxu1 %v3223_v29  ;;  %2533 = vmatprep.subr.bf16.mxu0 %v2733_v10  ;;  %v1555_v3 = vpack.c.bf16 %v2068_v1, %v2067_v63  ;;  %s1754_s11 = scalar_lea.vmem %s2772_s20, %s2071_s27  ;;  %p187_p4 = scmp.ge.s32.totalorder %s190_s24, 8  }
 0x105   : >> { %v315_v7 = vpop.f32.mrb[0].mxu0  ;;  %2553 = vmatprep.subr.bf16.mxu1 %v2733_v10 }
 0x106   : >> { %v404_v11 = vpop.f32.mrb[0].mxu1  ;;  %v2261_v13 = vpop.f32.mrb[1].mxu0 }
 0x107   : >> { %v405_v15 = vadd.f32 %v404_v11, %v315_v7  ;;  %v2281_v17 = vpop.f32.mrb[1].mxu1  ;;  %v318_v19 = vpop.f32.mrb[2].mxu0  ;;  %2534 = vmatpush3.bf16.msra.mxu0 %v3118_v2  ;;  %v1509_v2 = vpack.c.bf16 %v2066_v62, %v2065_v61 }
 0x108   : >> { %v407_v21 = vpop.f32.mrb[2].mxu1  ;;  %2554 = vmatpush3.bf16.msra.mxu1 %v3572_v22  ;;  %v2262_v23 = vpop.f32.mrb[3].mxu0  ;;  %2535 = vmatprep.subr.bf16.mxu0 %v2733_v10 }
 0x109   : >> { %v408_v24 = vadd.f32 %v407_v21, %v318_v19  ;;  %v2282_v26 = vpop.f32.mrb[3].mxu1  ;;  %2555 = vmatprep.subr.bf16.mxu1 %v2733_v10 }
 0x10b   : >> { %2536 = vmatpush3.bf16.msra.mxu0 %v3573_v32 }
 0x10c   : >> { %2556 = vmatpush3.bf16.msra.mxu1 %v3574_v33  ;;  %2537 = vmatprep.subr.bf16.mxu0 %v2733_v10  ;;  %v2735_v33 = vmov 0.0|0.0  }
 0x10d   : >> { %2557 = vmatprep.subr.bf16.mxu1 %v2733_v10 }
 0x10f   : >> { %2538 = vmatpush3.bf16.msra.mxu0 %v3575_v36 }
 0x110   : >> { %2558 = vmatpush3.bf16.msra.mxu1 %v3265_v6  ;;  %2563 = vmatprep.subr.bf16.mxu0 %v2733_v10 }
 0x111   : >> { %2583 = vmatprep.subr.bf16.mxu1 %v2733_v10 }
 0x112   : >> { %2540 = vmatmul.mubr.bf16.vlgmr.msra.gmra.mrb[28].mxu0 %v3363_v20 }
 0x113   : >> { %2560 = vmatmul.mubr.bf16.vlgmr.msra.gmra.mrb[28].mxu1 %v1463_v37  ;;  %2564 = vmatpush3.bf16.msra.mxu0 %v3576_v38 }
 0x114   : >> { %2584 = vmatpush3.bf16.msra.mxu1 %v3287_v8  ;;  %2565 = vmatprep.subr.bf16.mxu0 %v2733_v10  ;;  %v3579_v8 = vld [vmem:[#allocation10_spill] sm:$0xff] }
 0x115   : >> { %2585 = vmatprep.subr.bf16.mxu1 %v2733_v10  ;;  %2579 = vmatprep.mubr.msk.bf16.mxu0 %vm2734_vm2, %v2733_v10 }
 0x116   : >> { %2599 = vmatprep.mubr.msk.bf16.mxu1 %vm2734_vm2, %v2733_v10 }
 0x117   : >> { %2566 = vmatpush3.bf16.msra.mxu0 %v3577_v39 }
 0x118   : >> { %2586 = vmatpush3.bf16.msra.mxu1 %v3298_v4  ;;  %2567 = vmatprep.subr.bf16.mxu0 %v2733_v10 }
 0x119   : >> { %2587 = vmatprep.subr.bf16.mxu1 %v2733_v10 }
 0x11b   : >> { %2568 = vmatpush3.bf16.msra.mxu0 %v3578_v40 }
 0x11c   : >> { %2588 = vmatpush3.bf16.msra.mxu1 %v3311_v27  ;;  %2569 = vmatprep.subr.bf16.mxu0 %v2733_v10 }
 0x11d   : >> { %2589 = vmatprep.subr.bf16.mxu1 %v2733_v10 }
 0x11f   : >> { %2570 = vmatpush3.bf16.msra.mxu0 %v3579_v8 }
 0x120   : >> { %2590 = vmatpush3.bf16.msra.mxu1 %v3320_v9  ;;  %2571 = vmatprep.subr.bf16.mxu0 %v2733_v10 }
 0x121   : >> { %2591 = vmatprep.subr.bf16.mxu1 %v2733_v10 }
 0x123   : >> { %2572 = vmatpush3.bf16.msra.mxu0 %v3580_v41 }
 0x124   : >> { %2592 = vmatpush3.bf16.msra.mxu1 %v3329_v12  ;;  %2573 = vmatprep.subr.bf16.mxu0 %v2733_v10 }
 0x125   : >> { %v513_v42 = vpop.f32.mrb[4].mxu0  ;;  %2593 = vmatprep.subr.bf16.mxu1 %v2733_v10 }
 0x126   : >> { %v520_v43 = vadd.f32 %v513_v42, %v405_v15  ;;  %v627_v44 = vpop.f32.mrb[4].mxu1  ;;  %v2301_v45 = vpop.f32.mrb[5].mxu0 }
 0x127   : >> { %v2321_v46 = vpop.f32.mrb[5].mxu1  ;;  %v516_v48 = vpop.f32.mrb[6].mxu0  ;;  %2574 = vmatpush3.bf16.msra.mxu0 %v3581_v53 }
 0x128   : >> { %v634_v54 = vadd.f32 %v627_v44, %v520_v43  ;;  %v521_v55 = vadd.f32 %v516_v48, %v408_v24  ;;  %v630_v56 = vpop.f32.mrb[6].mxu1  ;;  %2594 = vmatpush3.bf16.msra.mxu1 %v3338_v14  ;;  %v2302_v57 = vpop.f32.mrb[7].mxu0  ;;  %2575 = vmatprep.subr.bf16.mxu0 %v2733_v10 }
 0x129   : >> { %v2322_v58 = vpop.f32.mrb[7].mxu1  ;;  %2595 = vmatprep.subr.bf16.mxu1 %v2733_v10 }
 0x12a   : >> { %v635_v59 = vadd.f32 %v630_v56, %v521_v55 }
 0x12b   : >> { %2576 = vmatpush3.bf16.msra.mxu0 %v3582_v60 }
 0x12c   : >> { %2596 = vmatpush3.bf16.msra.mxu1 %v3347_v16  ;;  %2577 = vmatprep.subr.bf16.mxu0 %v2733_v10 }
 0x12d   : >> { %2597 = vmatprep.subr.bf16.mxu1 %v2733_v10 }
 0x12f   : >> { %2578 = vmatpush3.bf16.msra.mxu0 %v3274_v0 }
 0x130   : >> { %2598 = vmatpush3.bf16.msra.mxu1 %v3356_v18  ;;  %2617 = vmatprep.subr.bf16.mxu0 %v2735_v33 }
 0x131   : >> { %2620 = vmatprep.subr.bf16.mxu1 %v2735_v33 }
 0x132   : >> { %2580 = vmatmul.mubr.bf16.vlgmr.msra.gmra.mrb[32].mxu0 %v1509_v2 }
 0x133   : >> { %2600 = vmatmul.mubr.bf16.vlgmr.msra.gmra.mrb[32].mxu1 %v1555_v3  ;;  %2607 = vmatprep.mubr.msk.f32.mxu0 %vm2734_vm2, %v2733_v10 }
 0x134   : >> { %2614 = vmatprep.mubr.msk.f32.mxu1 %vm2734_vm2, %v2733_v10 }
 0x145   : >> { %v738_v5 = vpop.f32.mrb[8].mxu0 }
 0x146   : >> { %v745_v30 = vadd.f32 %v738_v5, %v634_v54  ;;  %v849_v31 = vpop.f32.mrb[8].mxu1  ;;  %v2341_v47 = vpop.f32.mrb[9].mxu0 }
 0x147   : >> { %v2361_v50 = vpop.f32.mrb[9].mxu1  ;;  %v741_v52 = vpop.f32.mrb[10].mxu0 }
 0x148   : >> { %v856_v6 = vadd.f32 %v849_v31, %v745_v30  ;;  %v746_v25 = vadd.f32 %v741_v52, %v635_v59  ;;  %v852_v0 = vpop.f32.mrb[10].mxu1  ;;  %v2342_v28 = vpop.f32.mrb[11].mxu0 }
 0x149   : >> { %v2362_v29 = vpop.f32.mrb[11].mxu1 }
 0x14a   : >> { %v857_v4 = vadd.f32 %v852_v0, %v746_v25 }
 0x165   : >> { %v963_v27 = vpop.f32.mrb[12].mxu0 }
 0x166   : >> { %v970_v9 = vadd.f32 %v963_v27, %v856_v6  ;;  %v1074_v12 = vpop.f32.mrb[12].mxu1  ;;  %v2381_v14 = vpop.f32.mrb[13].mxu0 }
 0x167   : >> { %v2401_v16 = vpop.f32.mrb[13].mxu1  ;;  %v966_v18 = vpop.f32.mrb[14].mxu0 }
 0x168   : >> { %v1081_v49 = vadd.f32 %v1074_v12, %v970_v9  ;;  %v971_v10 = vadd.f32 %v966_v18, %v857_v4  ;;  %v1077_v51 = vpop.f32.mrb[14].mxu1  ;;  %v2382_v20 = vpop.f32.mrb[15].mxu0  ;;  %v3583_v9 = vld [vmem:[#allocation2_spill] sm:$0xff] }
 0x169   : >> { %v2402_v7 = vpop.f32.mrb[15].mxu1 }
 0x16a   : >> { %v1082_v11 = vadd.f32 %v1077_v51, %v971_v10 }
 0x185   : >> { %v1185_v13 = vpop.f32.mrb[16].mxu0 }
 0x186   : >> { %v1192_v15 = vadd.f32 %v1185_v13, %v1081_v49  ;;  %v1238_v17 = vpop.f32.mrb[16].mxu1  ;;  %v2421_v19 = vpop.f32.mrb[17].mxu0 }
 0x187   : >> { %v2441_v21 = vpop.f32.mrb[17].mxu1  ;;  %v1188_v22 = vpop.f32.mrb[18].mxu0 }
 0x188   : >> { %v1193_v23 = vadd.f32 %v1188_v22, %v1082_v11  ;;  %v1241_v24 = vpop.f32.mrb[18].mxu1  ;;  %v2422_v26 = vpop.f32.mrb[19].mxu0  ;;  %v1200_v12 = vadd.f32 %v3583_v9, %v1192_v15 }
 0x189   : >> { %v2442_v32 = vpop.f32.mrb[19].mxu1  ;;  %v3584_v26 = vld [vmem:[#allocation3_spill] sm:$0xff] }
 0x18a   : >> { %v1201_v51 = vadd.f32 %v3583_v9, %v1193_v23  ;;  %v1202_v11 = vmax.f32 %v1200_v12, 0.0  ;;  %v3585_v23 = vld [vmem:[#allocation4_spill] sm:$0xff] }
 0x18c   : >> { %v1203_v19 = vmax.f32 %v1201_v51, 0.0 }
 0x1a5   : >> { %v1279_v34 = vpop.f32.mrb[20].mxu0 }
 0x1a6   : >> { %v1280_v35 = vadd.f32 %v1279_v34, %v1238_v17  ;;  %v1320_v36 = vpop.f32.mrb[20].mxu1  ;;  %v2461_v37 = vpop.f32.mrb[21].mxu0 }
 0x1a7   : >> { %v2481_v38 = vpop.f32.mrb[21].mxu1  ;;  %v1282_v39 = vpop.f32.mrb[22].mxu0 }
 0x1a8   : >> { %v1327_v40 = vadd.f32 %v1320_v36, %v1280_v35  ;;  %v1283_v8 = vadd.f32 %v1282_v39, %v1241_v24  ;;  %v1323_v41 = vpop.f32.mrb[22].mxu1  ;;  %v2462_v42 = vpop.f32.mrb[23].mxu0 }
 0x1a9   : >> { %v2482_v43 = vpop.f32.mrb[23].mxu1 }
 0x1aa   : >> { %v1328_v44 = vadd.f32 %v1323_v41, %v1283_v8 }
 0x1c5   : >> { %v1363_v45 = vpop.f32.mrb[24].mxu0 }
 0x1c6   : >> { %v1370_v46 = vadd.f32 %v1363_v45, %v1327_v40  ;;  %v1406_v48 = vpop.f32.mrb[24].mxu1  ;;  %v2501_v53 = vpop.f32.mrb[25].mxu0 }
 0x1c7   : >> { %v2521_v54 = vpop.f32.mrb[25].mxu1  ;;  %v1366_v55 = vpop.f32.mrb[26].mxu0 }
 0x1c8   : >> { %v1413_v56 = vadd.f32 %v1406_v48, %v1370_v46  ;;  %v1371_v57 = vadd.f32 %v1366_v55, %v1328_v44  ;;  %v1409_v58 = vpop.f32.mrb[26].mxu1  ;;  %v2502_v59 = vpop.f32.mrb[27].mxu0 }
 0x1c9   : >> { %v2522_v60 = vpop.f32.mrb[27].mxu1 }
 0x1ca   : >> { %v1414_v61 = vadd.f32 %v1409_v58, %v1371_v57 }
 0x1e5   : >> { %v1449_v62 = vpop.f32.mrb[28].mxu0 }
 0x1e6   : >> { %v1456_v63 = vadd.f32 %v1449_v62, %v1413_v56  ;;  %v1498_v1 = vpop.f32.mrb[28].mxu1  ;;  %v2541_v2 = vpop.f32.mrb[29].mxu0 }
 0x1e7   : >> { %v2561_v3 = vpop.f32.mrb[29].mxu1  ;;  %v1452_v5 = vpop.f32.mrb[30].mxu0 }
 0x1e8   : >> { %v1505_v30 = vadd.f32 %v1498_v1, %v1456_v63  ;;  %v1457_v31 = vadd.f32 %v1452_v5, %v1414_v61  ;;  %v1501_v47 = vpop.f32.mrb[30].mxu1  ;;  %v2542_v50 = vpop.f32.mrb[31].mxu0 }
 0x1e9   : >> { %v2562_v52 = vpop.f32.mrb[31].mxu1 }
 0x1ea   : >> { %v1506_v6 = vadd.f32 %v1501_v47, %v1457_v31 }
 0x205   : >> { %v1544_v25 = vpop.f32.mrb[32].mxu0 }
 0x206   : >> { %v1551_v0 = vadd.f32 %v1544_v25, %v1505_v30  ;;  %v1590_v28 = vpop.f32.mrb[32].mxu1  ;;  %v2581_v29 = vpop.f32.mrb[33].mxu0 }
 0x207   : >> { %v2601_v4 = vpop.f32.mrb[33].mxu1  ;;  %v1547_v27 = vpop.f32.mrb[34].mxu0 }
 0x208   : >> { %v1597_v14 = vadd.f32 %v1590_v28, %v1551_v0  ;;  %v1552_v16 = vadd.f32 %v1547_v27, %v1506_v6  ;;  %v1593_v18 = vpop.f32.mrb[34].mxu1  ;;  %v2582_v49 = vpop.f32.mrb[35].mxu0 }
 0x209   : >> { %v2602_v10 = vpop.f32.mrb[35].mxu1 }
 0x20a   : >> { %v1599_v20 = vadd.f32 %v3583_v9, %v1597_v14  ;;  %v1598_v7 = vadd.f32 %v1593_v18, %v1552_v16 }
 0x20c   : >> { %v1601_v13 = vmax.f32 %v1599_v20, 0.0  ;;  %v1600_v17 = vadd.f32 %v3583_v9, %v1598_v7 }
 0x20e   : >> { %v1603_v21 = vmax.f32 %v1202_v11, %v1601_v13  ;;  %v1602_v22 = vmax.f32 %v1600_v17, 0.0 }
 0x210   : >> { %v1604_v15 = vmax.f32 %v1203_v19, %v1602_v22 }
 0x212   : >> { %v2618_v24 = vpack.c.bf16 %v1604_v15, %v1603_v21 }
 0x214   : >> { %2619 = vmatpush3.bf16.msra.mxu0 %v2618_v24  ;;  %2622 = vmatpush3.bf16.msra.mxu1 %v2618_v24 }
 0x217   : >> { %2608 = vmatmul.mubr.msk.f32.vlgmr.msra.gmra.mrb[36].mxu0 %vm1605_vm3, %v3584_v26  ;;  %2615 = vmatmul.mubr.msk.f32.vlgmr.msra.gmra.mrb[36].mxu1 %vm1605_vm3, %v3585_v23 }
 0x2e7   : > { %189 = sbr.rel (!%p187_p4) target bundleno = 17 (0x11), region = 82 }
 0x2ea   : >> { %v1675_v32 = vpop.f32.mrb[36].mxu0  ;;  %v1748_v33 = vpop.f32.mrb[36].mxu1 }
 0x2eb   : >> { %v1752_v34 = vmax.f32 %v1675_v32, %v1748_v33  ;;  %v2609_v35 = vpop.f32.mrb[37].mxu0  ;;  %v2616_v36 = vpop.f32.mrb[37].mxu1 }
 0x2ed   : >> { %1755 = vst [vmem:[%s1754_s11] sm:$0xff] %v1752_v34 }
 0x2ee PF: > { %s13_s12 = sadd.s32 1, %s2726_s12  }
 0x2ef   : > { %p10_p5 = scmp.ge.s32.totalorder %s13_s12, 4  }
 0x2f1   :  { %12 = sbr.rel (!%p10_p5) target bundleno = 1 (0x1), region = 93 }

// kernel: vgg_s_forward.8
= control target key start
LH: loop header
LB: loop body
LE: loop exit
PB: predicated region body
PF: predicated region fallthrough
CT: control target
= control target key end

     0   :  { %s2688_s12 = smov 0   ;;  %s3462_s0 = inlined_call_operand.vmem [shape: f32[2,10,10,128], index: 0, kind: input, shape index: {}]   ;;  %s3463_s1 = inlined_call_operand.vmem [shape: bf16[3,3,128,128], index: 1, kind: input, shape index: {}]   ;;  %s3464_s2 = inlined_call_operand.vmem [shape: f32[1,128], index: 2, kind: input, shape index: {}]   ;;  %s3465_s3 = inlined_call_operand.vmem [shape: f32[2,4,4,128], index: 3, kind: output, shape index: {}]  }
   0x1 LB: > { %s1783_s13 = sadd.s32 4294967295, %s2659_s12   ;;  %p1787_p0 = scmp.ge.s32.totalorder %s2659_s12, 1  ;;  %s2659_s12 = sphi %s2688_s12, %s13_s12  }
   0x2   : > { %p137_p1 = scmp.lt.s32.totalorder %s2659_s12, 3 }
   0x4   : > { %p138_p2 = pnand %p1787_p0, %p137_p1 }
   0x5   : > { %p161_p3 = scmp.lt.s32.totalorder (!%p138_p2), %s1783_s13, 1  ;;  %v2699_v0 = vld [vmem:[%s3464_s2] ss:$0 sm:$0xff] (!%p138_p2)  ;;  %v173_v1 = vlaneseq (!%p138_p2)  ;;  %v2665_v6 = vmov (!%p138_p2), 0.0   ;;  %s2715_s24 = smov (!%p138_p2), 0  }
   0x6   : > { %141 = sbr.rel (%p138_p2) target bundleno = 744 (0x2e8), region = 32  ;;  %3478 = vst [vmem:[#allocation2_spill] sm:$0xff] (!%p138_p2), %v2699_v0 }
   0x7   : > { %v174_v2 = vshrl.u32 (!%p138_p2), %v173_v1, 7  ;;  %v176_v3 = vand.u32 (!%p138_p2), 127, %v173_v1 }
   0x9   : > { %v177_v4 = vmul.u32 (!%p138_p2), 2, %v174_v2 }
   0xb   : > { %vm178_vm0 = vcmp.eq.s32.totalorder (!%p138_p2), %v176_v3, %v177_v4  ;;  %v181_v5 = vadd.s32 (!%p138_p2), 1, %v177_v4 }
   0xc   : > { %v2711_v7 = vsel (!%p138_p2), %vm178_vm0, 1.0, %v2665_v6 }
   0xd   : > { %s3507_s13 = smov (!%p161_p3, %s1783_s13), 1  ;;  %3479 = vst [vmem:[#allocation3_spill] sm:$0xff] %v2711_v7  ;;  %vm182_vm1 = vcmp.eq.s32.totalorder %v176_v3, %v181_v5 }
   0xe   : > { %s2557_s16 = smul.u32 160, %s3507_s13  ;;  %s2016_s17 = sshll.u32 %s3507_s13, 4  ;;  %v2713_v8 = vsel %vm182_vm1, 1.0, %v2665_v6 }
   0xf   : > { %s2704_s20 = scalar_lea.vmem %s3465_s3, %s2016_s17  ;;  %3480 = vst [vmem:[#allocation4_spill] sm:$0xff] %v2713_v8 }
  0x10   : > { %s2709_s23 = scalar_lea.vmem %s3462_s0, %s2557_s16 }
  0x11 LB: >> { %v2723_v9 = vld [vmem:[%s3463_s1 + $0x40] sm:$0xff]   ;;  %v2666_v10 = vmov 0.0   ;;  %v2736_v12 = vld [vmem:[%s3463_s1 + $0x48] sm:$0xff]   ;;  %vm2667_vm2 = vmmov 0   ;;  %v2754_v14 = vld [vmem:[%s3463_s1 + $0x50] sm:$0xff]   ;;  %s2017_s26 = sshll.u32 %s2663_s24, 5  ;;  %s2663_s24 = sphi %s2715_s24, %s190_s24  }
  0x12   : >> { %2187 = vmatprep.subr.bf16.mxu0 %v2666_v10  ;;  %2207 = vmatprep.subr.bf16.mxu1 %v2666_v10  ;;  %v2730_v11 = vld [vmem:[%s3463_s1] sm:$0xff]   ;;  %v2745_v13 = vld [vmem:[%s3463_s1 + $0x8] sm:$0xff]   ;;  %v2761_v15 = vld [vmem:[%s3463_s1 + $0x10] sm:$0xff]   ;;  %s2821_s4 = scalar_lea.vmem %s2709_s23, %s2017_s26  ;;  %vm1556_vm3 = vcmask 64512  }
  0x13   : >> { %2188 = vmatpush3.bf16.msra.mxu0 %v2723_v9  ;;  %2203 = vmatprep.mubr.msk.bf16.mxu0 %vm2667_vm2, %v2666_v10  ;;  %v2768_v16 = vld [vmem:[%s3463_s1 + $0x58] sm:$0xff]   ;;  %v2782_v18 = vld [vmem:[%s3463_s1 + $0x60] sm:$0xff]   ;;  %v2796_v20 = vld [vmem:[%s3463_s1 + $0x68] sm:$0xff]  }
  0x14   : >> { %2208 = vmatpush3.bf16.msra.mxu1 %v2730_v11  ;;  %2189 = vmatprep.subr.bf16.mxu0 %v2666_v10  ;;  %v2775_v17 = vld [vmem:[%s3463_s1 + $0x18] sm:$0xff]   ;;  %v2789_v19 = vld [vmem:[%s3463_s1 + $0x20] sm:$0xff]   ;;  %v2803_v21 = vld [vmem:[%s3463_s1 + $0x28] sm:$0xff]  }
  0x15   : >> { %2209 = vmatprep.subr.bf16.mxu1 %v2666_v10  ;;  %2223 = vmatprep.mubr.msk.bf16.mxu1 %vm2667_vm2, %v2666_v10  ;;  %v2811_v22 = vld [vmem:[%s3463_s1 + $0x70] sm:$0xff]   ;;  %v2827_v24 = vld [vmem:[%s3463_s1 + $0x78] sm:$0xff]   ;;  %v212_v26 = vld [vmem:[%s2821_s4 + $0x1] sm:$0xff] }
  0x16   : >> { %v2818_v23 = vld [vmem:[%s3463_s1 + $0x30] sm:$0xff]   ;;  %v2832_v25 = vld [vmem:[%s3463_s1 + $0x38] sm:$0xff]   ;;  %v194_v27 = vld [vmem:[%s2821_s4] sm:$0xff]  ;;  %v213_v28 = vpack.c.bf16 %v212_v26, %v212_v26 }
  0x17   : >> { %2190 = vmatpush3.bf16.msra.mxu0 %v2736_v12  ;;  %v195_v29 = vpack.c.bf16 %v194_v27, %v194_v27  ;;  %v2844_v30 = vld [vmem:[%s3463_s1 + $0x80] sm:$0xff]   ;;  %v2858_v32 = vld [vmem:[%s3463_s1 + $0x88] sm:$0xff]   ;;  %v2876_v34 = vld [vmem:[%s3463_s1 + $0x90] sm:$0xff]  }
  0x18   : >> { %2210 = vmatpush3.bf16.msra.mxu1 %v2745_v13  ;;  %2191 = vmatprep.subr.bf16.mxu0 %v2666_v10  ;;  %v2851_v31 = vld [vmem:[%s3463_s1 + $0xc0] sm:$0xff]   ;;  %v2865_v33 = vld [vmem:[%s3463_s1 + $0xc8] sm:$0xff]   ;;  %v2883_v35 = vld [vmem:[%s3463_s1 + $0xd0] sm:$0xff]  }
  0x19   : >> { %2211 = vmatprep.subr.bf16.mxu1 %v2666_v10  ;;  %v2890_v36 = vld [vmem:[%s3463_s1 + $0x98] sm:$0xff]   ;;  %v2904_v38 = vld [vmem:[%s3463_s1 + $0xa0] sm:$0xff]   ;;  %v2918_v40 = vld [vmem:[%s3463_s1 + $0xa8] sm:$0xff]  }
  0x1a   : >> { %v2897_v37 = vld [vmem:[%s3463_s1 + $0xd8] sm:$0xff]   ;;  %v2911_v39 = vld [vmem:[%s3463_s1 + $0xe0] sm:$0xff]   ;;  %v2925_v41 = vld [vmem:[%s3463_s1 + $0xe8] sm:$0xff]  }
  0x1b   : >> { %2192 = vmatpush3.bf16.msra.mxu0 %v2754_v14  ;;  %v2932_v42 = vld [vmem:[%s3463_s1 + $0xb0] sm:$0xff]   ;;  %v2945_v44 = vld [vmem:[%s3463_s1 + $0xb8] sm:$0xff]   ;;  %v407_v46 = vld [vmem:[%s2821_s4 + $0x2] sm:$0xff] }
  0x1c   : >> { %2212 = vmatpush3.bf16.msra.mxu1 %v2761_v15  ;;  %2193 = vmatprep.subr.bf16.mxu0 %v2666_v10  ;;  %v2939_v43 = vld [vmem:[%s3463_s1 + $0xf0] sm:$0xff]   ;;  %v2950_v45 = vld [vmem:[%s3463_s1 + $0xf8] sm:$0xff]   ;;  %v408_v48 = vpack.c.bf16 %v407_v46, %v407_v46  ;;  %v2964_v50 = vld [vmem:[%s3463_s1 + $0x100] sm:$0xff]  }
  0x1d   : >> { %2213 = vmatprep.subr.bf16.mxu1 %v2666_v10  ;;  %v1853_v47 = vld [vmem:[%s2821_s4 + $0x10] sm:$0xff]  ;;  %v2971_v51 = vld [vmem:[%s3463_s1 + $0x140] sm:$0xff]   ;;  %v2979_v52 = vld [vmem:[%s3463_s1 + $0x108] sm:$0xff]  }
  0x1e   : >> { %v2959_v49 = vpack.c.bf16 %v1853_v47, %v1853_v47  ;;  %v2986_v53 = vld [vmem:[%s3463_s1 + $0x148] sm:$0xff]   ;;  %v2997_v54 = vld [vmem:[%s3463_s1 + $0x110] sm:$0xff]   ;;  %v3011_v56 = vld [vmem:[%s3463_s1 + $0x118] sm:$0xff]  }
  0x1f   : >> { %2194 = vmatpush3.bf16.msra.mxu0 %v2768_v16  ;;  %v3004_v55 = vld [vmem:[%s3463_s1 + $0x150] sm:$0xff]   ;;  %v3018_v57 = vld [vmem:[%s3463_s1 + $0x158] sm:$0xff]   ;;  %v3025_v58 = vld [vmem:[%s3463_s1 + $0x120] sm:$0xff]  }
  0x20   : >> { %2214 = vmatpush3.bf16.msra.mxu1 %v2775_v17  ;;  %2195 = vmatprep.subr.bf16.mxu0 %v2666_v10  ;;  %v3032_v59 = vld [vmem:[%s3463_s1 + $0x160] sm:$0xff]   ;;  %v3039_v60 = vld [vmem:[%s3463_s1 + $0x128] sm:$0xff]   ;;  %v3053_v62 = vld [vmem:[%s3463_s1 + $0x130] sm:$0xff]  }
  0x21   : >> { %2215 = vmatprep.subr.bf16.mxu1 %v2666_v10  ;;  %v3046_v61 = vld [vmem:[%s3463_s1 + $0x168] sm:$0xff]   ;;  %v3060_v63 = vld [vmem:[%s3463_s1 + $0x170] sm:$0xff]   ;;  %v3067_v1 = vld [vmem:[%s3463_s1 + $0x138] sm:$0xff]  }
  0x22   : >> { %v1878_v2 = vld [vmem:[%s2821_s4 + $0x11] sm:$0xff]  ;;  %v3087_v26 = vld [vmem:[%s3463_s1 + $0x180] sm:$0xff]   ;;  %v3163_v7 = vld [vmem:[%s3463_s1 + $0x1a8] sm:$0xff]  }
  0x23   : >> { %2196 = vmatpush3.bf16.msra.mxu0 %v2782_v18  ;;  %v3075_v3 = vld [vmem:[%s3463_s1 + $0x178] sm:$0xff]   ;;  %v3079_v5 = vpack.c.bf16 %v1878_v2, %v1878_v2  ;;  %v3094_v27 = vld [vmem:[%s3463_s1 + $0x1c0] sm:$0xff]   ;;  %v3121_v46 = vld [vmem:[%s3463_s1 + $0x190] sm:$0xff]  }
  0x24   : >> { %2216 = vmatpush3.bf16.msra.mxu1 %v2789_v19  ;;  %2197 = vmatprep.subr.bf16.mxu0 %v2666_v10  ;;  %3481 = vst [vmem:[#allocation5_spill] sm:$0xff] %v3075_v3  ;;  %v1903_v4 = vld [vmem:[%s2821_s4 + $0x12] sm:$0xff]  ;;  %3482 = vst [vmem:[#allocation6_spill] sm:$0xff] %v3094_v27  ;;  %v3156_v8 = vld [vmem:[%s3463_s1 + $0x1e0] sm:$0xff]  }
  0x25   : >> { %2217 = vmatprep.subr.bf16.mxu1 %v2666_v10  ;;  %v3082_v6 = vpack.c.bf16 %v1903_v4, %v1903_v4  ;;  %v3128_v47 = vld [vmem:[%s3463_s1 + $0x1d0] sm:$0xff]   ;;  %v3142_v2 = vld [vmem:[%s3463_s1 + $0x1d8] sm:$0xff]   ;;  %v3149_v4 = vld [vmem:[%s3463_s1 + $0x1a0] sm:$0xff]   ;;  %3486 = vst [vmem:[#allocation10_spill] sm:$0xff] %v3156_v8 }
  0x26   : >> { %3484 = vst [vmem:[#allocation8_spill] sm:$0xff] %v3128_v47  ;;  %3485 = vst [vmem:[#allocation9_spill] sm:$0xff] %v3142_v2  ;;  %v3170_v0 = vld [vmem:[%s3463_s1 + $0x1e8] sm:$0xff]  }
  0x27   : >> { %2198 = vmatpush3.bf16.msra.mxu0 %v2796_v20  ;;  %3487 = vst [vmem:[#allocation11_spill] sm:$0xff] %v3170_v0 }
  0x28   : >> { %2218 = vmatpush3.bf16.msra.mxu1 %v2803_v21  ;;  %2199 = vmatprep.subr.bf16.mxu0 %v2666_v10 }
  0x29   : >> { %2219 = vmatprep.subr.bf16.mxu1 %v2666_v10 }
  0x2b   : >> { %2200 = vmatpush3.bf16.msra.mxu0 %v2811_v22 }
  0x2c   : >> { %2220 = vmatpush3.bf16.msra.mxu1 %v2818_v23  ;;  %2201 = vmatprep.subr.bf16.mxu0 %v2666_v10 }
  0x2d   : >> { %2221 = vmatprep.subr.bf16.mxu1 %v2666_v10 }
  0x2f   : >> { %2202 = vmatpush3.bf16.msra.mxu0 %v2827_v24 }
  0x30   : >> { %2222 = vmatpush3.bf16.msra.mxu1 %v2832_v25  ;;  %2227 = vmatprep.subr.bf16.mxu0 %v2666_v10 }
  0x31   : >> { %2247 = vmatprep.subr.bf16.mxu1 %v2666_v10 }
  0x32   : >> { %2204 = vmatmul.mubr.bf16.vlgmr.msra.gmra.mrb[0].mxu0 %v213_v28  ;;  %v3103_v28 = vld [vmem:[%s3463_s1 + $0x188] sm:$0xff]  }
  0x33   : >> { %2224 = vmatmul.mubr.bf16.vlgmr.msra.gmra.mrb[0].mxu1 %v195_v29  ;;  %2228 = vmatpush3.bf16.msra.mxu0 %v2844_v30  ;;  %v3110_v29 = vld [vmem:[%s3463_s1 + $0x1c8] sm:$0xff]  }
  0x34   : >> { %2248 = vmatpush3.bf16.msra.mxu1 %v2851_v31  ;;  %2229 = vmatprep.subr.bf16.mxu0 %v2666_v10  ;;  %3483 = vst [vmem:[#allocation7_spill] sm:$0xff] %v3110_v29 }
  0x35   : >> { %2249 = vmatprep.subr.bf16.mxu1 %v2666_v10  ;;  %2243 = vmatprep.mubr.msk.bf16.mxu0 %vm2667_vm2, %v2666_v10 }
  0x36   : >> { %2263 = vmatprep.mubr.msk.bf16.mxu1 %vm2667_vm2, %v2666_v10 }
  0x37   : >> { %2230 = vmatpush3.bf16.msra.mxu0 %v2858_v32 }
  0x38   : >> { %2250 = vmatpush3.bf16.msra.mxu1 %v2865_v33  ;;  %2231 = vmatprep.subr.bf16.mxu0 %v2666_v10 }
  0x39   : >> { %2251 = vmatprep.subr.bf16.mxu1 %v2666_v10 }
  0x3b   : >> { %2232 = vmatpush3.bf16.msra.mxu0 %v2876_v34 }
  0x3c   : >> { %2252 = vmatpush3.bf16.msra.mxu1 %v2883_v35  ;;  %2233 = vmatprep.subr.bf16.mxu0 %v2666_v10 }
  0x3d   : >> { %2253 = vmatprep.subr.bf16.mxu1 %v2666_v10 }
  0x3f   : >> { %2234 = vmatpush3.bf16.msra.mxu0 %v2890_v36 }
  0x40   : >> { %2254 = vmatpush3.bf16.msra.mxu1 %v2897_v37  ;;  %2235 = vmatprep.subr.bf16.mxu0 %v2666_v10 }
  0x41   : >> { %2255 = vmatprep.subr.bf16.mxu1 %v2666_v10 }
  0x43   : >> { %2236 = vmatpush3.bf16.msra.mxu0 %v2904_v38 }
  0x44   : >> { %2256 = vmatpush3.bf16.msra.mxu1 %v2911_v39  ;;  %2237 = vmatprep.subr.bf16.mxu0 %v2666_v10 }
  0x45   : >> { %2257 = vmatprep.subr.bf16.mxu1 %v2666_v10 }
  0x47   : >> { %2238 = vmatpush3.bf16.msra.mxu0 %v2918_v40 }
  0x48   : >> { %2258 = vmatpush3.bf16.msra.mxu1 %v2925_v41  ;;  %2239 = vmatprep.subr.bf16.mxu0 %v2666_v10 }
  0x49   : >> { %2259 = vmatprep.subr.bf16.mxu1 %v2666_v10 }
  0x4b   : >> { %2240 = vmatpush3.bf16.msra.mxu0 %v2932_v42 }
  0x4c   : >> { %2260 = vmatpush3.bf16.msra.mxu1 %v2939_v43  ;;  %2241 = vmatprep.subr.bf16.mxu0 %v2666_v10 }
  0x4d   : >> { %2261 = vmatprep.subr.bf16.mxu1 %v2666_v10 }
  0x4f   : >> { %2242 = vmatpush3.bf16.msra.mxu0 %v2945_v44 }
  0x50   : >> { %2262 = vmatpush3.bf16.msra.mxu1 %v2950_v45  ;;  %2267 = vmatprep.subr.bf16.mxu0 %v2666_v10 }
  0x51   : >> { %2287 = vmatprep.subr.bf16.mxu1 %v2666_v10 }
  0x52   : >> { %2244 = vmatmul.mubr.bf16.vlgmr.msra.gmra.mrb[4].mxu0 %v408_v48  ;;  %v3135_v48 = vld [vmem:[%s3463_s1 + $0x198] sm:$0xff]  }
  0x53   : >> { %2264 = vmatmul.mubr.bf16.vlgmr.msra.gmra.mrb[4].mxu1 %v2959_v49  ;;  %2268 = vmatpush3.bf16.msra.mxu0 %v2964_v50 }
  0x54   : >> { %2288 = vmatpush3.bf16.msra.mxu1 %v2971_v51  ;;  %2269 = vmatprep.subr.bf16.mxu0 %v2666_v10 }
  0x55   : >> { %2289 = vmatprep.subr.bf16.mxu1 %v2666_v10  ;;  %2283 = vmatprep.mubr.msk.bf16.mxu0 %vm2667_vm2, %v2666_v10 }
  0x56   : >> { %2303 = vmatprep.mubr.msk.bf16.mxu1 %vm2667_vm2, %v2666_v10 }
  0x57   : >> { %2270 = vmatpush3.bf16.msra.mxu0 %v2979_v52 }
  0x58   : >> { %2290 = vmatpush3.bf16.msra.mxu1 %v2986_v53  ;;  %2271 = vmatprep.subr.bf16.mxu0 %v2666_v10 }
  0x59   : >> { %2291 = vmatprep.subr.bf16.mxu1 %v2666_v10 }
  0x5b   : >> { %2272 = vmatpush3.bf16.msra.mxu0 %v2997_v54 }
  0x5c   : >> { %2292 = vmatpush3.bf16.msra.mxu1 %v3004_v55  ;;  %2273 = vmatprep.subr.bf16.mxu0 %v2666_v10 }
  0x5d   : >> { %2293 = vmatprep.subr.bf16.mxu1 %v2666_v10 }
  0x5f   : >> { %2274 = vmatpush3.bf16.msra.mxu0 %v3011_v56 }
  0x60   : >> { %2294 = vmatpush3.bf16.msra.mxu1 %v3018_v57  ;;  %2275 = vmatprep.subr.bf16.mxu0 %v2666_v10 }
  0x61   : >> { %2295 = vmatprep.subr.bf16.mxu1 %v2666_v10 }
  0x63   : >> { %2276 = vmatpush3.bf16.msra.mxu0 %v3025_v58 }
  0x64   : >> { %2296 = vmatpush3.bf16.msra.mxu1 %v3032_v59  ;;  %2277 = vmatprep.subr.bf16.mxu0 %v2666_v10 }
  0x65   : >> { %2297 = vmatprep.subr.bf16.mxu1 %v2666_v10 }
  0x67   : >> { %2278 = vmatpush3.bf16.msra.mxu0 %v3039_v60 }
  0x68   : >> { %2298 = vmatpush3.bf16.msra.mxu1 %v3046_v61  ;;  %2279 = vmatprep.subr.bf16.mxu0 %v2666_v10 }
  0x69   : >> { %2299 = vmatprep.subr.bf16.mxu1 %v2666_v10 }
  0x6b   : >> { %2280 = vmatpush3.bf16.msra.mxu0 %v3053_v62 }
  0x6c   : >> { %2300 = vmatpush3.bf16.msra.mxu1 %v3060_v63  ;;  %2281 = vmatprep.subr.bf16.mxu0 %v2666_v10 }
  0x6d   : >> { %2301 = vmatprep.subr.bf16.mxu1 %v2666_v10 }
  0x6f   : >> { %2282 = vmatpush3.bf16.msra.mxu0 %v3067_v1 }
  0x70   : >> { %2302 = vmatpush3.bf16.msra.mxu1 %v3075_v3  ;;  %2307 = vmatprep.subr.bf16.mxu0 %v2666_v10 }
  0x71   : >> { %2327 = vmatprep.subr.bf16.mxu1 %v2666_v10 }
  0x72   : >> { %2284 = vmatmul.mubr.bf16.vlgmr.msra.gmra.mrb[8].mxu0 %v3079_v5 }
  0x73   : >> { %2304 = vmatmul.mubr.bf16.vlgmr.msra.gmra.mrb[8].mxu1 %v3082_v6  ;;  %2308 = vmatpush3.bf16.msra.mxu0 %v3087_v26 }
  0x74   : >> { %2328 = vmatpush3.bf16.msra.mxu1 %v3094_v27  ;;  %2309 = vmatprep.subr.bf16.mxu0 %v2666_v10  ;;  %v1955_v27 = vld [vmem:[%s2821_s4 + $0x21] sm:$0xff] }
  0x75   : >> { %2329 = vmatprep.subr.bf16.mxu1 %v2666_v10  ;;  %2323 = vmatprep.mubr.msk.bf16.mxu0 %vm2667_vm2, %v2666_v10 }
  0x76   : >> { %2343 = vmatprep.mubr.msk.bf16.mxu1 %vm2667_vm2, %v2666_v10 }
  0x77   : >> { %2310 = vmatpush3.bf16.msra.mxu0 %v3103_v28 }
  0x78   : >> { %2330 = vmatpush3.bf16.msra.mxu1 %v3110_v29  ;;  %2311 = vmatprep.subr.bf16.mxu0 %v2666_v10  ;;  %v1930_v29 = vld [vmem:[%s2821_s4 + $0x20] sm:$0xff] }
  0x79   : >> { %2331 = vmatprep.subr.bf16.mxu1 %v2666_v10  ;;  %v3203_v3 = vpack.c.bf16 %v1930_v29, %v1930_v29  ;;  %v3235_v29 = vld [vmem:[%s3463_s1 + $0x210] sm:$0xff]  }
  0x7b   : >> { %2312 = vmatpush3.bf16.msra.mxu0 %v3121_v46 }
  0x7c   : >> { %2332 = vmatpush3.bf16.msra.mxu1 %v3128_v47  ;;  %2313 = vmatprep.subr.bf16.mxu0 %v2666_v10  ;;  %v3191_v47 = vld [vmem:[%s3463_s1 + $0x1b8] sm:$0xff]  }
  0x7d   : >> { %2333 = vmatprep.subr.bf16.mxu1 %v2666_v10 }
  0x7f   : >> { %2314 = vmatpush3.bf16.msra.mxu0 %v3135_v48 }
  0x80   : >> { %2334 = vmatpush3.bf16.msra.mxu1 %v3142_v2  ;;  %2315 = vmatprep.subr.bf16.mxu0 %v2666_v10  ;;  %v3177_v2 = vld [vmem:[%s3463_s1 + $0x1b0] sm:$0xff]  }
  0x81   : >> { %2335 = vmatprep.subr.bf16.mxu1 %v2666_v10  ;;  %3488 = vst [vmem:[#allocation12_spill] sm:$0xff] %v3177_v2 }
  0x83   : >> { %2316 = vmatpush3.bf16.msra.mxu0 %v3149_v4 }
  0x84   : >> { %2336 = vmatpush3.bf16.msra.mxu1 %v3156_v8  ;;  %2317 = vmatprep.subr.bf16.mxu0 %v2666_v10  ;;  %v3184_v8 = vld [vmem:[%s3463_s1 + $0x1f0] sm:$0xff]  }
  0x85   : >> { %2337 = vmatprep.subr.bf16.mxu1 %v2666_v10  ;;  %3489 = vst [vmem:[#allocation13_spill] sm:$0xff] %v3184_v8 }
  0x87   : >> { %2318 = vmatpush3.bf16.msra.mxu0 %v3163_v7 }
  0x88   : >> { %2338 = vmatpush3.bf16.msra.mxu1 %v3170_v0  ;;  %2319 = vmatprep.subr.bf16.mxu0 %v2666_v10  ;;  %v3199_v0 = vld [vmem:[%s3463_s1 + $0x1f8] sm:$0xff]  }
  0x89   : >> { %2339 = vmatprep.subr.bf16.mxu1 %v2666_v10  ;;  %3490 = vst [vmem:[#allocation14_spill] sm:$0xff] %v3199_v0 }
  0x8b   : >> { %2320 = vmatpush3.bf16.msra.mxu0 %v3177_v2  ;;  %v3206_v2 = vpack.c.bf16 %v1955_v27, %v1955_v27  ;;  %v3222_v27 = vld [vmem:[%s3463_s1 + $0x208] sm:$0xff]  }
  0x8c   : >> { %2340 = vmatpush3.bf16.msra.mxu1 %v3184_v8  ;;  %2321 = vmatprep.subr.bf16.mxu0 %v2666_v10  ;;  %v3211_v8 = vld [vmem:[%s3463_s1 + $0x200] sm:$0xff]  }
  0x8d   : >> { %2341 = vmatprep.subr.bf16.mxu1 %v2666_v10 }
  0x8f   : >> { %2322 = vmatpush3.bf16.msra.mxu0 %v3191_v47 }
  0x90   : >> { %2342 = vmatpush3.bf16.msra.mxu1 %v3199_v0  ;;  %2347 = vmatprep.subr.bf16.mxu0 %v2666_v10  ;;  %v1980_v0 = vld [vmem:[%s2821_s4 + $0x22] sm:$0xff] }
  0x91   : >> { %2367 = vmatprep.subr.bf16.mxu1 %v2666_v10 }
  0x92   : >> { %2324 = vmatmul.mubr.bf16.vlgmr.msra.gmra.mrb[12].mxu0 %v3203_v3 }
  0x93   : >> { %2344 = vmatmul.mubr.bf16.vlgmr.msra.gmra.mrb[12].mxu1 %v3206_v2  ;;  %2348 = vmatpush3.bf16.msra.mxu0 %v3211_v8 }
  0x94   : >> { %2368 = vmatpush3.bf16.msra.mxu1 %v2723_v9  ;;  %2349 = vmatprep.subr.bf16.mxu0 %v2666_v10  ;;  %v3244_v9 = vld [vmem:[%s3463_s1 + $0x218] sm:$0xff]  }
  0x95   : >> { %2369 = vmatprep.subr.bf16.mxu1 %v2666_v10  ;;  %2363 = vmatprep.mubr.msk.bf16.mxu0 %vm2667_vm2, %v2666_v10 }
  0x96   : >> { %2383 = vmatprep.mubr.msk.bf16.mxu1 %vm2667_vm2, %v2666_v10 }
  0x97   : >> { %2350 = vmatpush3.bf16.msra.mxu0 %v3222_v27 }
  0x98   : >> { %2370 = vmatpush3.bf16.msra.mxu1 %v2736_v12  ;;  %2351 = vmatprep.subr.bf16.mxu0 %v2666_v10  ;;  %v3253_v12 = vld [vmem:[%s3463_s1 + $0x220] sm:$0xff]  }
  0x99   : >> { %2371 = vmatprep.subr.bf16.mxu1 %v2666_v10 }
  0x9b   : >> { %2352 = vmatpush3.bf16.msra.mxu0 %v3235_v29 }
  0x9c   : >> { %2372 = vmatpush3.bf16.msra.mxu1 %v2754_v14  ;;  %2353 = vmatprep.subr.bf16.mxu0 %v2666_v10  ;;  %v3262_v14 = vld [vmem:[%s3463_s1 + $0x228] sm:$0xff]  }
  0x9d   : >> { %2373 = vmatprep.subr.bf16.mxu1 %v2666_v10  ;;  %3491 = vst [vmem:[#allocation15_spill] sm:$0xff] %v3262_v14 }
  0x9f   : >> { %2354 = vmatpush3.bf16.msra.mxu0 %v3244_v9 }
  0xa0   : >> { %2374 = vmatpush3.bf16.msra.mxu1 %v2768_v16  ;;  %2355 = vmatprep.subr.bf16.mxu0 %v2666_v10  ;;  %v3271_v16 = vld [vmem:[%s3463_s1 + $0x230] sm:$0xff]  }
  0xa1   : >> { %2375 = vmatprep.subr.bf16.mxu1 %v2666_v10 }
  0xa3   : >> { %2356 = vmatpush3.bf16.msra.mxu0 %v3253_v12 }
  0xa4   : >> { %2376 = vmatpush3.bf16.msra.mxu1 %v2782_v18  ;;  %2357 = vmatprep.subr.bf16.mxu0 %v2666_v10  ;;  %v3280_v18 = vld [vmem:[%s3463_s1 + $0x238] sm:$0xff]  }
  0xa5   : >> { %2377 = vmatprep.subr.bf16.mxu1 %v2666_v10 }
  0xa7   : >> { %2358 = vmatpush3.bf16.msra.mxu0 %v3262_v14  ;;  %v3286_v14 = vpack.c.bf16 %v1980_v0, %v1980_v0 }
  0xa8   : >> { %2378 = vmatpush3.bf16.msra.mxu1 %v2796_v20  ;;  %2359 = vmatprep.subr.bf16.mxu0 %v2666_v10 }
  0xa9   : >> { %2379 = vmatprep.subr.bf16.mxu1 %v2666_v10 }
  0xab   : >> { %2360 = vmatpush3.bf16.msra.mxu0 %v3271_v16 }
  0xac   : >> { %2380 = vmatpush3.bf16.msra.mxu1 %v2811_v22  ;;  %2361 = vmatprep.subr.bf16.mxu0 %v2666_v10 }
  0xad   : >> { %2381 = vmatprep.subr.bf16.mxu1 %v2666_v10 }
  0xaf   : >> { %2362 = vmatpush3.bf16.msra.mxu0 %v3280_v18 }
  0xb0   : >> { %2382 = vmatpush3.bf16.msra.mxu1 %v2827_v24  ;;  %2387 = vmatprep.subr.bf16.mxu0 %v2666_v10  ;;  %v2008_v24 = vld [vmem:[%s2821_s4 + $0x30] sm:$0xff] }
  0xb1   : >> { %2407 = vmatprep.subr.bf16.mxu1 %v2666_v10 }
  0xb2   : >> { %2364 = vmatmul.mubr.bf16.vlgmr.msra.gmra.mrb[16].mxu0 %v3286_v14 }
  0xb3   : >> { %2384 = vmatmul.mubr.bf16.vlgmr.msra.gmra.mrb[16].mxu1 %v3079_v5  ;;  %2388 = vmatpush3.bf16.msra.mxu0 %v2730_v11 }
  0xb4   : >> { %2408 = vmatpush3.bf16.msra.mxu1 %v2844_v30  ;;  %2389 = vmatprep.subr.bf16.mxu0 %v2666_v10  ;;  %v1425_v30 = vpack.c.bf16 %v2008_v24, %v2008_v24 }
  0xb5   : >> { %2409 = vmatprep.subr.bf16.mxu1 %v2666_v10  ;;  %2403 = vmatprep.mubr.msk.bf16.mxu0 %vm2667_vm2, %v2666_v10 }
  0xb6   : >> { %2423 = vmatprep.mubr.msk.bf16.mxu1 %vm2667_vm2, %v2666_v10 }
  0xb7   : >> { %2390 = vmatpush3.bf16.msra.mxu0 %v2745_v13 }
  0xb8   : >> { %2410 = vmatpush3.bf16.msra.mxu1 %v2858_v32  ;;  %2391 = vmatprep.subr.bf16.mxu0 %v2666_v10  ;;  %v3496_v32 = vld [vmem:[#allocation8_spill] sm:$0xff] }
  0xb9   : >> { %2411 = vmatprep.subr.bf16.mxu1 %v2666_v10 }
  0xbb   : >> { %2392 = vmatpush3.bf16.msra.mxu0 %v2761_v15 }
  0xbc   : >> { %2412 = vmatpush3.bf16.msra.mxu1 %v2876_v34  ;;  %2393 = vmatprep.subr.bf16.mxu0 %v2666_v10 }
  0xbd   : >> { %2413 = vmatprep.subr.bf16.mxu1 %v2666_v10 }
  0xbf   : >> { %2394 = vmatpush3.bf16.msra.mxu0 %v2775_v17 }
  0xc0   : >> { %2414 = vmatpush3.bf16.msra.mxu1 %v2890_v36  ;;  %2395 = vmatprep.subr.bf16.mxu0 %v2666_v10 }
  0xc1   : >> { %2415 = vmatprep.subr.bf16.mxu1 %v2666_v10 }
  0xc3   : >> { %2396 = vmatpush3.bf16.msra.mxu0 %v2789_v19 }
  0xc4   : >> { %2416 = vmatpush3.bf16.msra.mxu1 %v2904_v38  ;;  %2397 = vmatprep.subr.bf16.mxu0 %v2666_v10 }
  0xc5   : >> { %2417 = vmatprep.subr.bf16.mxu1 %v2666_v10 }
  0xc7   : >> { %2398 = vmatpush3.bf16.msra.mxu0 %v2803_v21 }
  0xc8   : >> { %2418 = vmatpush3.bf16.msra.mxu1 %v2918_v40  ;;  %2399 = vmatprep.subr.bf16.mxu0 %v2666_v10  ;;  %v3499_v40 = vld [vmem:[#allocation11_spill] sm:$0xff] }
  0xc9   : >> { %2419 = vmatprep.subr.bf16.mxu1 %v2666_v10 }
  0xcb   : >> { %2400 = vmatpush3.bf16.msra.mxu0 %v2818_v23  ;;  %v3492_v23 = vld [vmem:[#allocation12_spill] sm:$0xff] }
  0xcc   : >> { %2420 = vmatpush3.bf16.msra.mxu1 %v2932_v42  ;;  %2401 = vmatprep.subr.bf16.mxu0 %v2666_v10 }
  0xcd   : >> { %2421 = vmatprep.subr.bf16.mxu1 %v2666_v10 }
  0xcf   : >> { %2402 = vmatpush3.bf16.msra.mxu0 %v2832_v25  ;;  %v3493_v25 = vld [vmem:[#allocation5_spill] sm:$0xff] }
  0xd0   : >> { %2422 = vmatpush3.bf16.msra.mxu1 %v2945_v44  ;;  %2427 = vmatprep.subr.bf16.mxu0 %v2666_v10 }
  0xd1   : >> { %2447 = vmatprep.subr.bf16.mxu1 %v2666_v10 }
  0xd2   : >> { %2404 = vmatmul.mubr.bf16.vlgmr.msra.gmra.mrb[20].mxu0 %v2959_v49  ;;  %v3501_v49 = vld [vmem:[#allocation13_spill] sm:$0xff] }
  0xd3   : >> { %2424 = vmatmul.mubr.bf16.vlgmr.msra.gmra.mrb[20].mxu1 %v3082_v6  ;;  %2428 = vmatpush3.bf16.msra.mxu0 %v2851_v31  ;;  %v3495_v31 = vld [vmem:[#allocation7_spill] sm:$0xff] }
  0xd4   : >> { %2448 = vmatpush3.bf16.msra.mxu1 %v2964_v50  ;;  %2429 = vmatprep.subr.bf16.mxu0 %v2666_v10  ;;  %v2009_v50 = vld [vmem:[%s2821_s4 + $0x31] sm:$0xff] }
  0xd5   : >> { %2449 = vmatprep.subr.bf16.mxu1 %v2666_v10  ;;  %2443 = vmatprep.mubr.msk.bf16.mxu0 %vm2667_vm2, %v2666_v10 }
  0xd6   : >> { %2463 = vmatprep.mubr.msk.bf16.mxu1 %vm2667_vm2, %v2666_v10 }
  0xd7   : >> { %2430 = vmatpush3.bf16.msra.mxu0 %v2865_v33  ;;  %v3498_v33 = vld [vmem:[#allocation10_spill] sm:$0xff] }
  0xd8   : >> { %2450 = vmatpush3.bf16.msra.mxu1 %v2979_v52  ;;  %2431 = vmatprep.subr.bf16.mxu0 %v2666_v10  ;;  %v1468_v52 = vpack.c.bf16 %v2009_v50, %v2009_v50 }
  0xd9   : >> { %2451 = vmatprep.subr.bf16.mxu1 %v2666_v10 }
  0xdb   : >> { %2432 = vmatpush3.bf16.msra.mxu0 %v2883_v35 }
  0xdc   : >> { %2452 = vmatpush3.bf16.msra.mxu1 %v2997_v54  ;;  %2433 = vmatprep.subr.bf16.mxu0 %v2666_v10 }
  0xdd   : >> { %2453 = vmatprep.subr.bf16.mxu1 %v2666_v10 }
  0xdf   : >> { %2434 = vmatpush3.bf16.msra.mxu0 %v2897_v37 }
  0xe0   : >> { %2454 = vmatpush3.bf16.msra.mxu1 %v3011_v56  ;;  %2435 = vmatprep.subr.bf16.mxu0 %v2666_v10 }
  0xe1   : >> { %2455 = vmatprep.subr.bf16.mxu1 %v2666_v10 }
  0xe3   : >> { %2436 = vmatpush3.bf16.msra.mxu0 %v2911_v39 }
  0xe4   : >> { %2456 = vmatpush3.bf16.msra.mxu1 %v3025_v58  ;;  %2437 = vmatprep.subr.bf16.mxu0 %v2666_v10 }
  0xe5   : >> { %2457 = vmatprep.subr.bf16.mxu1 %v2666_v10 }
  0xe7   : >> { %2438 = vmatpush3.bf16.msra.mxu0 %v2925_v41 }
  0xe8   : >> { %2458 = vmatpush3.bf16.msra.mxu1 %v3039_v60  ;;  %2439 = vmatprep.subr.bf16.mxu0 %v2666_v10 }
  0xe9   : >> { %2459 = vmatprep.subr.bf16.mxu1 %v2666_v10 }
  0xeb   : >> { %2440 = vmatpush3.bf16.msra.mxu0 %v2939_v43  ;;  %v3500_v43 = vld [vmem:[#allocation15_spill] sm:$0xff] }
  0xec   : >> { %2460 = vmatpush3.bf16.msra.mxu1 %v3053_v62  ;;  %2441 = vmatprep.subr.bf16.mxu0 %v2666_v10 }
  0xed   : >> { %2461 = vmatprep.subr.bf16.mxu1 %v2666_v10 }
  0xef   : >> { %2442 = vmatpush3.bf16.msra.mxu0 %v2950_v45 }
  0xf0   : >> { %2462 = vmatpush3.bf16.msra.mxu1 %v3067_v1  ;;  %2467 = vmatprep.subr.bf16.mxu0 %v2666_v10 }
  0xf1   : >> { %2487 = vmatprep.subr.bf16.mxu1 %v2666_v10 }
  0xf2   : >> { %2444 = vmatmul.mubr.bf16.vlgmr.msra.gmra.mrb[24].mxu0 %v3203_v3 }
  0xf3   : >> { %2464 = vmatmul.mubr.bf16.vlgmr.msra.gmra.mrb[24].mxu1 %v3206_v2  ;;  %2468 = vmatpush3.bf16.msra.mxu0 %v2971_v51  ;;  %v2010_v51 = vld [vmem:[%s2821_s4 + $0x32] sm:$0xff]  ;;  %s2013_s4 = sshll.u32 %s2663_s24, 2  ;;  %s190_s24 = sadd.s32 1, %s2663_s24  }
  0xf4   : >> { %2488 = vmatpush3.bf16.msra.mxu1 %v3087_v26  ;;  %2469 = vmatprep.subr.bf16.mxu0 %v2666_v10  ;;  %v1511_v54 = vpack.c.bf16 %v2010_v51, %v2010_v51  ;;  %s1705_s11 = scalar_lea.vmem %s2704_s20, %s2013_s4  ;;  %p187_p4 = scmp.ge.s32.totalorder %s190_s24, 4  }
  0xf5   : >> { %2489 = vmatprep.subr.bf16.mxu1 %v2666_v10  ;;  %2483 = vmatprep.mubr.msk.bf16.mxu0 %vm2667_vm2, %v2666_v10 }
  0xf6   : >> { %2503 = vmatprep.mubr.msk.bf16.mxu1 %vm2667_vm2, %v2666_v10 }
  0xf7   : >> { %2470 = vmatpush3.bf16.msra.mxu0 %v2986_v53  ;;  %v3502_v53 = vld [vmem:[#allocation14_spill] sm:$0xff] }
  0xf8   : >> { %2490 = vmatpush3.bf16.msra.mxu1 %v3103_v28  ;;  %2471 = vmatprep.subr.bf16.mxu0 %v2666_v10 }
  0xf9   : >> { %2491 = vmatprep.subr.bf16.mxu1 %v2666_v10 }
  0xfb   : >> { %2472 = vmatpush3.bf16.msra.mxu0 %v3004_v55 }
  0xfc   : >> { %2492 = vmatpush3.bf16.msra.mxu1 %v3121_v46  ;;  %2473 = vmatprep.subr.bf16.mxu0 %v2666_v10 }
  0xfd   : >> { %2493 = vmatprep.subr.bf16.mxu1 %v2666_v10 }
  0xff   : >> { %2474 = vmatpush3.bf16.msra.mxu0 %v3018_v57 }
 0x100   : >> { %2494 = vmatpush3.bf16.msra.mxu1 %v3135_v48  ;;  %2475 = vmatprep.subr.bf16.mxu0 %v2666_v10 }
 0x101   : >> { %2495 = vmatprep.subr.bf16.mxu1 %v2666_v10 }
 0x103   : >> { %2476 = vmatpush3.bf16.msra.mxu0 %v3032_v59 }
 0x104   : >> { %2496 = vmatpush3.bf16.msra.mxu1 %v3149_v4  ;;  %2477 = vmatprep.subr.bf16.mxu0 %v2666_v10 }
 0x105   : >> { %v313_v0 = vpop.f32.mrb[0].mxu0  ;;  %2497 = vmatprep.subr.bf16.mxu1 %v2666_v10 }
 0x106   : >> { %v401_v11 = vpop.f32.mrb[0].mxu1  ;;  %v2205_v13 = vpop.f32.mrb[1].mxu0 }
 0x107   : >> { %v402_v15 = vadd.f32 %v401_v11, %v313_v0  ;;  %v2225_v17 = vpop.f32.mrb[1].mxu1  ;;  %v316_v19 = vpop.f32.mrb[2].mxu0  ;;  %2478 = vmatpush3.bf16.msra.mxu0 %v3046_v61 }
 0x108   : >> { %v404_v20 = vpop.f32.mrb[2].mxu1  ;;  %2498 = vmatpush3.bf16.msra.mxu1 %v3163_v7  ;;  %v2206_v21 = vpop.f32.mrb[3].mxu0  ;;  %2479 = vmatprep.subr.bf16.mxu0 %v2666_v10  ;;  %v3494_v7 = vld [vmem:[#allocation6_spill] sm:$0xff] }
 0x109   : >> { %v2226_v22 = vpop.f32.mrb[3].mxu1  ;;  %2499 = vmatprep.subr.bf16.mxu1 %v2666_v10 }
 0x10b   : >> { %2480 = vmatpush3.bf16.msra.mxu0 %v3060_v63 }
 0x10c   : >> { %2500 = vmatpush3.bf16.msra.mxu1 %v3492_v23  ;;  %2481 = vmatprep.subr.bf16.mxu0 %v2666_v10 }
 0x10d   : >> { %2501 = vmatprep.subr.bf16.mxu1 %v2666_v10 }
 0x10f   : >> { %2482 = vmatpush3.bf16.msra.mxu0 %v3493_v25 }
 0x110   : >> { %2502 = vmatpush3.bf16.msra.mxu1 %v3191_v47  ;;  %2507 = vmatprep.subr.bf16.mxu0 %v2666_v10 }
 0x111   : >> { %2527 = vmatprep.subr.bf16.mxu1 %v2666_v10 }
 0x112   : >> { %2484 = vmatmul.mubr.bf16.vlgmr.msra.gmra.mrb[28].mxu0 %v3286_v14 }
 0x113   : >> { %2504 = vmatmul.mubr.bf16.vlgmr.msra.gmra.mrb[28].mxu1 %v1425_v30  ;;  %2508 = vmatpush3.bf16.msra.mxu0 %v3494_v7 }
 0x114   : >> { %2528 = vmatpush3.bf16.msra.mxu1 %v3211_v8  ;;  %2509 = vmatprep.subr.bf16.mxu0 %v2666_v10  ;;  %v3497_v8 = vld [vmem:[#allocation9_spill] sm:$0xff] }
 0x115   : >> { %2529 = vmatprep.subr.bf16.mxu1 %v2666_v10  ;;  %2523 = vmatprep.mubr.msk.bf16.mxu0 %vm2667_vm2, %v2666_v10 }
 0x116   : >> { %2543 = vmatprep.mubr.msk.bf16.mxu1 %vm2667_vm2, %v2666_v10 }
 0x117   : >> { %2510 = vmatpush3.bf16.msra.mxu0 %v3495_v31 }
 0x118   : >> { %2530 = vmatpush3.bf16.msra.mxu1 %v3222_v27  ;;  %2511 = vmatprep.subr.bf16.mxu0 %v2666_v10 }
 0x119   : >> { %2531 = vmatprep.subr.bf16.mxu1 %v2666_v10 }
 0x11b   : >> { %2512 = vmatpush3.bf16.msra.mxu0 %v3496_v32 }
 0x11c   : >> { %2532 = vmatpush3.bf16.msra.mxu1 %v3235_v29  ;;  %2513 = vmatprep.subr.bf16.mxu0 %v2666_v10 }
 0x11d   : >> { %2533 = vmatprep.subr.bf16.mxu1 %v2666_v10 }
 0x11f   : >> { %2514 = vmatpush3.bf16.msra.mxu0 %v3497_v8 }
 0x120   : >> { %2534 = vmatpush3.bf16.msra.mxu1 %v3244_v9  ;;  %2515 = vmatprep.subr.bf16.mxu0 %v2666_v10 }
 0x121   : >> { %2535 = vmatprep.subr.bf16.mxu1 %v2666_v10 }
 0x123   : >> { %2516 = vmatpush3.bf16.msra.mxu0 %v3498_v33 }
 0x124   : >> { %2536 = vmatpush3.bf16.msra.mxu1 %v3253_v12  ;;  %2517 = vmatprep.subr.bf16.mxu0 %v2666_v10 }
 0x125   : >> { %v508_v34 = vpop.f32.mrb[4].mxu0  ;;  %2537 = vmatprep.subr.bf16.mxu1 %v2666_v10 }
 0x126   : >> { %v514_v35 = vadd.f32 %v508_v34, %v402_v15  ;;  %v619_v36 = vpop.f32.mrb[4].mxu1  ;;  %v2245_v37 = vpop.f32.mrb[5].mxu0 }
 0x127   : >> { %v2265_v38 = vpop.f32.mrb[5].mxu1  ;;  %v511_v39 = vpop.f32.mrb[6].mxu0  ;;  %2518 = vmatpush3.bf16.msra.mxu0 %v3499_v40 }
 0x128   : >> { %v625_v41 = vadd.f32 %v619_v36, %v514_v35  ;;  %v622_v42 = vpop.f32.mrb[6].mxu1  ;;  %2538 = vmatpush3.bf16.msra.mxu1 %v3500_v43  ;;  %v2246_v44 = vpop.f32.mrb[7].mxu0  ;;  %2519 = vmatprep.subr.bf16.mxu0 %v2666_v10 }
 0x129   : >> { %v2266_v45 = vpop.f32.mrb[7].mxu1  ;;  %2539 = vmatprep.subr.bf16.mxu1 %v2666_v10 }
 0x12b   : >> { %2520 = vmatpush3.bf16.msra.mxu0 %v3501_v49 }
 0x12c   : >> { %2540 = vmatpush3.bf16.msra.mxu1 %v3271_v16  ;;  %2521 = vmatprep.subr.bf16.mxu0 %v2666_v10 }
 0x12d   : >> { %2541 = vmatprep.subr.bf16.mxu1 %v2666_v10 }
 0x12f   : >> { %2522 = vmatpush3.bf16.msra.mxu0 %v3502_v53 }
 0x130   : >> { %2542 = vmatpush3.bf16.msra.mxu1 %v3280_v18  ;;  %2547 = vmatprep.subr.mxu0 %v2666_v10 }
 0x131   : >> { %2552 = vmatprep.subr.mxu1 %v2666_v10 }
 0x132   : >> { %2524 = vmatmul.mubr.bf16.vlgmr.msra.gmra.mrb[32].mxu0 %v1468_v52 }
 0x133   : >> { %2544 = vmatmul.mubr.bf16.vlgmr.msra.gmra.mrb[32].mxu1 %v1511_v54  ;;  %2549 = vmatprep.mubr.msk.f32.mxu0 %vm2667_vm2, %v2666_v10 }
 0x134   : >> { %2554 = vmatprep.mubr.msk.f32.mxu1 %vm2667_vm2, %v2666_v10 }
 0x145   : >> { %v727_v55 = vpop.f32.mrb[8].mxu0 }
 0x146   : >> { %v733_v56 = vadd.f32 %v727_v55, %v625_v41  ;;  %v835_v57 = vpop.f32.mrb[8].mxu1  ;;  %v2285_v58 = vpop.f32.mrb[9].mxu0 }
 0x147   : >> { %v2305_v59 = vpop.f32.mrb[9].mxu1  ;;  %v730_v60 = vpop.f32.mrb[10].mxu0 }
 0x148   : >> { %v841_v61 = vadd.f32 %v835_v57, %v733_v56  ;;  %v838_v62 = vpop.f32.mrb[10].mxu1  ;;  %v2286_v63 = vpop.f32.mrb[11].mxu0  ;;  %v3503_v56 = vld [vmem:[#allocation2_spill] sm:$0xff] }
 0x149   : >> { %v2306_v1 = vpop.f32.mrb[11].mxu1 }
 0x165   : >> { %v946_v3 = vpop.f32.mrb[12].mxu0 }
 0x166   : >> { %v952_v5 = vadd.f32 %v946_v3, %v841_v61  ;;  %v1054_v6 = vpop.f32.mrb[12].mxu1  ;;  %v2325_v26 = vpop.f32.mrb[13].mxu0 }
 0x167   : >> { %v2345_v28 = vpop.f32.mrb[13].mxu1  ;;  %v949_v46 = vpop.f32.mrb[14].mxu0 }
 0x168   : >> { %v1060_v47 = vadd.f32 %v1054_v6, %v952_v5  ;;  %v1057_v48 = vpop.f32.mrb[14].mxu1  ;;  %v2326_v2 = vpop.f32.mrb[15].mxu0  ;;  %v3504_v5 = vld [vmem:[#allocation3_spill] sm:$0xff]  ;;  %v3505_v6 = vld [vmem:[#allocation4_spill] sm:$0xff] }
 0x169   : >> { %v2346_v10 = vpop.f32.mrb[15].mxu1 }
 0x185   : >> { %v1162_v4 = vpop.f32.mrb[16].mxu0 }
 0x186   : >> { %v1168_v27 = vadd.f32 %v1162_v4, %v1060_v47  ;;  %v1211_v29 = vpop.f32.mrb[16].mxu1  ;;  %v2365_v9 = vpop.f32.mrb[17].mxu0 }
 0x187   : >> { %v2385_v12 = vpop.f32.mrb[17].mxu1  ;;  %v1165_v14 = vpop.f32.mrb[18].mxu0 }
 0x188   : >> { %v1214_v16 = vpop.f32.mrb[18].mxu1  ;;  %v2366_v18 = vpop.f32.mrb[19].mxu0  ;;  %v1175_v57 = vadd.f32 %v3503_v56, %v1168_v27 }
 0x189   : >> { %v2386_v0 = vpop.f32.mrb[19].mxu1 }
 0x18a   : >> { %v1176_v63 = vmax.f32 %v1175_v57, 0.0 }
 0x1a5   : >> { %v1251_v11 = vpop.f32.mrb[20].mxu0 }
 0x1a6   : >> { %v1252_v13 = vadd.f32 %v1251_v11, %v1211_v29  ;;  %v1291_v15 = vpop.f32.mrb[20].mxu1  ;;  %v2405_v17 = vpop.f32.mrb[21].mxu0 }
 0x1a7   : >> { %v2425_v19 = vpop.f32.mrb[21].mxu1  ;;  %v1254_v20 = vpop.f32.mrb[22].mxu0 }
 0x1a8   : >> { %v1297_v21 = vadd.f32 %v1291_v15, %v1252_v13  ;;  %v1294_v22 = vpop.f32.mrb[22].mxu1  ;;  %v2406_v23 = vpop.f32.mrb[23].mxu0 }
 0x1a9   : >> { %v2426_v24 = vpop.f32.mrb[23].mxu1 }
 0x1c5   : >> { %v1332_v25 = vpop.f32.mrb[24].mxu0 }
 0x1c6   : >> { %v1338_v30 = vadd.f32 %v1332_v25, %v1297_v21  ;;  %v1373_v7 = vpop.f32.mrb[24].mxu1  ;;  %v2445_v31 = vpop.f32.mrb[25].mxu0 }
 0x1c7   : >> { %v2465_v32 = vpop.f32.mrb[25].mxu1  ;;  %v1335_v8 = vpop.f32.mrb[26].mxu0 }
 0x1c8   : >> { %v1379_v33 = vadd.f32 %v1373_v7, %v1338_v30  ;;  %v1376_v34 = vpop.f32.mrb[26].mxu1  ;;  %v2446_v35 = vpop.f32.mrb[27].mxu0 }
 0x1c9   : >> { %v2466_v36 = vpop.f32.mrb[27].mxu1 }
 0x1e5   : >> { %v1414_v37 = vpop.f32.mrb[28].mxu0 }
 0x1e6   : >> { %v1420_v38 = vadd.f32 %v1414_v37, %v1379_v33  ;;  %v1460_v39 = vpop.f32.mrb[28].mxu1  ;;  %v2485_v40 = vpop.f32.mrb[29].mxu0 }
 0x1e7   : >> { %v2505_v41 = vpop.f32.mrb[29].mxu1  ;;  %v1417_v42 = vpop.f32.mrb[30].mxu0 }
 0x1e8   : >> { %v1466_v43 = vadd.f32 %v1460_v39, %v1420_v38  ;;  %v1463_v44 = vpop.f32.mrb[30].mxu1  ;;  %v2486_v45 = vpop.f32.mrb[31].mxu0 }
 0x1e9   : >> { %v2506_v49 = vpop.f32.mrb[31].mxu1 }
 0x205   : >> { %v1503_v50 = vpop.f32.mrb[32].mxu0 }
 0x206   : >> { %v1509_v51 = vadd.f32 %v1503_v50, %v1466_v43  ;;  %v1546_v52 = vpop.f32.mrb[32].mxu1  ;;  %v2525_v53 = vpop.f32.mrb[33].mxu0 }
 0x207   : >> { %v2545_v54 = vpop.f32.mrb[33].mxu1  ;;  %v1506_v55 = vpop.f32.mrb[34].mxu0 }
 0x208   : >> { %v1552_v58 = vadd.f32 %v1546_v52, %v1509_v51  ;;  %v1549_v59 = vpop.f32.mrb[34].mxu1  ;;  %v2526_v60 = vpop.f32.mrb[35].mxu0 }
 0x209   : >> { %v2546_v61 = vpop.f32.mrb[35].mxu1 }
 0x20a   : >> { %v1553_v62 = vadd.f32 %v3503_v56, %v1552_v58 }
 0x20c   : >> { %v1554_v1 = vmax.f32 %v1553_v62, 0.0 }
 0x20e   : >> { %v1555_v3 = vmax.f32 %v1176_v63, %v1554_v1 }
 0x210   : >> { %2548 = vmatpush3.msra.mxu0 %v1555_v3  ;;  %2553 = vmatpush3.msra.mxu1 %v1555_v3 }
 0x211   : >> { %2550 = vmatmul.mubr.msk.f32.vlgmr.msra.gmra.mrb[36].mxu0 %vm1556_vm3, %v3504_v5  ;;  %2555 = vmatmul.mubr.msk.f32.vlgmr.msra.gmra.mrb[36].mxu1 %vm1556_vm3, %v3505_v6 }
 0x2e1   : > { %189 = sbr.rel (!%p187_p4) target bundleno = 17 (0x11), region = 82 }
 0x2e4   : >> { %v1626_v26 = vpop.f32.mrb[36].mxu0  ;;  %v1699_v28 = vpop.f32.mrb[36].mxu1 }
 0x2e5   : >> { %v1703_v46 = vmax.f32 %v1626_v26, %v1699_v28  ;;  %v2551_v47 = vpop.f32.mrb[37].mxu0  ;;  %v2556_v48 = vpop.f32.mrb[37].mxu1 }
 0x2e7   : >> { %1706 = vst [vmem:[%s1705_s11] sm:$0xf] %v1703_v46 }
 0x2e8 PF: > { %s13_s12 = sadd.s32 1, %s2659_s12  }
 0x2e9   : > { %p10_p5 = scmp.ge.s32.totalorder %s13_s12, 4  }
 0x2eb   :  { %12 = sbr.rel (!%p10_p5) target bundleno = 1 (0x1), region = 93 }

// kernel: vgg_s_forward.11
= control target key start
LH: loop header
LB: loop body
LE: loop exit
PB: predicated region body
PF: predicated region fallthrough
CT: control target
= control target key end

     0   :  { %v547_v1 = vmov 0.0   ;;  %vm548_vm0 = vmmov 0   ;;  %s716_s0 = inlined_call_operand.vmem [shape: f32[2,128], index: 0, kind: input, shape index: {}]   ;;  %s717_s1 = inlined_call_operand.vmem [shape: bf16[128,128], index: 1, kind: input, shape index: {}]   ;;  %s718_s2 = inlined_call_operand.vmem [shape: f32[1,128], index: 2, kind: input, shape index: {}]   ;;  %s719_s3 = inlined_call_operand.vmem [shape: bf16[128,128], index: 3, kind: input, shape index: {}]   ;;  %s720_s4 = inlined_call_operand.vmem [shape: f32[1,128], index: 4, kind: input, shape index: {}]   ;;  %s721_s5 = inlined_call_operand.vmem [shape: bf16[128,128], index: 5, kind: input, shape index: {}]   ;;  %s722_s6 = inlined_call_operand.vmem [shape: f32[1,128], index: 6, kind: input, shape index: {}]   ;;  %s723_s7 = inlined_call_operand.hbm [shape: f32[2,128], index: 7, kind: output, shape index: {}]  }
   0x1   :  { %v499_v0 = vld [vmem:[%s717_s1] sm:$0xff]   ;;  %436 = vmatprep.subr.bf16.mxu0 %v547_v1  ;;  %456 = vmatprep.subr.bf16.mxu1 %v547_v1  ;;  %v500_v2 = vld [vmem:[%s717_s1 + $0x8] sm:$0xff]   ;;  %v501_v3 = vld [vmem:[%s717_s1 + $0x10] sm:$0xff]  }
   0x2   :  { %437 = vmatpush3.bf16.msra.mxu0 %v499_v0  ;;  %452 = vmatprep.mubr.msk.bf16.mxu0 %vm548_vm0, %v547_v1  ;;  %v507_v4 = vld [vmem:[%s719_s3] sm:$0xff]   ;;  %v502_v5 = vld [vmem:[%s717_s1 + $0x18] sm:$0xff]   ;;  %v508_v6 = vld [vmem:[%s719_s3 + $0x8] sm:$0xff]  }
   0x3   :  { %438 = vmatprep.subr.bf16.mxu0 %v547_v1  ;;  %472 = vmatprep.mubr.msk.bf16.mxu1 %vm548_vm0, %v547_v1  ;;  %v503_v7 = vld [vmem:[%s717_s1 + $0x20] sm:$0xff]   ;;  %v509_v8 = vld [vmem:[%s719_s3 + $0x10] sm:$0xff]   ;;  %v504_v9 = vld [vmem:[%s717_s1 + $0x28] sm:$0xff]  }
   0x4   :  { %457 = vmatpush3.bf16.msra.mxu1 %v507_v4  ;;  %v510_v10 = vld [vmem:[%s719_s3 + $0x18] sm:$0xff]  }
   0x5   :  { %458 = vmatprep.subr.bf16.mxu1 %v547_v1 }
   0x6   :  { %439 = vmatpush3.bf16.msra.mxu0 %v500_v2 }
   0x7   :  { %440 = vmatprep.subr.bf16.mxu0 %v547_v1 }
   0x8   :  { %459 = vmatpush3.bf16.msra.mxu1 %v508_v6 }
   0x9   :  { %460 = vmatprep.subr.bf16.mxu1 %v547_v1 }
   0xa   :  { %441 = vmatpush3.bf16.msra.mxu0 %v501_v3 }
   0xb   :  { %442 = vmatprep.subr.bf16.mxu0 %v547_v1 }
   0xc   :  { %461 = vmatpush3.bf16.msra.mxu1 %v509_v8 }
   0xd   :  { %462 = vmatprep.subr.bf16.mxu1 %v547_v1 }
   0xe   :  { %443 = vmatpush3.bf16.msra.mxu0 %v502_v5 }
   0xf   :  { %444 = vmatprep.subr.bf16.mxu0 %v547_v1 }
  0x12   :  { %445 = vmatpush3.bf16.msra.mxu0 %v503_v7 }
  0x13   :  { %446 = vmatprep.subr.bf16.mxu0 %v547_v1 }
  0x14   :  { %12 = vsyncpa [#allocation3], 0  ;;  %v505_v11 = vld [vmem:[%s717_s1 + $0x30] sm:$0xff]   ;;  %463 = vmatpush3.bf16.msra.mxu1 %v510_v10  ;;  %v511_v12 = vld [vmem:[%s719_s3 + $0x20] sm:$0xff]   ;;  %s549_s30 = smov [#allocation2]  }
  0x15   :  { %464 = vmatprep.subr.bf16.mxu1 %v547_v1  ;;  %v506_v13 = vld [vmem:[%s717_s1 + $0x38] sm:$0xff]   ;;  %v28_v14 = vld [vmem:[%s716_s0] sm:$0x3]  ;;  %v512_v15 = vld [vmem:[%s719_s3 + $0x28] sm:$0xff]   ;;  %s374_s0 = sshll.u32 %s549_s30, 4  ;;  %s375_s0 = int_to_ptr.vmem [resolvable:$true] %s374_s0 }
  0x16   :  { %447 = vmatpush3.bf16.msra.mxu0 %v504_v9  ;;  %v29_v16 = vpack.c.bf16 %v28_v14, %v28_v14  ;;  %v513_v17 = vld [vmem:[%s719_s3 + $0x30] sm:$0xff]   ;;  %v514_v18 = vld [vmem:[%s719_s3 + $0x38] sm:$0xff]   ;;  %v515_v19 = vld [vmem:[%s721_s5] sm:$0xff]   ;;  %p528_p1 = scmp.lt.s32.totalorder %s375_s0, %s375_s0 }
  0x17   :  { %448 = vmatprep.subr.bf16.mxu0 %v547_v1  ;;  %v516_v20 = vld [vmem:[%s721_s5 + $0x8] sm:$0xff]   ;;  %v517_v21 = vld [vmem:[%s721_s5 + $0x10] sm:$0xff]   ;;  %v518_v22 = vld [vmem:[%s721_s5 + $0x18] sm:$0xff]  }
  0x18   :  { %465 = vmatpush3.bf16.msra.mxu1 %v511_v12  ;;  %v519_v23 = vld [vmem:[%s721_s5 + $0x20] sm:$0xff]   ;;  %v520_v24 = vld [vmem:[%s721_s5 + $0x28] sm:$0xff]   ;;  %v521_v33 = vld [vmem:[%s721_s5 + $0x30] sm:$0xff]  }
  0x19   :  { %466 = vmatprep.subr.bf16.mxu1 %v547_v1  ;;  %v382_v25 = vld [vmem:[%s718_s2] ss:$0 sm:$0xff]  ;;  %v522_v34 = vld [vmem:[%s721_s5 + $0x38] sm:$0xff]  }
  0x1a   :  { %449 = vmatpush3.bf16.msra.mxu0 %v505_v11  ;;  %v391_v35 = vld [vmem:[%s720_s4] ss:$0 sm:$0xff]  ;;  %s523_s4 = scalar_lea.vmem %s375_s0, 32 }
  0x1b   :  { %450 = vmatprep.subr.bf16.mxu0 %v547_v1  ;;  %v400_v43 = vld [vmem:[%s722_s6] ss:$0 sm:$0xff]  ;;  %p524_p0 = scmp.ne.s32.totalorder %s375_s0, %s523_s4  ;;  %p529_p2 = scmp.lt.s32.totalorder %s523_s4, %s523_s4 }
  0x1c   :  { %467 = vmatpush3.bf16.msra.mxu1 %v512_v15 }
  0x1d   :  { %468 = vmatprep.subr.bf16.mxu1 %v547_v1  ;;  %p530_p3 = por %p529_p2, %p528_p1 }
  0x1e   :  { %451 = vmatpush3.bf16.msra.mxu0 %v506_v13 }
  0x1f   :  { %476 = vmatprep.subr.bf16.mxu0 %v547_v1  ;;  %p531_p4 = pnand %p530_p3, %p524_p0 }
  0x20   :  { %469 = vmatpush3.bf16.msra.mxu1 %v513_v17 }
  0x21   :  { %453 = vmatmul.mubr.bf16.vlgmr.msra.gmra.mrb[0].mxu0 %v29_v16  ;;  %470 = vmatprep.subr.bf16.mxu1 %v547_v1 }
  0x22   :  { %492 = vmatprep.mubr.msk.bf16.mxu0 %vm548_vm0, %v547_v1  ;;  %477 = vmatpush3.bf16.msra.mxu0 %v515_v19 }
  0x23   :  { %478 = vmatprep.subr.bf16.mxu0 %v547_v1 }
  0x24   :  { %471 = vmatpush3.bf16.msra.mxu1 %v514_v18 }
  0x26   :  { %479 = vmatpush3.bf16.msra.mxu0 %v516_v20 }
  0x27   :  { %480 = vmatprep.subr.bf16.mxu0 %v547_v1 }
  0x2a   :  { %481 = vmatpush3.bf16.msra.mxu0 %v517_v21 }
  0x2b   :  { %482 = vmatprep.subr.bf16.mxu0 %v547_v1 }
  0x2e   :  { %483 = vmatpush3.bf16.msra.mxu0 %v518_v22 }
  0x2f   :  { %484 = vmatprep.subr.bf16.mxu0 %v547_v1 }
  0x32   :  { %485 = vmatpush3.bf16.msra.mxu0 %v519_v23 }
  0x33   :  { %486 = vmatprep.subr.bf16.mxu0 %v547_v1 }
  0x36   :  { %487 = vmatpush3.bf16.msra.mxu0 %v520_v24 }
  0x37   :  { %488 = vmatprep.subr.bf16.mxu0 %v547_v1 }
  0x3a   :  { %489 = vmatpush3.bf16.msra.mxu0 %v521_v33 }
  0x3b   :  { %490 = vmatprep.subr.bf16.mxu0 %v547_v1 }
  0x3e   :  { %491 = vmatpush3.bf16.msra.mxu0 %v522_v34 }
  0xf4   :  { %v135_v26 = vpop.f32.mrb[0].mxu0 }
  0xf5   :  { %v136_v27 = vadd.f32 %v382_v25, %v135_v26  ;;  %v454_v28 = vpop.f32.mrb[1].mxu0 }
  0xf6   :  { %v138_v29 = vpop.f32.mrb[2].mxu0 }
  0xf7   :  { %v141_v30 = vmax.f32 %v136_v27, 0.0  ;;  %v455_v31 = vpop.f32.mrb[3].mxu0 }
  0xf9   :  { %v142_v32 = vpack.c.bf16 %v141_v30, %v141_v30 }
  0xfb   :  { %473 = vmatmul.mubr.bf16.vlgmr.msra.gmra.mrb[0].mxu1 %v142_v32 }
 0x1ce   :  { %v248_v36 = vpop.f32.mrb[0].mxu1 }
 0x1cf   :  { %v249_v37 = vadd.f32 %v391_v35, %v248_v36  ;;  %v474_v38 = vpop.f32.mrb[1].mxu1 }
 0x1d0   :  { %v251_v39 = vpop.f32.mrb[2].mxu1 }
 0x1d1   :  { %v254_v40 = vmax.f32 %v249_v37, 0.0  ;;  %v475_v41 = vpop.f32.mrb[3].mxu1 }
 0x1d3   :  { %v255_v42 = vpack.c.bf16 %v254_v40, %v254_v40 }
 0x1d5   :  { %493 = vmatmul.mubr.bf16.vlgmr.msra.gmra.mrb[4].mxu0 %v255_v42 }
 0x2a8   :  { %v361_v44 = vpop.f32.mrb[4].mxu0 }
 0x2a9   :  { %v362_v45 = vadd.f32 %v400_v43, %v361_v44  ;;  %v494_v46 = vpop.f32.mrb[5].mxu0 }
 0x2aa   :  { %v364_v47 = vpop.f32.mrb[6].mxu0 }
 0x2ab   :  { %367 = vst [vmem:[#allocation2] sm:$0x3] %v362_v45  ;;  %v495_v48 = vpop.f32.mrb[7].mxu0 }
 0x2ac   :  { %534 = shalt.err (!%p531_p4)
}
 0x2ad   :  { %s535_s6 = scalar_lea.hbm %s723_s7, 32 }
 0x2ae   :  { %p536_p5 = scmp.ne.s32.totalorder %s723_s7, %s535_s6  ;;  %p539_p6 = scmp.lt.u32.totalorder %s535_s6, %s723_s7 }
 0x2b0   :  { %p541_p7 = pnand %p539_p6, %p536_p5 }
 0x2b2   :  { %544 = shalt.err (!%p541_p7)
}
 0x2b3   :  { %377 = dma.vmem_to_hbm [thread:$0]  %s375_s0, 32, %s723_s7, [#allocation3]  }
 0x2b4   :  { %545 = dma.done.wait [#allocation3], 32  }
 0x2b5   :  { %546 = vsyncadd [#allocation3], 4294967264 }
 0x2b6   :  { %381 = vsyncpa [#allocation3], 1 }

// kernel: vgg_s_forward.9
= control target key start
LH: loop header
LB: loop body
LE: loop exit
PB: predicated region body
PF: predicated region fallthrough
CT: control target
= control target key end

     0   :  { %s2692_s12 = smov 0   ;;  %s3466_s0 = inlined_call_operand.vmem [shape: f32[2,6,6,128], index: 0, kind: input, shape index: {}]   ;;  %s3467_s1 = inlined_call_operand.vmem [shape: bf16[3,3,128,128], index: 1, kind: input, shape index: {}]   ;;  %s3468_s2 = inlined_call_operand.vmem [shape: f32[1,128], index: 2, kind: input, shape index: {}]   ;;  %s3469_s3 = inlined_call_operand.vmem [shape: f32[2,2,2,128], index: 3, kind: output, shape index: {}]  }
   0x1 LB: > { %s1786_s13 = sadd.s32 4294967295, %s2663_s12   ;;  %p1790_p0 = scmp.ge.s32.totalorder %s2663_s12, 1  ;;  %s2663_s12 = sphi %s2692_s12, %s13_s12  }
   0x2   : > { %p137_p1 = scmp.lt.s32.totalorder %s2663_s12, 3 }
   0x4   : > { %p138_p2 = pnand %p1790_p0, %p137_p1 }
   0x5   : > { %p161_p3 = scmp.lt.s32.totalorder (!%p138_p2), %s1786_s13, 1  ;;  %v2703_v0 = vld [vmem:[%s3468_s2] ss:$0 sm:$0xff] (!%p138_p2)  ;;  %v173_v1 = vlaneseq (!%p138_p2)  ;;  %v2669_v6 = vmov (!%p138_p2), 0.0   ;;  %s2719_s24 = smov (!%p138_p2), 0  }
   0x6   : > { %141 = sbr.rel (%p138_p2) target bundleno = 744 (0x2e8), region = 32  ;;  %3482 = vst [vmem:[#allocation2_spill] sm:$0xff] (!%p138_p2), %v2703_v0 }
   0x7   : > { %v174_v2 = vshrl.u32 (!%p138_p2), %v173_v1, 7  ;;  %v176_v3 = vand.u32 (!%p138_p2), 127, %v173_v1 }
   0x9   : > { %v177_v4 = vmul.u32 (!%p138_p2), 2, %v174_v2 }
   0xb   : > { %vm178_vm0 = vcmp.eq.s32.totalorder (!%p138_p2), %v176_v3, %v177_v4  ;;  %v181_v5 = vadd.s32 (!%p138_p2), 1, %v177_v4 }
   0xc   : > { %v2715_v7 = vsel (!%p138_p2), %vm178_vm0, 1.0, %v2669_v6 }
   0xd   : > { %s3511_s13 = smov (!%p161_p3, %s1786_s13), 1  ;;  %3483 = vst [vmem:[#allocation3_spill] sm:$0xff] %v2715_v7  ;;  %vm182_vm1 = vcmp.eq.s32.totalorder %v176_v3, %v181_v5 }
   0xe   : > { %s2561_s16 = smul.u32 48, %s3511_s13  ;;  %s2020_s17 = sshll.u32 %s3511_s13, 2  ;;  %v2717_v8 = vsel %vm182_vm1, 1.0, %v2669_v6 }
   0xf   : > { %s2708_s20 = scalar_lea.vmem %s3469_s3, %s2020_s17  ;;  %3484 = vst [vmem:[#allocation4_spill] sm:$0xff] %v2717_v8 }
  0x10   : > { %s2713_s23 = scalar_lea.vmem %s3466_s0, %s2561_s16 }
  0x11 LB: >> { %v2727_v9 = vld [vmem:[%s3467_s1 + $0x40] sm:$0xff]   ;;  %v2670_v10 = vmov 0.0   ;;  %v2740_v12 = vld [vmem:[%s3467_s1 + $0x48] sm:$0xff]   ;;  %vm2671_vm2 = vmmov 0   ;;  %v2758_v14 = vld [vmem:[%s3467_s1 + $0x50] sm:$0xff]   ;;  %s2021_s26 = sshll.u32 %s2667_s24, 4  ;;  %s2667_s24 = sphi %s2719_s24, %s190_s24  }
  0x12   : >> { %2191 = vmatprep.subr.bf16.mxu0 %v2670_v10  ;;  %2211 = vmatprep.subr.bf16.mxu1 %v2670_v10  ;;  %v2734_v11 = vld [vmem:[%s3467_s1] sm:$0xff]   ;;  %v2749_v13 = vld [vmem:[%s3467_s1 + $0x8] sm:$0xff]   ;;  %v2765_v15 = vld [vmem:[%s3467_s1 + $0x10] sm:$0xff]   ;;  %s2825_s4 = scalar_lea.vmem %s2713_s23, %s2021_s26  ;;  %vm1560_vm3 = vcmask 1043456   ;;  %vm1556_vm4 = vcmask 31744  }
  0x13   : >> { %2192 = vmatpush3.bf16.msra.mxu0 %v2727_v9  ;;  %2207 = vmatprep.mubr.msk.bf16.mxu0 %vm2671_vm2, %v2670_v10  ;;  %v2772_v16 = vld [vmem:[%s3467_s1 + $0x58] sm:$0xff]   ;;  %v2786_v18 = vld [vmem:[%s3467_s1 + $0x60] sm:$0xff]   ;;  %v2800_v20 = vld [vmem:[%s3467_s1 + $0x68] sm:$0xff]  }
  0x14   : >> { %2212 = vmatpush3.bf16.msra.mxu1 %v2734_v11  ;;  %2193 = vmatprep.subr.bf16.mxu0 %v2670_v10  ;;  %v2779_v17 = vld [vmem:[%s3467_s1 + $0x18] sm:$0xff]   ;;  %v2793_v19 = vld [vmem:[%s3467_s1 + $0x20] sm:$0xff]   ;;  %v2807_v21 = vld [vmem:[%s3467_s1 + $0x28] sm:$0xff]  }
  0x15   : >> { %2213 = vmatprep.subr.bf16.mxu1 %v2670_v10  ;;  %2227 = vmatprep.mubr.msk.bf16.mxu1 %vm2671_vm2, %v2670_v10  ;;  %v2815_v22 = vld [vmem:[%s3467_s1 + $0x70] sm:$0xff]   ;;  %v2831_v24 = vld [vmem:[%s3467_s1 + $0x78] sm:$0xff]   ;;  %v212_v26 = vld [vmem:[%s2825_s4 + $0x1] sm:$0xf] }
  0x16   : >> { %v2822_v23 = vld [vmem:[%s3467_s1 + $0x30] sm:$0xff]   ;;  %v2836_v25 = vld [vmem:[%s3467_s1 + $0x38] sm:$0xff]   ;;  %v194_v27 = vld [vmem:[%s2825_s4] sm:$0xf]  ;;  %v213_v28 = vpack.c.bf16 %v212_v26, %v212_v26 }
  0x17   : >> { %2194 = vmatpush3.bf16.msra.mxu0 %v2740_v12  ;;  %v195_v29 = vpack.c.bf16 %v194_v27, %v194_v27  ;;  %v2848_v30 = vld [vmem:[%s3467_s1 + $0x80] sm:$0xff]   ;;  %v2862_v32 = vld [vmem:[%s3467_s1 + $0x88] sm:$0xff]   ;;  %v2880_v34 = vld [vmem:[%s3467_s1 + $0x90] sm:$0xff]  }
  0x18   : >> { %2214 = vmatpush3.bf16.msra.mxu1 %v2749_v13  ;;  %2195 = vmatprep.subr.bf16.mxu0 %v2670_v10  ;;  %v2855_v31 = vld [vmem:[%s3467_s1 + $0xc0] sm:$0xff]   ;;  %v2869_v33 = vld [vmem:[%s3467_s1 + $0xc8] sm:$0xff]   ;;  %v2887_v35 = vld [vmem:[%s3467_s1 + $0xd0] sm:$0xff]  }
  0x19   : >> { %2215 = vmatprep.subr.bf16.mxu1 %v2670_v10  ;;  %v2894_v36 = vld [vmem:[%s3467_s1 + $0x98] sm:$0xff]   ;;  %v2908_v38 = vld [vmem:[%s3467_s1 + $0xa0] sm:$0xff]   ;;  %v2922_v40 = vld [vmem:[%s3467_s1 + $0xa8] sm:$0xff]  }
  0x1a   : >> { %v2901_v37 = vld [vmem:[%s3467_s1 + $0xd8] sm:$0xff]   ;;  %v2915_v39 = vld [vmem:[%s3467_s1 + $0xe0] sm:$0xff]   ;;  %v2929_v41 = vld [vmem:[%s3467_s1 + $0xe8] sm:$0xff]  }
  0x1b   : >> { %2196 = vmatpush3.bf16.msra.mxu0 %v2758_v14  ;;  %v2936_v42 = vld [vmem:[%s3467_s1 + $0xb0] sm:$0xff]   ;;  %v2949_v44 = vld [vmem:[%s3467_s1 + $0xb8] sm:$0xff]   ;;  %v407_v46 = vld [vmem:[%s2825_s4 + $0x2] sm:$0xf] }
  0x1c   : >> { %2216 = vmatpush3.bf16.msra.mxu1 %v2765_v15  ;;  %2197 = vmatprep.subr.bf16.mxu0 %v2670_v10  ;;  %v2943_v43 = vld [vmem:[%s3467_s1 + $0xf0] sm:$0xff]   ;;  %v2954_v45 = vld [vmem:[%s3467_s1 + $0xf8] sm:$0xff]   ;;  %v1856_v47 = vld [vmem:[%s2825_s4 + $0x8] sm:$0xf]  ;;  %v408_v48 = vpack.c.bf16 %v407_v46, %v407_v46 }
  0x1d   : >> { %2217 = vmatprep.subr.bf16.mxu1 %v2670_v10  ;;  %v2963_v49 = vpack.c.bf16 %v1856_v47, %v1856_v47  ;;  %v2968_v50 = vld [vmem:[%s3467_s1 + $0x100] sm:$0xff]   ;;  %v2983_v52 = vld [vmem:[%s3467_s1 + $0x108] sm:$0xff]   ;;  %v3001_v54 = vld [vmem:[%s3467_s1 + $0x110] sm:$0xff]  }
  0x1e   : >> { %v2975_v51 = vld [vmem:[%s3467_s1 + $0x140] sm:$0xff]   ;;  %v2990_v53 = vld [vmem:[%s3467_s1 + $0x148] sm:$0xff]   ;;  %v3008_v55 = vld [vmem:[%s3467_s1 + $0x150] sm:$0xff]  }
  0x1f   : >> { %2198 = vmatpush3.bf16.msra.mxu0 %v2772_v16  ;;  %v3015_v56 = vld [vmem:[%s3467_s1 + $0x118] sm:$0xff]   ;;  %v3029_v58 = vld [vmem:[%s3467_s1 + $0x120] sm:$0xff]   ;;  %v3043_v60 = vld [vmem:[%s3467_s1 + $0x128] sm:$0xff]  }
  0x20   : >> { %2218 = vmatpush3.bf16.msra.mxu1 %v2779_v17  ;;  %2199 = vmatprep.subr.bf16.mxu0 %v2670_v10  ;;  %v3022_v57 = vld [vmem:[%s3467_s1 + $0x158] sm:$0xff]   ;;  %v3036_v59 = vld [vmem:[%s3467_s1 + $0x160] sm:$0xff]   ;;  %v3050_v61 = vld [vmem:[%s3467_s1 + $0x168] sm:$0xff]  }
  0x21   : >> { %2219 = vmatprep.subr.bf16.mxu1 %v2670_v10  ;;  %v3057_v62 = vld [vmem:[%s3467_s1 + $0x130] sm:$0xff]   ;;  %v3071_v1 = vld [vmem:[%s3467_s1 + $0x138] sm:$0xff]   ;;  %v1881_v2 = vld [vmem:[%s2825_s4 + $0x9] sm:$0xf] }
  0x22   : >> { %v3064_v63 = vld [vmem:[%s3467_s1 + $0x170] sm:$0xff]   ;;  %v3079_v3 = vld [vmem:[%s3467_s1 + $0x178] sm:$0xff]   ;;  %v1906_v4 = vld [vmem:[%s2825_s4 + $0xa] sm:$0xf]  ;;  %v3083_v5 = vpack.c.bf16 %v1881_v2, %v1881_v2 }
  0x23   : >> { %2200 = vmatpush3.bf16.msra.mxu0 %v2786_v18  ;;  %3485 = vst [vmem:[#allocation5_spill] sm:$0xff] %v3079_v3  ;;  %v3086_v6 = vpack.c.bf16 %v1906_v4, %v1906_v4  ;;  %v3091_v26 = vld [vmem:[%s3467_s1 + $0x180] sm:$0xff]   ;;  %v3125_v46 = vld [vmem:[%s3467_s1 + $0x190] sm:$0xff]   ;;  %v3146_v2 = vld [vmem:[%s3467_s1 + $0x1d8] sm:$0xff]  }
  0x24   : >> { %2220 = vmatpush3.bf16.msra.mxu1 %v2793_v19  ;;  %2201 = vmatprep.subr.bf16.mxu0 %v2670_v10  ;;  %v3098_v27 = vld [vmem:[%s3467_s1 + $0x1c0] sm:$0xff]   ;;  %v3132_v47 = vld [vmem:[%s3467_s1 + $0x1d0] sm:$0xff]   ;;  %3489 = vst [vmem:[#allocation9_spill] sm:$0xff] %v3146_v2  ;;  %v3167_v7 = vld [vmem:[%s3467_s1 + $0x1a8] sm:$0xff]  }
  0x25   : >> { %2221 = vmatprep.subr.bf16.mxu1 %v2670_v10  ;;  %3486 = vst [vmem:[#allocation6_spill] sm:$0xff] %v3098_v27  ;;  %3488 = vst [vmem:[#allocation8_spill] sm:$0xff] %v3132_v47  ;;  %v3153_v4 = vld [vmem:[%s3467_s1 + $0x1a0] sm:$0xff]   ;;  %v3174_v0 = vld [vmem:[%s3467_s1 + $0x1e8] sm:$0xff]  }
  0x26   : >> { %v3160_v8 = vld [vmem:[%s3467_s1 + $0x1e0] sm:$0xff]   ;;  %3491 = vst [vmem:[#allocation11_spill] sm:$0xff] %v3174_v0 }
  0x27   : >> { %2202 = vmatpush3.bf16.msra.mxu0 %v2800_v20  ;;  %3490 = vst [vmem:[#allocation10_spill] sm:$0xff] %v3160_v8 }
  0x28   : >> { %2222 = vmatpush3.bf16.msra.mxu1 %v2807_v21  ;;  %2203 = vmatprep.subr.bf16.mxu0 %v2670_v10 }
  0x29   : >> { %2223 = vmatprep.subr.bf16.mxu1 %v2670_v10 }
  0x2b   : >> { %2204 = vmatpush3.bf16.msra.mxu0 %v2815_v22 }
  0x2c   : >> { %2224 = vmatpush3.bf16.msra.mxu1 %v2822_v23  ;;  %2205 = vmatprep.subr.bf16.mxu0 %v2670_v10 }
  0x2d   : >> { %2225 = vmatprep.subr.bf16.mxu1 %v2670_v10 }
  0x2f   : >> { %2206 = vmatpush3.bf16.msra.mxu0 %v2831_v24 }
  0x30   : >> { %2226 = vmatpush3.bf16.msra.mxu1 %v2836_v25  ;;  %2231 = vmatprep.subr.bf16.mxu0 %v2670_v10 }
  0x31   : >> { %2251 = vmatprep.subr.bf16.mxu1 %v2670_v10 }
  0x32   : >> { %2208 = vmatmul.mubr.bf16.vlgmr.msra.gmra.mrb[0].mxu0 %v213_v28  ;;  %v3107_v28 = vld [vmem:[%s3467_s1 + $0x188] sm:$0xff]  }
  0x33   : >> { %2228 = vmatmul.mubr.bf16.vlgmr.msra.gmra.mrb[0].mxu1 %v195_v29  ;;  %2232 = vmatpush3.bf16.msra.mxu0 %v2848_v30  ;;  %v3114_v29 = vld [vmem:[%s3467_s1 + $0x1c8] sm:$0xff]  }
  0x34   : >> { %2252 = vmatpush3.bf16.msra.mxu1 %v2855_v31  ;;  %2233 = vmatprep.subr.bf16.mxu0 %v2670_v10  ;;  %3487 = vst [vmem:[#allocation7_spill] sm:$0xff] %v3114_v29 }
  0x35   : >> { %2253 = vmatprep.subr.bf16.mxu1 %v2670_v10  ;;  %2247 = vmatprep.mubr.msk.bf16.mxu0 %vm2671_vm2, %v2670_v10 }
  0x36   : >> { %2267 = vmatprep.mubr.msk.bf16.mxu1 %vm2671_vm2, %v2670_v10 }
  0x37   : >> { %2234 = vmatpush3.bf16.msra.mxu0 %v2862_v32 }
  0x38   : >> { %2254 = vmatpush3.bf16.msra.mxu1 %v2869_v33  ;;  %2235 = vmatprep.subr.bf16.mxu0 %v2670_v10 }
  0x39   : >> { %2255 = vmatprep.subr.bf16.mxu1 %v2670_v10 }
  0x3b   : >> { %2236 = vmatpush3.bf16.msra.mxu0 %v2880_v34 }
  0x3c   : >> { %2256 = vmatpush3.bf16.msra.mxu1 %v2887_v35  ;;  %2237 = vmatprep.subr.bf16.mxu0 %v2670_v10 }
  0x3d   : >> { %2257 = vmatprep.subr.bf16.mxu1 %v2670_v10 }
  0x3f   : >> { %2238 = vmatpush3.bf16.msra.mxu0 %v2894_v36 }
  0x40   : >> { %2258 = vmatpush3.bf16.msra.mxu1 %v2901_v37  ;;  %2239 = vmatprep.subr.bf16.mxu0 %v2670_v10 }
  0x41   : >> { %2259 = vmatprep.subr.bf16.mxu1 %v2670_v10 }
  0x43   : >> { %2240 = vmatpush3.bf16.msra.mxu0 %v2908_v38 }
  0x44   : >> { %2260 = vmatpush3.bf16.msra.mxu1 %v2915_v39  ;;  %2241 = vmatprep.subr.bf16.mxu0 %v2670_v10 }
  0x45   : >> { %2261 = vmatprep.subr.bf16.mxu1 %v2670_v10 }
  0x47   : >> { %2242 = vmatpush3.bf16.msra.mxu0 %v2922_v40 }
  0x48   : >> { %2262 = vmatpush3.bf16.msra.mxu1 %v2929_v41  ;;  %2243 = vmatprep.subr.bf16.mxu0 %v2670_v10 }
  0x49   : >> { %2263 = vmatprep.subr.bf16.mxu1 %v2670_v10 }
  0x4b   : >> { %2244 = vmatpush3.bf16.msra.mxu0 %v2936_v42 }
  0x4c   : >> { %2264 = vmatpush3.bf16.msra.mxu1 %v2943_v43  ;;  %2245 = vmatprep.subr.bf16.mxu0 %v2670_v10 }
  0x4d   : >> { %2265 = vmatprep.subr.bf16.mxu1 %v2670_v10 }
  0x4f   : >> { %2246 = vmatpush3.bf16.msra.mxu0 %v2949_v44 }
  0x50   : >> { %2266 = vmatpush3.bf16.msra.mxu1 %v2954_v45  ;;  %2271 = vmatprep.subr.bf16.mxu0 %v2670_v10 }
  0x51   : >> { %2291 = vmatprep.subr.bf16.mxu1 %v2670_v10 }
  0x52   : >> { %2248 = vmatmul.mubr.bf16.vlgmr.msra.gmra.mrb[4].mxu0 %v408_v48  ;;  %v3139_v48 = vld [vmem:[%s3467_s1 + $0x198] sm:$0xff]  }
  0x53   : >> { %2268 = vmatmul.mubr.bf16.vlgmr.msra.gmra.mrb[4].mxu1 %v2963_v49  ;;  %2272 = vmatpush3.bf16.msra.mxu0 %v2968_v50 }
  0x54   : >> { %2292 = vmatpush3.bf16.msra.mxu1 %v2975_v51  ;;  %2273 = vmatprep.subr.bf16.mxu0 %v2670_v10 }
  0x55   : >> { %2293 = vmatprep.subr.bf16.mxu1 %v2670_v10  ;;  %2287 = vmatprep.mubr.msk.bf16.mxu0 %vm2671_vm2, %v2670_v10 }
  0x56   : >> { %2307 = vmatprep.mubr.msk.bf16.mxu1 %vm2671_vm2, %v2670_v10 }
  0x57   : >> { %2274 = vmatpush3.bf16.msra.mxu0 %v2983_v52 }
  0x58   : >> { %2294 = vmatpush3.bf16.msra.mxu1 %v2990_v53  ;;  %2275 = vmatprep.subr.bf16.mxu0 %v2670_v10 }
  0x59   : >> { %2295 = vmatprep.subr.bf16.mxu1 %v2670_v10 }
  0x5b   : >> { %2276 = vmatpush3.bf16.msra.mxu0 %v3001_v54 }
  0x5c   : >> { %2296 = vmatpush3.bf16.msra.mxu1 %v3008_v55  ;;  %2277 = vmatprep.subr.bf16.mxu0 %v2670_v10 }
  0x5d   : >> { %2297 = vmatprep.subr.bf16.mxu1 %v2670_v10 }
  0x5f   : >> { %2278 = vmatpush3.bf16.msra.mxu0 %v3015_v56 }
  0x60   : >> { %2298 = vmatpush3.bf16.msra.mxu1 %v3022_v57  ;;  %2279 = vmatprep.subr.bf16.mxu0 %v2670_v10 }
  0x61   : >> { %2299 = vmatprep.subr.bf16.mxu1 %v2670_v10 }
  0x63   : >> { %2280 = vmatpush3.bf16.msra.mxu0 %v3029_v58 }
  0x64   : >> { %2300 = vmatpush3.bf16.msra.mxu1 %v3036_v59  ;;  %2281 = vmatprep.subr.bf16.mxu0 %v2670_v10 }
  0x65   : >> { %2301 = vmatprep.subr.bf16.mxu1 %v2670_v10 }
  0x67   : >> { %2282 = vmatpush3.bf16.msra.mxu0 %v3043_v60 }
  0x68   : >> { %2302 = vmatpush3.bf16.msra.mxu1 %v3050_v61  ;;  %2283 = vmatprep.subr.bf16.mxu0 %v2670_v10 }
  0x69   : >> { %2303 = vmatprep.subr.bf16.mxu1 %v2670_v10 }
  0x6b   : >> { %2284 = vmatpush3.bf16.msra.mxu0 %v3057_v62 }
  0x6c   : >> { %2304 = vmatpush3.bf16.msra.mxu1 %v3064_v63  ;;  %2285 = vmatprep.subr.bf16.mxu0 %v2670_v10 }
  0x6d   : >> { %2305 = vmatprep.subr.bf16.mxu1 %v2670_v10 }
  0x6f   : >> { %2286 = vmatpush3.bf16.msra.mxu0 %v3071_v1 }
  0x70   : >> { %2306 = vmatpush3.bf16.msra.mxu1 %v3079_v3  ;;  %2311 = vmatprep.subr.bf16.mxu0 %v2670_v10 }
  0x71   : >> { %2331 = vmatprep.subr.bf16.mxu1 %v2670_v10 }
  0x72   : >> { %2288 = vmatmul.mubr.bf16.vlgmr.msra.gmra.mrb[8].mxu0 %v3083_v5 }
  0x73   : >> { %2308 = vmatmul.mubr.bf16.vlgmr.msra.gmra.mrb[8].mxu1 %v3086_v6  ;;  %2312 = vmatpush3.bf16.msra.mxu0 %v3091_v26 }
  0x74   : >> { %2332 = vmatpush3.bf16.msra.mxu1 %v3098_v27  ;;  %2313 = vmatprep.subr.bf16.mxu0 %v2670_v10  ;;  %v1958_v27 = vld [vmem:[%s2825_s4 + $0x11] sm:$0xf] }
  0x75   : >> { %2333 = vmatprep.subr.bf16.mxu1 %v2670_v10  ;;  %2327 = vmatprep.mubr.msk.bf16.mxu0 %vm2671_vm2, %v2670_v10 }
  0x76   : >> { %2347 = vmatprep.mubr.msk.bf16.mxu1 %vm2671_vm2, %v2670_v10 }
  0x77   : >> { %2314 = vmatpush3.bf16.msra.mxu0 %v3107_v28 }
  0x78   : >> { %2334 = vmatpush3.bf16.msra.mxu1 %v3114_v29  ;;  %2315 = vmatprep.subr.bf16.mxu0 %v2670_v10  ;;  %v1933_v29 = vld [vmem:[%s2825_s4 + $0x10] sm:$0xf] }
  0x79   : >> { %2335 = vmatprep.subr.bf16.mxu1 %v2670_v10  ;;  %v3207_v3 = vpack.c.bf16 %v1933_v29, %v1933_v29  ;;  %v3239_v29 = vld [vmem:[%s3467_s1 + $0x210] sm:$0xff]  }
  0x7b   : >> { %2316 = vmatpush3.bf16.msra.mxu0 %v3125_v46 }
  0x7c   : >> { %2336 = vmatpush3.bf16.msra.mxu1 %v3132_v47  ;;  %2317 = vmatprep.subr.bf16.mxu0 %v2670_v10  ;;  %v3195_v47 = vld [vmem:[%s3467_s1 + $0x1b8] sm:$0xff]  }
  0x7d   : >> { %2337 = vmatprep.subr.bf16.mxu1 %v2670_v10 }
  0x7f   : >> { %2318 = vmatpush3.bf16.msra.mxu0 %v3139_v48 }
  0x80   : >> { %2338 = vmatpush3.bf16.msra.mxu1 %v3146_v2  ;;  %2319 = vmatprep.subr.bf16.mxu0 %v2670_v10  ;;  %v3181_v2 = vld [vmem:[%s3467_s1 + $0x1b0] sm:$0xff]  }
  0x81   : >> { %2339 = vmatprep.subr.bf16.mxu1 %v2670_v10  ;;  %3492 = vst [vmem:[#allocation12_spill] sm:$0xff] %v3181_v2 }
  0x83   : >> { %2320 = vmatpush3.bf16.msra.mxu0 %v3153_v4 }
  0x84   : >> { %2340 = vmatpush3.bf16.msra.mxu1 %v3160_v8  ;;  %2321 = vmatprep.subr.bf16.mxu0 %v2670_v10  ;;  %v3188_v8 = vld [vmem:[%s3467_s1 + $0x1f0] sm:$0xff]  }
  0x85   : >> { %2341 = vmatprep.subr.bf16.mxu1 %v2670_v10  ;;  %3493 = vst [vmem:[#allocation13_spill] sm:$0xff] %v3188_v8 }
  0x87   : >> { %2322 = vmatpush3.bf16.msra.mxu0 %v3167_v7 }
  0x88   : >> { %2342 = vmatpush3.bf16.msra.mxu1 %v3174_v0  ;;  %2323 = vmatprep.subr.bf16.mxu0 %v2670_v10  ;;  %v3203_v0 = vld [vmem:[%s3467_s1 + $0x1f8] sm:$0xff]  }
  0x89   : >> { %2343 = vmatprep.subr.bf16.mxu1 %v2670_v10  ;;  %3494 = vst [vmem:[#allocation14_spill] sm:$0xff] %v3203_v0 }
  0x8b   : >> { %2324 = vmatpush3.bf16.msra.mxu0 %v3181_v2  ;;  %v3210_v2 = vpack.c.bf16 %v1958_v27, %v1958_v27  ;;  %v3226_v27 = vld [vmem:[%s3467_s1 + $0x208] sm:$0xff]  }
  0x8c   : >> { %2344 = vmatpush3.bf16.msra.mxu1 %v3188_v8  ;;  %2325 = vmatprep.subr.bf16.mxu0 %v2670_v10  ;;  %v3215_v8 = vld [vmem:[%s3467_s1 + $0x200] sm:$0xff]  }
  0x8d   : >> { %2345 = vmatprep.subr.bf16.mxu1 %v2670_v10 }
  0x8f   : >> { %2326 = vmatpush3.bf16.msra.mxu0 %v3195_v47 }
  0x90   : >> { %2346 = vmatpush3.bf16.msra.mxu1 %v3203_v0  ;;  %2351 = vmatprep.subr.bf16.mxu0 %v2670_v10  ;;  %v1983_v0 = vld [vmem:[%s2825_s4 + $0x12] sm:$0xf] }
  0x91   : >> { %2371 = vmatprep.subr.bf16.mxu1 %v2670_v10 }
  0x92   : >> { %2328 = vmatmul.mubr.bf16.vlgmr.msra.gmra.mrb[12].mxu0 %v3207_v3 }
  0x93   : >> { %2348 = vmatmul.mubr.bf16.vlgmr.msra.gmra.mrb[12].mxu1 %v3210_v2  ;;  %2352 = vmatpush3.bf16.msra.mxu0 %v3215_v8 }
  0x94   : >> { %2372 = vmatpush3.bf16.msra.mxu1 %v2727_v9  ;;  %2353 = vmatprep.subr.bf16.mxu0 %v2670_v10  ;;  %v3248_v9 = vld [vmem:[%s3467_s1 + $0x218] sm:$0xff]  }
  0x95   : >> { %2373 = vmatprep.subr.bf16.mxu1 %v2670_v10  ;;  %2367 = vmatprep.mubr.msk.bf16.mxu0 %vm2671_vm2, %v2670_v10 }
  0x96   : >> { %2387 = vmatprep.mubr.msk.bf16.mxu1 %vm2671_vm2, %v2670_v10 }
  0x97   : >> { %2354 = vmatpush3.bf16.msra.mxu0 %v3226_v27 }
  0x98   : >> { %2374 = vmatpush3.bf16.msra.mxu1 %v2740_v12  ;;  %2355 = vmatprep.subr.bf16.mxu0 %v2670_v10  ;;  %v3257_v12 = vld [vmem:[%s3467_s1 + $0x220] sm:$0xff]  }
  0x99   : >> { %2375 = vmatprep.subr.bf16.mxu1 %v2670_v10 }
  0x9b   : >> { %2356 = vmatpush3.bf16.msra.mxu0 %v3239_v29 }
  0x9c   : >> { %2376 = vmatpush3.bf16.msra.mxu1 %v2758_v14  ;;  %2357 = vmatprep.subr.bf16.mxu0 %v2670_v10  ;;  %v3266_v14 = vld [vmem:[%s3467_s1 + $0x228] sm:$0xff]  }
  0x9d   : >> { %2377 = vmatprep.subr.bf16.mxu1 %v2670_v10  ;;  %3495 = vst [vmem:[#allocation15_spill] sm:$0xff] %v3266_v14 }
  0x9f   : >> { %2358 = vmatpush3.bf16.msra.mxu0 %v3248_v9 }
  0xa0   : >> { %2378 = vmatpush3.bf16.msra.mxu1 %v2772_v16  ;;  %2359 = vmatprep.subr.bf16.mxu0 %v2670_v10  ;;  %v3275_v16 = vld [vmem:[%s3467_s1 + $0x230] sm:$0xff]  }
  0xa1   : >> { %2379 = vmatprep.subr.bf16.mxu1 %v2670_v10 }
  0xa3   : >> { %2360 = vmatpush3.bf16.msra.mxu0 %v3257_v12 }
  0xa4   : >> { %2380 = vmatpush3.bf16.msra.mxu1 %v2786_v18  ;;  %2361 = vmatprep.subr.bf16.mxu0 %v2670_v10  ;;  %v3284_v18 = vld [vmem:[%s3467_s1 + $0x238] sm:$0xff]  }
  0xa5   : >> { %2381 = vmatprep.subr.bf16.mxu1 %v2670_v10 }
  0xa7   : >> { %2362 = vmatpush3.bf16.msra.mxu0 %v3266_v14  ;;  %v3290_v14 = vpack.c.bf16 %v1983_v0, %v1983_v0 }
  0xa8   : >> { %2382 = vmatpush3.bf16.msra.mxu1 %v2800_v20  ;;  %2363 = vmatprep.subr.bf16.mxu0 %v2670_v10 }
  0xa9   : >> { %2383 = vmatprep.subr.bf16.mxu1 %v2670_v10 }
  0xab   : >> { %2364 = vmatpush3.bf16.msra.mxu0 %v3275_v16 }
  0xac   : >> { %2384 = vmatpush3.bf16.msra.mxu1 %v2815_v22  ;;  %2365 = vmatprep.subr.bf16.mxu0 %v2670_v10 }
  0xad   : >> { %2385 = vmatprep.subr.bf16.mxu1 %v2670_v10 }
  0xaf   : >> { %2366 = vmatpush3.bf16.msra.mxu0 %v3284_v18 }
  0xb0   : >> { %2386 = vmatpush3.bf16.msra.mxu1 %v2831_v24  ;;  %2391 = vmatprep.subr.bf16.mxu0 %v2670_v10  ;;  %v2011_v24 = vld [vmem:[%s2825_s4 + $0x18] sm:$0xf] }
  0xb1   : >> { %2411 = vmatprep.subr.bf16.mxu1 %v2670_v10 }
  0xb2   : >> { %2368 = vmatmul.mubr.bf16.vlgmr.msra.gmra.mrb[16].mxu0 %v3290_v14 }
  0xb3   : >> { %2388 = vmatmul.mubr.bf16.vlgmr.msra.gmra.mrb[16].mxu1 %v3083_v5  ;;  %2392 = vmatpush3.bf16.msra.mxu0 %v2734_v11 }
  0xb4   : >> { %2412 = vmatpush3.bf16.msra.mxu1 %v2848_v30  ;;  %2393 = vmatprep.subr.bf16.mxu0 %v2670_v10  ;;  %v1425_v30 = vpack.c.bf16 %v2011_v24, %v2011_v24 }
  0xb5   : >> { %2413 = vmatprep.subr.bf16.mxu1 %v2670_v10  ;;  %2407 = vmatprep.mubr.msk.bf16.mxu0 %vm2671_vm2, %v2670_v10 }
  0xb6   : >> { %2427 = vmatprep.mubr.msk.bf16.mxu1 %vm2671_vm2, %v2670_v10 }
  0xb7   : >> { %2394 = vmatpush3.bf16.msra.mxu0 %v2749_v13 }
  0xb8   : >> { %2414 = vmatpush3.bf16.msra.mxu1 %v2862_v32  ;;  %2395 = vmatprep.subr.bf16.mxu0 %v2670_v10  ;;  %v3500_v32 = vld [vmem:[#allocation8_spill] sm:$0xff] }
  0xb9   : >> { %2415 = vmatprep.subr.bf16.mxu1 %v2670_v10 }
  0xbb   : >> { %2396 = vmatpush3.bf16.msra.mxu0 %v2765_v15 }
  0xbc   : >> { %2416 = vmatpush3.bf16.msra.mxu1 %v2880_v34  ;;  %2397 = vmatprep.subr.bf16.mxu0 %v2670_v10 }
  0xbd   : >> { %2417 = vmatprep.subr.bf16.mxu1 %v2670_v10 }
  0xbf   : >> { %2398 = vmatpush3.bf16.msra.mxu0 %v2779_v17 }
  0xc0   : >> { %2418 = vmatpush3.bf16.msra.mxu1 %v2894_v36  ;;  %2399 = vmatprep.subr.bf16.mxu0 %v2670_v10 }
  0xc1   : >> { %2419 = vmatprep.subr.bf16.mxu1 %v2670_v10 }
  0xc3   : >> { %2400 = vmatpush3.bf16.msra.mxu0 %v2793_v19 }
  0xc4   : >> { %2420 = vmatpush3.bf16.msra.mxu1 %v2908_v38  ;;  %2401 = vmatprep.subr.bf16.mxu0 %v2670_v10 }
  0xc5   : >> { %2421 = vmatprep.subr.bf16.mxu1 %v2670_v10 }
  0xc7   : >> { %2402 = vmatpush3.bf16.msra.mxu0 %v2807_v21 }
  0xc8   : >> { %2422 = vmatpush3.bf16.msra.mxu1 %v2922_v40  ;;  %2403 = vmatprep.subr.bf16.mxu0 %v2670_v10  ;;  %v3503_v40 = vld [vmem:[#allocation11_spill] sm:$0xff] }
  0xc9   : >> { %2423 = vmatprep.subr.bf16.mxu1 %v2670_v10 }
  0xcb   : >> { %2404 = vmatpush3.bf16.msra.mxu0 %v2822_v23  ;;  %v3496_v23 = vld [vmem:[#allocation12_spill] sm:$0xff] }
  0xcc   : >> { %2424 = vmatpush3.bf16.msra.mxu1 %v2936_v42  ;;  %2405 = vmatprep.subr.bf16.mxu0 %v2670_v10 }
  0xcd   : >> { %2425 = vmatprep.subr.bf16.mxu1 %v2670_v10 }
  0xcf   : >> { %2406 = vmatpush3.bf16.msra.mxu0 %v2836_v25  ;;  %v3497_v25 = vld [vmem:[#allocation5_spill] sm:$0xff] }
  0xd0   : >> { %2426 = vmatpush3.bf16.msra.mxu1 %v2949_v44  ;;  %2431 = vmatprep.subr.bf16.mxu0 %v2670_v10 }
  0xd1   : >> { %2451 = vmatprep.subr.bf16.mxu1 %v2670_v10 }
  0xd2   : >> { %2408 = vmatmul.mubr.bf16.vlgmr.msra.gmra.mrb[20].mxu0 %v2963_v49  ;;  %v3505_v49 = vld [vmem:[#allocation13_spill] sm:$0xff] }
  0xd3   : >> { %2428 = vmatmul.mubr.bf16.vlgmr.msra.gmra.mrb[20].mxu1 %v3086_v6  ;;  %2432 = vmatpush3.bf16.msra.mxu0 %v2855_v31  ;;  %v3499_v31 = vld [vmem:[#allocation7_spill] sm:$0xff] }
  0xd4   : >> { %2452 = vmatpush3.bf16.msra.mxu1 %v2968_v50  ;;  %2433 = vmatprep.subr.bf16.mxu0 %v2670_v10  ;;  %v2012_v50 = vld [vmem:[%s2825_s4 + $0x19] sm:$0xf] }
  0xd5   : >> { %2453 = vmatprep.subr.bf16.mxu1 %v2670_v10  ;;  %2447 = vmatprep.mubr.msk.bf16.mxu0 %vm2671_vm2, %v2670_v10 }
  0xd6   : >> { %2467 = vmatprep.mubr.msk.bf16.mxu1 %vm2671_vm2, %v2670_v10 }
  0xd7   : >> { %2434 = vmatpush3.bf16.msra.mxu0 %v2869_v33  ;;  %v3502_v33 = vld [vmem:[#allocation10_spill] sm:$0xff] }
  0xd8   : >> { %2454 = vmatpush3.bf16.msra.mxu1 %v2983_v52  ;;  %2435 = vmatprep.subr.bf16.mxu0 %v2670_v10  ;;  %v1468_v52 = vpack.c.bf16 %v2012_v50, %v2012_v50 }
  0xd9   : >> { %2455 = vmatprep.subr.bf16.mxu1 %v2670_v10 }
  0xdb   : >> { %2436 = vmatpush3.bf16.msra.mxu0 %v2887_v35 }
  0xdc   : >> { %2456 = vmatpush3.bf16.msra.mxu1 %v3001_v54  ;;  %2437 = vmatprep.subr.bf16.mxu0 %v2670_v10 }
  0xdd   : >> { %2457 = vmatprep.subr.bf16.mxu1 %v2670_v10 }
  0xdf   : >> { %2438 = vmatpush3.bf16.msra.mxu0 %v2901_v37 }
  0xe0   : >> { %2458 = vmatpush3.bf16.msra.mxu1 %v3015_v56  ;;  %2439 = vmatprep.subr.bf16.mxu0 %v2670_v10 }
  0xe1   : >> { %2459 = vmatprep.subr.bf16.mxu1 %v2670_v10 }
  0xe3   : >> { %2440 = vmatpush3.bf16.msra.mxu0 %v2915_v39 }
  0xe4   : >> { %2460 = vmatpush3.bf16.msra.mxu1 %v3029_v58  ;;  %2441 = vmatprep.subr.bf16.mxu0 %v2670_v10 }
  0xe5   : >> { %2461 = vmatprep.subr.bf16.mxu1 %v2670_v10 }
  0xe7   : >> { %2442 = vmatpush3.bf16.msra.mxu0 %v2929_v41 }
  0xe8   : >> { %2462 = vmatpush3.bf16.msra.mxu1 %v3043_v60  ;;  %2443 = vmatprep.subr.bf16.mxu0 %v2670_v10 }
  0xe9   : >> { %2463 = vmatprep.subr.bf16.mxu1 %v2670_v10 }
  0xeb   : >> { %2444 = vmatpush3.bf16.msra.mxu0 %v2943_v43  ;;  %v3504_v43 = vld [vmem:[#allocation15_spill] sm:$0xff] }
  0xec   : >> { %2464 = vmatpush3.bf16.msra.mxu1 %v3057_v62  ;;  %2445 = vmatprep.subr.bf16.mxu0 %v2670_v10 }
  0xed   : >> { %2465 = vmatprep.subr.bf16.mxu1 %v2670_v10 }
  0xef   : >> { %2446 = vmatpush3.bf16.msra.mxu0 %v2954_v45 }
  0xf0   : >> { %2466 = vmatpush3.bf16.msra.mxu1 %v3071_v1  ;;  %2471 = vmatprep.subr.bf16.mxu0 %v2670_v10 }
  0xf1   : >> { %2491 = vmatprep.subr.bf16.mxu1 %v2670_v10 }
  0xf2   : >> { %2448 = vmatmul.mubr.bf16.vlgmr.msra.gmra.mrb[24].mxu0 %v3207_v3 }
  0xf3   : >> { %2468 = vmatmul.mubr.bf16.vlgmr.msra.gmra.mrb[24].mxu1 %v3210_v2  ;;  %2472 = vmatpush3.bf16.msra.mxu0 %v2975_v51  ;;  %v2013_v51 = vld [vmem:[%s2825_s4 + $0x1a] sm:$0xf]  ;;  %s1796_s4 = sshll.u32 %s2667_s24, 1  ;;  %s190_s24 = sadd.s32 1, %s2667_s24  }
  0xf4   : >> { %2492 = vmatpush3.bf16.msra.mxu1 %v3091_v26  ;;  %2473 = vmatprep.subr.bf16.mxu0 %v2670_v10  ;;  %v1511_v54 = vpack.c.bf16 %v2013_v51, %v2013_v51  ;;  %s1708_s11 = scalar_lea.vmem %s2708_s20, %s1796_s4  ;;  %p187_p4 = scmp.ge.s32.totalorder %s190_s24, 2  }
  0xf5   : >> { %2493 = vmatprep.subr.bf16.mxu1 %v2670_v10  ;;  %2487 = vmatprep.mubr.msk.bf16.mxu0 %vm2671_vm2, %v2670_v10 }
  0xf6   : >> { %2507 = vmatprep.mubr.msk.bf16.mxu1 %vm2671_vm2, %v2670_v10 }
  0xf7   : >> { %2474 = vmatpush3.bf16.msra.mxu0 %v2990_v53  ;;  %v3506_v53 = vld [vmem:[#allocation14_spill] sm:$0xff] }
  0xf8   : >> { %2494 = vmatpush3.bf16.msra.mxu1 %v3107_v28  ;;  %2475 = vmatprep.subr.bf16.mxu0 %v2670_v10 }
  0xf9   : >> { %2495 = vmatprep.subr.bf16.mxu1 %v2670_v10 }
  0xfb   : >> { %2476 = vmatpush3.bf16.msra.mxu0 %v3008_v55 }
  0xfc   : >> { %2496 = vmatpush3.bf16.msra.mxu1 %v3125_v46  ;;  %2477 = vmatprep.subr.bf16.mxu0 %v2670_v10 }
  0xfd   : >> { %2497 = vmatprep.subr.bf16.mxu1 %v2670_v10 }
  0xff   : >> { %2478 = vmatpush3.bf16.msra.mxu0 %v3022_v57 }
 0x100   : >> { %2498 = vmatpush3.bf16.msra.mxu1 %v3139_v48  ;;  %2479 = vmatprep.subr.bf16.mxu0 %v2670_v10 }
 0x101   : >> { %2499 = vmatprep.subr.bf16.mxu1 %v2670_v10 }
 0x103   : >> { %2480 = vmatpush3.bf16.msra.mxu0 %v3036_v59 }
 0x104   : >> { %2500 = vmatpush3.bf16.msra.mxu1 %v3153_v4  ;;  %2481 = vmatprep.subr.bf16.mxu0 %v2670_v10 }
 0x105   : >> { %v313_v0 = vpop.f32.mrb[0].mxu0  ;;  %2501 = vmatprep.subr.bf16.mxu1 %v2670_v10 }
 0x106   : >> { %v401_v11 = vpop.f32.mrb[0].mxu1  ;;  %v2209_v13 = vpop.f32.mrb[1].mxu0 }
 0x107   : >> { %v402_v15 = vadd.f32 %v401_v11, %v313_v0  ;;  %v2229_v17 = vpop.f32.mrb[1].mxu1  ;;  %v316_v19 = vpop.f32.mrb[2].mxu0  ;;  %2482 = vmatpush3.bf16.msra.mxu0 %v3050_v61 }
 0x108   : >> { %v404_v20 = vpop.f32.mrb[2].mxu1  ;;  %2502 = vmatpush3.bf16.msra.mxu1 %v3167_v7  ;;  %v2210_v21 = vpop.f32.mrb[3].mxu0  ;;  %2483 = vmatprep.subr.bf16.mxu0 %v2670_v10  ;;  %v3498_v7 = vld [vmem:[#allocation6_spill] sm:$0xff] }
 0x109   : >> { %v2230_v22 = vpop.f32.mrb[3].mxu1  ;;  %2503 = vmatprep.subr.bf16.mxu1 %v2670_v10 }
 0x10b   : >> { %2484 = vmatpush3.bf16.msra.mxu0 %v3064_v63 }
 0x10c   : >> { %2504 = vmatpush3.bf16.msra.mxu1 %v3496_v23  ;;  %2485 = vmatprep.subr.bf16.mxu0 %v2670_v10 }
 0x10d   : >> { %2505 = vmatprep.subr.bf16.mxu1 %v2670_v10 }
 0x10f   : >> { %2486 = vmatpush3.bf16.msra.mxu0 %v3497_v25 }
 0x110   : >> { %2506 = vmatpush3.bf16.msra.mxu1 %v3195_v47  ;;  %2511 = vmatprep.subr.bf16.mxu0 %v2670_v10 }
 0x111   : >> { %2531 = vmatprep.subr.bf16.mxu1 %v2670_v10 }
 0x112   : >> { %2488 = vmatmul.mubr.bf16.vlgmr.msra.gmra.mrb[28].mxu0 %v3290_v14 }
 0x113   : >> { %2508 = vmatmul.mubr.bf16.vlgmr.msra.gmra.mrb[28].mxu1 %v1425_v30  ;;  %2512 = vmatpush3.bf16.msra.mxu0 %v3498_v7 }
 0x114   : >> { %2532 = vmatpush3.bf16.msra.mxu1 %v3215_v8  ;;  %2513 = vmatprep.subr.bf16.mxu0 %v2670_v10  ;;  %v3501_v8 = vld [vmem:[#allocation9_spill] sm:$0xff] }
 0x115   : >> { %2533 = vmatprep.subr.bf16.mxu1 %v2670_v10  ;;  %2527 = vmatprep.mubr.msk.bf16.mxu0 %vm2671_vm2, %v2670_v10 }
 0x116   : >> { %2547 = vmatprep.mubr.msk.bf16.mxu1 %vm2671_vm2, %v2670_v10 }
 0x117   : >> { %2514 = vmatpush3.bf16.msra.mxu0 %v3499_v31 }
 0x118   : >> { %2534 = vmatpush3.bf16.msra.mxu1 %v3226_v27  ;;  %2515 = vmatprep.subr.bf16.mxu0 %v2670_v10 }
 0x119   : >> { %2535 = vmatprep.subr.bf16.mxu1 %v2670_v10 }
 0x11b   : >> { %2516 = vmatpush3.bf16.msra.mxu0 %v3500_v32 }
 0x11c   : >> { %2536 = vmatpush3.bf16.msra.mxu1 %v3239_v29  ;;  %2517 = vmatprep.subr.bf16.mxu0 %v2670_v10 }
 0x11d   : >> { %2537 = vmatprep.subr.bf16.mxu1 %v2670_v10 }
 0x11f   : >> { %2518 = vmatpush3.bf16.msra.mxu0 %v3501_v8 }
 0x120   : >> { %2538 = vmatpush3.bf16.msra.mxu1 %v3248_v9  ;;  %2519 = vmatprep.subr.bf16.mxu0 %v2670_v10 }
 0x121   : >> { %2539 = vmatprep.subr.bf16.mxu1 %v2670_v10 }
 0x123   : >> { %2520 = vmatpush3.bf16.msra.mxu0 %v3502_v33 }
 0x124   : >> { %2540 = vmatpush3.bf16.msra.mxu1 %v3257_v12  ;;  %2521 = vmatprep.subr.bf16.mxu0 %v2670_v10 }
 0x125   : >> { %v508_v34 = vpop.f32.mrb[4].mxu0  ;;  %2541 = vmatprep.subr.bf16.mxu1 %v2670_v10 }
 0x126   : >> { %v514_v35 = vadd.f32 %v508_v34, %v402_v15  ;;  %v619_v36 = vpop.f32.mrb[4].mxu1  ;;  %v2249_v37 = vpop.f32.mrb[5].mxu0 }
 0x127   : >> { %v2269_v38 = vpop.f32.mrb[5].mxu1  ;;  %v511_v39 = vpop.f32.mrb[6].mxu0  ;;  %2522 = vmatpush3.bf16.msra.mxu0 %v3503_v40 }
 0x128   : >> { %v625_v41 = vadd.f32 %v619_v36, %v514_v35  ;;  %v622_v42 = vpop.f32.mrb[6].mxu1  ;;  %2542 = vmatpush3.bf16.msra.mxu1 %v3504_v43  ;;  %v2250_v44 = vpop.f32.mrb[7].mxu0  ;;  %2523 = vmatprep.subr.bf16.mxu0 %v2670_v10 }
 0x129   : >> { %v2270_v45 = vpop.f32.mrb[7].mxu1  ;;  %2543 = vmatprep.subr.bf16.mxu1 %v2670_v10 }
 0x12b   : >> { %2524 = vmatpush3.bf16.msra.mxu0 %v3505_v49 }
 0x12c   : >> { %2544 = vmatpush3.bf16.msra.mxu1 %v3275_v16  ;;  %2525 = vmatprep.subr.bf16.mxu0 %v2670_v10 }
 0x12d   : >> { %2545 = vmatprep.subr.bf16.mxu1 %v2670_v10 }
 0x12f   : >> { %2526 = vmatpush3.bf16.msra.mxu0 %v3506_v53 }
 0x130   : >> { %2546 = vmatpush3.bf16.msra.mxu1 %v3284_v18  ;;  %2551 = vmatprep.subr.mxu0 %v2670_v10 }
 0x131   : >> { %2556 = vmatprep.subr.mxu1 %v2670_v10 }
 0x132   : >> { %2528 = vmatmul.mubr.bf16.vlgmr.msra.gmra.mrb[32].mxu0 %v1468_v52 }
 0x133   : >> { %2548 = vmatmul.mubr.bf16.vlgmr.msra.gmra.mrb[32].mxu1 %v1511_v54  ;;  %2553 = vmatprep.mubr.msk.f32.mxu0 %vm2671_vm2, %v2670_v10 }
 0x134   : >> { %2558 = vmatprep.mubr.msk.f32.mxu1 %vm2671_vm2, %v2670_v10 }
 0x145   : >> { %v727_v55 = vpop.f32.mrb[8].mxu0 }
 0x146   : >> { %v733_v56 = vadd.f32 %v727_v55, %v625_v41  ;;  %v835_v57 = vpop.f32.mrb[8].mxu1  ;;  %v2289_v58 = vpop.f32.mrb[9].mxu0 }
 0x147   : >> { %v2309_v59 = vpop.f32.mrb[9].mxu1  ;;  %v730_v60 = vpop.f32.mrb[10].mxu0 }
 0x148   : >> { %v841_v61 = vadd.f32 %v835_v57, %v733_v56  ;;  %v838_v62 = vpop.f32.mrb[10].mxu1  ;;  %v2290_v63 = vpop.f32.mrb[11].mxu0  ;;  %v3507_v56 = vld [vmem:[#allocation2_spill] sm:$0xff] }
 0x149   : >> { %v2310_v1 = vpop.f32.mrb[11].mxu1 }
 0x165   : >> { %v946_v3 = vpop.f32.mrb[12].mxu0 }
 0x166   : >> { %v952_v5 = vadd.f32 %v946_v3, %v841_v61  ;;  %v1054_v6 = vpop.f32.mrb[12].mxu1  ;;  %v2329_v26 = vpop.f32.mrb[13].mxu0 }
 0x167   : >> { %v2349_v28 = vpop.f32.mrb[13].mxu1  ;;  %v949_v46 = vpop.f32.mrb[14].mxu0 }
 0x168   : >> { %v1060_v47 = vadd.f32 %v1054_v6, %v952_v5  ;;  %v1057_v48 = vpop.f32.mrb[14].mxu1  ;;  %v2330_v2 = vpop.f32.mrb[15].mxu0  ;;  %v3508_v5 = vld [vmem:[#allocation3_spill] sm:$0xff]  ;;  %v3509_v6 = vld [vmem:[#allocation4_spill] sm:$0xff] }
 0x169   : >> { %v2350_v10 = vpop.f32.mrb[15].mxu1 }
 0x185   : >> { %v1162_v4 = vpop.f32.mrb[16].mxu0 }
 0x186   : >> { %v1168_v27 = vadd.f32 %v1162_v4, %v1060_v47  ;;  %v1211_v29 = vpop.f32.mrb[16].mxu1  ;;  %v2369_v9 = vpop.f32.mrb[17].mxu0 }
 0x187   : >> { %v2389_v12 = vpop.f32.mrb[17].mxu1  ;;  %v1165_v14 = vpop.f32.mrb[18].mxu0 }
 0x188   : >> { %v1214_v16 = vpop.f32.mrb[18].mxu1  ;;  %v2370_v18 = vpop.f32.mrb[19].mxu0  ;;  %v1175_v57 = vadd.f32 %v3507_v56, %v1168_v27 }
 0x189   : >> { %v2390_v0 = vpop.f32.mrb[19].mxu1 }
 0x18a   : >> { %v1176_v63 = vmax.f32 %v1175_v57, 0.0 }
 0x1a5   : >> { %v1251_v11 = vpop.f32.mrb[20].mxu0 }
 0x1a6   : >> { %v1252_v13 = vadd.f32 %v1251_v11, %v1211_v29  ;;  %v1291_v15 = vpop.f32.mrb[20].mxu1  ;;  %v2409_v17 = vpop.f32.mrb[21].mxu0 }
 0x1a7   : >> { %v2429_v19 = vpop.f32.mrb[21].mxu1  ;;  %v1254_v20 = vpop.f32.mrb[22].mxu0 }
 0x1a8   : >> { %v1297_v21 = vadd.f32 %v1291_v15, %v1252_v13  ;;  %v1294_v22 = vpop.f32.mrb[22].mxu1  ;;  %v2410_v23 = vpop.f32.mrb[23].mxu0 }
 0x1a9   : >> { %v2430_v24 = vpop.f32.mrb[23].mxu1 }
 0x1c5   : >> { %v1332_v25 = vpop.f32.mrb[24].mxu0 }
 0x1c6   : >> { %v1338_v30 = vadd.f32 %v1332_v25, %v1297_v21  ;;  %v1373_v7 = vpop.f32.mrb[24].mxu1  ;;  %v2449_v31 = vpop.f32.mrb[25].mxu0 }
 0x1c7   : >> { %v2469_v32 = vpop.f32.mrb[25].mxu1  ;;  %v1335_v8 = vpop.f32.mrb[26].mxu0 }
 0x1c8   : >> { %v1379_v33 = vadd.f32 %v1373_v7, %v1338_v30  ;;  %v1376_v34 = vpop.f32.mrb[26].mxu1  ;;  %v2450_v35 = vpop.f32.mrb[27].mxu0 }
 0x1c9   : >> { %v2470_v36 = vpop.f32.mrb[27].mxu1 }
 0x1e5   : >> { %v1414_v37 = vpop.f32.mrb[28].mxu0 }
 0x1e6   : >> { %v1420_v38 = vadd.f32 %v1414_v37, %v1379_v33  ;;  %v1460_v39 = vpop.f32.mrb[28].mxu1  ;;  %v2489_v40 = vpop.f32.mrb[29].mxu0 }
 0x1e7   : >> { %v2509_v41 = vpop.f32.mrb[29].mxu1  ;;  %v1417_v42 = vpop.f32.mrb[30].mxu0 }
 0x1e8   : >> { %v1466_v43 = vadd.f32 %v1460_v39, %v1420_v38  ;;  %v1463_v44 = vpop.f32.mrb[30].mxu1  ;;  %v2490_v45 = vpop.f32.mrb[31].mxu0 }
 0x1e9   : >> { %v2510_v49 = vpop.f32.mrb[31].mxu1 }
 0x205   : >> { %v1503_v50 = vpop.f32.mrb[32].mxu0 }
 0x206   : >> { %v1509_v51 = vadd.f32 %v1503_v50, %v1466_v43  ;;  %v1546_v52 = vpop.f32.mrb[32].mxu1  ;;  %v2529_v53 = vpop.f32.mrb[33].mxu0 }
 0x207   : >> { %v2549_v54 = vpop.f32.mrb[33].mxu1  ;;  %v1506_v55 = vpop.f32.mrb[34].mxu0 }
 0x208   : >> { %v1552_v58 = vadd.f32 %v1546_v52, %v1509_v51  ;;  %v1549_v59 = vpop.f32.mrb[34].mxu1  ;;  %v2530_v60 = vpop.f32.mrb[35].mxu0 }
 0x209   : >> { %v2550_v61 = vpop.f32.mrb[35].mxu1 }
 0x20a   : >> { %v1553_v62 = vadd.f32 %v3507_v56, %v1552_v58 }
 0x20c   : >> { %v1554_v1 = vmax.f32 %v1553_v62, 0.0 }
 0x20e   : >> { %v1555_v3 = vmax.f32 %v1176_v63, %v1554_v1 }
 0x210   : >> { %2552 = vmatpush3.msk.msra.mxu0 %vm1560_vm3, %v1555_v3  ;;  %2557 = vmatpush3.msk.msra.mxu1 %vm1560_vm3, %v1555_v3 }
 0x211   : >> { %2554 = vmatmul.mubr.msk.f32.vlgmr.msra.gmra.mrb[36].mxu0 %vm1556_vm4, %v3508_v5  ;;  %2559 = vmatmul.mubr.msk.f32.vlgmr.msra.gmra.mrb[36].mxu1 %vm1556_vm4, %v3509_v6 }
 0x2e1   : > { %189 = sbr.rel (!%p187_p4) target bundleno = 17 (0x11), region = 82 }
 0x2e4   : >> { %v1630_v26 = vpop.f32.mrb[36].mxu0  ;;  %v1703_v28 = vpop.f32.mrb[36].mxu1 }
 0x2e5   : >> { %v1707_v46 = vmax.f32 %v1630_v26, %v1703_v28  ;;  %v2555_v47 = vpop.f32.mrb[37].mxu0  ;;  %v2560_v48 = vpop.f32.mrb[37].mxu1 }
 0x2e7   : >> { %1709 = vst [vmem:[%s1708_s11] sm:$0x3] %v1707_v46 }
 0x2e8 PF: > { %s13_s12 = sadd.s32 1, %s2663_s12  }
 0x2e9   : > { %p10_p5 = scmp.ge.s32.totalorder %s13_s12, 4  }
 0x2eb   :  { %12 = sbr.rel (!%p10_p5) target bundleno = 1 (0x1), region = 93 }

// kernel: vgg_s_forward.10
= control target key start
LH: loop header
LB: loop body
LE: loop exit
PB: predicated region body
PF: predicated region fallthrough
CT: control target
= control target key end

     0   :  { %s2611_s12 = smov 0   ;;  %s3369_s0 = inlined_call_operand.vmem [shape: f32[2,4,4,128], index: 0, kind: input, shape index: {}]   ;;  %s3370_s1 = inlined_call_operand.vmem [shape: bf16[3,3,128,128], index: 1, kind: input, shape index: {}]   ;;  %s3371_s2 = inlined_call_operand.vmem [shape: f32[1,128], index: 2, kind: input, shape index: {}]   ;;  %s3372_s3 = inlined_call_operand.vmem [shape: f32[2,1,1,128], index: 3, kind: output, shape index: {}]  }
   0x1 LB: > { %s1737_s13 = sadd.s32 4294967295, %s2587_s12   ;;  %p1741_p0 = scmp.ge.s32.totalorder %s2587_s12, 1  ;;  %s2587_s12 = sphi %s2611_s12, %s13_s12  }
   0x2   : > { %p137_p1 = scmp.lt.s32.totalorder %s2587_s12, 3 }
   0x4   : > { %p138_p2 = pnand %p1741_p0, %p137_p1 }
   0x6   : > { %141 = sbr.rel (%p138_p2) target bundleno = 740 (0x2e4), region = 32 }
   0xd   : > { %v2622_v0 = vld [vmem:[%s3370_s1 + $0x40] sm:$0xff]   ;;  %v2589_v1 = vmov 0.0   ;;  %v2635_v3 = vld [vmem:[%s3370_s1 + $0x48] sm:$0xff]   ;;  %vm2590_vm0 = vmmov 0   ;;  %v2653_v5 = vld [vmem:[%s3370_s1 + $0x50] sm:$0xff]   ;;  %p159_p3 = scmp.lt.s32.totalorder %s1737_s13, 1 }
   0xe   : > { %2129 = vmatprep.subr.bf16.mxu0 %v2589_v1  ;;  %2149 = vmatprep.subr.bf16.mxu1 %v2589_v1  ;;  %v2629_v2 = vld [vmem:[%s3370_s1] sm:$0xff]   ;;  %v2644_v4 = vld [vmem:[%s3370_s1 + $0x8] sm:$0xff]   ;;  %v2660_v6 = vld [vmem:[%s3370_s1 + $0x10] sm:$0xff]   ;;  %vm1541_vm3 = vcmask 1041408   ;;  %vm1537_vm4 = vcmask 15360  }
   0xf   : > { %2130 = vmatpush3.bf16.msra.mxu0 %v2622_v0  ;;  %2145 = vmatprep.mubr.msk.bf16.mxu0 %vm2590_vm0, %v2589_v1  ;;  %v2667_v7 = vld [vmem:[%s3370_s1 + $0x58] sm:$0xff]   ;;  %v2683_v9 = vld [vmem:[%s3370_s1 + $0x60] sm:$0xff]   ;;  %s3407_s13 = smov (!%p159_p3, %s1737_s13), 1  ;;  %v2701_v11 = vld [vmem:[%s3370_s1 + $0x68] sm:$0xff]  }
  0x10   : > { %2150 = vmatpush3.bf16.msra.mxu1 %v2629_v2  ;;  %2131 = vmatprep.subr.bf16.mxu0 %v2589_v1  ;;  %v2674_v8 = vld [vmem:[%s3370_s1 + $0x18] sm:$0xff]   ;;  %v2690_v10 = vld [vmem:[%s3370_s1 + $0x20] sm:$0xff]   ;;  %v2708_v12 = vld [vmem:[%s3370_s1 + $0x28] sm:$0xff]   ;;  %s1962_s11 = sshll.u32 %s3407_s13, 4  ;;  %s166_s19 = scalar_lea.vmem %s3372_s3, %s3407_s13 }
  0x11   : > { %2151 = vmatprep.subr.bf16.mxu1 %v2589_v1  ;;  %2165 = vmatprep.mubr.msk.bf16.mxu1 %vm2590_vm0, %v2589_v1  ;;  %v2716_v13 = vld [vmem:[%s3370_s1 + $0x70] sm:$0xff]   ;;  %s2728_s20 = scalar_lea.vmem %s3369_s0, %s1962_s11  ;;  %v2734_v15 = vld [vmem:[%s3370_s1 + $0x78] sm:$0xff]   ;;  %v2751_v21 = vld [vmem:[%s3370_s1 + $0x80] sm:$0xff]  }
  0x12   : > { %v2723_v14 = vld [vmem:[%s3370_s1 + $0x30] sm:$0xff]   ;;  %v2739_v16 = vld [vmem:[%s3370_s1 + $0x38] sm:$0xff]   ;;  %v199_v17 = vld [vmem:[%s2728_s20 + $0x1] sm:$0x3] }
  0x13   : > { %2132 = vmatpush3.bf16.msra.mxu0 %v2635_v3  ;;  %v181_v18 = vld [vmem:[%s2728_s20] sm:$0x3]  ;;  %v200_v19 = vpack.c.bf16 %v199_v17, %v199_v17  ;;  %v2765_v23 = vld [vmem:[%s3370_s1 + $0x88] sm:$0xff]   ;;  %v2783_v25 = vld [vmem:[%s3370_s1 + $0x90] sm:$0xff]  }
  0x14   : > { %2152 = vmatpush3.bf16.msra.mxu1 %v2644_v4  ;;  %2133 = vmatprep.subr.bf16.mxu0 %v2589_v1  ;;  %v182_v20 = vpack.c.bf16 %v181_v18, %v181_v18  ;;  %v2758_v22 = vld [vmem:[%s3370_s1 + $0xc0] sm:$0xff]   ;;  %v2772_v24 = vld [vmem:[%s3370_s1 + $0xc8] sm:$0xff]   ;;  %v2790_v26 = vld [vmem:[%s3370_s1 + $0xd0] sm:$0xff]  }
  0x15   : > { %2153 = vmatprep.subr.bf16.mxu1 %v2589_v1  ;;  %v2797_v27 = vld [vmem:[%s3370_s1 + $0x98] sm:$0xff]   ;;  %v2811_v29 = vld [vmem:[%s3370_s1 + $0xa0] sm:$0xff]   ;;  %v2825_v31 = vld [vmem:[%s3370_s1 + $0xa8] sm:$0xff]  }
  0x16   : > { %v2804_v28 = vld [vmem:[%s3370_s1 + $0xd8] sm:$0xff]   ;;  %v2818_v30 = vld [vmem:[%s3370_s1 + $0xe0] sm:$0xff]   ;;  %v2832_v32 = vld [vmem:[%s3370_s1 + $0xe8] sm:$0xff]  }
  0x17   : > { %2134 = vmatpush3.bf16.msra.mxu0 %v2653_v5  ;;  %v2839_v33 = vld [vmem:[%s3370_s1 + $0xb0] sm:$0xff]   ;;  %v2852_v35 = vld [vmem:[%s3370_s1 + $0xb8] sm:$0xff]   ;;  %v394_v37 = vld [vmem:[%s2728_s20 + $0x2] sm:$0x3] }
  0x18   : > { %2154 = vmatpush3.bf16.msra.mxu1 %v2660_v6  ;;  %2135 = vmatprep.subr.bf16.mxu0 %v2589_v1  ;;  %v2846_v34 = vld [vmem:[%s3370_s1 + $0xf0] sm:$0xff]   ;;  %v2857_v36 = vld [vmem:[%s3370_s1 + $0xf8] sm:$0xff]   ;;  %v1802_v38 = vld [vmem:[%s2728_s20 + $0x4] sm:$0x3]  ;;  %v395_v39 = vpack.c.bf16 %v394_v37, %v394_v37 }
  0x19   : > { %2155 = vmatprep.subr.bf16.mxu1 %v2589_v1  ;;  %v2866_v40 = vpack.c.bf16 %v1802_v38, %v1802_v38  ;;  %v2871_v41 = vld [vmem:[%s3370_s1 + $0x100] sm:$0xff]   ;;  %v2886_v43 = vld [vmem:[%s3370_s1 + $0x108] sm:$0xff]   ;;  %v2904_v45 = vld [vmem:[%s3370_s1 + $0x110] sm:$0xff]  }
  0x1a   : > { %v2878_v42 = vld [vmem:[%s3370_s1 + $0x140] sm:$0xff]   ;;  %v2893_v44 = vld [vmem:[%s3370_s1 + $0x148] sm:$0xff]   ;;  %v2911_v46 = vld [vmem:[%s3370_s1 + $0x150] sm:$0xff]  }
  0x1b   : > { %2136 = vmatpush3.bf16.msra.mxu0 %v2667_v7  ;;  %v2918_v47 = vld [vmem:[%s3370_s1 + $0x118] sm:$0xff]   ;;  %v2932_v49 = vld [vmem:[%s3370_s1 + $0x120] sm:$0xff]   ;;  %v2946_v51 = vld [vmem:[%s3370_s1 + $0x128] sm:$0xff]  }
  0x1c   : > { %2156 = vmatpush3.bf16.msra.mxu1 %v2674_v8  ;;  %2137 = vmatprep.subr.bf16.mxu0 %v2589_v1  ;;  %v2925_v48 = vld [vmem:[%s3370_s1 + $0x158] sm:$0xff]   ;;  %v2939_v50 = vld [vmem:[%s3370_s1 + $0x160] sm:$0xff]   ;;  %v2953_v52 = vld [vmem:[%s3370_s1 + $0x168] sm:$0xff]  }
  0x1d   : > { %2157 = vmatprep.subr.bf16.mxu1 %v2589_v1  ;;  %v2960_v53 = vld [vmem:[%s3370_s1 + $0x130] sm:$0xff]   ;;  %v2974_v55 = vld [vmem:[%s3370_s1 + $0x138] sm:$0xff]   ;;  %v1827_v56 = vld [vmem:[%s2728_s20 + $0x5] sm:$0x3] }
  0x1e   : > { %v2967_v54 = vld [vmem:[%s3370_s1 + $0x170] sm:$0xff]   ;;  %v2982_v57 = vld [vmem:[%s3370_s1 + $0x178] sm:$0xff]   ;;  %v1852_v58 = vld [vmem:[%s2728_s20 + $0x6] sm:$0x3]  ;;  %v2986_v59 = vpack.c.bf16 %v1827_v56, %v1827_v56 }
  0x1f   : > { %2138 = vmatpush3.bf16.msra.mxu0 %v2683_v9  ;;  %3384 = vst [vmem:[#allocation2_spill] sm:$0xff] %v2982_v57  ;;  %v2989_v60 = vpack.c.bf16 %v1852_v58, %v1852_v58  ;;  %v2994_v61 = vld [vmem:[%s3370_s1 + $0x180] sm:$0xff]   ;;  %v3010_v63 = vld [vmem:[%s3370_s1 + $0x188] sm:$0xff]   ;;  %v3028_v18 = vld [vmem:[%s3370_s1 + $0x190] sm:$0xff]  }
  0x20   : > { %2158 = vmatpush3.bf16.msra.mxu1 %v2690_v10  ;;  %2139 = vmatprep.subr.bf16.mxu0 %v2589_v1  ;;  %v3001_v62 = vld [vmem:[%s3370_s1 + $0x1c0] sm:$0xff]   ;;  %v3017_v17 = vld [vmem:[%s3370_s1 + $0x1c8] sm:$0xff]   ;;  %v3049_v37 = vld [vmem:[%s3370_s1 + $0x1d8] sm:$0xff]  }
  0x21   : > { %2159 = vmatprep.subr.bf16.mxu1 %v2589_v1  ;;  %3385 = vst [vmem:[#allocation3_spill] sm:$0xff] %v3001_v62  ;;  %3386 = vst [vmem:[#allocation4_spill] sm:$0xff] %v3017_v17  ;;  %v3056_v38 = vld [vmem:[%s3370_s1 + $0x1a0] sm:$0xff]   ;;  %v3070_v56 = vld [vmem:[%s3370_s1 + $0x1a8] sm:$0xff]  }
  0x22   : > { %3388 = vst [vmem:[#allocation6_spill] sm:$0xff] %v3049_v37  ;;  %v3077_v58 = vld [vmem:[%s3370_s1 + $0x1e8] sm:$0xff]  }
  0x23   : > { %2140 = vmatpush3.bf16.msra.mxu0 %v2701_v11  ;;  %3390 = vst [vmem:[#allocation8_spill] sm:$0xff] %v3077_v58 }
  0x24   : > { %2160 = vmatpush3.bf16.msra.mxu1 %v2708_v12  ;;  %2141 = vmatprep.subr.bf16.mxu0 %v2589_v1 }
  0x25   : > { %2161 = vmatprep.subr.bf16.mxu1 %v2589_v1 }
  0x27   : > { %2142 = vmatpush3.bf16.msra.mxu0 %v2716_v13 }
  0x28   : > { %2162 = vmatpush3.bf16.msra.mxu1 %v2723_v14  ;;  %2143 = vmatprep.subr.bf16.mxu0 %v2589_v1 }
  0x29   : > { %2163 = vmatprep.subr.bf16.mxu1 %v2589_v1 }
  0x2b   : > { %2144 = vmatpush3.bf16.msra.mxu0 %v2734_v15 }
  0x2c   : > { %2164 = vmatpush3.bf16.msra.mxu1 %v2739_v16  ;;  %2169 = vmatprep.subr.bf16.mxu0 %v2589_v1 }
  0x2d   : > { %2189 = vmatprep.subr.bf16.mxu1 %v2589_v1 }
  0x2e   : > { %2146 = vmatmul.mubr.bf16.vlgmr.msra.gmra.mrb[0].mxu0 %v200_v19  ;;  %v3035_v19 = vld [vmem:[%s3370_s1 + $0x1d0] sm:$0xff]  }
  0x2f   : > { %2166 = vmatmul.mubr.bf16.vlgmr.msra.gmra.mrb[0].mxu1 %v182_v20  ;;  %2170 = vmatpush3.bf16.msra.mxu0 %v2751_v21  ;;  %3387 = vst [vmem:[#allocation5_spill] sm:$0xff] %v3035_v19  ;;  %v3042_v20 = vld [vmem:[%s3370_s1 + $0x198] sm:$0xff]  }
  0x30   : > { %2190 = vmatpush3.bf16.msra.mxu1 %v2758_v22  ;;  %2171 = vmatprep.subr.bf16.mxu0 %v2589_v1 }
  0x31   : > { %2191 = vmatprep.subr.bf16.mxu1 %v2589_v1  ;;  %2185 = vmatprep.mubr.msk.bf16.mxu0 %vm2590_vm0, %v2589_v1 }
  0x32   : > { %2205 = vmatprep.mubr.msk.bf16.mxu1 %vm2590_vm0, %v2589_v1 }
  0x33   : > { %2172 = vmatpush3.bf16.msra.mxu0 %v2765_v23 }
  0x34   : > { %2192 = vmatpush3.bf16.msra.mxu1 %v2772_v24  ;;  %2173 = vmatprep.subr.bf16.mxu0 %v2589_v1 }
  0x35   : > { %2193 = vmatprep.subr.bf16.mxu1 %v2589_v1 }
  0x37   : > { %2174 = vmatpush3.bf16.msra.mxu0 %v2783_v25 }
  0x38   : > { %2194 = vmatpush3.bf16.msra.mxu1 %v2790_v26  ;;  %2175 = vmatprep.subr.bf16.mxu0 %v2589_v1 }
  0x39   : > { %2195 = vmatprep.subr.bf16.mxu1 %v2589_v1 }
  0x3b   : > { %2176 = vmatpush3.bf16.msra.mxu0 %v2797_v27 }
  0x3c   : > { %2196 = vmatpush3.bf16.msra.mxu1 %v2804_v28  ;;  %2177 = vmatprep.subr.bf16.mxu0 %v2589_v1 }
  0x3d   : > { %2197 = vmatprep.subr.bf16.mxu1 %v2589_v1 }
  0x3f   : > { %2178 = vmatpush3.bf16.msra.mxu0 %v2811_v29 }
  0x40   : > { %2198 = vmatpush3.bf16.msra.mxu1 %v2818_v30  ;;  %2179 = vmatprep.subr.bf16.mxu0 %v2589_v1 }
  0x41   : > { %2199 = vmatprep.subr.bf16.mxu1 %v2589_v1 }
  0x43   : > { %2180 = vmatpush3.bf16.msra.mxu0 %v2825_v31 }
  0x44   : > { %2200 = vmatpush3.bf16.msra.mxu1 %v2832_v32  ;;  %2181 = vmatprep.subr.bf16.mxu0 %v2589_v1 }
  0x45   : > { %2201 = vmatprep.subr.bf16.mxu1 %v2589_v1 }
  0x47   : > { %2182 = vmatpush3.bf16.msra.mxu0 %v2839_v33 }
  0x48   : > { %2202 = vmatpush3.bf16.msra.mxu1 %v2846_v34  ;;  %2183 = vmatprep.subr.bf16.mxu0 %v2589_v1 }
  0x49   : > { %2203 = vmatprep.subr.bf16.mxu1 %v2589_v1 }
  0x4b   : > { %2184 = vmatpush3.bf16.msra.mxu0 %v2852_v35 }
  0x4c   : > { %2204 = vmatpush3.bf16.msra.mxu1 %v2857_v36  ;;  %2209 = vmatprep.subr.bf16.mxu0 %v2589_v1 }
  0x4d   : > { %2229 = vmatprep.subr.bf16.mxu1 %v2589_v1 }
  0x4e   : > { %2186 = vmatmul.mubr.bf16.vlgmr.msra.gmra.mrb[4].mxu0 %v395_v39  ;;  %v3063_v39 = vld [vmem:[%s3370_s1 + $0x1e0] sm:$0xff]  }
  0x4f   : > { %2206 = vmatmul.mubr.bf16.vlgmr.msra.gmra.mrb[4].mxu1 %v2866_v40  ;;  %2210 = vmatpush3.bf16.msra.mxu0 %v2871_v41  ;;  %3389 = vst [vmem:[#allocation7_spill] sm:$0xff] %v3063_v39 }
  0x50   : > { %2230 = vmatpush3.bf16.msra.mxu1 %v2878_v42  ;;  %2211 = vmatprep.subr.bf16.mxu0 %v2589_v1 }
  0x51   : > { %2231 = vmatprep.subr.bf16.mxu1 %v2589_v1  ;;  %2225 = vmatprep.mubr.msk.bf16.mxu0 %vm2590_vm0, %v2589_v1 }
  0x52   : > { %2245 = vmatprep.mubr.msk.bf16.mxu1 %vm2590_vm0, %v2589_v1 }
  0x53   : > { %2212 = vmatpush3.bf16.msra.mxu0 %v2886_v43 }
  0x54   : > { %2232 = vmatpush3.bf16.msra.mxu1 %v2893_v44  ;;  %2213 = vmatprep.subr.bf16.mxu0 %v2589_v1 }
  0x55   : > { %2233 = vmatprep.subr.bf16.mxu1 %v2589_v1 }
  0x57   : > { %2214 = vmatpush3.bf16.msra.mxu0 %v2904_v45 }
  0x58   : > { %2234 = vmatpush3.bf16.msra.mxu1 %v2911_v46  ;;  %2215 = vmatprep.subr.bf16.mxu0 %v2589_v1 }
  0x59   : > { %2235 = vmatprep.subr.bf16.mxu1 %v2589_v1 }
  0x5b   : > { %2216 = vmatpush3.bf16.msra.mxu0 %v2918_v47 }
  0x5c   : > { %2236 = vmatpush3.bf16.msra.mxu1 %v2925_v48  ;;  %2217 = vmatprep.subr.bf16.mxu0 %v2589_v1 }
  0x5d   : > { %2237 = vmatprep.subr.bf16.mxu1 %v2589_v1 }
  0x5f   : > { %2218 = vmatpush3.bf16.msra.mxu0 %v2932_v49 }
  0x60   : > { %2238 = vmatpush3.bf16.msra.mxu1 %v2939_v50  ;;  %2219 = vmatprep.subr.bf16.mxu0 %v2589_v1 }
  0x61   : > { %2239 = vmatprep.subr.bf16.mxu1 %v2589_v1 }
  0x63   : > { %2220 = vmatpush3.bf16.msra.mxu0 %v2946_v51 }
  0x64   : > { %2240 = vmatpush3.bf16.msra.mxu1 %v2953_v52  ;;  %2221 = vmatprep.subr.bf16.mxu0 %v2589_v1 }
  0x65   : > { %2241 = vmatprep.subr.bf16.mxu1 %v2589_v1 }
  0x67   : > { %2222 = vmatpush3.bf16.msra.mxu0 %v2960_v53 }
  0x68   : > { %2242 = vmatpush3.bf16.msra.mxu1 %v2967_v54  ;;  %2223 = vmatprep.subr.bf16.mxu0 %v2589_v1 }
  0x69   : > { %2243 = vmatprep.subr.bf16.mxu1 %v2589_v1 }
  0x6b   : > { %2224 = vmatpush3.bf16.msra.mxu0 %v2974_v55 }
  0x6c   : > { %2244 = vmatpush3.bf16.msra.mxu1 %v2982_v57  ;;  %2249 = vmatprep.subr.bf16.mxu0 %v2589_v1 }
  0x6d   : > { %2269 = vmatprep.subr.bf16.mxu1 %v2589_v1 }
  0x6e   : > { %2226 = vmatmul.mubr.bf16.vlgmr.msra.gmra.mrb[8].mxu0 %v2986_v59 }
  0x6f   : > { %2246 = vmatmul.mubr.bf16.vlgmr.msra.gmra.mrb[8].mxu1 %v2989_v60  ;;  %2250 = vmatpush3.bf16.msra.mxu0 %v2994_v61 }
  0x70   : > { %2270 = vmatpush3.bf16.msra.mxu1 %v3001_v62  ;;  %2251 = vmatprep.subr.bf16.mxu0 %v2589_v1  ;;  %v1902_v62 = vld [vmem:[%s2728_s20 + $0x9] sm:$0x3] }
  0x71   : > { %2271 = vmatprep.subr.bf16.mxu1 %v2589_v1  ;;  %2265 = vmatprep.mubr.msk.bf16.mxu0 %vm2590_vm0, %v2589_v1 }
  0x72   : > { %2285 = vmatprep.mubr.msk.bf16.mxu1 %vm2590_vm0, %v2589_v1 }
  0x73   : > { %2252 = vmatpush3.bf16.msra.mxu0 %v3010_v63 }
  0x74   : > { %2272 = vmatpush3.bf16.msra.mxu1 %v3017_v17  ;;  %2253 = vmatprep.subr.bf16.mxu0 %v2589_v1  ;;  %v1877_v17 = vld [vmem:[%s2728_s20 + $0x8] sm:$0x3] }
  0x75   : > { %2273 = vmatprep.subr.bf16.mxu1 %v2589_v1  ;;  %v3110_v57 = vpack.c.bf16 %v1877_v17, %v1877_v17  ;;  %v3142_v17 = vld [vmem:[%s3370_s1 + $0x210] sm:$0xff]  }
  0x77   : > { %2254 = vmatpush3.bf16.msra.mxu0 %v3028_v18 }
  0x78   : > { %2274 = vmatpush3.bf16.msra.mxu1 %v3035_v19  ;;  %2255 = vmatprep.subr.bf16.mxu0 %v2589_v1  ;;  %v3098_v19 = vld [vmem:[%s3370_s1 + $0x1b8] sm:$0xff]  }
  0x79   : > { %2275 = vmatprep.subr.bf16.mxu1 %v2589_v1 }
  0x7b   : > { %2256 = vmatpush3.bf16.msra.mxu0 %v3042_v20 }
  0x7c   : > { %2276 = vmatpush3.bf16.msra.mxu1 %v3049_v37  ;;  %2257 = vmatprep.subr.bf16.mxu0 %v2589_v1  ;;  %v3084_v37 = vld [vmem:[%s3370_s1 + $0x1b0] sm:$0xff]  }
  0x7d   : > { %2277 = vmatprep.subr.bf16.mxu1 %v2589_v1  ;;  %3391 = vst [vmem:[#allocation9_spill] sm:$0xff] %v3084_v37 }
  0x7f   : > { %2258 = vmatpush3.bf16.msra.mxu0 %v3056_v38 }
  0x80   : > { %2278 = vmatpush3.bf16.msra.mxu1 %v3063_v39  ;;  %2259 = vmatprep.subr.bf16.mxu0 %v2589_v1  ;;  %v3091_v39 = vld [vmem:[%s3370_s1 + $0x1f0] sm:$0xff]  }
  0x81   : > { %2279 = vmatprep.subr.bf16.mxu1 %v2589_v1  ;;  %3392 = vst [vmem:[#allocation10_spill] sm:$0xff] %v3091_v39 }
  0x83   : > { %2260 = vmatpush3.bf16.msra.mxu0 %v3070_v56 }
  0x84   : > { %2280 = vmatpush3.bf16.msra.mxu1 %v3077_v58  ;;  %2261 = vmatprep.subr.bf16.mxu0 %v2589_v1  ;;  %v3106_v58 = vld [vmem:[%s3370_s1 + $0x1f8] sm:$0xff]  }
  0x85   : > { %2281 = vmatprep.subr.bf16.mxu1 %v2589_v1  ;;  %3393 = vst [vmem:[#allocation11_spill] sm:$0xff] %v3106_v58 }
  0x87   : > { %2262 = vmatpush3.bf16.msra.mxu0 %v3084_v37  ;;  %v3113_v37 = vpack.c.bf16 %v1902_v62, %v1902_v62  ;;  %v3129_v62 = vld [vmem:[%s3370_s1 + $0x208] sm:$0xff]  }
  0x88   : > { %2282 = vmatpush3.bf16.msra.mxu1 %v3091_v39  ;;  %2263 = vmatprep.subr.bf16.mxu0 %v2589_v1  ;;  %v3118_v39 = vld [vmem:[%s3370_s1 + $0x200] sm:$0xff]  }
  0x89   : > { %2283 = vmatprep.subr.bf16.mxu1 %v2589_v1 }
  0x8b   : > { %2264 = vmatpush3.bf16.msra.mxu0 %v3098_v19 }
  0x8c   : > { %2284 = vmatpush3.bf16.msra.mxu1 %v3106_v58  ;;  %2289 = vmatprep.subr.bf16.mxu0 %v2589_v1  ;;  %v1927_v58 = vld [vmem:[%s2728_s20 + $0xa] sm:$0x3] }
  0x8d   : > { %2309 = vmatprep.subr.bf16.mxu1 %v2589_v1 }
  0x8e   : > { %2266 = vmatmul.mubr.bf16.vlgmr.msra.gmra.mrb[12].mxu0 %v3110_v57 }
  0x8f   : > { %2286 = vmatmul.mubr.bf16.vlgmr.msra.gmra.mrb[12].mxu1 %v3113_v37  ;;  %2290 = vmatpush3.bf16.msra.mxu0 %v3118_v39 }
  0x90   : > { %2310 = vmatpush3.bf16.msra.mxu1 %v2622_v0  ;;  %2291 = vmatprep.subr.bf16.mxu0 %v2589_v1  ;;  %v3151_v0 = vld [vmem:[%s3370_s1 + $0x218] sm:$0xff]  }
  0x91   : > { %2311 = vmatprep.subr.bf16.mxu1 %v2589_v1  ;;  %2305 = vmatprep.mubr.msk.bf16.mxu0 %vm2590_vm0, %v2589_v1 }
  0x92   : > { %2325 = vmatprep.mubr.msk.bf16.mxu1 %vm2590_vm0, %v2589_v1 }
  0x93   : > { %2292 = vmatpush3.bf16.msra.mxu0 %v3129_v62 }
  0x94   : > { %2312 = vmatpush3.bf16.msra.mxu1 %v2635_v3  ;;  %2293 = vmatprep.subr.bf16.mxu0 %v2589_v1  ;;  %v3160_v3 = vld [vmem:[%s3370_s1 + $0x220] sm:$0xff]  }
  0x95   : > { %2313 = vmatprep.subr.bf16.mxu1 %v2589_v1 }
  0x97   : > { %2294 = vmatpush3.bf16.msra.mxu0 %v3142_v17 }
  0x98   : > { %2314 = vmatpush3.bf16.msra.mxu1 %v2653_v5  ;;  %2295 = vmatprep.subr.bf16.mxu0 %v2589_v1  ;;  %v3169_v5 = vld [vmem:[%s3370_s1 + $0x228] sm:$0xff]  }
  0x99   : > { %2315 = vmatprep.subr.bf16.mxu1 %v2589_v1  ;;  %3394 = vst [vmem:[#allocation12_spill] sm:$0xff] %v3169_v5 }
  0x9b   : > { %2296 = vmatpush3.bf16.msra.mxu0 %v3151_v0 }
  0x9c   : > { %2316 = vmatpush3.bf16.msra.mxu1 %v2667_v7  ;;  %2297 = vmatprep.subr.bf16.mxu0 %v2589_v1  ;;  %v3178_v7 = vld [vmem:[%s3370_s1 + $0x230] sm:$0xff]  }
  0x9d   : > { %2317 = vmatprep.subr.bf16.mxu1 %v2589_v1 }
  0x9f   : > { %2298 = vmatpush3.bf16.msra.mxu0 %v3160_v3 }
  0xa0   : > { %2318 = vmatpush3.bf16.msra.mxu1 %v2683_v9  ;;  %2299 = vmatprep.subr.bf16.mxu0 %v2589_v1  ;;  %v3187_v9 = vld [vmem:[%s3370_s1 + $0x238] sm:$0xff]  }
  0xa1   : > { %2319 = vmatprep.subr.bf16.mxu1 %v2589_v1 }
  0xa3   : > { %2300 = vmatpush3.bf16.msra.mxu0 %v3169_v5  ;;  %v3193_v5 = vpack.c.bf16 %v1927_v58, %v1927_v58 }
  0xa4   : > { %2320 = vmatpush3.bf16.msra.mxu1 %v2701_v11  ;;  %2301 = vmatprep.subr.bf16.mxu0 %v2589_v1 }
  0xa5   : > { %2321 = vmatprep.subr.bf16.mxu1 %v2589_v1 }
  0xa7   : > { %2302 = vmatpush3.bf16.msra.mxu0 %v3178_v7 }
  0xa8   : > { %2322 = vmatpush3.bf16.msra.mxu1 %v2716_v13  ;;  %2303 = vmatprep.subr.bf16.mxu0 %v2589_v1 }
  0xa9   : > { %2323 = vmatprep.subr.bf16.mxu1 %v2589_v1 }
  0xab   : > { %2304 = vmatpush3.bf16.msra.mxu0 %v3187_v9 }
  0xac   : > { %2324 = vmatpush3.bf16.msra.mxu1 %v2734_v15  ;;  %2329 = vmatprep.subr.bf16.mxu0 %v2589_v1  ;;  %v3395_v15 = vld [vmem:[#allocation9_spill] sm:$0xff] }
  0xad   : > { %2349 = vmatprep.subr.bf16.mxu1 %v2589_v1 }
  0xae   : > { %2306 = vmatmul.mubr.bf16.vlgmr.msra.gmra.mrb[16].mxu0 %v3193_v5 }
  0xaf   : > { %2326 = vmatmul.mubr.bf16.vlgmr.msra.gmra.mrb[16].mxu1 %v2986_v59  ;;  %2330 = vmatpush3.bf16.msra.mxu0 %v2629_v2 }
  0xb0   : > { %2350 = vmatpush3.bf16.msra.mxu1 %v2751_v21  ;;  %2331 = vmatprep.subr.bf16.mxu0 %v2589_v1  ;;  %v3396_v21 = vld [vmem:[#allocation2_spill] sm:$0xff] }
  0xb1   : > { %2351 = vmatprep.subr.bf16.mxu1 %v2589_v1  ;;  %2345 = vmatprep.mubr.msk.bf16.mxu0 %vm2590_vm0, %v2589_v1 }
  0xb2   : > { %2365 = vmatprep.mubr.msk.bf16.mxu1 %vm2590_vm0, %v2589_v1 }
  0xb3   : > { %2332 = vmatpush3.bf16.msra.mxu0 %v2644_v4 }
  0xb4   : > { %2352 = vmatpush3.bf16.msra.mxu1 %v2765_v23  ;;  %2333 = vmatprep.subr.bf16.mxu0 %v2589_v1  ;;  %v3397_v23 = vld [vmem:[#allocation3_spill] sm:$0xff] }
  0xb5   : > { %2353 = vmatprep.subr.bf16.mxu1 %v2589_v1 }
  0xb7   : > { %2334 = vmatpush3.bf16.msra.mxu0 %v2660_v6 }
  0xb8   : > { %2354 = vmatpush3.bf16.msra.mxu1 %v2783_v25  ;;  %2335 = vmatprep.subr.bf16.mxu0 %v2589_v1  ;;  %v3399_v25 = vld [vmem:[#allocation5_spill] sm:$0xff] }
  0xb9   : > { %2355 = vmatprep.subr.bf16.mxu1 %v2589_v1 }
  0xbb   : > { %2336 = vmatpush3.bf16.msra.mxu0 %v2674_v8 }
  0xbc   : > { %2356 = vmatpush3.bf16.msra.mxu1 %v2797_v27  ;;  %2337 = vmatprep.subr.bf16.mxu0 %v2589_v1  ;;  %v3401_v27 = vld [vmem:[#allocation7_spill] sm:$0xff] }
  0xbd   : > { %2357 = vmatprep.subr.bf16.mxu1 %v2589_v1 }
  0xbf   : > { %2338 = vmatpush3.bf16.msra.mxu0 %v2690_v10 }
  0xc0   : > { %2358 = vmatpush3.bf16.msra.mxu1 %v2811_v29  ;;  %2339 = vmatprep.subr.bf16.mxu0 %v2589_v1 }
  0xc1   : > { %2359 = vmatprep.subr.bf16.mxu1 %v2589_v1 }
  0xc3   : > { %2340 = vmatpush3.bf16.msra.mxu0 %v2708_v12 }
  0xc4   : > { %2360 = vmatpush3.bf16.msra.mxu1 %v2825_v31  ;;  %2341 = vmatprep.subr.bf16.mxu0 %v2589_v1 }
  0xc5   : > { %2361 = vmatprep.subr.bf16.mxu1 %v2589_v1 }
  0xc7   : > { %2342 = vmatpush3.bf16.msra.mxu0 %v2723_v14 }
  0xc8   : > { %2362 = vmatpush3.bf16.msra.mxu1 %v2839_v33  ;;  %2343 = vmatprep.subr.bf16.mxu0 %v2589_v1 }
  0xc9   : > { %2363 = vmatprep.subr.bf16.mxu1 %v2589_v1 }
  0xcb   : > { %2344 = vmatpush3.bf16.msra.mxu0 %v2739_v16  ;;  %v1953_v16 = vld [vmem:[%s2728_s20 + $0xc] sm:$0x3] }
  0xcc   : > { %2364 = vmatpush3.bf16.msra.mxu1 %v2852_v35  ;;  %2369 = vmatprep.subr.bf16.mxu0 %v2589_v1 }
  0xcd   : > { %2389 = vmatprep.subr.bf16.mxu1 %v2589_v1 }
  0xce   : > { %2346 = vmatmul.mubr.bf16.vlgmr.msra.gmra.mrb[20].mxu0 %v2866_v40  ;;  %v3403_v40 = vld [vmem:[#allocation12_spill] sm:$0xff] }
  0xcf   : > { %2366 = vmatmul.mubr.bf16.vlgmr.msra.gmra.mrb[20].mxu1 %v2989_v60  ;;  %2370 = vmatpush3.bf16.msra.mxu0 %v2758_v22  ;;  %v1406_v22 = vpack.c.bf16 %v1953_v16, %v1953_v16 }
  0xd0   : > { %2390 = vmatpush3.bf16.msra.mxu1 %v2871_v41  ;;  %2371 = vmatprep.subr.bf16.mxu0 %v2589_v1 }
  0xd1   : > { %2391 = vmatprep.subr.bf16.mxu1 %v2589_v1  ;;  %2385 = vmatprep.mubr.msk.bf16.mxu0 %vm2590_vm0, %v2589_v1 }
  0xd2   : > { %2405 = vmatprep.mubr.msk.bf16.mxu1 %vm2590_vm0, %v2589_v1 }
  0xd3   : > { %2372 = vmatpush3.bf16.msra.mxu0 %v2772_v24  ;;  %v3398_v24 = vld [vmem:[#allocation4_spill] sm:$0xff] }
  0xd4   : > { %2392 = vmatpush3.bf16.msra.mxu1 %v2886_v43  ;;  %2373 = vmatprep.subr.bf16.mxu0 %v2589_v1  ;;  %v3404_v43 = vld [vmem:[#allocation10_spill] sm:$0xff] }
  0xd5   : > { %2393 = vmatprep.subr.bf16.mxu1 %v2589_v1 }
  0xd7   : > { %2374 = vmatpush3.bf16.msra.mxu0 %v2790_v26  ;;  %v3400_v26 = vld [vmem:[#allocation6_spill] sm:$0xff] }
  0xd8   : > { %2394 = vmatpush3.bf16.msra.mxu1 %v2904_v45  ;;  %2375 = vmatprep.subr.bf16.mxu0 %v2589_v1  ;;  %v1955_v45 = vld [vmem:[%s2728_s20 + $0xe] sm:$0x3] }
  0xd9   : > { %2395 = vmatprep.subr.bf16.mxu1 %v2589_v1 }
  0xdb   : > { %2376 = vmatpush3.bf16.msra.mxu0 %v2804_v28 }
  0xdc   : > { %2396 = vmatpush3.bf16.msra.mxu1 %v2918_v47  ;;  %2377 = vmatprep.subr.bf16.mxu0 %v2589_v1  ;;  %v3405_v47 = vld [vmem:[#allocation11_spill] sm:$0xff] }
  0xdd   : > { %2397 = vmatprep.subr.bf16.mxu1 %v2589_v1 }
  0xdf   : > { %2378 = vmatpush3.bf16.msra.mxu0 %v2818_v30 }
  0xe0   : > { %2398 = vmatpush3.bf16.msra.mxu1 %v2932_v49  ;;  %2379 = vmatprep.subr.bf16.mxu0 %v2589_v1 }
  0xe1   : > { %2399 = vmatprep.subr.bf16.mxu1 %v2589_v1 }
  0xe3   : > { %2380 = vmatpush3.bf16.msra.mxu0 %v2832_v32 }
  0xe4   : > { %2400 = vmatpush3.bf16.msra.mxu1 %v2946_v51  ;;  %2381 = vmatprep.subr.bf16.mxu0 %v2589_v1 }
  0xe5   : > { %2401 = vmatprep.subr.bf16.mxu1 %v2589_v1 }
  0xe7   : > { %2382 = vmatpush3.bf16.msra.mxu0 %v2846_v34  ;;  %v3402_v34 = vld [vmem:[#allocation8_spill] sm:$0xff] }
  0xe8   : > { %2402 = vmatpush3.bf16.msra.mxu1 %v2960_v53  ;;  %2383 = vmatprep.subr.bf16.mxu0 %v2589_v1 }
  0xe9   : > { %2403 = vmatprep.subr.bf16.mxu1 %v2589_v1 }
  0xeb   : > { %2384 = vmatpush3.bf16.msra.mxu0 %v2857_v36 }
  0xec   : > { %2404 = vmatpush3.bf16.msra.mxu1 %v2974_v55  ;;  %2409 = vmatprep.subr.bf16.mxu0 %v2589_v1 }
  0xed   : > { %2429 = vmatprep.subr.bf16.mxu1 %v2589_v1 }
  0xee   : > { %2386 = vmatmul.mubr.bf16.vlgmr.msra.gmra.mrb[24].mxu0 %v3110_v57 }
  0xef   : > { %2406 = vmatmul.mubr.bf16.vlgmr.msra.gmra.mrb[24].mxu1 %v3113_v37  ;;  %2410 = vmatpush3.bf16.msra.mxu0 %v2878_v42 }
  0xf0   : > { %2430 = vmatpush3.bf16.msra.mxu1 %v2994_v61  ;;  %2411 = vmatprep.subr.bf16.mxu0 %v2589_v1 }
  0xf1   : > { %2431 = vmatprep.subr.bf16.mxu1 %v2589_v1  ;;  %2425 = vmatprep.mubr.msk.bf16.mxu0 %vm2590_vm0, %v2589_v1 }
  0xf2   : > { %2445 = vmatprep.mubr.msk.bf16.mxu1 %vm2590_vm0, %v2589_v1 }
  0xf3   : > { %2412 = vmatpush3.bf16.msra.mxu0 %v2893_v44  ;;  %v1954_v44 = vld [vmem:[%s2728_s20 + $0xd] sm:$0x3] }
  0xf4   : > { %2432 = vmatpush3.bf16.msra.mxu1 %v3010_v63  ;;  %2413 = vmatprep.subr.bf16.mxu0 %v2589_v1 }
  0xf5   : > { %2433 = vmatprep.subr.bf16.mxu1 %v2589_v1 }
  0xf7   : > { %2414 = vmatpush3.bf16.msra.mxu0 %v2911_v46  ;;  %v1449_v46 = vpack.c.bf16 %v1954_v44, %v1954_v44 }
  0xf8   : > { %2434 = vmatpush3.bf16.msra.mxu1 %v3028_v18  ;;  %2415 = vmatprep.subr.bf16.mxu0 %v2589_v1 }
  0xf9   : > { %2435 = vmatprep.subr.bf16.mxu1 %v2589_v1 }
  0xfb   : > { %2416 = vmatpush3.bf16.msra.mxu0 %v2925_v48  ;;  %v1492_v48 = vpack.c.bf16 %v1955_v45, %v1955_v45  ;;  %v169_v45 = vlaneseq }
  0xfc   : > { %2436 = vmatpush3.bf16.msra.mxu1 %v3042_v20  ;;  %2417 = vmatprep.subr.bf16.mxu0 %v2589_v1 }
  0xfd   : > { %2437 = vmatprep.subr.bf16.mxu1 %v2589_v1 }
  0xff   : > { %2418 = vmatpush3.bf16.msra.mxu0 %v2939_v50 }
 0x100   : > { %2438 = vmatpush3.bf16.msra.mxu1 %v3056_v38  ;;  %2419 = vmatprep.subr.bf16.mxu0 %v2589_v1 }
 0x101   : > { %v300_v2 = vpop.f32.mrb[0].mxu0  ;;  %2439 = vmatprep.subr.bf16.mxu1 %v2589_v1 }
 0x102   : > { %v388_v4 = vpop.f32.mrb[0].mxu1  ;;  %v2147_v6 = vpop.f32.mrb[1].mxu0 }
 0x103   : > { %v389_v8 = vadd.f32 %v388_v4, %v300_v2  ;;  %v2167_v10 = vpop.f32.mrb[1].mxu1  ;;  %v303_v11 = vpop.f32.mrb[2].mxu0  ;;  %2420 = vmatpush3.bf16.msra.mxu0 %v2953_v52 }
 0x104   : > { %v391_v12 = vpop.f32.mrb[2].mxu1  ;;  %2440 = vmatpush3.bf16.msra.mxu1 %v3070_v56  ;;  %v2148_v13 = vpop.f32.mrb[3].mxu0  ;;  %2421 = vmatprep.subr.bf16.mxu0 %v2589_v1 }
 0x105   : > { %v2168_v14 = vpop.f32.mrb[3].mxu1  ;;  %2441 = vmatprep.subr.bf16.mxu1 %v2589_v1 }
 0x107   : > { %2422 = vmatpush3.bf16.msra.mxu0 %v2967_v54 }
 0x108   : > { %2442 = vmatpush3.bf16.msra.mxu1 %v3395_v15  ;;  %2423 = vmatprep.subr.bf16.mxu0 %v2589_v1 }
 0x109   : > { %2443 = vmatprep.subr.bf16.mxu1 %v2589_v1 }
 0x10b   : > { %2424 = vmatpush3.bf16.msra.mxu0 %v3396_v21 }
 0x10c   : > { %2444 = vmatpush3.bf16.msra.mxu1 %v3098_v19  ;;  %2449 = vmatprep.subr.bf16.mxu0 %v2589_v1 }
 0x10d   : > { %2469 = vmatprep.subr.bf16.mxu1 %v2589_v1 }
 0x10e   : > { %2426 = vmatmul.mubr.bf16.vlgmr.msra.gmra.mrb[28].mxu0 %v3193_v5 }
 0x10f   : > { %2446 = vmatmul.mubr.bf16.vlgmr.msra.gmra.mrb[28].mxu1 %v1406_v22  ;;  %2450 = vmatpush3.bf16.msra.mxu0 %v3397_v23 }
 0x110   : > { %2470 = vmatpush3.bf16.msra.mxu1 %v3118_v39  ;;  %2451 = vmatprep.subr.bf16.mxu0 %v2589_v1 }
 0x111   : > { %2471 = vmatprep.subr.bf16.mxu1 %v2589_v1  ;;  %2465 = vmatprep.mubr.msk.bf16.mxu0 %vm2590_vm0, %v2589_v1 }
 0x112   : > { %2485 = vmatprep.mubr.msk.bf16.mxu1 %vm2590_vm0, %v2589_v1 }
 0x113   : > { %2452 = vmatpush3.bf16.msra.mxu0 %v3398_v24 }
 0x114   : > { %2472 = vmatpush3.bf16.msra.mxu1 %v3129_v62  ;;  %2453 = vmatprep.subr.bf16.mxu0 %v2589_v1 }
 0x115   : > { %2473 = vmatprep.subr.bf16.mxu1 %v2589_v1 }
 0x117   : > { %2454 = vmatpush3.bf16.msra.mxu0 %v3399_v25 }
 0x118   : > { %2474 = vmatpush3.bf16.msra.mxu1 %v3142_v17  ;;  %2455 = vmatprep.subr.bf16.mxu0 %v2589_v1 }
 0x119   : > { %2475 = vmatprep.subr.bf16.mxu1 %v2589_v1 }
 0x11b   : > { %2456 = vmatpush3.bf16.msra.mxu0 %v3400_v26 }
 0x11c   : > { %2476 = vmatpush3.bf16.msra.mxu1 %v3151_v0  ;;  %2457 = vmatprep.subr.bf16.mxu0 %v2589_v1 }
 0x11d   : > { %2477 = vmatprep.subr.bf16.mxu1 %v2589_v1 }
 0x11f   : > { %2458 = vmatpush3.bf16.msra.mxu0 %v3401_v27 }
 0x120   : > { %2478 = vmatpush3.bf16.msra.mxu1 %v3160_v3  ;;  %2459 = vmatprep.subr.bf16.mxu0 %v2589_v1 }
 0x121   : > { %v495_v28 = vpop.f32.mrb[4].mxu0  ;;  %2479 = vmatprep.subr.bf16.mxu1 %v2589_v1 }
 0x122   : > { %v501_v29 = vadd.f32 %v495_v28, %v389_v8  ;;  %v604_v30 = vpop.f32.mrb[4].mxu1  ;;  %v2187_v31 = vpop.f32.mrb[5].mxu0 }
 0x123   : > { %v2207_v32 = vpop.f32.mrb[5].mxu1  ;;  %v498_v33 = vpop.f32.mrb[6].mxu0  ;;  %2460 = vmatpush3.bf16.msra.mxu0 %v3402_v34 }
 0x124   : > { %v610_v35 = vadd.f32 %v604_v30, %v501_v29  ;;  %v607_v36 = vpop.f32.mrb[6].mxu1  ;;  %2480 = vmatpush3.bf16.msra.mxu1 %v3403_v40  ;;  %v2188_v41 = vpop.f32.mrb[7].mxu0  ;;  %2461 = vmatprep.subr.bf16.mxu0 %v2589_v1 }
 0x125   : > { %v2208_v42 = vpop.f32.mrb[7].mxu1  ;;  %2481 = vmatprep.subr.bf16.mxu1 %v2589_v1 }
 0x127   : > { %2462 = vmatpush3.bf16.msra.mxu0 %v3404_v43 }
 0x128   : > { %2482 = vmatpush3.bf16.msra.mxu1 %v3178_v7  ;;  %2463 = vmatprep.subr.bf16.mxu0 %v2589_v1 }
 0x129   : > { %2483 = vmatprep.subr.bf16.mxu1 %v2589_v1 }
 0x12b   : > { %2464 = vmatpush3.bf16.msra.mxu0 %v3405_v47 }
 0x12c   : > { %2484 = vmatpush3.bf16.msra.mxu1 %v3187_v9  ;;  %2489 = vmatprep.subr.mxu0 %v2589_v1 }
 0x12d   : > { %2494 = vmatprep.subr.mxu1 %v2589_v1 }
 0x12e   : > { %2466 = vmatmul.mubr.bf16.vlgmr.msra.gmra.mrb[32].mxu0 %v1449_v46  ;;  %v170_v46 = vshrl.u32 %v169_v45, 7 }
 0x12f   : > { %2486 = vmatmul.mubr.bf16.vlgmr.msra.gmra.mrb[32].mxu1 %v1492_v48  ;;  %2491 = vmatprep.mubr.msk.f32.mxu0 %vm2590_vm0, %v2589_v1  ;;  %v1952_v48 = vld [vmem:[%s3371_s2] ss:$0 sm:$0xff] }
 0x130   : > { %2496 = vmatprep.mubr.msk.f32.mxu1 %vm2590_vm0, %v2589_v1  ;;  %v173_v47 = vmul.u32 2, %v170_v46 }
 0x141   : > { %v712_v49 = vpop.f32.mrb[8].mxu0 }
 0x142   : > { %v718_v50 = vadd.f32 %v712_v49, %v610_v35  ;;  %v820_v51 = vpop.f32.mrb[8].mxu1  ;;  %v2227_v52 = vpop.f32.mrb[9].mxu0 }
 0x143   : > { %v2247_v53 = vpop.f32.mrb[9].mxu1  ;;  %v715_v54 = vpop.f32.mrb[10].mxu0 }
 0x144   : > { %v826_v55 = vadd.f32 %v820_v51, %v718_v50  ;;  %v823_v57 = vpop.f32.mrb[10].mxu1  ;;  %v2228_v59 = vpop.f32.mrb[11].mxu0 }
 0x145   : > { %v2248_v60 = vpop.f32.mrb[11].mxu1  ;;  %v177_v57 = vadd.s32 1, %v173_v47 }
 0x161   : > { %v929_v61 = vpop.f32.mrb[12].mxu0 }
 0x162   : > { %v935_v63 = vadd.f32 %v929_v61, %v826_v55  ;;  %v1037_v18 = vpop.f32.mrb[12].mxu1  ;;  %v2267_v19 = vpop.f32.mrb[13].mxu0  ;;  %v172_v55 = vand.u32 127, %v169_v45 }
 0x163   : > { %v2287_v20 = vpop.f32.mrb[13].mxu1  ;;  %v932_v37 = vpop.f32.mrb[14].mxu0 }
 0x164   : > { %v1043_v38 = vadd.f32 %v1037_v18, %v935_v63  ;;  %v1040_v39 = vpop.f32.mrb[14].mxu1  ;;  %v2268_v56 = vpop.f32.mrb[15].mxu0  ;;  %vm174_vm1 = vcmp.eq.s32.totalorder %v172_v55, %v173_v47  ;;  %vm178_vm2 = vcmp.eq.s32.totalorder %v172_v55, %v177_v57 }
 0x165   : > { %v2288_v58 = vpop.f32.mrb[15].mxu1  ;;  %v1744_v39 = vsel %vm174_vm1, 1.0, %v2589_v1  ;;  %v1745_v56 = vsel %vm178_vm2, 1.0, %v2589_v1 }
 0x181   : > { %v1145_v62 = vpop.f32.mrb[16].mxu0 }
 0x182   : > { %v1151_v17 = vadd.f32 %v1145_v62, %v1043_v38  ;;  %v1194_v0 = vpop.f32.mrb[16].mxu1  ;;  %v2307_v3 = vpop.f32.mrb[17].mxu0 }
 0x183   : > { %v2327_v5 = vpop.f32.mrb[17].mxu1  ;;  %v1148_v7 = vpop.f32.mrb[18].mxu0 }
 0x184   : > { %v1197_v9 = vpop.f32.mrb[18].mxu1  ;;  %v2308_v2 = vpop.f32.mrb[19].mxu0  ;;  %v1158_v59 = vadd.f32 %v1952_v48, %v1151_v17 }
 0x185   : > { %v2328_v4 = vpop.f32.mrb[19].mxu1 }
 0x186   : > { %v1159_v20 = vmax.f32 %v1158_v59, 0.0 }
 0x1a1   : > { %v1234_v6 = vpop.f32.mrb[20].mxu0 }
 0x1a2   : > { %v1235_v8 = vadd.f32 %v1234_v6, %v1194_v0  ;;  %v1274_v10 = vpop.f32.mrb[20].mxu1  ;;  %v2347_v11 = vpop.f32.mrb[21].mxu0 }
 0x1a3   : > { %v2367_v12 = vpop.f32.mrb[21].mxu1  ;;  %v1237_v13 = vpop.f32.mrb[22].mxu0 }
 0x1a4   : > { %v1280_v14 = vadd.f32 %v1274_v10, %v1235_v8  ;;  %v1277_v15 = vpop.f32.mrb[22].mxu1  ;;  %v2348_v16 = vpop.f32.mrb[23].mxu0 }
 0x1a5   : > { %v2368_v21 = vpop.f32.mrb[23].mxu1 }
 0x1c1   : > { %v1315_v22 = vpop.f32.mrb[24].mxu0 }
 0x1c2   : > { %v1321_v23 = vadd.f32 %v1315_v22, %v1280_v14  ;;  %v1356_v24 = vpop.f32.mrb[24].mxu1  ;;  %v2387_v25 = vpop.f32.mrb[25].mxu0 }
 0x1c3   : > { %v2407_v26 = vpop.f32.mrb[25].mxu1  ;;  %v1318_v27 = vpop.f32.mrb[26].mxu0 }
 0x1c4   : > { %v1362_v28 = vadd.f32 %v1356_v24, %v1321_v23  ;;  %v1359_v29 = vpop.f32.mrb[26].mxu1  ;;  %v2388_v30 = vpop.f32.mrb[27].mxu0 }
 0x1c5   : > { %v2408_v31 = vpop.f32.mrb[27].mxu1 }
 0x1e1   : > { %v1397_v32 = vpop.f32.mrb[28].mxu0 }
 0x1e2   : > { %v1403_v33 = vadd.f32 %v1397_v32, %v1362_v28  ;;  %v1441_v34 = vpop.f32.mrb[28].mxu1  ;;  %v2427_v35 = vpop.f32.mrb[29].mxu0 }
 0x1e3   : > { %v2447_v36 = vpop.f32.mrb[29].mxu1  ;;  %v1400_v40 = vpop.f32.mrb[30].mxu0 }
 0x1e4   : > { %v1447_v41 = vadd.f32 %v1441_v34, %v1403_v33  ;;  %v1444_v42 = vpop.f32.mrb[30].mxu1  ;;  %v2428_v43 = vpop.f32.mrb[31].mxu0 }
 0x1e5   : > { %v2448_v44 = vpop.f32.mrb[31].mxu1 }
 0x201   : > { %v1484_v49 = vpop.f32.mrb[32].mxu0 }
 0x202   : > { %v1490_v50 = vadd.f32 %v1484_v49, %v1447_v41  ;;  %v1527_v51 = vpop.f32.mrb[32].mxu1  ;;  %v2467_v52 = vpop.f32.mrb[33].mxu0 }
 0x203   : > { %v2487_v53 = vpop.f32.mrb[33].mxu1  ;;  %v1487_v54 = vpop.f32.mrb[34].mxu0 }
 0x204   : > { %v1533_v60 = vadd.f32 %v1527_v51, %v1490_v50  ;;  %v1530_v61 = vpop.f32.mrb[34].mxu1  ;;  %v2468_v63 = vpop.f32.mrb[35].mxu0 }
 0x205   : > { %v2488_v18 = vpop.f32.mrb[35].mxu1 }
 0x206   : > { %v1534_v19 = vadd.f32 %v1952_v48, %v1533_v60 }
 0x208   : > { %v1535_v37 = vmax.f32 %v1534_v19, 0.0 }
 0x20a   : > { %v1536_v38 = vmax.f32 %v1159_v20, %v1535_v37 }
 0x20c   : > { %2490 = vmatpush3.msk.msra.mxu0 %vm1541_vm3, %v1536_v38  ;;  %2495 = vmatpush3.msk.msra.mxu1 %vm1541_vm3, %v1536_v38 }
 0x20d   : > { %2492 = vmatmul.mubr.msk.f32.vlgmr.msra.gmra.mrb[36].mxu0 %vm1537_vm4, %v1744_v39  ;;  %2497 = vmatmul.mubr.msk.f32.vlgmr.msra.gmra.mrb[36].mxu1 %vm1537_vm4, %v1745_v56 }
 0x2e0   : > { %v1611_v58 = vpop.f32.mrb[36].mxu0  ;;  %v1684_v62 = vpop.f32.mrb[36].mxu1 }
 0x2e1   : > { %v1688_v17 = vmax.f32 %v1611_v58, %v1684_v62  ;;  %v2493_v0 = vpop.f32.mrb[37].mxu0  ;;  %v2498_v3 = vpop.f32.mrb[37].mxu1 }
 0x2e3   : > { %1689 = vst [vmem:[%s166_s19] sm:$0x1] %v1688_v17 }
 0x2e4 PF: > { %s13_s12 = sadd.s32 1, %s2587_s12  }
 0x2e5   : > { %p10_p4 = scmp.ge.s32.totalorder %s13_s12, 4  }
 0x2e7   :  { %12 = sbr.rel (!%p10_p4) target bundleno = 1 (0x1), region = 73 }

</bundles_post_ra>
